<compile_context>
chip_gen: v7x
topology: tpu7x:2x2x1
jax: 0.10.0
libtpu: 0.0.40
codegen_flags: <defaults>
</compile_context>

<pallas_src>
import math

import jax
import jax.numpy as jnp
from jax.experimental import pallas as pl
from jax.experimental.pallas import tpu as pltpu


# ---------------------------------------------------------------------------
# Kernel
# ---------------------------------------------------------------------------
def _periodic_kernel(x_ref, e_ref, coef_ref, out_ref):
    # x_ref:    (TB, F)     f32 block of input rows
    # e_ref:    (F,  F*2K)  bf16 0/1 indicator: E[f, f*2K+j] = 1
    # coef_ref: (2,  F*2K)  f32: row 0 = 2*pi*w (flat, duplicated for cos/sin
    #                       halves), row 1 = phase (0 for cos, -pi/2 for sin)
    # out_ref:  (TB, F*2K)  lane-dense output block
    x = x_ref[...]

    # Exact 3-way bf16 split: x == hi + mid + lo (each bf16-representable,
    # reconstruction exact in f32).  Three DEFAULT-precision bf16 MXU passes
    # replace the former Precision.HIGHEST (6-pass) f32 matmul.
    hi = x.astype(jnp.bfloat16)
    r1 = x - hi.astype(jnp.float32)
    mid = r1.astype(jnp.bfloat16)
    lo = (r1 - mid.astype(jnp.float32)).astype(jnp.bfloat16)

    e = e_ref[...]
    xb = jnp.dot(hi, e, preferred_element_type=jnp.float32)
    xb = xb + jnp.dot(mid, e, preferred_element_type=jnp.float32)
    xb = xb + jnp.dot(lo, e, preferred_element_type=jnp.float32)  # == x per lane

    coef = coef_ref[...]
    v = xb * coef[0:1, :] + coef[1:2, :]   # 2*pi*w*x  (sin lanes shifted by -pi/2)
    # TODO(synk): if bundle dumps show jnp.cos lowering to a long VPU
    # polynomial (VALU-bound) rather than an EUP op, switch to a cheaper
    # range-reduced approximation (|v| is bounded by the trunc_normal weights).
    out_ref[...] = jnp.cos(v).astype(out_ref.dtype)


# ---------------------------------------------------------------------------
# Wrapper helpers
# ---------------------------------------------------------------------------
def _ceil_to(a, m):
    return -(-a // m) * m


def _build_tables(weight):
    """Indicator matrix (bf16) and the f32 scale/phase rows."""
    f, k = weight.shape
    two_k = 2 * k
    lane_len = f * two_k
    # 2*pi folded into the weights once (same op order as the reference:
    # (2*pi*w) * x), duplicated for the cos / sin halves.
    w2 = (2.0 * math.pi) * jnp.concatenate([weight, weight], axis=-1)     # (F, 2K)
    eye = jnp.eye(f, dtype=jnp.float32)
    e = jnp.repeat(eye, two_k, axis=1).astype(jnp.bfloat16)               # (F, F*2K)
    phase_one = jnp.concatenate(
        [jnp.zeros((k,), jnp.float32), jnp.full((k,), -0.5 * math.pi, jnp.float32)]
    )                                                                     # (2K,)
    coef = jnp.stack([w2.reshape(lane_len),
                      jnp.tile(phase_one, f)], axis=0)                    # (2, F*2K)
    return e, coef.astype(jnp.float32)


def _tpu_info():
    """(vmem_capacity_bytes, tensorcores_per_chip) with safe fallbacks."""
    vmem_cap = 128 << 20
    num_tc = 1
    try:
        vmem_cap = int(pltpu.get_tpu_info().vmem_capacity_bytes)
    except Exception:
        pass
    try:
        kind = jax.devices()[0].device_kind.lower()
    except Exception:
        kind = ""
    if "v7" in kind:            # v7x: 2 TCs per chip, 64 MiB VMEM per TC
        num_tc = 2
        vmem_cap = min(vmem_cap, 64 << 20)
    return vmem_cap, num_tc


def _pick_tb(batch, lane_len, out_itemsize, *, num_tc, const_bytes, vmem_cap):
    """Batch-tile size: generation-aware block target, cdiv-friendly."""
    q = 16 if out_itemsize == 2 else 8            # sublane quantum (bf16 packs 16)
    row_bytes = _ceil_to(lane_len, 128) * out_itemsize
    # Generation-aware target for one (double-buffered) output block.
    target = (8 << 20) if vmem_cap >= (100 << 20) else (4 << 20)
    if const_bytes > vmem_cap // 8:               # large indicator -> smaller tiles
        target = 2 << 20
    tb = max(q, (target // row_bytes) // q * q)

    if num_tc >= 2 and batch >= 2 * q:
        # Balance across TensorCores: >= num_tc steps and an (approximately)
        # even step count so no core idles.
        tb = min(tb, _ceil_to(pl.cdiv(batch, num_tc), q))
        steps = pl.cdiv(batch, tb)
        if steps % num_tc:
            tb = max(q, _ceil_to(pl.cdiv(batch, _ceil_to(steps, num_tc)), q))

    if tb >= batch:
        return batch        # single full-dim block; no forced split on 1-TC chips
    return tb


def _vmem_estimate(tb, f, lane_len, out_itemsize):
    lanes_l = _ceil_to(lane_len, 128)
    lanes_f = _ceil_to(f, 128)
    sub_tb = _ceil_to(tb, 8)
    x_blk = sub_tb * lanes_f * 4
    e_blk = _ceil_to(f, 16) * lanes_l * 2          # bf16 indicator (single-buffered)
    c_blk = 8 * lanes_l * 4                        # (2, L) f32 coef rows
    o_blk = sub_tb * lanes_l * out_itemsize
    return 2 * (x_blk + o_blk) + (e_blk + c_blk)   # constants single-buffered


def _const_block_spec(block_shape):
    """Constant-per-grid-step input: request single buffering when supported."""
    idx = lambda i: (0, 0)
    try:
        return pl.BlockSpec(block_shape, idx, pipeline_mode=pl.Buffered(1))
    except TypeError:   # older jax without pipeline_mode on BlockSpec
        return pl.BlockSpec(block_shape, idx)


# ---------------------------------------------------------------------------
# Public forward
# ---------------------------------------------------------------------------
def periodic_forward(x, weight, *, tb=None, out_dtype=None):
    """x: (..., F) float32, weight: (F, K) float32 -> (..., F, 2K)."""
    if x.ndim < 1:
        raise ValueError(f"The input must have at least one dimension, x.ndim={x.ndim!r}")
    *lead, f_in = x.shape
    f, k = weight.shape
    if f_in != f:
        raise ValueError(
            f"The last dimension of the input was expected to be {f}, "
            f"however, x.shape[-1]={f_in!r}"
        )
    out_dtype = x.dtype if out_dtype is None else jnp.dtype(out_dtype)
    out_itemsize = jnp.dtype(out_dtype).itemsize

    x2 = x.reshape(-1, f)
    b = x2.shape[0]
    lane_len = f * 2 * k                       # flat output width (lane-dense)

    e, coef = _build_tables(weight)
    const_bytes = f * lane_len * 2 + 2 * lane_len * 4

    vmem_cap, num_tc = _tpu_info()
    if tb is None:
        tb = _pick_tb(b, lane_len, out_itemsize,
                      num_tc=num_tc, const_bytes=const_bytes, vmem_cap=vmem_cap)
    grid = (pl.cdiv(b, tb),)                   # partial last block handled by Pallas

    est = _vmem_estimate(tb, f, lane_len, out_itemsize)
    vmem_limit = int(min(max(2 * est + (8 << 20), 32 << 20), int(0.75 * vmem_cap)))

    cost = pl.CostEstimate(
        flops=int(2 * b * 3 * f * lane_len + 2 * b * lane_len),
        transcendentals=int(b * lane_len),
        bytes_accessed=int(4 * b * f + 2 * f * lane_len + 8 * lane_len
                           + out_itemsize * b * lane_len),
    )

    out_flat = pl.pallas_call(
        _periodic_kernel,
        out_shape=jax.ShapeDtypeStruct((b, lane_len), out_dtype),
        grid_spec=pltpu.PrefetchScalarGridSpec(
            num_scalar_prefetch=0,
            grid=grid,
            in_specs=[
                pl.BlockSpec((tb, f), lambda i: (i, 0)),
                _const_block_spec((f, lane_len)),
                _const_block_spec((2, lane_len)),
            ],
            out_specs=pl.BlockSpec((tb, lane_len), lambda i: (i, 0)),
        ),
        compiler_params=pltpu.CompilerParams(
            dimension_semantics=("parallel",),
            vmem_limit_bytes=vmem_limit,
        ),
        cost_estimate=cost,
    )(x2, e, coef)

    # Free row-major reshape back to the logical (..., F, 2K) layout.
    return out_flat.reshape(*lead, f, 2 * k)


# ---------------------------------------------------------------------------
# Reference + init (matches the PyTorch module)
# ---------------------------------------------------------------------------
def periodic_reference(x, weight):
    v = 2.0 * math.pi * weight * x[..., None]
    return jnp.concatenate([jnp.cos(v), jnp.sin(v)], axis=-1)


def init_periodic_weight(key, n_features, k, sigma):
    # nn.init.trunc_normal_(w, 0.0, sigma, a=-3*sigma, b=3*sigma)
    return sigma * jax.random.truncated_normal(
        key, -3.0, 3.0, (n_features, k), dtype=jnp.float32
    )


if __name__ == "__main__":
    # Small shapes consistent with the module: batch=64 rows, n_features=16, k=32
    B, F, K = 64, 16, 32
    sigma = 0.1

    key = jax.random.PRNGKey(0)
    kx, kw, kx3 = jax.random.split(key, 3)
    x = jax.random.normal(kx, (B, F), dtype=jnp.float32)
    weight = init_periodic_weight(kw, F, K, sigma)

    out = jax.block_until_ready(periodic_forward(x, weight))
    ref = periodic_reference(x, weight)
    assert out.shape == (B, F, 2 * K), out.shape
    assert jnp.allclose(out, ref, atol=1e-4, rtol=1e-4), (
        "mismatch vs reference: max abs err = "
        f"{float(jnp.max(jnp.abs(out - ref)))}"
    )

    # Exercise leading batch dims + the cdiv grid with a partial last block.
    x3 = jax.random.normal(kx3, (3, 7, F), dtype=jnp.float32)
    out3 = jax.block_until_ready(periodic_forward(x3, weight, tb=8))
    ref3 = periodic_reference(x3, weight)
    assert out3.shape == (3, 7, F, 2 * K), out3.shape
    assert jnp.allclose(out3, ref3, atol=1e-4, rtol=1e-4), (
        "mismatch vs reference (3D case): max abs err = "
        f"{float(jnp.max(jnp.abs(out3 - ref3)))}"
    )

    print("KERNEL_OK")
</pallas_src>

<mosaic_0001>
module attributes {stable_mosaic.version = 11 : i64} {
  func.func @_periodic_kernel(%arg0: i32, %arg1: memref<64x16xf32, #tpu.memory_space<vmem>>, %arg2: memref<16x1024xbf16, #tpu.memory_space<vmem>>, %arg3: memref<2x1024xf32, #tpu.memory_space<vmem>>, %arg4: memref<64x1024xf32, #tpu.memory_space<vmem>>) attributes {dimension_semantics = [#tpu.dimension_semantics<parallel>], iteration_bounds = array<i64: 1>, scalar_prefetch = 0 : i64, scratch_operands = 0 : i64, tpu.core_type = #tpu.core_type<tc>, window_params = [{transform_indices = @transform_0, window_bounds = array<i64: 64, 16>}, {pipeline_mode = #tpu.pipeline_mode<synchronous>, transform_indices = @transform_1, window_bounds = array<i64: 16, 1024>}, {pipeline_mode = #tpu.pipeline_mode<synchronous>, transform_indices = @transform_2, window_bounds = array<i64: 2, 1024>}, {transform_indices = @transform_3, window_bounds = array<i64: 64, 1024>}]} {
    %c0 = arith.constant 0 : index
    %c0_0 = arith.constant 0 : index
    %0 = vector.load %arg1[%c0, %c0_0] : memref<64x16xf32, #tpu.memory_space<vmem>>, vector<64x16xf32>
    %1 = arith.truncf %0 : vector<64x16xf32> to vector<64x16xbf16>
    %2 = arith.extf %1 : vector<64x16xbf16> to vector<64x16xf32>
    %3 = arith.subf %0, %2 : vector<64x16xf32>
    %4 = arith.truncf %3 : vector<64x16xf32> to vector<64x16xbf16>
    %5 = arith.extf %4 : vector<64x16xbf16> to vector<64x16xf32>
    %6 = arith.subf %3, %5 : vector<64x16xf32>
    %7 = arith.truncf %6 : vector<64x16xf32> to vector<64x16xbf16>
    %c0_1 = arith.constant 0 : index
    %c0_2 = arith.constant 0 : index
    %8 = vector.load %arg2[%c0_1, %c0_2] : memref<16x1024xbf16, #tpu.memory_space<vmem>>, vector<16x1024xbf16>
    %cst = arith.constant dense<0.000000e+00> : vector<64x1024xf32>
    %9 = tpu.matmul %1, %8, %cst {dimension_numbers = #tpu.dot_dimension_numbers<[1], [0], [0], [1], [0, 0, 1, 1], [], []>} : vector<64x16xbf16>, vector<16x1024xbf16>, vector<64x1024xf32> -> vector<64x1024xf32>
    %cst_3 = arith.constant dense<0.000000e+00> : vector<64x1024xf32>
    %10 = tpu.matmul %4, %8, %cst_3 {dimension_numbers = #tpu.dot_dimension_numbers<[1], [0], [0], [1], [0, 0, 1, 1], [], []>} : vector<64x16xbf16>, vector<16x1024xbf16>, vector<64x1024xf32> -> vector<64x1024xf32>
    %11 = arith.addf %9, %10 : vector<64x1024xf32>
    %cst_4 = arith.constant dense<0.000000e+00> : vector<64x1024xf32>
    %12 = tpu.matmul %7, %8, %cst_4 {dimension_numbers = #tpu.dot_dimension_numbers<[1], [0], [0], [1], [0, 0, 1, 1], [], []>} : vector<64x16xbf16>, vector<16x1024xbf16>, vector<64x1024xf32> -> vector<64x1024xf32>
    %13 = arith.addf %11, %12 : vector<64x1024xf32>
    %c0_5 = arith.constant 0 : index
    %c0_6 = arith.constant 0 : index
    %14 = vector.load %arg3[%c0_5, %c0_6] : memref<2x1024xf32, #tpu.memory_space<vmem>>, vector<2x1024xf32>
    %15 = vector.extract_strided_slice %14 {offsets = [0, 0], sizes = [1, 1024], strides = [1, 1]} : vector<2x1024xf32> to vector<1x1024xf32>
    %16 = vector.broadcast %15 : vector<1x1024xf32> to vector<64x1024xf32>
    %17 = arith.mulf %13, %16 : vector<64x1024xf32>
    %18 = vector.extract_strided_slice %14 {offsets = [1, 0], sizes = [1, 1024], strides = [1, 1]} : vector<2x1024xf32> to vector<1x1024xf32>
    %19 = vector.broadcast %18 : vector<1x1024xf32> to vector<64x1024xf32>
    %20 = arith.addf %17, %19 : vector<64x1024xf32>
    %21 = math.cos %20 : vector<64x1024xf32>
    %c0_7 = arith.constant 0 : index
    %c0_8 = arith.constant 0 : index
    %22 = vector.load %arg4[%c0_7, %c0_8] : memref<64x1024xf32, #tpu.memory_space<vmem>>, vector<64x1024xf32>
    tpu.vector_store %arg4[%c0_7, %c0_8], %21 {strides = array<i32>} : memref<64x1024xf32, #tpu.memory_space<vmem>>, vector<64x1024xf32>,
    return
  }
  func.func @transform_0(%arg0: i32) -> (i32, i32) {
    %c0_i32 = arith.constant 0 : i32
    %c0_i32_0 = arith.constant 0 : i32
    return %arg0, %c0_i32 : i32, i32
  }
  func.func @transform_1(%arg0: i32) -> (i32, i32) {
    %c0_i32 = arith.constant 0 : i32
    %c0_i32_0 = arith.constant 0 : i32
    %c0_i32_1 = arith.constant 0 : i32
    return %c0_i32, %c0_i32_0 : i32, i32
  }
  func.func @transform_2(%arg0: i32) -> (i32, i32) {
    %c0_i32 = arith.constant 0 : i32
    %c0_i32_0 = arith.constant 0 : i32
    %c0_i32_1 = arith.constant 0 : i32
    return %c0_i32, %c0_i32_0 : i32, i32
  }
  func.func @transform_3(%arg0: i32) -> (i32, i32) {
    %c0_i32 = arith.constant 0 : i32
    %c0_i32_0 = arith.constant 0 : i32
    return %arg0, %c0_i32 : i32, i32
  }
}

</mosaic_0001>

<bundles_post_ra>
// kernel: tpu_custom_call.1
= control target key start
LH: loop header
LB: loop body
LE: loop exit
PB: predicated region body
PF: predicated region fallthrough
CT: control target
= control target key end

     0   :  { %v9027_v6 = vmov 0   ;;  %s14757_s0 = inlined_call_operand.vmem [shape: f32[64,16], index: 0, kind: input, shape index: {}]   ;;  %s14758_s1 = inlined_call_operand.vmem [shape: bf16[16,1024], index: 1, kind: input, shape index: {}]   ;;  %s14759_s2 = inlined_call_operand.vmem [shape: f32[2,1024], index: 2, kind: input, shape index: {}]   ;;  %s14760_s3 = inlined_call_operand.hbm [shape: f32[64,1024], index: 3, kind: output, shape index: {}]  }
   0x1   :  { %v68_v0 = vld [vmem:[%s14758_s1] sm:$0xff]  ;;  %v69_v2 = vld [vmem:[%s14758_s1 + $0x8] sm:$0xff]  ;;  %161 = vmatprep.mubr.bf16.mxu0 %v9027_v6  ;;  %234 = vmatprep.mubr.bf16.mxu1 %v9027_v6  ;;  %v70_v7 = vld [vmem:[%s14758_s1 + $0x10] sm:$0xff] }
   0x2   :  { %v72_v1 = vld [vmem:[%s14758_s1 + $0x20] sm:$0xff]  ;;  %v73_v4 = vld [vmem:[%s14758_s1 + $0x28] sm:$0xff]  ;;  %v74_v8 = vld [vmem:[%s14758_s1 + $0x30] sm:$0xff] }
   0x3   :  { %v9066_v3 = vcombine.high %v68_v0, %v72_v1  ;;  %v9071_v5 = vcombine.low %v68_v0, %v72_v1  ;;  %v9081_v9 = vcombine.high %v69_v2, %v73_v4  ;;  %v9083_v10 = vcombine.low %v69_v2, %v73_v4  ;;  %v71_v12 = vld [vmem:[%s14758_s1 + $0x18] sm:$0xff]  ;;  %v16_v14 = vld [vmem:[%s14757_s0] sm:$0xff]  ;;  %v17_v16 = vld [vmem:[%s14757_s0 + $0x8] sm:$0xff] }
   0x4   :  { %v9085_v11 = vcombine.high %v70_v7, %v74_v8  ;;  %v75_v13 = vld [vmem:[%s14758_s1 + $0x38] sm:$0xff]  ;;  %v18_v17 = vld [vmem:[%s14757_s0 + $0x10] sm:$0xff]  ;;  %v9110_v19 = vpack.c.bf16 %v17_v16, %v16_v14  ;;  %v20_v21 = vld [vmem:[%s14757_s0 + $0x20] sm:$0xff] }
   0x5   :  { %129 = vmatprep.subr.bf16.mxu0 %v9066_v3  ;;  %v9097_v15 = vcombine.high %v71_v12, %v75_v13  ;;  %v19_v18 = vld [vmem:[%s14757_s0 + $0x18] sm:$0xff]  ;;  %202 = vmatprep.subr.bf16.mxu1 %v9081_v9  ;;  %v21_v22 = vld [vmem:[%s14757_s0 + $0x28] sm:$0xff] }
   0x6   :  { %130 = vmatpush1.bf16.msra.mxu0 %v9071_v5  ;;  %v9112_v20 = vpack.c.bf16 %v19_v18, %v18_v17  ;;  %203 = vmatpush1.bf16.msra.mxu1 %v9083_v10 }
   0x7   :  { %275 = vmatprep.subr.bf16.mxu0 %v9085_v11 }
   0x8   :  { %8 = vsyncpa [#allocation3], 0  ;;  %348 = vmatprep.subr.bf16.mxu1 %v9097_v15  ;;  %v28_v23 = vunpack.c.l.bf16 %v9110_v19  ;;  %v29_v24 = vunpack.c.h.bf16 %v9110_v19  ;;  %v30_v25 = vunpack.c.l.bf16 %v9112_v20  ;;  %v31_v26 = vunpack.c.h.bf16 %v9112_v20  ;;  %v22_v38 = vld [vmem:[%s14757_s0 + $0x30] sm:$0xff]  ;;  %v23_v39 = vld [vmem:[%s14757_s0 + $0x38] sm:$0xff] }
   0x9   :  { %v9127_v27 = vpack.c.bf16 %v21_v22, %v20_v21  ;;  %v9129_v32 = vcombine.low %v70_v7, %v74_v8  ;;  %v9131_v33 = vcombine.low %v71_v12, %v75_v13  ;;  %vm116_vm0 = vcmask 130048  }
   0xa   :  { %v36_v28 = vsub.f32 %v16_v14, %v28_v23  ;;  %v37_v29 = vsub.f32 %v17_v16, %v29_v24  ;;  %v38_v30 = vsub.f32 %v18_v17, %v30_v25  ;;  %v39_v31 = vsub.f32 %v19_v18, %v31_v26 }
   0xb   :  { %v32_v35 = vunpack.c.l.bf16 %v9127_v27  ;;  %v33_v36 = vunpack.c.h.bf16 %v9127_v27  ;;  %v9147_v48 = vpack.c.bf16 %v23_v39, %v22_v38 }
   0xc   :  { %v44_v34 = vpack.c.bf16 %v37_v29, %v36_v28  ;;  %v45_v37 = vpack.c.bf16 %v39_v31, %v38_v30 }
   0xd   :  { %v40_v46 = vsub.f32 %v20_v21, %v32_v35  ;;  %v41_v47 = vsub.f32 %v21_v22, %v33_v36  ;;  %v34_v54 = vunpack.c.l.bf16 %v9147_v48  ;;  %v35_v55 = vunpack.c.h.bf16 %v9147_v48 }
   0xe   :  { %8049 = vmatmul.mubr.msk.bf16.vlgmr.msra.gmra.mrb[0].mxu0 %vm116_vm0, %v44_v34  ;;  %8053 = vmatmul.mubr.msk.bf16.vlgmr.msra.gmra.mrb[0].mxu1 %vm116_vm0, %v44_v34  ;;  %v48_v40 = vunpack.c.l.bf16 %v44_v34  ;;  %v49_v41 = vunpack.c.h.bf16 %v44_v34  ;;  %v50_v44 = vunpack.c.l.bf16 %v45_v37  ;;  %v51_v45 = vunpack.c.h.bf16 %v45_v37 }
   0xf   :  { %276 = vmatpush1.bf16.msra.mxu0 %v9129_v32  ;;  %349 = vmatpush1.bf16.msra.mxu1 %v9131_v33  ;;  %v46_v53 = vpack.c.bf16 %v41_v47, %v40_v46  ;;  %v42_v58 = vsub.f32 %v22_v38, %v34_v54  ;;  %v43_v59 = vsub.f32 %v23_v39, %v35_v55 }
  0x10   :  { %171 = vmatprep.mubr.bf16.mxu0 %v9027_v6  ;;  %244 = vmatprep.mubr.bf16.mxu1 %v9027_v6  ;;  %v56_v42 = vsub.f32 %v36_v28, %v48_v40  ;;  %v57_v43 = vsub.f32 %v37_v29, %v49_v41  ;;  %v58_v50 = vsub.f32 %v38_v30, %v50_v44 }
  0x11   :  { %433 = vmatprep.subr.bf16.mxu0 %v9066_v3  ;;  %506 = vmatprep.subr.bf16.mxu1 %v9081_v9  ;;  %v59_v51 = vsub.f32 %v39_v31, %v51_v45  ;;  %v52_v56 = vunpack.c.l.bf16 %v46_v53  ;;  %v53_v57 = vunpack.c.h.bf16 %v46_v53  ;;  %v47_v63 = vpack.c.bf16 %v43_v59, %v42_v58 }
  0x12   :  { %v9151_v49 = vpack.c.bf16 %v57_v43, %v56_v42 }
  0x13   :  { %v9153_v52 = vpack.c.bf16 %v59_v51, %v58_v50  ;;  %v60_v60 = vsub.f32 %v40_v46, %v52_v56  ;;  %v61_v61 = vsub.f32 %v41_v47, %v53_v57  ;;  %v54_v0 = vunpack.c.l.bf16 %v47_v63 }
  0x14   :  { %v55_v1 = vunpack.c.h.bf16 %v47_v63 }
  0x15   :  { %v9161_v62 = vpack.c.bf16 %v61_v61, %v60_v60  ;;  %v62_v2 = vsub.f32 %v42_v58, %v54_v0 }
  0x16   :  { %8050 = vmatmul.mubr.msk.bf16.gmra.mrb[4].mxu0 %vm116_vm0, %v45_v37  ;;  %8054 = vmatmul.mubr.msk.bf16.gmra.mrb[4].mxu1 %vm116_vm0, %v45_v37  ;;  %v63_v4 = vsub.f32 %v43_v59, %v55_v1 }
  0x17   :  { %181 = vmatprep.mubr.bf16.mxu0 %v9027_v6  ;;  %254 = vmatprep.mubr.bf16.mxu1 %v9027_v6 }
  0x18   :  { %v9167_v7 = vpack.c.bf16 %v63_v4, %v62_v2 }
  0x1e   :  { %8051 = vmatmul.mubr.msk.bf16.gmra.mrb[8].mxu0 %vm116_vm0, %v46_v53  ;;  %8055 = vmatmul.mubr.msk.bf16.gmra.mrb[8].mxu1 %vm116_vm0, %v46_v53 }
  0x1f   :  { %191 = vmatprep.mubr.bf16.mxu0 %v9027_v6  ;;  %264 = vmatprep.mubr.bf16.mxu1 %v9027_v6 }
  0x26   :  { %8052 = vmatmul.mubr.msk.bf16.gmra.mrb[12].mxu0 %vm116_vm0, %v47_v63  ;;  %8056 = vmatmul.mubr.msk.bf16.gmra.mrb[12].mxu1 %vm116_vm0, %v47_v63 }
  0x27   :  { %307 = vmatprep.mubr.bf16.mxu0 %v9027_v6  ;;  %380 = vmatprep.mubr.bf16.mxu1 %v9027_v6 }
  0x2e   :  { %8057 = vmatmul.mubr.msk.bf16.vlgmr.msra.gmra.mrb[16].mxu0 %vm116_vm0, %v44_v34  ;;  %8061 = vmatmul.mubr.msk.bf16.vlgmr.msra.gmra.mrb[16].mxu1 %vm116_vm0, %v44_v34 }
  0x2f   :  { %434 = vmatpush1.bf16.msra.mxu0 %v9071_v5  ;;  %507 = vmatpush1.bf16.msra.mxu1 %v9083_v10 }
  0x30   :  { %317 = vmatprep.mubr.bf16.mxu0 %v9027_v6  ;;  %390 = vmatprep.mubr.bf16.mxu1 %v9027_v6 }
  0x31   :  { %579 = vmatprep.subr.bf16.mxu0 %v9085_v11  ;;  %652 = vmatprep.subr.bf16.mxu1 %v9097_v15 }
  0x36   :  { %8058 = vmatmul.mubr.msk.bf16.gmra.mrb[20].mxu0 %vm116_vm0, %v45_v37  ;;  %8062 = vmatmul.mubr.msk.bf16.gmra.mrb[20].mxu1 %vm116_vm0, %v45_v37 }
  0x37   :  { %327 = vmatprep.mubr.bf16.mxu0 %v9027_v6  ;;  %400 = vmatprep.mubr.bf16.mxu1 %v9027_v6 }
  0x3e   :  { %8059 = vmatmul.mubr.msk.bf16.gmra.mrb[24].mxu0 %vm116_vm0, %v46_v53  ;;  %8063 = vmatmul.mubr.msk.bf16.gmra.mrb[24].mxu1 %vm116_vm0, %v46_v53 }
  0x3f   :  { %337 = vmatprep.mubr.bf16.mxu0 %v9027_v6  ;;  %410 = vmatprep.mubr.bf16.mxu1 %v9027_v6 }
  0x46   :  { %8060 = vmatmul.mubr.msk.bf16.gmra.mrb[28].mxu0 %vm116_vm0, %v47_v63  ;;  %8064 = vmatmul.mubr.msk.bf16.gmra.mrb[28].mxu1 %vm116_vm0, %v47_v63 }
  0x47   :  { %465 = vmatprep.mubr.bf16.mxu0 %v9027_v6  ;;  %538 = vmatprep.mubr.bf16.mxu1 %v9027_v6 }
  0x4e   :  { %8065 = vmatmul.mubr.msk.bf16.vlgmr.msra.gmra.mrb[0].mxu0 %vm116_vm0, %v9110_v19  ;;  %8069 = vmatmul.mubr.msk.bf16.vlgmr.msra.gmra.mrb[0].mxu1 %vm116_vm0, %v9110_v19 }
  0x4f   :  { %580 = vmatpush1.bf16.msra.mxu0 %v9129_v32  ;;  %653 = vmatpush1.bf16.msra.mxu1 %v9131_v33 }
  0x50   :  { %475 = vmatprep.mubr.bf16.mxu0 %v9027_v6  ;;  %548 = vmatprep.mubr.bf16.mxu1 %v9027_v6 }
  0x51   :  { %737 = vmatprep.subr.bf16.mxu0 %v9066_v3  ;;  %810 = vmatprep.subr.bf16.mxu1 %v9081_v9  ;;  %v1097_v3 = vlaneseq }
  0x56   :  { %8066 = vmatmul.mubr.msk.bf16.gmra.mrb[4].mxu0 %vm116_vm0, %v9112_v20  ;;  %8070 = vmatmul.mubr.msk.bf16.gmra.mrb[4].mxu1 %vm116_vm0, %v9112_v20 }
  0x57   :  { %485 = vmatprep.mubr.bf16.mxu0 %v9027_v6  ;;  %558 = vmatprep.mubr.bf16.mxu1 %v9027_v6 }
  0x5e   :  { %8067 = vmatmul.mubr.msk.bf16.gmra.mrb[8].mxu0 %vm116_vm0, %v9127_v27  ;;  %8071 = vmatmul.mubr.msk.bf16.gmra.mrb[8].mxu1 %vm116_vm0, %v9127_v27 }
  0x5f   :  { %495 = vmatprep.mubr.bf16.mxu0 %v9027_v6  ;;  %568 = vmatprep.mubr.bf16.mxu1 %v9027_v6 }
  0x66   :  { %8068 = vmatmul.mubr.msk.bf16.gmra.mrb[12].mxu0 %vm116_vm0, %v9147_v48  ;;  %8072 = vmatmul.mubr.msk.bf16.gmra.mrb[12].mxu1 %vm116_vm0, %v9147_v48 }
  0x67   :  { %611 = vmatprep.mubr.bf16.mxu0 %v9027_v6  ;;  %684 = vmatprep.mubr.bf16.mxu1 %v9027_v6 }
  0x6e   :  { %8073 = vmatmul.mubr.msk.bf16.vlgmr.msra.gmra.mrb[16].mxu0 %vm116_vm0, %v9110_v19  ;;  %8077 = vmatmul.mubr.msk.bf16.vlgmr.msra.gmra.mrb[16].mxu1 %vm116_vm0, %v9110_v19 }
  0x6f   :  { %738 = vmatpush1.bf16.msra.mxu0 %v9071_v5  ;;  %811 = vmatpush1.bf16.msra.mxu1 %v9083_v10  ;;  %v9297_v5 = vshrl.u32 %v1097_v3, 7  ;;  %v1093_v10 = vld [vmem:[%s14759_s2] sm:$0xff] }
  0x70   :  { %621 = vmatprep.mubr.bf16.mxu0 %v9027_v6  ;;  %694 = vmatprep.mubr.bf16.mxu1 %v9027_v6 }
  0x71   :  { %883 = vmatprep.subr.bf16.mxu0 %v9085_v11  ;;  %956 = vmatprep.subr.bf16.mxu1 %v9097_v15  ;;  %v9300_v8 = vsub.s32 0, %v9297_v5  ;;  %v14766_v9 = vsub.s32 4, %v9297_v5  ;;  %v9308_v11 = vsub.s32 1, %v9297_v5  ;;  %v14765_v12 = vsub.s32 5, %v9297_v5 }
  0x72   :  { %v14763_v13 = vsub.s32 3, %v9297_v5  ;;  %v14762_v25 = vsub.s32 6, %v9297_v5  ;;  %v14761_v39 = vsub.s32 7, %v9297_v5 }
  0x73   :  { %v1100_v14 = vrot.slane %v1093_v10, %v9300_v8  ;;  %v1108_v15 = vrot.slane %v1093_v10, %v14766_v9  ;;  %v1236_v17 = vrot.slane %v1093_v10, %v9308_v11  ;;  %v1244_v18 = vrot.slane %v1093_v10, %v14765_v12 }
  0x74   :  { %v1240_v19 = vrot.slane %v1093_v10, %v14763_v13  ;;  %v1112_v38 = vrot.slane %v1093_v10, %v14762_v25 }
  0x75   :  { %v9326_v21 = vrot.slane %v1108_v15, %v9300_v8  ;;  %v9332_v23 = vrot.slane %v1236_v17, %v9308_v11  ;;  %v9335_v24 = vrot.slane %v1244_v18, %v9308_v11  ;;  %v9028_v18 = vmov 683565275  }
  0x76   :  { %8074 = vmatmul.mubr.msk.bf16.gmra.mrb[20].mxu0 %vm116_vm0, %v9112_v20  ;;  %8078 = vmatmul.mubr.msk.bf16.gmra.mrb[20].mxu1 %vm116_vm0, %v9112_v20  ;;  %v9323_v20 = vrot.slane %v1100_v14, %v9300_v8  ;;  %v9339_v28 = vrot.slane %v1240_v19, %v9308_v11 }
  0x77   :  { %631 = vmatprep.mubr.bf16.mxu0 %v9027_v6  ;;  %704 = vmatprep.mubr.bf16.mxu1 %v9027_v6 }
  0x7e   :  { %8075 = vmatmul.mubr.msk.bf16.gmra.mrb[24].mxu0 %vm116_vm0, %v9127_v27  ;;  %8079 = vmatmul.mubr.msk.bf16.gmra.mrb[24].mxu1 %vm116_vm0, %v9127_v27 }
  0x7f   :  { %641 = vmatprep.mubr.bf16.mxu0 %v9027_v6  ;;  %714 = vmatprep.mubr.bf16.mxu1 %v9027_v6 }
  0x86   :  { %8076 = vmatmul.mubr.msk.bf16.gmra.mrb[28].mxu0 %vm116_vm0, %v9147_v48  ;;  %8080 = vmatmul.mubr.msk.bf16.gmra.mrb[28].mxu1 %vm116_vm0, %v9147_v48  ;;  %v9369_v48 = vrot.slane %v1112_v38, %v9300_v8 }
  0x87   :  { %769 = vmatprep.mubr.bf16.mxu0 %v9027_v6  ;;  %842 = vmatprep.mubr.bf16.mxu1 %v9027_v6 }
  0x8e   :  { %8081 = vmatmul.mubr.msk.bf16.vlgmr.msra.gmra.mrb[0].mxu0 %vm116_vm0, %v9151_v49  ;;  %8085 = vmatmul.mubr.msk.bf16.vlgmr.msra.gmra.mrb[0].mxu1 %vm116_vm0, %v9151_v49 }
  0x8f   :  { %884 = vmatpush1.bf16.msra.mxu0 %v9129_v32  ;;  %957 = vmatpush1.bf16.msra.mxu1 %v9131_v33 }
  0x90   :  { %779 = vmatprep.mubr.bf16.mxu0 %v9027_v6  ;;  %852 = vmatprep.mubr.bf16.mxu1 %v9027_v6 }
  0x96   :  { %8082 = vmatmul.mubr.msk.bf16.gmra.mrb[4].mxu0 %vm116_vm0, %v9153_v52  ;;  %8086 = vmatmul.mubr.msk.bf16.gmra.mrb[4].mxu1 %vm116_vm0, %v9153_v52 }
  0x97   :  { %789 = vmatprep.mubr.bf16.mxu0 %v9027_v6  ;;  %862 = vmatprep.mubr.bf16.mxu1 %v9027_v6 }
  0x9e   :  { %8083 = vmatmul.mubr.msk.bf16.gmra.mrb[8].mxu0 %vm116_vm0, %v9161_v62  ;;  %8087 = vmatmul.mubr.msk.bf16.gmra.mrb[8].mxu1 %vm116_vm0, %v9161_v62 }
  0x9f   :  { %799 = vmatprep.mubr.bf16.mxu0 %v9027_v6  ;;  %872 = vmatprep.mubr.bf16.mxu1 %v9027_v6 }
  0xa6   :  { %8084 = vmatmul.mubr.msk.bf16.gmra.mrb[12].mxu0 %vm116_vm0, %v9167_v7  ;;  %8088 = vmatmul.mubr.msk.bf16.gmra.mrb[12].mxu1 %vm116_vm0, %v9167_v7 }
  0xa7   :  { %915 = vmatprep.mubr.bf16.mxu0 %v9027_v6  ;;  %988 = vmatprep.mubr.bf16.mxu1 %v9027_v6 }
  0xae   :  { %8089 = vmatmul.mubr.msk.bf16.vlgmr.msra.gmra.mrb[16].mxu0 %vm116_vm0, %v9151_v49  ;;  %8093 = vmatmul.mubr.msk.bf16.vlgmr.msra.gmra.mrb[16].mxu1 %vm116_vm0, %v9151_v49  ;;  %v1248_v49 = vrot.slane %v1093_v10, %v14761_v39 }
  0xaf   :  { %925 = vmatprep.mubr.bf16.mxu0 %v9027_v6  ;;  %998 = vmatprep.mubr.bf16.mxu1 %v9027_v6 }
  0xb0   :  { %v9380_v60 = vrot.slane %v1248_v49, %v9308_v11 }
  0xb6   :  { %8090 = vmatmul.mubr.msk.bf16.gmra.mrb[20].mxu0 %vm116_vm0, %v9153_v52  ;;  %8094 = vmatmul.mubr.msk.bf16.gmra.mrb[20].mxu1 %vm116_vm0, %v9153_v52 }
  0xb7   :  { %935 = vmatprep.mubr.bf16.mxu0 %v9027_v6  ;;  %1008 = vmatprep.mubr.bf16.mxu1 %v9027_v6 }
  0xbe   :  { %8091 = vmatmul.mubr.msk.bf16.gmra.mrb[24].mxu0 %vm116_vm0, %v9161_v62  ;;  %8095 = vmatmul.mubr.msk.bf16.gmra.mrb[24].mxu1 %vm116_vm0, %v9161_v62 }
  0xbf   :  { %945 = vmatprep.mubr.bf16.mxu0 %v9027_v6  ;;  %1018 = vmatprep.mubr.bf16.mxu1 %v9027_v6  ;;  %v14764_v6 = vsub.s32 2, %v9297_v5 }
  0xc1   :  { %v1104_v16 = vrot.slane %v1093_v10, %v14764_v6 }
  0xc3   :  { %v9329_v22 = vrot.slane %v1104_v16, %v9300_v8 }
  0xc6   :  { %8092 = vmatmul.mubr.msk.bf16.gmra.mrb[28].mxu0 %vm116_vm0, %v9167_v7  ;;  %8096 = vmatmul.mubr.msk.bf16.gmra.mrb[28].mxu1 %vm116_vm0, %v9167_v7 }
 0x161   :  { %v771_v26 = vpop.f32.mrb[0].mxu0  ;;  %v844_v27 = vpop.f32.mrb[0].mxu1 }
 0x162   :  { %v1169_v29 = vmul.f32 %v9323_v20, %v771_v26  ;;  %v1171_v30 = vmul.f32 %v9326_v21, %v844_v27  ;;  %v773_v31 = vpop.f32.mrb[1].mxu0  ;;  %v846_v32 = vpop.f32.mrb[1].mxu1 }
 0x163   :  { %v1170_v33 = vmul.f32 %v9329_v22, %v773_v31  ;;  %v9344_v34 = vpop.f32.mrb[2].mxu0  ;;  %v9346_v35 = vpop.f32.mrb[2].mxu1  ;;  %v1172_v59 = vmul.f32 %v9369_v48, %v846_v32  ;;  %v9030_v31 = vmov 2131351028  }
 0x164   :  { %v9349_v36 = vadd.f32 %v9332_v23, %v1169_v29  ;;  %v9352_v37 = vadd.f32 %v9335_v24, %v1171_v30  ;;  %v9357_v40 = vpop.f32.mrb[3].mxu0  ;;  %v9376_v54 = vpop.f32.mrb[3].mxu1  ;;  %v9029_v29 = vmov 2475754826  }
 0x165   :  { %v9360_v41 = vadd.f32 %v9339_v28, %v1170_v33  ;;  %v9384_v3 = vadd.f32 %v9380_v60, %v1172_v59  ;;  %v9031_v33 = vmov 2102212464  }
 0x166   :  { %v1369_v42 = vand.u32 2147483647, %v9349_v36  ;;  %v1372_v43 = vand.u32 2139095040, %v9349_v36  ;;  %v1575_v44 = vand.u32 2147483647, %v9352_v37  ;;  %v1578_v45 = vand.u32 2139095040, %v9352_v37 }
 0x167   :  { %v1475_v52 = vand.u32 2139095040, %v9360_v41  ;;  %v14768_v63 = vand.u32 2147483647, %v9360_v41  ;;  %vm1371_vm14 = vcmp.lt.s32.totalorder %v9349_v36, 0 }
 0x168   :  { %v1373_v46 = vshrl.u32 %v1372_v43, 23  ;;  %v1376_v47 = vand.u32 8388607, %v1369_v42  ;;  %v1579_v50 = vshrl.u32 %v1578_v45, 23  ;;  %v1582_v51 = vand.u32 8388607, %v1575_v44 }
 0x169   :  { %v1476_v56 = vshrl.u32 %v1475_v52, 23  ;;  %v9392_v15 = vand.u32 8388607, %v14768_v63  ;;  %v9032_v43 = vmov 920167782  }
 0x16a   :  { %v8097_v53 = vadd.s32 4294967169, %v1373_v46  ;;  %v8105_v55 = vadd.s32 4294967169, %v1579_v50  ;;  %v1377_v57 = vor.u32 8388608, %v1376_v47  ;;  %v1583_v61 = vor.u32 8388608, %v1582_v51 }
 0x16b   :  { %v8101_v0 = vadd.s32 4294967169, %v1476_v56  ;;  %v9033_v52 = vmov 1326507024  }
 0x16c   :  { %v1379_v58 = vadd.s32 1, %v8097_v53  ;;  %v1585_v62 = vadd.s32 1, %v8105_v55  ;;  %v9386_v10 = vshll.u32 %v1377_v57, 8  ;;  %v9388_v14 = vshll.u32 %v1583_v61, 8 }
 0x16d   :  { %v9394_v16 = vadd.s32 1, %v8101_v0 }
 0x16e   :  { %vm1380_vm1 = vcmp.gt.s32.totalorder %v1379_v58, 0  ;;  %vm1586_vm2 = vcmp.gt.s32.totalorder %v1585_v62, 0 }
 0x16f   :  { %v1381_v1 = vsel %vm1380_vm1, %v1379_v58, 0  ;;  %v1587_v7 = vsel %vm1586_vm2, %v1585_v62, 0  ;;  %vm1483_vm7 = vcmp.gt.s32.totalorder %v9394_v16, 0 }
 0x170   :  { %v1382_v2 = vshrl.u32 %v1381_v1, 5  ;;  %v1383_v4 = vand.u32 31, %v1381_v1  ;;  %v9397_v26 = vshrl.u32 %v1587_v7, 5  ;;  %v1589_v27 = vand.u32 31, %v1587_v7 }
 0x172   :  { %v1384_v17 = vsub.s32 32, %v1383_v4  ;;  %v1386_v19 = vshll.u32 %v9028_v18, %v1383_v4  ;;  %v1389_v30 = vshll.u32 %v9029_v29, %v1383_v4  ;;  %v1392_v32 = vshll.u32 %v9030_v31, %v1383_v4 }
 0x173   :  { %v1395_v38 = vshll.u32 %v9031_v33, %v1383_v4  ;;  %v1398_v45 = vshll.u32 %v9032_v43, %v1383_v4  ;;  %vm1401_vm3 = vcmp.lt.s32.totalorder %v1382_v2, 1  ;;  %vm1402_vm4 = vcmp.lt.s32.totalorder %v1382_v2, 2 }
 0x174   :  { %v1387_v46 = vshrl.u32 %v9029_v29, %v1384_v17  ;;  %v1390_v47 = vshrl.u32 %v9030_v31, %v1384_v17  ;;  %v1393_v49 = vshrl.u32 %v9031_v33, %v1384_v17  ;;  %v1385_v50 = vshrl.u32 %v9028_v18, %v1384_v17 }
 0x175   :  { %v1396_v51 = vshrl.u32 %v9032_v43, %v1384_v17  ;;  %v1399_v53 = vshrl.u32 %v9033_v52, %v1384_v17  ;;  %v1590_v58 = vsub.s32 32, %v1589_v27  ;;  %vm1403_vm5 = vcmp.lt.s32.totalorder %v1382_v2, 3 }
 0x176   :  { %v1388_v55 = vor.u32 %v1387_v46, %v1386_v19  ;;  %v1391_v56 = vor.u32 %v1390_v47, %v1389_v30  ;;  %v1394_v57 = vor.u32 %v1393_v49, %v1392_v32  ;;  %vm1404_vm6 = vcmp.lt.s32.totalorder %v1382_v2, 4 }
 0x177   :  { %v1397_v59 = vor.u32 %v1396_v51, %v1395_v38  ;;  %v1400_v61 = vor.u32 %v1399_v53, %v1398_v45  ;;  %v1592_v17 = vshll.u32 %v9028_v18, %v1589_v27  ;;  %v1593_v32 = vshrl.u32 %v9029_v29, %v1590_v58 }
 0x178   :  { %v1405_v62 = vsel %vm1401_vm3, %v1385_v50, %v1388_v55  ;;  %v1406_v0 = vsel %vm1404_vm6, %v1394_v57, 2102212464  ;;  %v1409_v1 = vsel %vm1401_vm3, %v1388_v55, %v1391_v56  ;;  %v1413_v4 = vsel %vm1401_vm3, %v1391_v56, %v1394_v57 }
 0x179   :  { %v1407_v7 = vsel %vm1403_vm5, %v1391_v56, %v1406_v0  ;;  %v1410_v39 = vsel %vm1404_vm6, %v1397_v59, 920167782  ;;  %v1414_v25 = vsel %vm1404_vm6, %v1400_v61, 1326507024  ;;  %v1595_v38 = vshll.u32 %v9029_v29, %v1589_v27 }
 0x17a   :  { %v1411_v19 = vsel %vm1403_vm5, %v1394_v57, %v1410_v39  ;;  %v1415_v30 = vsel %vm1403_vm5, %v1397_v59, %v1414_v25  ;;  %v1408_v45 = vsel %vm1402_vm4, %v1405_v62, %v1407_v7  ;;  %v1596_v49 = vshrl.u32 %v9030_v31, %v1590_v58 }
 0x17b   :  { %v1412_v46 = vsel %vm1402_vm4, %v1409_v1, %v1411_v19  ;;  %v1416_v47 = vsel %vm1402_vm4, %v1413_v4, %v1415_v30  ;;  %v1594_v25 = vor.u32 %v1593_v32, %v1592_v17  ;;  %v1598_v56 = vshll.u32 %v9030_v31, %v1589_v27 }
 0x17c   :  { %v9421_v50 = vmul.u32.u64.low %v9386_v10, %v1416_v47  ;;  %v9422_v51 = vmul.u32.u64.high %v9386_v10, %v1416_v47, %v9421_v50  ;;  %v9425_v53 = vmul.u32.u64.low %v9386_v10, %v1412_v46  ;;  %v9426_v39 = vmul.u32.u64.high %v9386_v10, %v1412_v46, %v9425_v53 }
 0x17d   :  { %v1597_v55 = vor.u32 %v1596_v49, %v1595_v38  ;;  %v1599_v57 = vshrl.u32 %v9031_v33, %v1590_v58  ;;  %v1591_v2 = vshrl.u32 %v9028_v18, %v1590_v58  ;;  %v1601_v59 = vshll.u32 %v9031_v33, %v1589_v27 }
 0x17e   :  { %v1602_v61 = vshrl.u32 %v9032_v43, %v1590_v58  ;;  %v1605_v62 = vshrl.u32 %v9033_v52, %v1590_v58  ;;  %v1424_v0 = vmul.u32 %v9386_v10, %v1408_v45  ;;  %v1604_v4 = vshll.u32 %v9032_v43, %v1589_v27 }
 0x17f   :  { %v1600_v1 = vor.u32 %v1599_v57, %v1598_v56  ;;  %vm1607_vm8 = vcmp.lt.s32.totalorder %v9397_v26, 1  ;;  %vm1426_vm9 = vc.u32 %v9422_v51, %v9425_v53  ;;  %v1427_v7 = vadd.s32 1, %v9426_v39 }
 0x180   :  { %v1603_v17 = vor.u32 %v1602_v61, %v1601_v59  ;;  %vm1608_vm10 = vcmp.lt.s32.totalorder %v9397_v26, 2  ;;  %v1606_v19 = vor.u32 %v1605_v62, %v1604_v4  ;;  %vm1609_vm11 = vcmp.lt.s32.totalorder %v9397_v26, 3 }
 0x181   :  { %vm1610_vm12 = vcmp.lt.s32.totalorder %v9397_v26, 4  ;;  %v1615_v58 = vsel %vm1607_vm8, %v1594_v25, %v1597_v55  ;;  %v1428_v10 = vsel %vm1426_vm9, %v1427_v7, %v9426_v39  ;;  %v1619_v32 = vsel %vm1607_vm8, %v1597_v55, %v1600_v1  ;;  %v9467_v7 = vpop.f32.mrb[4].mxu0 }
 0x182   :  { %v1612_v30 = vsel %vm1610_vm12, %v1600_v1, 2102212464  ;;  %v1616_v27 = vsel %vm1610_vm12, %v1603_v17, 920167782  ;;  %v1429_v38 = vadd.s32 %v1428_v10, %v1424_v0  ;;  %v1611_v45 = vsel %vm1607_vm8, %v1591_v2, %v1594_v25 }
 0x183   :  { %v1617_v46 = vsel %vm1609_vm11, %v1600_v1, %v1616_v27  ;;  %v1620_v47 = vsel %vm1610_vm12, %v1606_v19, 1326507024  ;;  %v1613_v49 = vsel %vm1609_vm11, %v1597_v55, %v1612_v30  ;;  %v1484_v57 = vsel %vm1483_vm7, %v9394_v16, 0 }
 0x184   :  { %v1618_v50 = vsel %vm1608_vm10, %v1615_v58, %v1617_v46  ;;  %v1621_v56 = vsel %vm1609_vm11, %v1603_v17, %v1620_v47  ;;  %v1430_v59 = vadd.s32 536870912, %v1429_v38  ;;  %v1614_v0 = vsel %vm1608_vm10, %v1611_v45, %v1613_v49 }
 0x185   :  { %v1622_v39 = vsel %vm1608_vm10, %v1619_v32, %v1621_v56  ;;  %v9453_v61 = vmul.u32.u64.low %v9388_v14, %v1618_v50  ;;  %v9454_v62 = vmul.u32.u64.high %v9388_v14, %v1618_v50, %v9453_v61  ;;  %v1486_v1 = vand.u32 31, %v1484_v57 }
 0x186   :  { %v9458_v25 = vmul.u32.u64.low %v9388_v14, %v1622_v39  ;;  %v9459_v55 = vmul.u32.u64.high %v9388_v14, %v1622_v39, %v9458_v25  ;;  %v9461_v2 = vshrl.u32 %v1430_v59, 30  ;;  %v1681_v16 = vand.u32 2139095040, %v9384_v3 }
 0x187   :  { %v14767_v4 = vand.u32 2147483647, %v9384_v3  ;;  %v1633_v19 = vadd.s32 1, %v9454_v62  ;;  %v1480_v58 = vor.u32 8388608, %v9392_v15  ;;  %v1487_v10 = vsub.s32 32, %v1486_v1 }
 0x188   :  { %v1432_v17 = vshll.u32 %v9461_v2, 30  ;;  %v1630_v30 = vmul.u32 %v9388_v14, %v1614_v0  ;;  %vm1632_vm13 = vc.u32 %v9459_v55, %v9453_v61  ;;  %v9477_v26 = vmul.f32 %v9323_v20, %v9344_v34 }
 0x189   :  { %v1634_v32 = vsel %vm1632_vm13, %v1633_v19, %v9454_v62  ;;  %v1682_v45 = vshrl.u32 %v1681_v16, 23  ;;  %v9484_v46 = vmul.f32 %v9326_v21, %v9346_v35  ;;  %v1490_v47 = vshrl.u32 %v9029_v29, %v1487_v10 }
 0x18a   :  { %v9479_v27 = vsub.s32 %v1429_v38, %v1432_v17  ;;  %v1635_v15 = vadd.s32 %v1634_v32, %v1630_v30  ;;  %v1493_v14 = vshrl.u32 %v9030_v31, %v1487_v10  ;;  %v9490_v49 = vand.u32 8388607, %v14767_v4 }
 0x18b   :  { %v1489_v38 = vshll.u32 %v9028_v18, %v1486_v1  ;;  %v1496_v50 = vshrl.u32 %v9031_v33, %v1487_v10  ;;  %v9495_v56 = vshll.u32 %v1480_v58, 8  ;;  %v1425_v35 = vadd.s32 %v9425_v53, %v9422_v51 }
 0x18c   :  { %v1435_v34 = vsub.s32 0, %v9479_v27  ;;  %v1636_v59 = vadd.s32 536870912, %v1635_v15  ;;  %v1485_v39 = vshrl.u32 %v1484_v57, 5  ;;  %v1492_v62 = vshll.u32 %v9029_v29, %v1486_v1 }
 0x18d   :  { %v1491_v0 = vor.u32 %v1490_v47, %v1489_v38  ;;  %v1495_v16 = vshll.u32 %v9030_v31, %v1486_v1  ;;  %v8109_v17 = vadd.s32 4294967169, %v1682_v45  ;;  %v1498_v58 = vshll.u32 %v9031_v33, %v1486_v1 }
 0x18e   :  { %v8098_v25 = vmin.u32 %v1435_v34, %v9479_v27  ;;  %v9503_v19 = vshrl.u32 %v1636_v59, 30  ;;  %v1494_v30 = vor.u32 %v1493_v14, %v1492_v62  ;;  %v1499_v32 = vshrl.u32 %v9032_v43, %v1487_v10 }
 0x18f   :  { %v1497_v6 = vor.u32 %v1496_v50, %v1495_v16  ;;  %v1501_v51 = vshll.u32 %v9032_v43, %v1486_v1  ;;  %v1502_v53 = vshrl.u32 %v9033_v52, %v1487_v10  ;;  %vm1504_vm15 = vcmp.lt.s32.totalorder %v1485_v39, 1 }
 0x190   :  { %v1437_v13 = vclz %v8098_v25  ;;  %v1638_v57 = vshll.u32 %v9503_v19, 30  ;;  %v1500_v34 = vor.u32 %v1499_v32, %v1498_v58  ;;  %vm1505_vm0 = vcmp.lt.s32.totalorder %v1485_v39, 2 }
 0x191   :  { %v1455_v45 = vsub.s32 4, %v9461_v2  ;;  %v1503_v38 = vor.u32 %v1502_v53, %v1501_v51  ;;  %vm1507_vm1 = vcmp.lt.s32.totalorder %v1485_v39, 4  ;;  %vm1506_vm2 = vcmp.lt.s32.totalorder %v1485_v39, 3 }
 0x192   :  { %v8099_v47 = vadd.s32 4294967294, %v1437_v13  ;;  %v9511_v14 = vsub.s32 %v1635_v15, %v1638_v57  ;;  %v1512_v59 = vsel %vm1504_vm15, %v1491_v0, %v1494_v30  ;;  %v1513_v50 = vsel %vm1507_vm1, %v1500_v34, 920167782 }
 0x193   :  { %v1509_v1 = vsel %vm1507_vm1, %v1497_v6, 2102212464  ;;  %v1514_v62 = vsel %vm1506_vm2, %v1497_v6, %v1513_v50  ;;  %v1517_v25 = vsel %vm1507_vm1, %v1503_v38, 1326507024  ;;  %v1488_v13 = vshrl.u32 %v9028_v18, %v1487_v10 }
 0x194   :  { %vm8100_vm3 = vcmp.lt.s32.totalorder %v8099_v47, 0  ;;  %v1641_v58 = vsub.s32 0, %v9511_v14  ;;  %v1516_v32 = vsel %vm1504_vm15, %v1494_v30, %v1497_v6  ;;  %v1456_v15 = vsel %vm1371_vm14, %v1455_v45, %v9461_v2 }
 0x195   :  { %v1440_v16 = vsel %vm8100_vm3, 0, %v8099_v47  ;;  %v1518_v57 = vsel %vm1506_vm2, %v1500_v34, %v1517_v25  ;;  %v1508_v50 = vsel %vm1504_vm15, %v1488_v13, %v1491_v0  ;;  %v1510_v47 = vsel %vm1506_vm2, %v1494_v30, %v1509_v1 }
 0x196   :  { %v1441_v51 = vsub.s32 32, %v1440_v16  ;;  %v1445_v53 = vsub.s32 4294967266, %v1440_v16  ;;  %v8106_v12 = vmin.u32 %v1641_v58, %v9511_v14  ;;  %v1515_v38 = vsel %vm1505_vm0, %v1512_v59, %v1514_v62 }
 0x197   :  { %v1442_v10 = vshll.u32 %v9479_v27, %v1440_v16  ;;  %v1519_v4 = vsel %vm1505_vm0, %v1516_v32, %v1518_v57  ;;  %vm1577_vm4 = vcmp.lt.s32.totalorder %v9352_v37, 0  ;;  %v1688_v45 = vadd.s32 1, %v8109_v17 }
 0x198   :  { %v1443_v9 = vshrl.u32 %v1425_v35, %v1441_v51  ;;  %v1446_v6 = vadd.s32 127, %v1445_v53  ;;  %v1643_v63 = vclz %v8106_v12  ;;  %vm9540_vm5 = vcmp.le.f32.partialorder %v1369_v42, 0.7853982 }
 0x199   :  { %v9530_v2 = vmul.u32.u64.low %v9495_v56, %v1519_v4  ;;  %v9531_v34 = vmul.u32.u64.high %v9495_v56, %v1519_v4, %v9530_v2  ;;  %v9534_v30 = vmul.u32.u64.low %v9495_v56, %v1515_v38  ;;  %v9535_v1 = vmul.u32.u64.high %v9495_v56, %v1515_v38, %v9534_v30 }
 0x19a   :  { %v1444_v25 = vor.u32 %v1443_v9, %v1442_v10  ;;  %v1447_v0 = vshll.u32 %v1446_v6, 23  ;;  %v8107_v35 = vadd.s32 4294967294, %v1643_v63  ;;  %v1686_v12 = vor.u32 8388608, %v9490_v49 }
 0x19b   :  { %vm1689_vm6 = vcmp.gt.s32.totalorder %v1688_v45, 0  ;;  %v1458_v9 = vsel %vm9540_vm5, 0, %v1456_v15  ;;  %v1511_v17 = vsel %vm1505_vm0, %v1508_v50, %v1510_v47  ;;  %v1661_v16 = vsub.s32 4, %v9503_v19 }
 0x19c   :  { %v1448_v4 = vor.u32 4788187, %v1447_v0  ;;  %v1690_v59 = vsel %vm1689_vm6, %v1688_v45, 0  ;;  %v1451_v62 = vcvt.s32.f32 %v1444_v25  ;;  %vm8108_vm7 = vcmp.lt.s32.totalorder %v8107_v35, 0 }
 0x19d   :  { %vm1529_vm8 = vc.u32 %v9531_v34, %v9534_v30  ;;  %v1646_v58 = vsel %vm8108_vm7, 0, %v8107_v35  ;;  %v1530_v63 = vadd.s32 1, %v9535_v1  ;;  %v1692_v13 = vand.u32 31, %v1690_v59 }
 0x19e   :  { %v1449_v42 = vand.u32 2147483647, %v1448_v4  ;;  %v1631_v32 = vadd.s32 %v9453_v61, %v9459_v55  ;;  %v1647_v51 = vsub.s32 32, %v1646_v58  ;;  %v1651_v53 = vsub.s32 4294967266, %v1646_v58 }
 0x19f   :  { %v1527_v39 = vmul.u32 %v9495_v56, %v1511_v17  ;;  %v9555_v57 = vand.u32 3, %v1458_v9  ;;  %vm9559_vm9 = vcmp.le.f32.partialorder %v1575_v44, 0.7853982  ;;  %v1531_v47 = vsel %vm1529_vm8, %v1530_v63, %v9535_v1 }
 0x1a0   :  { %v1452_v15 = vmul.f32 %v1451_v62, %v1449_v42  ;;  %v1693_v38 = vsub.s32 32, %v1692_v13  ;;  %v1648_v10 = vshll.u32 %v9511_v14, %v1646_v58  ;;  %v1649_v6 = vshrl.u32 %v1631_v32, %v1647_v51 }
 0x1a1   :  { %v1652_v61 = vadd.s32 127, %v1651_v53  ;;  %v1532_v55 = vadd.s32 %v1531_v47, %v1527_v39  ;;  %v9568_v56 = vsel %vm1577_vm4, %v1661_v16, %v9503_v19  ;;  %v9570_v45 = vshrl.u32 %v1690_v59, 5 }
 0x1a2   :  { %v1453_v2 = vxor.u32 2147483648, %v1452_v15  ;;  %v1695_v44 = vshll.u32 %v9028_v18, %v1692_v13  ;;  %v1650_v25 = vor.u32 %v1649_v6, %v1648_v10  ;;  %v1698_v1 = vshll.u32 %v9029_v29, %v1692_v13  ;;  %v9589_v10 = vpop.f32.mrb[4].mxu1 }
 0x1a3   :  { %v1653_v0 = vshll.u32 %v1652_v61, 23  ;;  %v1533_v35 = vadd.s32 536870912, %v1532_v55  ;;  %v1696_v4 = vshrl.u32 %v9029_v29, %v1693_v38  ;;  %v1699_v9 = vshrl.u32 %v9030_v31, %v1693_v38 }
 0x1a4   :  { %v1454_v14 = vsel %vm1371_vm14, %v1453_v2, %v1452_v15  ;;  %v1702_v17 = vshrl.u32 %v9031_v33, %v1693_v38  ;;  %v1701_v16 = vshll.u32 %v9030_v31, %v1692_v13  ;;  %v1657_v42 = vcvt.s32.f32 %v1650_v25 }
 0x1a5   :  { %v1457_v19 = vsel %vm9540_vm5, %v9349_v36, %v1454_v14  ;;  %v1654_v59 = vor.u32 4788187, %v1653_v0  ;;  %v9582_v62 = vshrl.u32 %v1533_v35, 30  ;;  %v1704_v58 = vshll.u32 %v9031_v33, %v1692_v13 }
 0x1a6   :  { %8747 = vcosq.f32 %v1457_v19  ;;  %v1705_v63 = vshrl.u32 %v9032_v43, %v1693_v38  ;;  %v1703_v53 = vor.u32 %v1702_v17, %v1701_v16  ;;  %v1697_v39 = vor.u32 %v1696_v4, %v1695_v44 }
 0x1a7   :  { %8749 = vsinq.f32 %v1457_v19  ;;  %v1655_v32 = vand.u32 2147483647, %v1654_v59  ;;  %v1535_v51 = vshll.u32 %v9582_v62, 30  ;;  %v1700_v15 = vor.u32 %v1699_v9, %v1698_v1 }
 0x1a8   :  { %v1706_v27 = vor.u32 %v1705_v63, %v1704_v58  ;;  %v1708_v47 = vshrl.u32 %v9033_v52, %v1693_v38  ;;  %v1664_v61 = vsel %vm9559_vm9, 0, %v9568_v56  ;;  %v1707_v25 = vshll.u32 %v9032_v43, %v1692_v13 }
 0x1a9   :  { %v1658_v6 = vmul.f32 %v1657_v42, %v1655_v32  ;;  %v9594_v2 = vsub.s32 %v1532_v55, %v1535_v51  ;;  %vm1467_vm10 = vcmp.eq.s32.totalorder %v9555_v57, 2  ;;  %v1694_v0 = vshrl.u32 %v9028_v18, %v1693_v38 }
 0x1aa   :  { %vm1710_vm11 = vcmp.lt.s32.totalorder %v9570_v45, 1  ;;  %vm1713_vm12 = vcmp.lt.s32.totalorder %v9570_v45, 4  ;;  %v9603_v44 = vshll.u32 %v1686_v12, 8  ;;  %vm1464_vm13 = vcmp.eq.s32.totalorder %v9555_v57, 0 }
 0x1ab   :  { %v1659_v35 = vxor.u32 2147483648, %v1658_v6  ;;  %v1538_v55 = vsub.s32 0, %v9594_v2  ;;  %v1709_v56 = vor.u32 %v1708_v47, %v1707_v25  ;;  %v1715_v13 = vsel %vm1713_vm12, %v1703_v53, 2102212464 }
 0x1ac   :  { %vm1463_vm14 = vcmp.lt.s32.totalorder %v9555_v57, 2  ;;  %vm1711_vm15 = vcmp.lt.s32.totalorder %v9570_v45, 2  ;;  %v1718_v38 = vsel %vm1710_vm11, %v1697_v39, %v1700_v15  ;;  %v1719_v49 = vsel %vm1713_vm12, %v1706_v27, 920167782 }
 0x1ad   :  { %v9617_v12 = vadd.f32 %v9332_v23, %v9477_v26  ;;  %vm1461_vm0 = vweird.f32 %v9349_v36  ;;  %v1660_v1 = vsel %vm1577_vm4, %v1659_v35, %v1658_v6  ;;  %v8102_v14 = vmin.u32 %v1538_v55, %v9594_v2 }
 0x1ae   :  { %vm1712_vm1 = vcmp.lt.s32.totalorder %v9570_v45, 3  ;;  %v1714_v4 = vsel %vm1710_vm11, %v1694_v0, %v1697_v39  ;;  %v1663_v9 = vsel %vm9559_vm9, %v9352_v37, %v1660_v1  ;;  %v1722_v26 = vsel %vm1710_vm11, %v1700_v15, %v1703_v53 }
 0x1af   :  { %v1716_v17 = vsel %vm1712_vm1, %v1700_v15, %v1715_v13  ;;  %v1720_v19 = vsel %vm1712_vm1, %v1703_v53, %v1719_v49  ;;  %8751 = vcosq.f32 %v1663_v9  ;;  %v1540_v59 = vclz %v8102_v14 }
 0x1b0   :  { %v1721_v16 = vsel %vm1711_vm15, %v1718_v38, %v1720_v19  ;;  %v1723_v42 = vsel %vm1713_vm12, %v1709_v56, 1326507024  ;;  %v8748_v58 = vpop.eup %8747  ;;  %8753 = vsinq.f32 %v1663_v9  ;;  %v1668_v47 = vand.u32 3, %v1664_v61  ;;  %v9660_v9 = vpop.f32.mrb[5].mxu0 }
 0x1b1   :  { %v1724_v63 = vsel %vm1712_vm1, %v1706_v27, %v1723_v42  ;;  %v9636_v32 = vmul.u32.u64.low %v9603_v44, %v1721_v16  ;;  %v9637_v50 = vmul.u32.u64.high %v9603_v44, %v1721_v16, %v9636_v32  ;;  %v8750_v51 = vpop.eup %8749  ;;  %v1468_v39 = vxor.u32 2147483648, %v8748_v58 }
 0x1b2   :  { %v8103_v53 = vadd.s32 4294967294, %v1540_v59  ;;  %v1725_v15 = vsel %vm1711_vm15, %v1722_v26, %v1724_v63  ;;  %v1465_v6 = vxor.u32 2147483648, %v8750_v51  ;;  %v1717_v25 = vsel %vm1711_vm15, %v1714_v4, %v1716_v17 }
 0x1b3   :  { %v9645_v0 = vmul.u32.u64.low %v9603_v44, %v1725_v15  ;;  %v9646_v35 = vmul.u32.u64.high %v9603_v44, %v1725_v15, %v9645_v0  ;;  %v1469_v27 = vsel %vm1467_vm10, %v1468_v39, %v8750_v51  ;;  %v1528_v55 = vadd.s32 %v9534_v30, %v9531_v34 }
 0x1b4   :  { %vm8104_vm2 = vcmp.lt.s32.totalorder %v8103_v53, 0  ;;  %v2196_v61 = vand.u32 2139095040, %v9617_v12  ;;  %v1466_v56 = vsel %vm1464_vm13, %v8748_v58, %v1465_v6  ;;  %v1558_v45 = vsub.s32 4, %v9582_v62 }
 0x1b5   :  { %v1543_v13 = vsel %vm8104_vm2, 0, %v8103_v53  ;;  %v1736_v38 = vadd.s32 1, %v9637_v50  ;;  %v1470_v49 = vsel %vm1463_vm14, %v1466_v56, %v1469_v27  ;;  %v1733_v4 = vmul.u32 %v9603_v44, %v1717_v25 }
 0x1b6   :  { %v1544_v1 = vsub.s32 32, %v1543_v13  ;;  %v1548_v14 = vsub.s32 4294967266, %v1543_v13  ;;  %v1471_v34 = vsel %vm1461_vm0, nan, %v1470_v49  ;;  %vm1735_vm3 = vc.u32 %v9646_v35, %v9636_v32 }
 0x1b7   :  { %v2193_v30 = vand.u32 2147483647, %v9617_v12  ;;  %v2197_v17 = vshrl.u32 %v2196_v61, 23  ;;  %7961 = vst [vmem:[#allocation2] sm:$0xff] %v1471_v34  ;;  %v1545_v19 = vshll.u32 %v9594_v2, %v1543_v13  ;;  %v1737_v59 = vsel %vm1735_vm3, %v1736_v38, %v9637_v50 }
 0x1b8   :  { %v1546_v57 = vshrl.u32 %v1528_v55, %v1544_v1  ;;  %v1549_v26 = vadd.s32 127, %v1548_v14  ;;  %vm1667_vm4 = vweird.f32 %v9352_v37  ;;  %vm1474_vm5 = vcmp.lt.s32.totalorder %v9360_v41, 0 }
 0x1b9   :  { %v1738_v44 = vadd.s32 %v1737_v59, %v1733_v4  ;;  %v8129_v36 = vadd.s32 4294967169, %v2197_v17  ;;  %v8752_v16 = vpop.eup %8751  ;;  %vm1669_vm6 = vcmp.lt.s32.totalorder %v1668_v47, 2  ;;  %v14773_v42 = vand.u32 2147483647, %v9360_v41 }
 0x1ba   :  { %v1547_v63 = vor.u32 %v1546_v57, %v1545_v19  ;;  %v1550_v2 = vshll.u32 %v1549_v26, 23  ;;  %v8754_v51 = vpop.eup %8753  ;;  %v1674_v39 = vxor.u32 2147483648, %v8752_v16  ;;  %v2200_v50 = vand.u32 8388607, %v2193_v30 }
 0x1bb   :  { %vm9673_vm7 = vcmp.le.f32.partialorder %v14773_v42, 0.7853982  ;;  %v1739_v53 = vadd.s32 536870912, %v1738_v44  ;;  %v2203_v15 = vadd.s32 1, %v8129_v36  ;;  %v1671_v6 = vxor.u32 2147483648, %v8754_v51 }
 0x1bc   :  { %vm1673_vm8 = vcmp.eq.s32.totalorder %v1668_v47, 2  ;;  %v1551_v25 = vor.u32 4788187, %v1550_v2  ;;  %v1559_v0 = vsel %vm1474_vm5, %v1558_v45, %v9582_v62  ;;  %vm1670_vm9 = vcmp.eq.s32.totalorder %v1668_v47, 0 }
 0x1bd   :  { %v1675_v27 = vsel %vm1673_vm8, %v1674_v39, %v8754_v51  ;;  %v9682_v55 = vshrl.u32 %v1739_v53, 30  ;;  %vm2204_vm10 = vcmp.gt.s32.totalorder %v2203_v15, 0  ;;  %v1672_v61 = vsel %vm1670_vm9, %v8752_v16, %v1671_v6 }
 0x1be   :  { %v1552_v56 = vand.u32 2147483647, %v1551_v25  ;;  %v1554_v13 = vcvt.s32.f32 %v1547_v63  ;;  %v2205_v38 = vsel %vm2204_vm10, %v2203_v15, 0  ;;  %v1676_v49 = vsel %vm1669_vm6, %v1672_v61, %v1675_v27 }
 0x1bf   :  { %v1561_v1 = vsel %vm9673_vm7, 0, %v1559_v0  ;;  %v1741_v14 = vshll.u32 %v9682_v55, 30  ;;  %v2201_v4 = vor.u32 8388608, %v2200_v50  ;;  %v1677_v62 = vsel %vm1667_vm4, nan, %v1676_v49 }
 0x1c0   :  { %v1555_v45 = vmul.f32 %v1554_v13, %v1552_v56  ;;  %v2207_v34 = vand.u32 31, %v2205_v38  ;;  %7963 = vst [vmem:[#allocation2 + $0x10] sm:$0xff] %v1677_v62  ;;  %v9694_v19 = vadd.f32 %v9335_v24, %v9484_v46  ;;  %v9698_v47 = vmul.f32 %v9329_v22, %v9357_v40 }
 0x1c1   :  { %v9690_v17 = vsub.s32 %v1738_v44, %v1741_v14  ;;  %v9700_v26 = vand.u32 3, %v1561_v1  ;;  %v9702_v59 = vshrl.u32 %v2205_v38, 5  ;;  %v1734_v36 = vadd.s32 %v9636_v32, %v9646_v35 }
 0x1c2   :  { %v1556_v57 = vxor.u32 2147483648, %v1555_v45  ;;  %v2208_v37 = vsub.s32 32, %v2207_v34  ;;  %v1764_v16 = vsub.s32 4, %v9682_v55  ;;  %v9708_v42 = vshll.u32 %v2201_v4, 8 }
 0x1c3   :  { %v1744_v44 = vsub.s32 0, %v9690_v17  ;;  %v2210_v40 = vshll.u32 %v9028_v18, %v2207_v34  ;;  %v2213_v35 = vshll.u32 %v9029_v29, %v2207_v34  ;;  %v2402_v39 = vand.u32 2139095040, %v9694_v19 }
 0x1c4   :  { %v1557_v46 = vsel %vm1474_vm5, %v1556_v57, %v1555_v45  ;;  %v2211_v63 = vshrl.u32 %v9029_v29, %v2208_v37  ;;  %v2214_v2 = vshrl.u32 %v9030_v31, %v2208_v37  ;;  %v2216_v50 = vshll.u32 %v9030_v31, %v2207_v34 }
 0x1c5   :  { %v1560_v51 = vsel %vm9673_vm7, %v9360_v41, %v1557_v46  ;;  %v8110_v32 = vmin.u32 %v1744_v44, %v9690_v17  ;;  %vm2225_vm11 = vcmp.lt.s32.totalorder %v9702_v59, 1  ;;  %v2217_v25 = vshrl.u32 %v9031_v33, %v2208_v37  ;;  %v9738_v44 = vpop.f32.mrb[5].mxu1 }
 0x1c6   :  { %8755 = vcosq.f32 %v1560_v51  ;;  %v2212_v53 = vor.u32 %v2211_v63, %v2210_v40  ;;  %v2215_v6 = vor.u32 %v2214_v2, %v2213_v35  ;;  %v2219_v58 = vshll.u32 %v9031_v33, %v2207_v34 }
 0x1c7   :  { %8757 = vsinq.f32 %v1560_v51  ;;  %v1746_v15 = vclz %v8110_v32  ;;  %v2220_v0 = vshrl.u32 %v9032_v43, %v2208_v37  ;;  %v2222_v27 = vshll.u32 %v9032_v43, %v2207_v34 }
 0x1c8   :  { %v2223_v61 = vshrl.u32 %v9033_v52, %v2208_v37  ;;  %v2209_v13 = vshrl.u32 %v9028_v18, %v2208_v37  ;;  %v2218_v38 = vor.u32 %v2217_v25, %v2216_v50  ;;  %vm2226_vm12 = vcmp.lt.s32.totalorder %v9702_v59, 2 }
 0x1c9   :  { %v8111_v56 = vadd.s32 4294967294, %v1746_v15  ;;  %vm1680_vm13 = vcmp.lt.s32.totalorder %v9384_v3, 0  ;;  %v2221_v49 = vor.u32 %v2220_v0, %v2219_v58  ;;  %vm2228_vm14 = vcmp.lt.s32.totalorder %v9702_v59, 4 }
 0x1ca   :  { %v2224_v1 = vor.u32 %v2223_v61, %v2222_v27  ;;  %v2403_v14 = vshrl.u32 %v2402_v39, 23  ;;  %vm2227_vm0 = vcmp.lt.s32.totalorder %v9702_v59, 3  ;;  %v2230_v4 = vsel %vm2228_vm14, %v2218_v38, 2102212464 }
 0x1cb   :  { %vm8112_vm15 = vcmp.lt.s32.totalorder %v8111_v56, 0  ;;  %v2233_v62 = vsel %vm2225_vm11, %v2212_v53, %v2215_v6  ;;  %vm1566_vm1 = vcmp.lt.s32.totalorder %v9700_v26, 2  ;;  %v2234_v34 = vsel %vm2228_vm14, %v2221_v49, 920167782 }
 0x1cc   :  { %v1749_v45 = vsel %vm8112_vm15, 0, %v8111_v56  ;;  %v2237_v57 = vsel %vm2225_vm11, %v2215_v6, %v2218_v38  ;;  %v2238_v37 = vsel %vm2228_vm14, %v2224_v1, 1326507024  ;;  %vm1564_vm2 = vweird.f32 %v9360_v41 }
 0x1cd   :  { %v1750_v46 = vsub.s32 32, %v1749_v45  ;;  %v1754_v40 = vsub.s32 4294967266, %v1749_v45  ;;  %v2229_v63 = vsel %vm2225_vm11, %v2209_v13, %v2212_v53  ;;  %v2231_v2 = vsel %vm2227_vm0, %v2215_v6, %v2230_v4 }
 0x1ce   :  { %v1751_v51 = vshll.u32 %v9690_v17, %v1749_v45  ;;  %v2235_v32 = vsel %vm2227_vm0, %v2218_v38, %v2234_v34  ;;  %v2239_v35 = vsel %vm2227_vm0, %v2221_v49, %v2238_v37  ;;  %v8137_v39 = vadd.s32 4294967169, %v2403_v14 }
 0x1cf   :  { %v1752_v50 = vshrl.u32 %v1734_v36, %v1750_v46  ;;  %v1755_v15 = vadd.s32 127, %v1754_v40  ;;  %v2236_v25 = vsel %vm2226_vm12, %v2233_v62, %v2235_v32  ;;  %v2240_v53 = vsel %vm2226_vm12, %v2237_v57, %v2239_v35 }
 0x1d0   :  { %v8756_v58 = vpop.eup %8755  ;;  %v9755_v6 = vmul.u32.u64.low %v9708_v42, %v2240_v53  ;;  %v9756_v0 = vmul.u32.u64.high %v9708_v42, %v2240_v53, %v9755_v6  ;;  %v9759_v17 = vmul.u32.u64.low %v9708_v42, %v2236_v25  ;;  %v9760_v27 = vmul.u32.u64.high %v9708_v42, %v2236_v25, %v9759_v17 }
 0x1d1   :  { %v8758_v61 = vpop.eup %8757  ;;  %v1571_v56 = vxor.u32 2147483648, %v8756_v58  ;;  %v1753_v36 = vor.u32 %v1752_v50, %v1751_v51  ;;  %v1756_v13 = vshll.u32 %v1755_v15, 23  ;;  %v2232_v38 = vsel %vm2226_vm12, %v2229_v63, %v2231_v2 }
 0x1d2   :  { %v1568_v49 = vxor.u32 2147483648, %v8758_v61  ;;  %vm1570_vm3 = vcmp.eq.s32.totalorder %v9700_v26, 2  ;;  %v2399_v1 = vand.u32 2147483647, %v9694_v19  ;;  %v2409_v14 = vadd.s32 1, %v8137_v39 }
 0x1d3   :  { %vm1567_vm4 = vcmp.eq.s32.totalorder %v9700_v26, 0  ;;  %v1572_v4 = vsel %vm1570_vm3, %v1571_v56, %v8758_v61  ;;  %v1757_v62 = vor.u32 4788187, %v1756_v13  ;;  %v1765_v45 = vsel %vm1680_vm13, %v1764_v16, %v9682_v55 }
 0x1d4   :  { %v1569_v34 = vsel %vm1567_vm4, %v8756_v58, %v1568_v49  ;;  %v2248_v59 = vmul.u32 %v9708_v42, %v2232_v38  ;;  %vm2250_vm5 = vc.u32 %v9756_v0, %v9759_v17  ;;  %v2251_v57 = vadd.s32 1, %v9760_v27 }
 0x1d5   :  { %v1573_v37 = vsel %vm1566_vm1, %v1569_v34, %v1572_v4  ;;  %v1758_v46 = vand.u32 2147483647, %v1757_v62  ;;  %v1760_v40 = vcvt.s32.f32 %v1753_v36  ;;  %vm2410_vm6 = vcmp.gt.s32.totalorder %v2409_v14, 0 }
 0x1d6   :  { %v1574_v63 = vsel %vm1564_vm2, nan, %v1573_v37  ;;  %v2252_v2 = vsel %vm2250_vm5, %v2251_v57, %v9760_v27  ;;  %v2406_v55 = vand.u32 8388607, %v2399_v1  ;;  %v2411_v16 = vsel %vm2410_vm6, %v2409_v14, 0 }
 0x1d7   :  { %7962 = vst [vmem:[#allocation2 + $0x8] sm:$0xff] %v1574_v63  ;;  %v1761_v42 = vmul.f32 %v1760_v40, %v1758_v46  ;;  %v2253_v51 = vadd.s32 %v2252_v2, %v2248_v59  ;;  %v2413_v32 = vand.u32 31, %v2411_v16  ;;  %v14776_v35 = vand.u32 2147483647, %v9384_v3 }
 0x1d8   :  { %v9792_v41 = vadd.f32 %v9339_v28, %v9698_v47  ;;  %v2407_v53 = vor.u32 8388608, %v2406_v55  ;;  %v2412_v62 = vshrl.u32 %v2411_v16, 5  ;;  %vm2195_vm14 = vcmp.lt.s32.totalorder %v9617_v12, 0 }
 0x1d9   :  { %vm9786_vm7 = vcmp.le.f32.partialorder %v14776_v35, 0.7853982  ;;  %v1762_v39 = vxor.u32 2147483648, %v1761_v42  ;;  %v2254_v15 = vadd.s32 536870912, %v2253_v51  ;;  %v2414_v25 = vsub.s32 32, %v2413_v32 }
 0x1da   :  { %v1767_v50 = vsel %vm9786_vm7, 0, %v1765_v45  ;;  %v2416_v58 = vshll.u32 %v9028_v18, %v2413_v32  ;;  %v2419_v6 = vshll.u32 %v9029_v29, %v2413_v32  ;;  %v2422_v27 = vshll.u32 %v9030_v31, %v2413_v32 }
 0x1db   :  { %v1763_v61 = vsel %vm1680_vm13, %v1762_v39, %v1761_v42  ;;  %v9801_v56 = vshrl.u32 %v2254_v15, 30  ;;  %v2417_v47 = vshrl.u32 %v9029_v29, %v2414_v25  ;;  %v2425_v36 = vshll.u32 %v9031_v33, %v2413_v32 }
 0x1dc   :  { %v1766_v13 = vsel %vm9786_vm7, %v9384_v3, %v1763_v61  ;;  %v2420_v38 = vshrl.u32 %v9030_v31, %v2414_v25  ;;  %v2423_v49 = vshrl.u32 %v9031_v33, %v2414_v25  ;;  %v2426_v14 = vshrl.u32 %v9032_v43, %v2414_v25 }
 0x1dd   :  { %8759 = vcosq.f32 %v1766_v13  ;;  %v2256_v4 = vshll.u32 %v9801_v56, 30  ;;  %v2418_v45 = vor.u32 %v2417_v47, %v2416_v58  ;;  %v1771_v37 = vand.u32 3, %v1767_v50 }
 0x1de   :  { %8761 = vsinq.f32 %v1766_v13  ;;  %v2421_v34 = vor.u32 %v2420_v38, %v2419_v6  ;;  %v2424_v59 = vor.u32 %v2423_v49, %v2422_v27  ;;  %v2427_v57 = vor.u32 %v2426_v14, %v2425_v36 }
 0x1df   :  { %v9812_v46 = vsub.s32 %v2253_v51, %v2256_v4  ;;  %v2428_v40 = vshll.u32 %v9032_v43, %v2413_v32  ;;  %v2429_v63 = vshrl.u32 %v9033_v52, %v2414_v25  ;;  %v9816_v2 = vshll.u32 %v2407_v53, 8  ;;  %v9823_v53 = vpop.f32.mrb[6].mxu0 }
 0x1e0   :  { %v2296_v55 = vand.u32 2147483647, %v9792_v41  ;;  %v2299_v42 = vand.u32 2139095040, %v9792_v41  ;;  %vm2431_vm8 = vcmp.lt.s32.totalorder %v2412_v62, 1  ;;  %vm2434_vm9 = vcmp.lt.s32.totalorder %v2412_v62, 4 }
 0x1e1   :  { %v2259_v16 = vsub.s32 0, %v9812_v46  ;;  %v2430_v35 = vor.u32 %v2429_v63, %v2428_v40  ;;  %v2415_v26 = vshrl.u32 %v9028_v18, %v2414_v25  ;;  %v2436_v39 = vsel %vm2434_vm9, %v2424_v59, 2102212464 }
 0x1e2   :  { %v2439_v51 = vsel %vm2431_vm8, %v2418_v45, %v2421_v34  ;;  %v2440_v50 = vsel %vm2434_vm9, %v2427_v57, 920167782  ;;  %vm1772_vm10 = vcmp.lt.s32.totalorder %v1771_v37, 2  ;;  %vm2432_vm11 = vcmp.lt.s32.totalorder %v2412_v62, 2 }
 0x1e3   :  { %v8130_v32 = vmin.u32 %v2259_v16, %v9812_v46  ;;  %vm2433_vm12 = vcmp.lt.s32.totalorder %v2412_v62, 3  ;;  %v2443_v15 = vsel %vm2431_vm8, %v2421_v34, %v2424_v59  ;;  %vm1770_vm13 = vweird.f32 %v9384_v3 }
 0x1e4   :  { %v2435_v58 = vsel %vm2431_vm8, %v2415_v26, %v2418_v45  ;;  %v2441_v6 = vsel %vm2433_vm12, %v2424_v59, %v2440_v50  ;;  %v2444_v27 = vsel %vm2434_vm9, %v2430_v35, 1326507024  ;;  %v2300_v61 = vshrl.u32 %v2299_v42, 23 }
 0x1e5   :  { %v2261_v25 = vclz %v8130_v32  ;;  %v2437_v47 = vsel %vm2433_vm12, %v2421_v34, %v2436_v39  ;;  %v2442_v36 = vsel %vm2432_vm11, %v2439_v51, %v2441_v6  ;;  %v2445_v13 = vsel %vm2433_vm12, %v2427_v57, %v2444_v27 }
 0x1e6   :  { %vm1773_vm15 = vcmp.eq.s32.totalorder %v1771_v37, 0  ;;  %v2446_v38 = vsel %vm2432_vm11, %v2443_v15, %v2445_v13  ;;  %v9830_v49 = vmul.u32.u64.low %v9816_v2, %v2442_v36  ;;  %v9831_v14 = vmul.u32.u64.high %v9816_v2, %v2442_v36, %v9830_v49 }
 0x1e7   :  { %v8760_v4 = vpop.eup %8759  ;;  %v8131_v45 = vadd.s32 4294967294, %v2261_v25  ;;  %v9835_v59 = vmul.u32.u64.low %v9816_v2, %v2446_v38  ;;  %v9836_v40 = vmul.u32.u64.high %v9816_v2, %v2446_v38, %v9835_v59  ;;  %v8133_v63 = vadd.s32 4294967169, %v2300_v61 }
 0x1e8   :  { %v8762_v42 = vpop.eup %8761  ;;  %vm1776_vm0 = vcmp.eq.s32.totalorder %v1771_v37, 2  ;;  %v1777_v34 = vxor.u32 2147483648, %v8760_v4  ;;  %v2249_v57 = vadd.s32 %v9759_v17, %v9756_v0  ;;  %v2438_v16 = vsel %vm2432_vm11, %v2435_v58, %v2437_v47 }
 0x1e9   :  { %v1774_v35 = vxor.u32 2147483648, %v8762_v42  ;;  %vm8132_vm1 = vcmp.lt.s32.totalorder %v8131_v45, 0  ;;  %v2303_v26 = vand.u32 8388607, %v2296_v55  ;;  %v2306_v39 = vadd.s32 1, %v8133_v63 }
 0x1ea   :  { %v1778_v51 = vsel %vm1776_vm0, %v1777_v34, %v8762_v42  ;;  %v2264_v50 = vsel %vm8132_vm1, 0, %v8131_v45  ;;  %v2279_v32 = vsub.s32 4, %v9801_v56  ;;  %v2457_v15 = vadd.s32 1, %v9831_v14 }
 0x1eb   :  { %v1775_v6 = vsel %vm1773_vm15, %v8760_v4, %v1774_v35  ;;  %v2265_v27 = vsub.s32 32, %v2264_v50  ;;  %v2269_v61 = vsub.s32 4294967266, %v2264_v50  ;;  %v2454_v0 = vmul.u32 %v9816_v2, %v2438_v16 }
 0x1ec   :  { %v1779_v17 = vsel %vm1772_vm10, %v1775_v6, %v1778_v51  ;;  %v2266_v62 = vshll.u32 %v9812_v46, %v2264_v50  ;;  %vm2456_vm2 = vc.u32 %v9836_v40, %v9830_v49  ;;  %vm2307_vm3 = vcmp.gt.s32.totalorder %v2306_v39, 0 }
 0x1ed   :  { %v1780_v58 = vsel %vm1770_vm13, nan, %v1779_v17  ;;  %v2267_v25 = vshrl.u32 %v2249_v57, %v2265_v27  ;;  %v2270_v47 = vadd.s32 127, %v2269_v61  ;;  %v2458_v36 = vsel %vm2456_vm2, %v2457_v15, %v9831_v14 }
 0x1ee   :  { %7964 = vst [vmem:[#allocation2 + $0x18] sm:$0xff] %v1780_v58  ;;  %v2280_v2 = vsel %vm2195_vm14, %v2279_v32, %v9801_v56  ;;  %v2459_v37 = vadd.s32 %v2458_v36, %v2454_v0  ;;  %v2308_v13 = vsel %vm2307_vm3, %v2306_v39, 0  ;;  %v1180_v46 = vmul.f32 %v9369_v48, %v9376_v54 }
 0x1ef   :  { %v2268_v38 = vor.u32 %v2267_v25, %v2266_v62  ;;  %v2271_v4 = vshll.u32 %v2270_v47, 23  ;;  %v2310_v45 = vand.u32 31, %v2308_v13  ;;  %vm9861_vm4 = vcmp.le.f32.partialorder %v2193_v30, 0.7853982 }
 0x1f0   :  { %v2460_v14 = vadd.s32 536870912, %v2459_v37  ;;  %v2282_v63 = vsel %vm9861_vm4, 0, %v2280_v2  ;;  %v2304_v57 = vor.u32 8388608, %v2303_v26  ;;  %v9870_v54 = vadd.f32 %v9380_v60, %v1180_v46 }
 0x1f1   :  { %v2272_v59 = vor.u32 4788187, %v2271_v4  ;;  %v2311_v56 = vsub.s32 32, %v2310_v45  ;;  %v2275_v42 = vcvt.s32.f32 %v2268_v38  ;;  %v2313_v35 = vshll.u32 %v9028_v18, %v2310_v45 }
 0x1f2   :  { %v9867_v34 = vshrl.u32 %v2460_v14, 30  ;;  %v2316_v50 = vshll.u32 %v9029_v29, %v2310_v45  ;;  %v9879_v26 = vand.u32 3, %v2282_v63  ;;  %v2309_v27 = vshrl.u32 %v2308_v13, 5 }
 0x1f3   :  { %v2273_v16 = vand.u32 2147483647, %v2272_v59  ;;  %v2314_v30 = vshrl.u32 %v9029_v29, %v2311_v56  ;;  %v2317_v39 = vshrl.u32 %v9030_v31, %v2311_v56  ;;  %v2320_v32 = vshrl.u32 %v9031_v33, %v2311_v56 }
 0x1f4   :  { %v2462_v51 = vshll.u32 %v9867_v34, 30  ;;  %v2323_v15 = vshrl.u32 %v9032_v43, %v2311_v56  ;;  %v2319_v61 = vshll.u32 %v9030_v31, %v2310_v45  ;;  %v2322_v58 = vshll.u32 %v9031_v33, %v2310_v45 }
 0x1f5   :  { %v2276_v6 = vmul.f32 %v2275_v42, %v2273_v16  ;;  %v2315_v17 = vor.u32 %v2314_v30, %v2313_v35  ;;  %v2318_v62 = vor.u32 %v2317_v39, %v2316_v50  ;;  %v2325_v36 = vshll.u32 %v9032_v43, %v2310_v45  ;;  %v9901_v30 = vpop.f32.mrb[6].mxu1 }
 0x1f6   :  { %v9882_v0 = vsub.s32 %v2459_v37, %v2462_v51  ;;  %v2321_v47 = vor.u32 %v2320_v32, %v2319_v61  ;;  %v2326_v2 = vshrl.u32 %v9033_v52, %v2311_v56  ;;  %v2324_v38 = vor.u32 %v2323_v15, %v2322_v58 }
 0x1f7   :  { %v2277_v25 = vxor.u32 2147483648, %v2276_v6  ;;  %v9888_v4 = vshll.u32 %v2304_v57, 8  ;;  %v2505_v13 = vand.u32 2139095040, %v9870_v54  ;;  %v2312_v14 = vshrl.u32 %v9028_v18, %v2311_v56 }
 0x1f8   :  { %v2465_v46 = vsub.s32 0, %v9882_v0  ;;  %v2327_v59 = vor.u32 %v2326_v2, %v2325_v36  ;;  %vm2328_vm5 = vcmp.lt.s32.totalorder %v2309_v27, 1  ;;  %vm2329_vm6 = vcmp.lt.s32.totalorder %v2309_v27, 2 }
 0x1f9   :  { %v2278_v37 = vsel %vm2195_vm14, %v2277_v25, %v2276_v6  ;;  %vm2331_vm7 = vcmp.lt.s32.totalorder %v2309_v27, 4  ;;  %vm2330_vm8 = vcmp.lt.s32.totalorder %v2309_v27, 3  ;;  %v2336_v57 = vsel %vm2328_vm5, %v2315_v17, %v2318_v62 }
 0x1fa   :  { %v2281_v45 = vsel %vm9861_vm4, %v9617_v12, %v2278_v37  ;;  %v8138_v63 = vmin.u32 %v2465_v46, %v9882_v0  ;;  %v2333_v42 = vsel %vm2331_vm7, %v2321_v47, 2102212464  ;;  %vm2401_vm9 = vcmp.lt.s32.totalorder %v9694_v19, 0 }
 0x1fb   :  { %8763 = vcosq.f32 %v2281_v45  ;;  %v2332_v56 = vsel %vm2328_vm5, %v2312_v14, %v2315_v17  ;;  %v2337_v35 = vsel %vm2331_vm7, %v2324_v38, 920167782  ;;  %v2334_v3 = vsel %vm2330_vm8, %v2318_v62, %v2333_v42 }
 0x1fc   :  { %8765 = vsinq.f32 %v2281_v45  ;;  %v2467_v16 = vclz %v8138_v63  ;;  %v2338_v39 = vsel %vm2330_vm8, %v2321_v47, %v2337_v35  ;;  %v2340_v51 = vsel %vm2328_vm5, %v2318_v62, %v2321_v47 }
 0x1fd   :  { %v2341_v50 = vsel %vm2331_vm7, %v2327_v59, 1326507024  ;;  %v2339_v15 = vsel %vm2329_vm6, %v2336_v57, %v2338_v39  ;;  %v2502_v61 = vand.u32 2147483647, %v9870_v54  ;;  %v2506_v17 = vshrl.u32 %v2505_v13, 23 }
 0x1fe   :  { %v8139_v32 = vadd.s32 4294967294, %v2467_v16  ;;  %v2342_v6 = vsel %vm2330_vm8, %v2324_v38, %v2341_v50  ;;  %v9908_v25 = vmul.u32.u64.low %v9888_v4, %v2339_v15  ;;  %v9909_v36 = vmul.u32.u64.high %v9888_v4, %v2339_v15, %v9908_v25 }
 0x1ff   :  { %v2343_v58 = vsel %vm2329_vm6, %v2340_v51, %v2342_v6  ;;  %vm9914_vm10 = vcmp.le.f32.partialorder %v2399_v1, 0.7853982  ;;  %v2335_v62 = vsel %vm2329_vm6, %v2332_v56, %v2334_v3  ;;  %v2485_v37 = vsub.s32 4, %v9867_v34 }
 0x200   :  { %vm8140_vm11 = vcmp.lt.s32.totalorder %v8139_v32, 0  ;;  %v9920_v47 = vmul.u32.u64.low %v9888_v4, %v2343_v58  ;;  %v9921_v46 = vmul.u32.u64.high %v9888_v4, %v2343_v58, %v9920_v47  ;;  %v8141_v14 = vadd.s32 4294967169, %v2506_v17 }
 0x201   :  { %v2470_v38 = vsel %vm8140_vm11, 0, %v8139_v32  ;;  %v1185_v13 = vmul.f32 %v9323_v20, %v9467_v7  ;;  %vm2285_vm12 = vweird.f32 %v9617_v12  ;;  %vm2287_vm13 = vcmp.lt.s32.totalorder %v9879_v26, 2 }
 0x202   :  { %v2455_v1 = vadd.s32 %v9830_v49, %v9836_v40  ;;  %v2471_v27 = vsub.s32 32, %v2470_v38  ;;  %v2475_v59 = vsub.s32 4294967266, %v2470_v38  ;;  %v2351_v45 = vmul.u32 %v9888_v4, %v2335_v62 }
 0x203   :  { %v2354_v63 = vadd.s32 1, %v9909_v36  ;;  %v2509_v42 = vand.u32 8388607, %v2502_v61  ;;  %v2512_v57 = vadd.s32 1, %v8141_v14  ;;  %v2472_v16 = vshll.u32 %v9882_v0, %v2470_v38 }
 0x204   :  { %v2473_v7 = vshrl.u32 %v2455_v1, %v2471_v27  ;;  %v2476_v56 = vadd.s32 127, %v2475_v59  ;;  %vm2353_vm14 = vc.u32 %v9921_v46, %v9908_v25  ;;  %v2486_v49 = vsel %vm2401_vm9, %v2485_v37, %v9867_v34 }
 0x205   :  { %v8764_v35 = vpop.eup %8763  ;;  %v2355_v40 = vsel %vm2353_vm14, %v2354_v63, %v9909_v36  ;;  %vm2513_vm15 = vcmp.gt.s32.totalorder %v2512_v57, 0  ;;  %v9942_v4 = vadd.f32 %v9332_v23, %v1185_v13  ;;  %vm2288_vm0 = vcmp.eq.s32.totalorder %v9879_v26, 0 }
 0x206   :  { %v8766_v3 = vpop.eup %8765  ;;  %v2292_v39 = vxor.u32 2147483648, %v8764_v35  ;;  %v2474_v51 = vor.u32 %v2473_v7, %v2472_v16  ;;  %v2477_v0 = vshll.u32 %v2476_v56, 23  ;;  %v2356_v50 = vadd.s32 %v2355_v40, %v2351_v45 }
 0x207   :  { %v2289_v32 = vxor.u32 2147483648, %v8766_v3  ;;  %vm2291_vm1 = vcmp.eq.s32.totalorder %v9879_v26, 2  ;;  %v2514_v15 = vsel %vm2513_vm15, %v2512_v57, 0  ;;  %v2510_v17 = vor.u32 8388608, %v2509_v42 }
 0x208   :  { %v2293_v6 = vsel %vm2291_vm1, %v2292_v39, %v8766_v3  ;;  %v2478_v58 = vor.u32 4788187, %v2477_v0  ;;  %v2357_v34 = vadd.s32 536870912, %v2356_v50  ;;  %v2488_v62 = vsel %vm9914_vm10, 0, %v2486_v49 }
 0x209   :  { %v2290_v36 = vsel %vm2288_vm0, %v8764_v35, %v2289_v32  ;;  %v2516_v47 = vand.u32 31, %v2514_v15  ;;  %v3020_v38 = vand.u32 2139095040, %v9942_v4  ;;  %v2481_v13 = vcvt.s32.f32 %v2474_v51 }
 0x20a   :  { %v2294_v37 = vsel %vm2287_vm13, %v2290_v36, %v2293_v6  ;;  %v2479_v14 = vand.u32 2147483647, %v2478_v58  ;;  %v9951_v1 = vshrl.u32 %v2357_v34, 30  ;;  %v9955_v63 = vand.u32 3, %v2488_v62 }
 0x20b   :  { %v2295_v27 = vsel %vm2285_vm12, nan, %v2294_v37  ;;  %v2517_v59 = vsub.s32 32, %v2516_v47  ;;  %v9958_v57 = vshll.u32 %v2510_v17, 8  ;;  %v2519_v16 = vshll.u32 %v9028_v18, %v2516_v47 }
 0x20c   :  { %7969 = vst [vmem:[#allocation2 + $0x40] sm:$0xff] %v2295_v27  ;;  %v2482_v45 = vmul.f32 %v2481_v13, %v2479_v14  ;;  %v2359_v42 = vshll.u32 %v9951_v1, 30  ;;  %v2522_v49 = vshll.u32 %v9029_v29, %v2516_v47  ;;  %v3021_v40 = vshrl.u32 %v3020_v38, 23 }
 0x20d   :  { %v2520_v26 = vshrl.u32 %v9029_v29, %v2517_v59  ;;  %v2523_v7 = vshrl.u32 %v9030_v31, %v2517_v59  ;;  %v2526_v56 = vshrl.u32 %v9031_v33, %v2517_v59  ;;  %v2515_v3 = vshrl.u32 %v2514_v15, 5 }
 0x20e   :  { %v2483_v35 = vxor.u32 2147483648, %v2482_v45  ;;  %v9964_v12 = vsub.s32 %v2356_v50, %v2359_v42  ;;  %v2525_v51 = vshll.u32 %v9030_v31, %v2516_v47  ;;  %v2528_v0 = vshll.u32 %v9031_v33, %v2516_v47 }
 0x20f   :  { %v2521_v39 = vor.u32 %v2520_v26, %v2519_v16  ;;  %v2524_v58 = vor.u32 %v2523_v7, %v2522_v49  ;;  %v2529_v34 = vshrl.u32 %v9032_v43, %v2517_v59  ;;  %v2531_v15 = vshll.u32 %v9032_v43, %v2516_v47 }
 0x210   :  { %v2484_v32 = vsel %vm2401_vm9, %v2483_v35, %v2482_v45  ;;  %v2362_v6 = vsub.s32 0, %v9964_v12  ;;  %v2527_v17 = vor.u32 %v2526_v56, %v2525_v51  ;;  %v2532_v36 = vshrl.u32 %v9033_v52, %v2517_v59 }
 0x211   :  { %v2487_v50 = vsel %vm9914_vm10, %v9694_v19, %v2484_v32  ;;  %v3017_v38 = vand.u32 2147483647, %v9942_v4  ;;  %v8161_v37 = vadd.s32 4294967169, %v3021_v40  ;;  %v2518_v14 = vshrl.u32 %v9028_v18, %v2517_v59 }
 0x212   :  { %8767 = vcosq.f32 %v2487_v50  ;;  %v8134_v62 = vmin.u32 %v2362_v6, %v9964_v12  ;;  %v2530_v13 = vor.u32 %v2529_v34, %v2528_v0  ;;  %v2533_v27 = vor.u32 %v2532_v36, %v2531_v15  ;;  %v9997_v34 = vpop.f32.mrb[7].mxu0 }
 0x213   :  { %8769 = vsinq.f32 %v2487_v50  ;;  %vm2298_vm2 = vcmp.lt.s32.totalorder %v9792_v41, 0  ;;  %vm2534_vm3 = vcmp.lt.s32.totalorder %v2515_v3, 1  ;;  %vm2535_vm4 = vcmp.lt.s32.totalorder %v2515_v3, 2 }
 0x214   :  { %v2364_v2 = vclz %v8134_v62  ;;  %vm2537_vm5 = vcmp.lt.s32.totalorder %v2515_v3, 4  ;;  %vm2536_vm6 = vcmp.lt.s32.totalorder %v2515_v3, 3  ;;  %v2542_v45 = vsel %vm2534_vm3, %v2521_v39, %v2524_v58 }
 0x215   :  { %v2539_v47 = vsel %vm2537_vm5, %v2527_v17, 2102212464  ;;  %v2543_v42 = vsel %vm2537_vm5, %v2530_v13, 920167782  ;;  %vm2497_vm7 = vcmp.eq.s32.totalorder %v9955_v63, 2  ;;  %v2538_v26 = vsel %vm2534_vm3, %v2518_v14, %v2521_v39 }
 0x216   :  { %v8135_v16 = vadd.s32 4294967294, %v2364_v2  ;;  %v2544_v7 = vsel %vm2536_vm6, %v2527_v17, %v2543_v42  ;;  %v2546_v56 = vsel %vm2534_vm3, %v2524_v58, %v2527_v17  ;;  %vm2494_vm8 = vcmp.eq.s32.totalorder %v9955_v63, 0 }
 0x217   :  { %v2540_v59 = vsel %vm2536_vm6, %v2524_v58, %v2539_v47  ;;  %v2545_v35 = vsel %vm2535_vm4, %v2542_v45, %v2544_v7  ;;  %v2547_v49 = vsel %vm2537_vm5, %v2533_v27, 1326507024  ;;  %v3027_v40 = vadd.s32 1, %v8161_v37 }
 0x218   :  { %vm2493_vm9 = vcmp.lt.s32.totalorder %v9955_v63, 2  ;;  %vm8136_vm10 = vcmp.lt.s32.totalorder %v8135_v16, 0  ;;  %v2548_v51 = vsel %vm2536_vm6, %v2530_v13, %v2547_v49  ;;  %vm2491_vm11 = vweird.f32 %v9694_v19 }
 0x219   :  { %v9990_v0 = vmul.u32.u64.low %v9958_v57, %v2545_v35  ;;  %v9991_v32 = vmul.u32.u64.high %v9958_v57, %v2545_v35, %v9990_v0  ;;  %v2367_v39 = vsel %vm8136_vm10, 0, %v8135_v16  ;;  %v2382_v6 = vsub.s32 4, %v9951_v1 }
 0x21a   :  { %v2549_v58 = vsel %vm2535_vm4, %v2546_v56, %v2548_v51  ;;  %vm3028_vm12 = vcmp.gt.s32.totalorder %v3027_v40, 0  ;;  %v2352_v50 = vadd.s32 %v9908_v25, %v9921_v46  ;;  %v2368_v17 = vsub.s32 32, %v2367_v39 }
 0x21b   :  { %v2372_v15 = vsub.s32 4294967266, %v2367_v39  ;;  %v3029_v36 = vsel %vm3028_vm12, %v3027_v40, 0  ;;  %v2541_v62 = vsel %vm2535_vm4, %v2538_v26, %v2540_v59  ;;  %v2369_v2 = vshll.u32 %v9964_v12, %v2367_v39 }
 0x21c   :  { %v10003_v37 = vmul.u32.u64.low %v9958_v57, %v2549_v58  ;;  %v10004_v14 = vmul.u32.u64.high %v9958_v57, %v2549_v58, %v10003_v37  ;;  %v3031_v13 = vand.u32 31, %v3029_v36  ;;  %v8768_v27 = vpop.eup %8767  ;;  %v2370_v47 = vshrl.u32 %v2352_v50, %v2368_v17 }
 0x21d   :  { %v2373_v45 = vadd.s32 127, %v2372_v15  ;;  %v2560_v42 = vadd.s32 1, %v9991_v32  ;;  %v8770_v16 = vpop.eup %8769  ;;  %v2498_v7 = vxor.u32 2147483648, %v8768_v27  ;;  %v10011_v25 = vsel %vm2298_vm2, %v2382_v6, %v9951_v1 }
 0x21e   :  { %v3024_v46 = vand.u32 8388607, %v3017_v38  ;;  %v3032_v3 = vsub.s32 32, %v3031_v13  ;;  %v2495_v26 = vxor.u32 2147483648, %v8770_v16  ;;  %v2371_v56 = vor.u32 %v2370_v47, %v2369_v2 }
 0x21f   :  { %v2374_v59 = vshll.u32 %v2373_v45, 23  ;;  %v2557_v12 = vmul.u32 %v9958_v57, %v2541_v62  ;;  %v2499_v35 = vsel %vm2497_vm7, %v2498_v7, %v8770_v16  ;;  %vm2559_vm13 = vc.u32 %v10004_v14, %v9990_v0 }
 0x220   :  { %v10020_v49 = vshrl.u32 %v3029_v36, 5  ;;  %v3034_v1 = vshll.u32 %v9028_v18, %v3031_v13  ;;  %v2496_v40 = vsel %vm2494_vm8, %v8768_v27, %v2495_v26  ;;  %v2561_v39 = vsel %vm2559_vm13, %v2560_v42, %v9991_v32 }
 0x221   :  { %v2375_v51 = vor.u32 4788187, %v2374_v59  ;;  %v3037_v6 = vshll.u32 %v9029_v29, %v3031_v13  ;;  %v2500_v57 = vsel %vm2493_vm9, %v2496_v40, %v2499_v35  ;;  %v2562_v58 = vadd.s32 %v2561_v39, %v2557_v12 }
 0x222   :  { %v3035_v50 = vshrl.u32 %v9029_v29, %v3032_v3  ;;  %v3038_v17 = vshrl.u32 %v9030_v31, %v3032_v3  ;;  %v2501_v15 = vsel %vm2491_vm11, nan, %v2500_v57  ;;  %v2378_v62 = vcvt.s32.f32 %v2371_v56 }
 0x223   :  { %v2376_v36 = vand.u32 2147483647, %v2375_v51  ;;  %v3041_v37 = vshrl.u32 %v9031_v33, %v3032_v3  ;;  %7971 = vst [vmem:[#allocation2 + $0x50] sm:$0xff] %v2501_v15  ;;  %v2563_v27 = vadd.s32 536870912, %v2562_v58  ;;  %v3040_v32 = vshll.u32 %v9030_v31, %v3031_v13 }
 0x224   :  { %v3043_v2 = vshll.u32 %v9031_v33, %v3031_v13  ;;  %v3044_v63 = vshrl.u32 %v9032_v43, %v3032_v3  ;;  %v3036_v45 = vor.u32 %v3035_v50, %v3034_v1  ;;  %v3039_v42 = vor.u32 %v3038_v17, %v3037_v6 }
 0x225   :  { %v2379_v47 = vmul.f32 %v2378_v62, %v2376_v36  ;;  %v3047_v16 = vshrl.u32 %v9033_v52, %v3032_v3  ;;  %vm10040_vm14 = vcmp.le.f32.partialorder %v2296_v55, 0.7853982  ;;  %v2564_v7 = vshrl.u32 %v2563_v27, 30 }
 0x226   :  { %v3025_v26 = vor.u32 8388608, %v3024_v46  ;;  %v3045_v56 = vor.u32 %v3044_v63, %v3043_v2  ;;  %v3042_v12 = vor.u32 %v3041_v37, %v3040_v32  ;;  %v3046_v35 = vshll.u32 %v9032_v43, %v3031_v13 }
 0x227   :  { %v2380_v59 = vxor.u32 2147483648, %v2379_v47  ;;  %v1187_v40 = vmul.f32 %v9326_v21, %v9589_v10  ;;  %v2385_v1 = vsel %vm10040_vm14, 0, %v10011_v25  ;;  %v2565_v51 = vshll.u32 %v2564_v7, 30 }
 0x228   :  { %vm3049_vm15 = vcmp.lt.s32.totalorder %v10020_v49, 1  ;;  %vm3052_vm0 = vcmp.lt.s32.totalorder %v10020_v49, 4  ;;  %v3048_v46 = vor.u32 %v3047_v16, %v3046_v35  ;;  %vm3051_vm1 = vcmp.lt.s32.totalorder %v10020_v49, 3 }
 0x229   :  { %v2381_v55 = vsel %vm2298_vm2, %v2380_v59, %v2379_v47  ;;  %v3057_v39 = vsel %vm3049_vm15, %v3036_v45, %v3039_v42  ;;  %v3058_v13 = vsel %vm3052_vm0, %v3045_v56, 920167782  ;;  %v10061_v25 = vsub.s32 %v2562_v58, %v2565_v51 }
 0x22a   :  { %v2384_v10 = vsel %vm10040_vm14, %v9792_v41, %v2381_v55  ;;  %v3065_v6 = vshll.u32 %v3025_v26, 8  ;;  %v3033_v57 = vshrl.u32 %v9028_v18, %v3032_v3  ;;  %vm3050_vm2 = vcmp.lt.s32.totalorder %v10020_v49, 2 }
 0x22b   :  { %8771 = vcosq.f32 %v2384_v10  ;;  %v3059_v50 = vsel %vm3051_vm1, %v3042_v12, %v3058_v13  ;;  %v2568_v17 = vsub.s32 0, %v10061_v25  ;;  %v3054_v15 = vsel %vm3052_vm0, %v3042_v12, 2102212464 }
 0x22c   :  { %8773 = vsinq.f32 %v2384_v10  ;;  %v3060_v58 = vsel %vm3050_vm2, %v3057_v39, %v3059_v50  ;;  %v3061_v36 = vsel %vm3049_vm15, %v3039_v42, %v3042_v12  ;;  %v3062_v3 = vsel %vm3052_vm0, %v3048_v46, 1326507024  ;;  %v10093_v12 = vpop.f32.mrb[7].mxu1 }
 0x22d   :  { %v10077_v62 = vmul.u32.u64.low %v3065_v6, %v3060_v58  ;;  %v10078_v37 = vmul.u32.u64.high %v3065_v6, %v3060_v58, %v10077_v62  ;;  %v2389_v27 = vand.u32 3, %v2385_v1  ;;  %v8142_v32 = vmin.u32 %v2568_v17, %v10061_v25 }
 0x22e   :  { %v3053_v2 = vsel %vm3049_vm15, %v3033_v57, %v3036_v45  ;;  %v3055_v63 = vsel %vm3051_vm1, %v3039_v42, %v3054_v15  ;;  %v3063_v47 = vsel %vm3051_vm1, %v3045_v56, %v3062_v3  ;;  %v10089_v16 = vadd.f32 %v9335_v24, %v1187_v40 }
 0x22f   :  { %v2570_v19 = vclz %v8142_v32  ;;  %v2588_v26 = vsub.s32 4, %v2564_v7  ;;  %v3064_v59 = vsel %vm3050_vm2, %v3061_v36, %v3063_v47  ;;  %vm2388_vm3 = vweird.f32 %v9792_v41 }
 0x230   :  { %v10095_v35 = vmul.u32.u64.low %v3065_v6, %v3064_v59  ;;  %v10096_v1 = vmul.u32.u64.high %v3065_v6, %v3064_v59, %v10095_v35  ;;  %v3056_v42 = vsel %vm3050_vm2, %v3053_v2, %v3055_v63  ;;  %v3223_v56 = vand.u32 2147483647, %v10089_v16 }
 0x231   :  { %v8143_v45 = vadd.s32 4294967294, %v2570_v19  ;;  %v3226_v40 = vand.u32 2139095040, %v10089_v16  ;;  %vm2391_vm4 = vcmp.eq.s32.totalorder %v2389_v27, 0  ;;  %vm2394_vm5 = vcmp.eq.s32.totalorder %v2389_v27, 2 }
 0x232   :  { %vm2504_vm6 = vcmp.lt.s32.totalorder %v9870_v54, 0  ;;  %v3075_v51 = vadd.s32 1, %v10078_v37  ;;  %v2558_v55 = vadd.s32 %v9990_v0, %v10004_v14  ;;  %v3072_v10 = vmul.u32 %v3065_v6, %v3056_v42 }
 0x233   :  { %vm8144_vm7 = vcmp.lt.s32.totalorder %v8143_v45, 0  ;;  %v2589_v46 = vsel %vm2504_vm6, %v2588_v26, %v2564_v7  ;;  %v3227_v39 = vshrl.u32 %v3226_v40, 23  ;;  %vm3074_vm8 = vc.u32 %v10096_v1, %v10077_v62 }
 0x234   :  { %v2573_v13 = vsel %vm8144_vm7, 0, %v8143_v45  ;;  %v1186_v57 = vmul.f32 %v9329_v22, %v9660_v9  ;;  %v3230_v0 = vand.u32 8388607, %v3223_v56  ;;  %v3076_v36 = vsel %vm3074_vm8, %v3075_v51, %v10078_v37 }
 0x235   :  { %v8772_v49 = vpop.eup %8771  ;;  %v2574_v15 = vsub.s32 32, %v2573_v13  ;;  %v2578_v58 = vsub.s32 4294967266, %v2573_v13  ;;  %v2575_v7 = vshll.u32 %v10061_v25, %v2573_v13  ;;  %v8169_v3 = vadd.s32 4294967169, %v3227_v39 }
 0x236   :  { %v8774_v50 = vpop.eup %8773  ;;  %v2395_v17 = vxor.u32 2147483648, %v8772_v49  ;;  %v3077_v63 = vadd.s32 %v3076_v36, %v3072_v10  ;;  %vm2390_vm9 = vcmp.lt.s32.totalorder %v2389_v27, 2  ;;  %vm10121_vm10 = vcmp.le.f32.partialorder %v2502_v61, 0.7853982 }
 0x237   :  { %v2392_v14 = vxor.u32 2147483648, %v8774_v50  ;;  %v2576_v32 = vshrl.u32 %v2558_v55, %v2574_v15  ;;  %v2579_v2 = vadd.s32 127, %v2578_v58  ;;  %v3233_v19 = vadd.s32 1, %v8169_v3 }
 0x238   :  { %v2396_v6 = vsel %vm2394_vm5, %v2395_v17, %v8774_v50  ;;  %v3078_v37 = vadd.s32 536870912, %v3077_v63  ;;  %v2591_v45 = vsel %vm10121_vm10, 0, %v2589_v46  ;;  %v10130_v27 = vadd.f32 %v9339_v28, %v1186_v57 }
 0x239   :  { %v2393_v9 = vsel %vm2391_vm4, %v8772_v49, %v2392_v14  ;;  %v2577_v25 = vor.u32 %v2576_v32, %v2575_v7  ;;  %v2580_v59 = vshll.u32 %v2579_v2, 23  ;;  %vm3234_vm11 = vcmp.gt.s32.totalorder %v3233_v19, 0 }
 0x23a   :  { %v2397_v26 = vsel %vm2390_vm9, %v2393_v9, %v2396_v6  ;;  %v10132_v42 = vshrl.u32 %v3078_v37, 30  ;;  %v3231_v40 = vor.u32 8388608, %v3230_v0  ;;  %v3235_v51 = vsel %vm3234_vm11, %v3233_v19, 0 }
 0x23b   :  { %v2398_v35 = vsel %vm2388_vm3, nan, %v2397_v26  ;;  %v2581_v61 = vor.u32 4788187, %v2580_v59  ;;  %v3237_v55 = vand.u32 31, %v3235_v51  ;;  %v2584_v49 = vcvt.s32.f32 %v2577_v25 }
 0x23c   :  { %7970 = vst [vmem:[#allocation2 + $0x48] sm:$0xff] %v2398_v35  ;;  %v3080_v13 = vshll.u32 %v10132_v42, 30  ;;  %v10135_v41 = vand.u32 3, %v2591_v45  ;;  %v3073_v46 = vadd.s32 %v10077_v62, %v10096_v1  ;;  %v10141_v57 = vmul.f32 %v9369_v48, %v9738_v44 }
 0x23d   :  { %v2582_v39 = vand.u32 2147483647, %v2581_v61  ;;  %v3238_v10 = vsub.s32 32, %v3237_v55  ;;  %v10145_v15 = vshll.u32 %v3231_v40, 8  ;;  %v3123_v58 = vand.u32 2139095040, %v10130_v27 }
 0x23e   :  { %v10143_v17 = vsub.s32 %v3077_v63, %v3080_v13  ;;  %v3236_v0 = vshrl.u32 %v3235_v51, 5  ;;  %v3120_v36 = vand.u32 2147483647, %v10130_v27  ;;  %v3240_v44 = vshll.u32 %v9028_v18, %v3237_v55 }
 0x23f   :  { %v2585_v50 = vmul.f32 %v2584_v49, %v2582_v39  ;;  %v3241_v14 = vshrl.u32 %v9029_v29, %v3238_v10  ;;  %v3244_v7 = vshrl.u32 %v9030_v31, %v3238_v10  ;;  %v3247_v3 = vshrl.u32 %v9031_v33, %v3238_v10 }
 0x240   :  { %v3083_v1 = vsub.s32 0, %v10143_v17  ;;  %v3243_v6 = vshll.u32 %v9029_v29, %v3237_v55  ;;  %v3246_v32 = vshll.u32 %v9030_v31, %v3237_v55  ;;  %v3249_v2 = vshll.u32 %v9031_v33, %v3237_v55 }
 0x241   :  { %v2586_v62 = vxor.u32 2147483648, %v2585_v50  ;;  %v3250_v63 = vshrl.u32 %v9032_v43, %v3238_v10  ;;  %v3242_v26 = vor.u32 %v3241_v14, %v3240_v44  ;;  %v3124_v25 = vshrl.u32 %v3123_v58, 23 }
 0x242   :  { %v8162_v19 = vmin.u32 %v3083_v1, %v10143_v17  ;;  %v3245_v37 = vor.u32 %v3244_v7, %v3243_v6  ;;  %v3248_v35 = vor.u32 %v3247_v3, %v3246_v32  ;;  %v3252_v40 = vshll.u32 %v9032_v43, %v3237_v55  ;;  %v10178_v32 = vpop.f32.mrb[8].mxu0 }
 0x243   :  { %v2587_v9 = vsel %vm2504_vm6, %v2586_v62, %v2585_v50  ;;  %v3251_v45 = vor.u32 %v3250_v63, %v3249_v2  ;;  %v3253_v51 = vshrl.u32 %v9033_v52, %v3238_v10  ;;  %vm3019_vm12 = vcmp.lt.s32.totalorder %v9942_v4, 0 }
 0x244   :  { %v2590_v59 = vsel %vm10121_vm10, %v9870_v54, %v2587_v9  ;;  %v3085_v61 = vclz %v8162_v19  ;;  %v3103_v39 = vsub.s32 4, %v10132_v42  ;;  %v3239_v49 = vshrl.u32 %v9028_v18, %v3238_v10 }
 0x245   :  { %8775 = vcosq.f32 %v2590_v59  ;;  %vm3255_vm13 = vcmp.lt.s32.totalorder %v3236_v0, 1  ;;  %v3254_v47 = vor.u32 %v3253_v51, %v3252_v40  ;;  %vm3257_vm14 = vcmp.lt.s32.totalorder %v3236_v0, 3 }
 0x246   :  { %8777 = vsinq.f32 %v2590_v59  ;;  %v8163_v13 = vadd.s32 4294967294, %v3085_v61  ;;  %vm3258_vm15 = vcmp.lt.s32.totalorder %v3236_v0, 4  ;;  %v3263_v58 = vsel %vm3255_vm13, %v3242_v26, %v3245_v37 }
 0x247   :  { %v3260_v50 = vsel %vm3258_vm15, %v3248_v35, 2102212464  ;;  %v3264_v14 = vsel %vm3258_vm15, %v3251_v45, 920167782  ;;  %v3267_v7 = vsel %vm3255_vm13, %v3245_v37, %v3248_v35  ;;  %vm10171_vm0 = vcmp.le.f32.partialorder %v3017_v38, 0.7853982 }
 0x248   :  { %vm8164_vm1 = vcmp.lt.s32.totalorder %v8163_v13, 0  ;;  %vm3256_vm2 = vcmp.lt.s32.totalorder %v3236_v0, 2  ;;  %v3265_v62 = vsel %vm3257_vm14, %v3248_v35, %v3264_v14  ;;  %v3268_v10 = vsel %vm3258_vm15, %v3254_v47, 1326507024 }
 0x249   :  { %v3088_v1 = vsel %vm8164_vm1, 0, %v8163_v13  ;;  %v3259_v44 = vsel %vm3255_vm13, %v3239_v49, %v3242_v26  ;;  %v3266_v3 = vsel %vm3256_vm2, %v3263_v58, %v3265_v62  ;;  %v3269_v6 = vsel %vm3257_vm14, %v3251_v45, %v3268_v10 }
 0x24a   :  { %vm2596_vm3 = vcmp.lt.s32.totalorder %v10135_v41, 2  ;;  %v3089_v2 = vsub.s32 32, %v3088_v1  ;;  %v3093_v38 = vsub.s32 4294967266, %v3088_v1  ;;  %v3261_v63 = vsel %vm3257_vm14, %v3245_v37, %v3260_v50 }
 0x24b   :  { %v3270_v9 = vsel %vm3256_vm2, %v3267_v7, %v3269_v6  ;;  %v10188_v26 = vmul.u32.u64.low %v10145_v15, %v3266_v3  ;;  %v10189_v35 = vmul.u32.u64.high %v10145_v15, %v3266_v3, %v10188_v26  ;;  %v3090_v45 = vshll.u32 %v10143_v17, %v3088_v1 }
 0x24c   :  { %v10184_v19 = vmul.u32.u64.low %v10145_v15, %v3270_v9  ;;  %v10185_v59 = vmul.u32.u64.high %v10145_v15, %v3270_v9, %v10184_v19  ;;  %v3091_v61 = vshrl.u32 %v3073_v46, %v3089_v2  ;;  %v3094_v40 = vadd.s32 127, %v3093_v38 }
 0x24d   :  { %v8165_v51 = vadd.s32 4294967169, %v3124_v25  ;;  %vm2597_vm4 = vcmp.eq.s32.totalorder %v10135_v41, 0  ;;  %vm2600_vm5 = vcmp.eq.s32.totalorder %v10135_v41, 2  ;;  %v3262_v37 = vsel %vm3256_vm2, %v3259_v44, %v3261_v63 }
 0x24e   :  { %v10198_v49 = vadd.f32 %v9380_v60, %v10141_v57  ;;  %v3092_v47 = vor.u32 %v3091_v61, %v3090_v45  ;;  %v3095_v50 = vshll.u32 %v3094_v40, 23  ;;  %v3104_v17 = vsel %vm3019_vm12, %v3103_v39, %v10132_v42 }
 0x24f   :  { %v8776_v13 = vpop.eup %8775  ;;  %v3130_v46 = vadd.s32 1, %v8165_v51  ;;  %vm3280_vm6 = vc.u32 %v10185_v59, %v10188_v26  ;;  %v3281_v0 = vadd.s32 1, %v10189_v35  ;;  %v3127_v14 = vand.u32 8388607, %v3120_v36 }
 0x250   :  { %v8778_v58 = vpop.eup %8777  ;;  %v2601_v25 = vxor.u32 2147483648, %v8776_v13  ;;  %v3096_v7 = vor.u32 4788187, %v3095_v50  ;;  %v3278_v62 = vmul.u32 %v10145_v15, %v3262_v37  ;;  %v3106_v42 = vsel %vm10171_vm0, 0, %v3104_v17 }
 0x251   :  { %v2598_v57 = vxor.u32 2147483648, %v8778_v58  ;;  %vm3131_vm7 = vcmp.gt.s32.totalorder %v3130_v46, 0  ;;  %v3282_v39 = vsel %vm3280_vm6, %v3281_v0, %v10189_v35  ;;  %v3099_v6 = vcvt.s32.f32 %v3092_v47 }
 0x252   :  { %v2602_v10 = vsel %vm2600_vm5, %v2601_v25, %v8778_v58  ;;  %v3132_v1 = vsel %vm3131_vm7, %v3130_v46, 0  ;;  %v3097_v3 = vand.u32 2147483647, %v3096_v7  ;;  %v3283_v2 = vadd.s32 %v3282_v39, %v3278_v62 }
 0x253   :  { %v2599_v44 = vsel %vm2597_vm4, %v8776_v13, %v2598_v57  ;;  %vm2594_vm8 = vweird.f32 %v9870_v54  ;;  %v3134_v38 = vand.u32 31, %v3132_v1  ;;  %v10221_v45 = vmul.f32 %v9323_v20, %v9823_v53 }
 0x254   :  { %v2603_v15 = vsel %vm2596_vm3, %v2599_v44, %v2602_v10  ;;  %v3100_v9 = vmul.f32 %v3099_v6, %v3097_v3  ;;  %v3284_v19 = vadd.s32 536870912, %v3283_v2  ;;  %v10223_v35 = vand.u32 3, %v3106_v42 }
 0x255   :  { %v2604_v63 = vsel %vm2594_vm8, nan, %v2603_v15  ;;  %v3128_v61 = vor.u32 8388608, %v3127_v14  ;;  %v3135_v40 = vsub.s32 32, %v3134_v38  ;;  %v3329_v51 = vand.u32 2139095040, %v10198_v49 }
 0x256   :  { %7972 = vst [vmem:[#allocation2 + $0x58] sm:$0xff] %v2604_v63  ;;  %v3101_v37 = vxor.u32 2147483648, %v3100_v9  ;;  %v10226_v54 = vshrl.u32 %v3284_v19, 30  ;;  %v3133_v41 = vshrl.u32 %v3132_v1, 5  ;;  %v3137_v13 = vshll.u32 %v9028_v18, %v3134_v38 }
 0x257   :  { %v3138_v47 = vshrl.u32 %v9029_v29, %v3135_v40  ;;  %v3141_v50 = vshrl.u32 %v9030_v31, %v3135_v40  ;;  %v3143_v53 = vshll.u32 %v9030_v31, %v3134_v38  ;;  %v3144_v17 = vshrl.u32 %v9031_v33, %v3135_v40 }
 0x258   :  { %v3102_v46 = vsel %vm3019_vm12, %v3101_v37, %v3100_v9  ;;  %v3286_v58 = vshll.u32 %v10226_v54, 30  ;;  %v3140_v25 = vshll.u32 %v9029_v29, %v3134_v38  ;;  %v3147_v0 = vshrl.u32 %v9032_v43, %v3135_v40  ;;  %v10253_v37 = vpop.f32.mrb[8].mxu1 }
 0x259   :  { %v3105_v14 = vsel %vm10171_vm0, %v9942_v4, %v3102_v46  ;;  %v3145_v57 = vor.u32 %v3144_v17, %v3143_v53  ;;  %v3146_v7 = vshll.u32 %v9031_v33, %v3134_v38  ;;  %v3326_v62 = vand.u32 2147483647, %v10198_v49 }
 0x25a   :  { %8779 = vcosq.f32 %v3105_v14  ;;  %v10243_v10 = vsub.s32 %v3283_v2, %v3286_v58  ;;  %v3139_v42 = vor.u32 %v3138_v47, %v3137_v13  ;;  %v3142_v39 = vor.u32 %v3141_v50, %v3140_v25 }
 0x25b   :  { %8781 = vsinq.f32 %v3105_v14  ;;  %v3148_v1 = vor.u32 %v3147_v0, %v3146_v7  ;;  %v3149_v44 = vshll.u32 %v9032_v43, %v3134_v38  ;;  %v3150_v3 = vshrl.u32 %v9033_v52, %v3135_v40 }
 0x25c   :  { %vm3225_vm9 = vcmp.lt.s32.totalorder %v10089_v16, 0  ;;  %v3289_v55 = vsub.s32 0, %v10243_v10  ;;  %vm3155_vm10 = vcmp.lt.s32.totalorder %v3133_v41, 4  ;;  %v10249_v6 = vshll.u32 %v3128_v61, 8 }
 0x25d   :  { %v3330_v15 = vshrl.u32 %v3329_v51, 23  ;;  %v3136_v63 = vshrl.u32 %v9028_v18, %v3135_v40  ;;  %v3151_v2 = vor.u32 %v3150_v3, %v3149_v44  ;;  %vm3152_vm11 = vcmp.lt.s32.totalorder %v3133_v41, 1 }
 0x25e   :  { %v3157_v9 = vsel %vm3155_vm10, %v3145_v57, 2102212464  ;;  %v8170_v19 = vmin.u32 %v3289_v55, %v10243_v10  ;;  %vm3153_vm12 = vcmp.lt.s32.totalorder %v3133_v41, 2  ;;  %vm3154_vm13 = vcmp.lt.s32.totalorder %v3133_v41, 3 }
 0x25f   :  { %v3160_v38 = vsel %vm3152_vm11, %v3139_v42, %v3142_v39  ;;  %v3156_v13 = vsel %vm3152_vm11, %v3136_v63, %v3139_v42  ;;  %v3161_v47 = vsel %vm3155_vm10, %v3148_v1, 920167782  ;;  %v3164_v50 = vsel %vm3152_vm11, %v3142_v39, %v3145_v57 }
 0x260   :  { %v3165_v53 = vsel %vm3155_vm10, %v3151_v2, 1326507024  ;;  %vm3111_vm14 = vcmp.lt.s32.totalorder %v10223_v35, 2  ;;  %v3291_v61 = vclz %v8170_v19  ;;  %v3158_v51 = vsel %vm3154_vm13, %v3142_v39, %v3157_v9 }
 0x261   :  { %v3162_v17 = vsel %vm3154_vm13, %v3145_v57, %v3161_v47  ;;  %v3166_v40 = vsel %vm3154_vm13, %v3148_v1, %v3165_v53  ;;  %vm3109_vm15 = vweird.f32 %v9942_v4  ;;  %v3309_v46 = vsub.s32 4, %v10226_v54 }
 0x262   :  { %v3163_v58 = vsel %vm3153_vm12, %v3160_v38, %v3162_v17  ;;  %v3167_v25 = vsel %vm3153_vm12, %v3164_v50, %v3166_v40  ;;  %v8173_v0 = vadd.s32 4294967169, %v3330_v15  ;;  %vm3112_vm0 = vcmp.eq.s32.totalorder %v10223_v35, 0 }
 0x263   :  { %v8171_v14 = vadd.s32 4294967294, %v3291_v61  ;;  %v10262_v7 = vmul.u32.u64.low %v10249_v6, %v3167_v25  ;;  %v10263_v42 = vmul.u32.u64.high %v10249_v6, %v3167_v25, %v10262_v7  ;;  %v3159_v39 = vsel %vm3153_vm12, %v3156_v13, %v3158_v51 }
 0x264   :  { %v10267_v57 = vmul.u32.u64.low %v10249_v6, %v3163_v58  ;;  %v10268_v1 = vmul.u32.u64.high %v10249_v6, %v3163_v58, %v10267_v57  ;;  %v3336_v44 = vadd.s32 1, %v8173_v0  ;;  %v8780_v3 = vpop.eup %8779  ;;  %vm3115_vm1 = vcmp.eq.s32.totalorder %v10223_v35, 2 }
 0x265   :  { %v3279_v55 = vadd.s32 %v10188_v26, %v10185_v59  ;;  %vm8172_vm2 = vcmp.lt.s32.totalorder %v8171_v14, 0  ;;  %v3333_v15 = vand.u32 8388607, %v3326_v62  ;;  %v8782_v63 = vpop.eup %8781  ;;  %v3116_v2 = vxor.u32 2147483648, %v8780_v3 }
 0x266   :  { %v3294_v41 = vsel %vm8172_vm2, 0, %v8171_v14  ;;  %v3310_v9 = vsel %vm3225_vm9, %v3309_v46, %v10226_v54  ;;  %vm3337_vm3 = vcmp.gt.s32.totalorder %v3336_v44, 0  ;;  %v3113_v19 = vxor.u32 2147483648, %v8782_v63 }
 0x267   :  { %v3295_v38 = vsub.s32 32, %v3294_v41  ;;  %v3299_v13 = vsub.s32 4294967266, %v3294_v41  ;;  %v3175_v47 = vmul.u32 %v10249_v6, %v3159_v39  ;;  %v3117_v50 = vsel %vm3115_vm1, %v3116_v2, %v8782_v63 }
 0x268   :  { %v3296_v59 = vshll.u32 %v10243_v10, %v3294_v41  ;;  %vm3177_vm4 = vc.u32 %v10263_v42, %v10267_v57  ;;  %v3178_v26 = vadd.s32 1, %v10268_v1  ;;  %v3114_v53 = vsel %vm3112_vm0, %v8780_v3, %v3113_v19 }
 0x269   :  { %v3297_v61 = vshrl.u32 %v3279_v55, %v3295_v38  ;;  %v3300_v51 = vadd.s32 127, %v3299_v13  ;;  %v3338_v54 = vsel %vm3337_vm3, %v3336_v44, 0  ;;  %v3118_v17 = vsel %vm3111_vm14, %v3114_v53, %v3117_v50 }
 0x26a   :  { %vm10290_vm5 = vcmp.le.f32.partialorder %v3223_v56, 0.7853982  ;;  %v3179_v10 = vsel %vm3177_vm4, %v3178_v26, %v10268_v1  ;;  %v3340_v40 = vand.u32 31, %v3338_v54  ;;  %v3119_v46 = vsel %vm3109_vm15, nan, %v3118_v17 }
 0x26b   :  { %v3298_v58 = vor.u32 %v3297_v61, %v3296_v59  ;;  %v3301_v25 = vshll.u32 %v3300_v51, 23  ;;  %v3180_v0 = vadd.s32 %v3179_v10, %v3175_v47  ;;  %7977 = vst [vmem:[#allocation2 + $0x80] sm:$0xff] %v3119_v46  ;;  %v3312_v35 = vsel %vm10290_vm5, 0, %v3310_v9 }
 0x26c   :  { %v3341_v14 = vsub.s32 32, %v3340_v40  ;;  %v10301_v56 = vadd.f32 %v9332_v23, %v10221_v45  ;;  %v3334_v44 = vor.u32 8388608, %v3333_v15  ;;  %v10303_v1 = vshrl.u32 %v3338_v54, 5 }
 0x26d   :  { %v3302_v7 = vor.u32 4788187, %v3301_v25  ;;  %v3181_v39 = vadd.s32 536870912, %v3180_v0  ;;  %v3343_v4 = vshll.u32 %v9028_v18, %v3340_v40  ;;  %v3305_v41 = vcvt.s32.f32 %v3298_v58 }
 0x26e   :  { %v3344_v3 = vshrl.u32 %v9029_v29, %v3341_v14  ;;  %v3347_v55 = vshrl.u32 %v9030_v31, %v3341_v14  ;;  %v3350_v63 = vshrl.u32 %v9031_v33, %v3341_v14  ;;  %v3353_v45 = vshrl.u32 %v9032_v43, %v3341_v14 }
 0x26f   :  { %v3303_v2 = vand.u32 2147483647, %v3302_v7  ;;  %v10309_v9 = vshrl.u32 %v3181_v39, 30  ;;  %v3346_v19 = vshll.u32 %v9029_v29, %v3340_v40  ;;  %v3349_v15 = vshll.u32 %v9030_v31, %v3340_v40 }
 0x270   :  { %v3352_v38 = vshll.u32 %v9031_v33, %v3340_v40  ;;  %v3356_v13 = vshrl.u32 %v9033_v52, %v3341_v14  ;;  %v3355_v59 = vshll.u32 %v9032_v43, %v3340_v40  ;;  %v3345_v26 = vor.u32 %v3344_v3, %v3343_v4 }
 0x271   :  { %v3306_v47 = vmul.f32 %v3305_v41, %v3303_v2  ;;  %v3183_v50 = vshll.u32 %v10309_v9, 30  ;;  %v3348_v53 = vor.u32 %v3347_v55, %v3346_v19  ;;  %v3351_v61 = vor.u32 %v3350_v63, %v3349_v15  ;;  %v10335_v41 = vpop.f32.mrb[9].mxu0 }
 0x272   :  { %v3354_v51 = vor.u32 %v3353_v45, %v3352_v38  ;;  %v10318_v17 = vand.u32 3, %v3312_v35  ;;  %v3374_v46 = vshll.u32 %v3334_v44, 8  ;;  %v3342_v58 = vshrl.u32 %v9028_v18, %v3341_v14 }
 0x273   :  { %v3307_v54 = vxor.u32 2147483648, %v3306_v47  ;;  %v10320_v10 = vsub.s32 %v3180_v0, %v3183_v50  ;;  %v3357_v25 = vor.u32 %v3356_v13, %v3355_v59  ;;  %vm3358_vm6 = vcmp.lt.s32.totalorder %v10303_v1, 1 }
 0x274   :  { %v3844_v7 = vand.u32 2139095040, %v10301_v56  ;;  %vm3359_vm7 = vcmp.lt.s32.totalorder %v10303_v1, 2  ;;  %vm3361_vm8 = vcmp.lt.s32.totalorder %v10303_v1, 4  ;;  %v3366_v14 = vsel %vm3358_vm6, %v3345_v26, %v3348_v53 }
 0x275   :  { %v3308_v40 = vsel %vm3225_vm9, %v3307_v54, %v3306_v47  ;;  %v3186_v39 = vsub.s32 0, %v10320_v10  ;;  %v3363_v35 = vsel %vm3361_vm8, %v3351_v61, 2102212464  ;;  %v3367_v44 = vsel %vm3361_vm8, %v3354_v51, 920167782 }
 0x276   :  { %v3311_v0 = vsel %vm10290_vm5, %v10089_v16, %v3308_v40  ;;  %vm3360_vm10 = vcmp.lt.s32.totalorder %v10303_v1, 3  ;;  %v3370_v3 = vsel %vm3358_vm6, %v3348_v53, %v3351_v61  ;;  %v3362_v55 = vsel %vm3358_vm6, %v3342_v58, %v3345_v26 }
 0x277   :  { %8783 = vcosq.f32 %v3311_v0  ;;  %v8166_v4 = vmin.u32 %v3186_v39, %v10320_v10  ;;  %v3368_v63 = vsel %vm3360_vm10, %v3351_v61, %v3367_v44  ;;  %v3371_v2 = vsel %vm3361_vm8, %v3357_v25, 1326507024 }
 0x278   :  { %8785 = vsinq.f32 %v3311_v0  ;;  %v3364_v19 = vsel %vm3360_vm10, %v3348_v53, %v3363_v35  ;;  %v3369_v6 = vsel %vm3359_vm7, %v3366_v14, %v3368_v63  ;;  %v3372_v15 = vsel %vm3360_vm10, %v3354_v51, %v3371_v2 }
 0x279   :  { %v3188_v45 = vclz %v8166_v4  ;;  %v3373_v38 = vsel %vm3359_vm7, %v3370_v3, %v3372_v15  ;;  %v10341_v13 = vmul.u32.u64.low %v3374_v46, %v3369_v6  ;;  %v10342_v47 = vmul.u32.u64.high %v3374_v46, %v3369_v6, %v10341_v13 }
 0x27a   :  { %v3845_v50 = vshrl.u32 %v3844_v7, 23  ;;  %v3206_v26 = vsub.s32 4, %v10309_v9  ;;  %v10346_v61 = vmul.u32.u64.low %v3374_v46, %v3373_v38  ;;  %v10347_v54 = vmul.u32.u64.high %v3374_v46, %v3373_v38, %v10346_v61 }
 0x27b   :  { %v8167_v59 = vadd.s32 4294967294, %v3188_v45  ;;  %vm3122_vm9 = vcmp.lt.s32.totalorder %v10130_v27, 0  ;;  %v1195_v51 = vmul.f32 %v9326_v21, %v9901_v30  ;;  %vm3318_vm11 = vcmp.eq.s32.totalorder %v10318_v17, 0 }
 0x27c   :  { %v8193_v53 = vadd.s32 4294967169, %v3845_v50  ;;  %vm10355_vm12 = vcmp.le.f32.partialorder %v3120_v36, 0.7853982  ;;  %v3365_v25 = vsel %vm3359_vm7, %v3362_v55, %v3364_v19  ;;  %v3384_v40 = vadd.s32 1, %v10342_v47 }
 0x27d   :  { %vm8168_vm13 = vcmp.lt.s32.totalorder %v8167_v59, 0  ;;  %v3841_v39 = vand.u32 2147483647, %v10301_v56  ;;  %v3176_v30 = vadd.s32 %v10267_v57, %v10263_v42  ;;  %v3207_v36 = vsel %vm3122_vm9, %v3206_v26, %v10309_v9 }
 0x27e   :  { %v3191_v7 = vsel %vm8168_vm13, 0, %v8167_v59  ;;  %v3851_v0 = vadd.s32 1, %v8193_v53  ;;  %v3381_v4 = vmul.u32 %v3374_v46, %v3365_v25  ;;  %vm3383_vm14 = vc.u32 %v10347_v54, %v10341_v13 }
 0x27f   :  { %v3192_v35 = vsub.s32 32, %v3191_v7  ;;  %v3196_v14 = vsub.s32 4294967266, %v3191_v7  ;;  %v3193_v44 = vshll.u32 %v10320_v10, %v3191_v7  ;;  %v3385_v63 = vsel %vm3383_vm14, %v3384_v40, %v10342_v47 }
 0x280   :  { %vm3852_vm15 = vcmp.gt.s32.totalorder %v3851_v0, 0  ;;  %vm3321_vm0 = vcmp.eq.s32.totalorder %v10318_v17, 2  ;;  %v3386_v45 = vadd.s32 %v3385_v63, %v3381_v4  ;;  %v3209_v46 = vsel %vm10355_vm12, 0, %v3207_v36 }
 0x281   :  { %v8784_v1 = vpop.eup %8783  ;;  %v3194_v3 = vshrl.u32 %v3176_v30, %v3192_v35  ;;  %v3197_v55 = vadd.s32 127, %v3196_v14  ;;  %v3853_v2 = vsel %vm3852_vm15, %v3851_v0, 0  ;;  %v3848_v50 = vand.u32 8388607, %v3841_v39 }
 0x282   :  { %v8786_v42 = vpop.eup %8785  ;;  %v3322_v57 = vxor.u32 2147483648, %v8784_v1  ;;  %v3855_v19 = vand.u32 31, %v3853_v2  ;;  %v3387_v38 = vadd.s32 536870912, %v3386_v45  ;;  %vm3317_vm1 = vcmp.lt.s32.totalorder %v10318_v17, 2 }
 0x283   :  { %v3319_v9 = vxor.u32 2147483648, %v8786_v42  ;;  %v3195_v6 = vor.u32 %v3194_v3, %v3193_v44  ;;  %v3198_v10 = vshll.u32 %v3197_v55, 23  ;;  %vm3315_vm2 = vweird.f32 %v10089_v16 }
 0x284   :  { %v3323_v15 = vsel %vm3321_vm0, %v3322_v57, %v8786_v42  ;;  %v3856_v59 = vsub.s32 32, %v3855_v19  ;;  %v10381_v53 = vand.u32 3, %v3209_v46  ;;  %v10383_v25 = vshrl.u32 %v3387_v38, 30 }
 0x285   :  { %v3320_v47 = vsel %vm3318_vm11, %v8784_v1, %v3319_v9  ;;  %v3199_v26 = vor.u32 4788187, %v3198_v10  ;;  %v3202_v0 = vcvt.s32.f32 %v3195_v6  ;;  %v10386_v30 = vadd.f32 %v9335_v24, %v1195_v51 }
 0x286   :  { %v3324_v61 = vsel %vm3317_vm1, %v3320_v47, %v3323_v15  ;;  %v3389_v35 = vshll.u32 %v10383_v25, 30  ;;  %v3849_v14 = vor.u32 8388608, %v3848_v50  ;;  %v3859_v17 = vshrl.u32 %v9029_v29, %v3856_v59 }
 0x287   :  { %v3325_v7 = vsel %vm3315_vm2, nan, %v3324_v61  ;;  %v3200_v40 = vand.u32 2147483647, %v3199_v26  ;;  %v3862_v36 = vshrl.u32 %v9030_v31, %v3856_v59  ;;  %v3854_v44 = vshrl.u32 %v3853_v2, 5 }
 0x288   :  { %7979 = vst [vmem:[#allocation2 + $0x90] sm:$0xff] %v3325_v7  ;;  %v3865_v4 = vshrl.u32 %v9031_v33, %v3856_v59  ;;  %v3868_v1 = vshrl.u32 %v9032_v43, %v3856_v59  ;;  %v10393_v3 = vsub.s32 %v3386_v45, %v3389_v35  ;;  %v3858_v55 = vshll.u32 %v9028_v18, %v3855_v19 }
 0x289   :  { %v3203_v16 = vmul.f32 %v3202_v0, %v3200_v40  ;;  %v3861_v51 = vshll.u32 %v9029_v29, %v3855_v19  ;;  %v3864_v63 = vshll.u32 %v9030_v31, %v3855_v19  ;;  %v3867_v57 = vshll.u32 %v9031_v33, %v3855_v19 }
 0x28a   :  { %v3870_v9 = vshll.u32 %v9032_v43, %v3855_v19  ;;  %v3871_v6 = vshrl.u32 %v9033_v52, %v3856_v59  ;;  %v3392_v2 = vsub.s32 0, %v10393_v3  ;;  %v3860_v10 = vor.u32 %v3859_v17, %v3858_v55 }
 0x28b   :  { %v3204_v42 = vxor.u32 2147483648, %v3203_v16  ;;  %v3863_v46 = vor.u32 %v3862_v36, %v3861_v51  ;;  %v4047_v45 = vand.u32 2147483647, %v10386_v30  ;;  %v3866_v38 = vor.u32 %v3865_v4, %v3864_v63 }
 0x28c   :  { %v3869_v50 = vor.u32 %v3868_v1, %v3867_v57  ;;  %v3872_v47 = vor.u32 %v3871_v6, %v3870_v9  ;;  %v8174_v19 = vmin.u32 %v3392_v2, %v10393_v3  ;;  %v3857_v61 = vshrl.u32 %v9028_v18, %v3856_v59  ;;  %v10433_v2 = vpop.f32.mrb[9].mxu1 }
 0x28d   :  { %v3205_v15 = vsel %vm3122_vm9, %v3204_v42, %v3203_v16  ;;  %v10410_v7 = vshll.u32 %v3849_v14, 8  ;;  %v3412_v40 = vsub.s32 4, %v10383_v25  ;;  %vm3873_vm3 = vcmp.lt.s32.totalorder %v3854_v44, 1 }
 0x28e   :  { %v3208_v26 = vsel %vm10355_vm12, %v10130_v27, %v3205_v15  ;;  %vm3875_vm4 = vcmp.lt.s32.totalorder %v3854_v44, 3  ;;  %vm3328_vm5 = vcmp.lt.s32.totalorder %v10198_v49, 0  ;;  %v3394_v0 = vclz %v8174_v19 }
 0x28f   :  { %8787 = vcosq.f32 %v3208_v26  ;;  %vm3876_vm6 = vcmp.lt.s32.totalorder %v3854_v44, 4  ;;  %v3881_v35 = vsel %vm3873_vm3, %v3860_v10, %v3863_v46  ;;  %v3885_v36 = vsel %vm3873_vm3, %v3863_v46, %v3866_v38 }
 0x290   :  { %8789 = vsinq.f32 %v3208_v26  ;;  %v3878_v58 = vsel %vm3876_vm6, %v3866_v38, 2102212464  ;;  %v3882_v17 = vsel %vm3876_vm6, %v3869_v50, 920167782  ;;  %v3886_v16 = vsel %vm3876_vm6, %v3872_v47, 1326507024 }
 0x291   :  { %v8175_v59 = vadd.s32 4294967294, %v3394_v0  ;;  %vm3874_vm7 = vcmp.lt.s32.totalorder %v3854_v44, 2  ;;  %v3883_v14 = vsel %vm3875_vm4, %v3866_v38, %v3882_v17  ;;  %v3887_v4 = vsel %vm3875_vm4, %v3869_v50, %v3886_v16 }
 0x292   :  { %vm10420_vm8 = vcmp.le.f32.partialorder %v3326_v62, 0.7853982  ;;  %v3877_v55 = vsel %vm3873_vm3, %v3857_v61, %v3860_v10  ;;  %v3884_v51 = vsel %vm3874_vm7, %v3881_v35, %v3883_v14  ;;  %v3888_v63 = vsel %vm3874_vm7, %v3885_v36, %v3887_v4 }
 0x293   :  { %v4050_v42 = vand.u32 2139095040, %v10386_v30  ;;  %vm8176_vm10 = vcmp.lt.s32.totalorder %v8175_v59, 0  ;;  %v3879_v57 = vsel %vm3875_vm4, %v3863_v46, %v3878_v58  ;;  %vm3212_vm9 = vweird.f32 %v10130_v27 }
 0x294   :  { %v10430_v9 = vmul.u32.u64.low %v10410_v7, %v3888_v63  ;;  %v10431_v6 = vmul.u32.u64.high %v10410_v7, %v3888_v63, %v10430_v9  ;;  %v3397_v62 = vsel %vm8176_vm10, 0, %v8175_v59  ;;  %vm3214_vm11 = vcmp.lt.s32.totalorder %v10381_v53, 2 }
 0x295   :  { %v10436_v15 = vmul.u32.u64.low %v10410_v7, %v3884_v51  ;;  %v10437_v38 = vmul.u32.u64.high %v10410_v7, %v3884_v51, %v10436_v15  ;;  %v4051_v10 = vshrl.u32 %v4050_v42, 23  ;;  %v3382_v46 = vadd.s32 %v10341_v13, %v10347_v54 }
 0x296   :  { %v3398_v50 = vsub.s32 32, %v3397_v62  ;;  %v3402_v47 = vsub.s32 4294967266, %v3397_v62  ;;  %vm3215_vm12 = vcmp.eq.s32.totalorder %v10381_v53, 0  ;;  %v3880_v26 = vsel %vm3874_vm7, %v3877_v55, %v3879_v57 }
 0x297   :  { %v8201_v19 = vadd.s32 4294967169, %v4051_v10  ;;  %v1194_v61 = vmul.f32 %v9329_v22, %v9997_v34  ;;  %v3399_v0 = vshll.u32 %v10393_v3, %v3397_v62  ;;  %vm3898_vm13 = vc.u32 %v10431_v6, %v10436_v15 }
 0x298   :  { %v3400_v35 = vshrl.u32 %v3382_v46, %v3398_v50  ;;  %v3403_v58 = vadd.s32 127, %v3402_v47  ;;  %v3413_v13 = vsel %vm3328_vm5, %v3412_v40, %v10383_v25  ;;  %v3899_v54 = vadd.s32 1, %v10437_v38 }
 0x299   :  { %v8788_v17 = vpop.eup %8787  ;;  %v4054_v44 = vand.u32 8388607, %v4047_v45  ;;  %v4057_v36 = vadd.s32 1, %v8201_v19  ;;  %v3896_v14 = vmul.u32 %v10410_v7, %v3880_v26  ;;  %vm3218_vm14 = vcmp.eq.s32.totalorder %v10381_v53, 2 }
 0x29a   :  { %v8790_v16 = vpop.eup %8789  ;;  %v3219_v34 = vxor.u32 2147483648, %v8788_v17  ;;  %v3401_v59 = vor.u32 %v3400_v35, %v3399_v0  ;;  %v3404_v3 = vshll.u32 %v3403_v58, 23  ;;  %v3900_v55 = vsel %vm3898_vm13, %v3899_v54, %v10437_v38 }
 0x29b   :  { %v3216_v4 = vxor.u32 2147483648, %v8790_v16  ;;  %vm4058_vm15 = vcmp.gt.s32.totalorder %v4057_v36, 0  ;;  %v3415_v40 = vsel %vm10420_vm8, 0, %v3413_v13  ;;  %v3901_v63 = vadd.s32 %v3900_v55, %v3896_v14 }
 0x29c   :  { %v3220_v51 = vsel %vm3218_vm14, %v3219_v34, %v8790_v16  ;;  %v3405_v25 = vor.u32 4788187, %v3404_v3  ;;  %v4055_v57 = vor.u32 8388608, %v4054_v44  ;;  %v4059_v9 = vsel %vm4058_vm15, %v4057_v36, 0 }
 0x29d   :  { %v3217_v42 = vsel %vm3215_vm12, %v8788_v17, %v3216_v4  ;;  %v10465_v62 = vadd.f32 %v9339_v28, %v1194_v61  ;;  %v3408_v38 = vcvt.s32.f32 %v3401_v59  ;;  %v3902_v46 = vadd.s32 536870912, %v3901_v63 }
 0x29e   :  { %v3221_v7 = vsel %vm3214_vm11, %v3217_v42, %v3220_v51  ;;  %v3406_v10 = vand.u32 2147483647, %v3405_v25  ;;  %v4061_v47 = vand.u32 31, %v4059_v9  ;;  %v10475_v0 = vmul.f32 %v9369_v48, %v10093_v12 }
 0x29f   :  { %v3222_v50 = vsel %vm3212_vm9, nan, %v3221_v7  ;;  %v10471_v19 = vshrl.u32 %v3902_v46, 30  ;;  %v10477_v61 = vand.u32 3, %v3415_v40  ;;  %v10479_v53 = vshll.u32 %v4055_v57, 8 }
 0x2a0   :  { %7978 = vst [vmem:[#allocation2 + $0x88] sm:$0xff] %v3222_v50  ;;  %v3409_v26 = vmul.f32 %v3408_v38, %v3406_v10  ;;  %v4062_v35 = vsub.s32 32, %v4061_v47  ;;  %v3947_v58 = vand.u32 2139095040, %v10465_v62  ;;  %v10483_v13 = vshrl.u32 %v4059_v9, 5  ;;  %v10511_v50 = vpop.f32.mrb[10].mxu0 }
 0x2a1   :  { %v3904_v27 = vshll.u32 %v10471_v19, 30  ;;  %v4064_v54 = vshll.u32 %v9028_v18, %v4061_v47  ;;  %v4067_v36 = vshll.u32 %v9029_v29, %v4061_v47  ;;  %v4070_v3 = vshll.u32 %v9030_v31, %v4061_v47 }
 0x2a2   :  { %v3410_v17 = vxor.u32 2147483648, %v3409_v26  ;;  %v4065_v44 = vshrl.u32 %v9029_v29, %v4062_v35  ;;  %v4068_v12 = vshrl.u32 %v9030_v31, %v4062_v35  ;;  %v4071_v16 = vshrl.u32 %v9031_v33, %v4062_v35 }
 0x2a3   :  { %v10492_v59 = vsub.s32 %v3901_v63, %v3904_v27  ;;  %v4074_v14 = vshrl.u32 %v9032_v43, %v4062_v35  ;;  %v4073_v51 = vshll.u32 %v9031_v33, %v4061_v47  ;;  %v3944_v25 = vand.u32 2147483647, %v10465_v62 }
 0x2a4   :  { %v3411_v34 = vsel %vm3328_vm5, %v3410_v17, %v3409_v26  ;;  %v4066_v55 = vor.u32 %v4065_v44, %v4064_v54  ;;  %v4069_v42 = vor.u32 %v4068_v12, %v4067_v36  ;;  %v4072_v57 = vor.u32 %v4071_v16, %v4070_v3 }
 0x2a5   :  { %v3414_v4 = vsel %vm10420_vm8, %v10198_v49, %v3411_v34  ;;  %v3907_v40 = vsub.s32 0, %v10492_v59  ;;  %v4075_v63 = vor.u32 %v4074_v14, %v4073_v51  ;;  %v4076_v9 = vshll.u32 %v9032_v43, %v4061_v47 }
 0x2a6   :  { %8791 = vcosq.f32 %v3414_v4  ;;  %v4077_v7 = vshrl.u32 %v9033_v52, %v4062_v35  ;;  %vm3843_vm0 = vcmp.lt.s32.totalorder %v10301_v56, 0  ;;  %vm4079_vm1 = vcmp.lt.s32.totalorder %v10483_v13, 1 }
 0x2a7   :  { %8793 = vsinq.f32 %v3414_v4  ;;  %v8194_v1 = vmin.u32 %v3907_v40, %v10492_v59  ;;  %vm4080_vm2 = vcmp.lt.s32.totalorder %v10483_v13, 2  ;;  %v3948_v10 = vshrl.u32 %v3947_v58, 23 }
 0x2a8   :  { %v4063_v38 = vshrl.u32 %v9028_v18, %v4062_v35  ;;  %v4078_v46 = vor.u32 %v4077_v7, %v4076_v9  ;;  %vm4081_vm3 = vcmp.lt.s32.totalorder %v10483_v13, 3  ;;  %vm4082_vm4 = vcmp.lt.s32.totalorder %v10483_v13, 4 }
 0x2a9   :  { %v3909_v47 = vclz %v8194_v1  ;;  %v4084_v26 = vsel %vm4082_vm4, %v4072_v57, 2102212464  ;;  %v4087_v17 = vsel %vm4079_vm1, %v4066_v55, %v4069_v42  ;;  %v4088_v27 = vsel %vm4082_vm4, %v4075_v63, 920167782 }
 0x2aa   :  { %vm3421_vm5 = vcmp.eq.s32.totalorder %v10477_v61, 0  ;;  %v3927_v54 = vsub.s32 4, %v10471_v19  ;;  %v4089_v35 = vsel %vm4081_vm3, %v4072_v57, %v4088_v27  ;;  %v4091_v58 = vsel %vm4079_vm1, %v4069_v42, %v4072_v57 }
 0x2ab   :  { %v4092_v44 = vsel %vm4082_vm4, %v4078_v46, 1326507024  ;;  %vm3420_vm6 = vcmp.lt.s32.totalorder %v10477_v61, 2  ;;  %v8195_v36 = vadd.s32 4294967294, %v3909_v47  ;;  %v4083_v12 = vsel %vm4079_vm1, %v4063_v38, %v4066_v55 }
 0x2ac   :  { %v4090_v16 = vsel %vm4080_vm2, %v4087_v17, %v4089_v35  ;;  %v4093_v34 = vsel %vm4081_vm3, %v4075_v63, %v4092_v44  ;;  %vm3418_vm7 = vweird.f32 %v10198_v49  ;;  %vm10531_vm8 = vcmp.le.f32.partialorder %v3841_v39, 0.7853982 }
 0x2ad   :  { %v4085_v14 = vsel %vm4081_vm3, %v4069_v42, %v4084_v26  ;;  %v4094_v4 = vsel %vm4080_vm2, %v4091_v58, %v4093_v34  ;;  %v10540_v55 = vmul.u32.u64.low %v10479_v53, %v4090_v16  ;;  %v10541_v51 = vmul.u32.u64.high %v10479_v53, %v4090_v16, %v10540_v55 }
 0x2ae   :  { %vm8196_vm10 = vcmp.lt.s32.totalorder %v8195_v36, 0  ;;  %v10545_v40 = vmul.u32.u64.low %v10479_v53, %v4094_v4  ;;  %v10546_v57 = vmul.u32.u64.high %v10479_v53, %v4094_v4, %v10545_v40  ;;  %v8197_v39 = vadd.s32 4294967169, %v3948_v10 }
 0x2af   :  { %vm3424_vm9 = vcmp.eq.s32.totalorder %v10477_v61, 2  ;;  %v3897_v63 = vadd.s32 %v10436_v15, %v10431_v6  ;;  %v3912_v42 = vsel %vm8196_vm10, 0, %v8195_v36  ;;  %v10553_v9 = vadd.f32 %v9380_v60, %v10475_v0 }
 0x2b0   :  { %v8792_v7 = vpop.eup %8791  ;;  %v3913_v1 = vsub.s32 32, %v3912_v42  ;;  %v3917_v38 = vsub.s32 4294967266, %v3912_v42  ;;  %v4086_v46 = vsel %vm4080_vm2, %v4083_v12, %v4085_v14  ;;  %v3954_v47 = vadd.s32 1, %v8197_v39 }
 0x2b1   :  { %v8794_v26 = vpop.eup %8793  ;;  %v3425_v17 = vxor.u32 2147483648, %v8792_v7  ;;  %v3928_v10 = vsel %vm3843_vm0, %v3927_v54, %v10471_v19  ;;  %v4105_v6 = vadd.s32 1, %v10541_v51  ;;  %v3951_v15 = vand.u32 8388607, %v3944_v25 }
 0x2b2   :  { %v3422_v0 = vxor.u32 2147483648, %v8794_v26  ;;  %v3914_v27 = vshll.u32 %v10492_v59, %v3912_v42  ;;  %v3915_v35 = vshrl.u32 %v3897_v63, %v3913_v1  ;;  %v3918_v58 = vadd.s32 127, %v3917_v38 }
 0x2b3   :  { %v3426_v13 = vsel %vm3424_vm9, %v3425_v17, %v8794_v26  ;;  %v4102_v44 = vmul.u32 %v10479_v53, %v4086_v46  ;;  %vm4104_vm11 = vc.u32 %v10546_v57, %v10540_v55  ;;  %vm3955_vm12 = vcmp.gt.s32.totalorder %v3954_v47, 0 }
 0x2b4   :  { %v3423_v19 = vsel %vm3421_vm5, %v8792_v7, %v3422_v0  ;;  %v3916_v54 = vor.u32 %v3915_v35, %v3914_v27  ;;  %v3919_v36 = vshll.u32 %v3918_v58, 23  ;;  %v4106_v12 = vsel %vm4104_vm11, %v4105_v6, %v10541_v51 }
 0x2b5   :  { %v3427_v59 = vsel %vm3420_vm6, %v3423_v19, %v3426_v13  ;;  %v4107_v16 = vadd.s32 %v4106_v12, %v4102_v44  ;;  %v3952_v34 = vor.u32 8388608, %v3951_v15  ;;  %v3956_v14 = vsel %vm3955_vm12, %v3954_v47, 0 }
 0x2b6   :  { %v3428_v53 = vsel %vm3418_vm7, nan, %v3427_v59  ;;  %v3920_v4 = vor.u32 4788187, %v3919_v36  ;;  %v3930_v40 = vsel %vm10531_vm8, 0, %v3928_v10  ;;  %v4153_v39 = vand.u32 2139095040, %v10553_v9 }
 0x2b7   :  { %7980 = vst [vmem:[#allocation2 + $0x98] sm:$0xff] %v3428_v53  ;;  %v4108_v63 = vadd.s32 536870912, %v4107_v16  ;;  %v3958_v42 = vand.u32 31, %v3956_v14  ;;  %v3923_v51 = vcvt.s32.f32 %v3916_v54  ;;  %v10579_v1 = vand.u32 3, %v3930_v40 }
 0x2b8   :  { %v3921_v7 = vand.u32 2147483647, %v3920_v4  ;;  %v10585_v49 = vmul.f32 %v9323_v20, %v10178_v32  ;;  %v10587_v47 = vshrl.u32 %v3956_v14, 5  ;;  %v10589_v26 = vshll.u32 %v3952_v34, 8 }
 0x2b9   :  { %v10581_v61 = vshrl.u32 %v4108_v63, 30  ;;  %v3959_v38 = vsub.s32 32, %v3958_v42  ;;  %v4154_v17 = vshrl.u32 %v4153_v39, 23  ;;  %v3961_v6 = vshll.u32 %v9028_v18, %v3958_v42 }
 0x2ba   :  { %v3924_v46 = vmul.f32 %v3923_v51, %v3921_v7  ;;  %v3964_v0 = vshll.u32 %v9029_v29, %v3958_v42  ;;  %v3967_v44 = vshll.u32 %v9030_v31, %v3958_v42  ;;  %v3970_v19 = vshll.u32 %v9031_v33, %v3958_v42  ;;  %v10618_v51 = vpop.f32.mrb[10].mxu1 }
 0x2bb   :  { %v4110_v10 = vshll.u32 %v10581_v61, 30  ;;  %v3962_v15 = vshrl.u32 %v9029_v29, %v3959_v38  ;;  %v3965_v35 = vshrl.u32 %v9030_v31, %v3959_v38  ;;  %v3968_v32 = vshrl.u32 %v9031_v33, %v3959_v38 }
 0x2bc   :  { %v3925_v27 = vxor.u32 2147483648, %v3924_v46  ;;  %v3971_v58 = vshrl.u32 %v9032_v43, %v3959_v38  ;;  %v3974_v54 = vshrl.u32 %v9033_v52, %v3959_v38  ;;  %v3973_v34 = vshll.u32 %v9032_v43, %v3958_v42 }
 0x2bd   :  { %v10598_v13 = vsub.s32 %v4107_v16, %v4110_v10  ;;  %v3963_v12 = vor.u32 %v3962_v15, %v3961_v6  ;;  %v3966_v59 = vor.u32 %v3965_v35, %v3964_v0  ;;  %v3969_v53 = vor.u32 %v3968_v32, %v3967_v44 }
 0x2be   :  { %v3926_v36 = vsel %vm3843_vm0, %v3925_v27, %v3924_v46  ;;  %v3972_v4 = vor.u32 %v3971_v58, %v3970_v19  ;;  %v3975_v40 = vor.u32 %v3974_v54, %v3973_v34  ;;  %v4150_v39 = vand.u32 2147483647, %v10553_v9 }
 0x2bf   :  { %v3929_v14 = vsel %vm10531_vm8, %v10301_v56, %v3926_v36  ;;  %v4113_v16 = vsub.s32 0, %v10598_v13  ;;  %v8205_v63 = vadd.s32 4294967169, %v4154_v17  ;;  %vm3976_vm13 = vcmp.lt.s32.totalorder %v10587_v47, 1 }
 0x2c0   :  { %8795 = vcosq.f32 %v3929_v14  ;;  %vm3979_vm14 = vcmp.lt.s32.totalorder %v10587_v47, 4  ;;  %vm3977_vm15 = vcmp.lt.s32.totalorder %v10587_v47, 2  ;;  %vm3978_vm0 = vcmp.lt.s32.totalorder %v10587_v47, 3 }
 0x2c1   :  { %8797 = vsinq.f32 %v3929_v14  ;;  %v8202_v7 = vmin.u32 %v4113_v16, %v10598_v13  ;;  %v3984_v3 = vsel %vm3976_vm13, %v3963_v12, %v3966_v59  ;;  %v3985_v42 = vsel %vm3979_vm14, %v3972_v4, 920167782 }
 0x2c2   :  { %v3981_v10 = vsel %vm3979_vm14, %v3969_v53, 2102212464  ;;  %v3986_v17 = vsel %vm3978_vm0, %v3969_v53, %v3985_v42  ;;  %v3988_v6 = vsel %vm3976_vm13, %v3966_v59, %v3969_v53  ;;  %v4133_v15 = vsub.s32 4, %v10581_v61 }
 0x2c3   :  { %v4115_v46 = vclz %v8202_v7  ;;  %v3960_v0 = vshrl.u32 %v9028_v18, %v3959_v38  ;;  %v3987_v27 = vsel %vm3977_vm15, %v3984_v3, %v3986_v17  ;;  %v3989_v35 = vsel %vm3979_vm14, %v3975_v40, 1326507024 }
 0x2c4   :  { %v3990_v58 = vsel %vm3978_vm0, %v3972_v4, %v3989_v35  ;;  %v10631_v44 = vmul.u32.u64.low %v10589_v26, %v3987_v27  ;;  %v10632_v19 = vmul.u32.u64.high %v10589_v26, %v3987_v27, %v10631_v44  ;;  %vm10637_vm1 = vcmp.le.f32.partialorder %v4047_v45, 0.7853982 }
 0x2c5   :  { %v8203_v32 = vadd.s32 4294967294, %v4115_v46  ;;  %v3980_v38 = vsel %vm3976_vm13, %v3960_v0, %v3963_v12  ;;  %v3982_v36 = vsel %vm3978_vm0, %v3966_v59, %v3981_v10  ;;  %v3991_v34 = vsel %vm3977_vm15, %v3988_v6, %v3990_v58 }
 0x2c6   :  { %v4160_v14 = vadd.s32 1, %v8205_v63  ;;  %vm3933_vm2 = vweird.f32 %v10301_v56  ;;  %vm4049_vm3 = vcmp.lt.s32.totalorder %v10386_v30, 0  ;;  %vm3936_vm5 = vcmp.eq.s32.totalorder %v10579_v1, 0 }
 0x2c7   :  { %vm8204_vm4 = vcmp.lt.s32.totalorder %v8203_v32, 0  ;;  %v10650_v45 = vmul.u32.u64.low %v10589_v26, %v3991_v34  ;;  %v10651_v16 = vmul.u32.u64.high %v10589_v26, %v3991_v34, %v10650_v45  ;;  %v4103_v12 = vadd.s32 %v10540_v55, %v10546_v57 }
 0x2c8   :  { %v4118_v53 = vsel %vm8204_vm4, 0, %v8203_v32  ;;  %vm4161_vm6 = vcmp.gt.s32.totalorder %v4160_v14, 0  ;;  %v3983_v40 = vsel %vm3977_vm15, %v3980_v38, %v3982_v36  ;;  %v4002_v63 = vadd.s32 1, %v10632_v19 }
 0x2c9   :  { %v4119_v59 = vsub.s32 32, %v4118_v53  ;;  %v4123_v4 = vsub.s32 4294967266, %v4118_v53  ;;  %vm3939_vm7 = vcmp.eq.s32.totalorder %v10579_v1, 2  ;;  %v4134_v3 = vsel %vm4049_vm3, %v4133_v15, %v10581_v61 }
 0x2ca   :  { %v8796_v7 = vpop.eup %8795  ;;  %v4157_v42 = vand.u32 8388607, %v4150_v39  ;;  %v4162_v55 = vsel %vm4161_vm6, %v4160_v14, 0  ;;  %v4120_v10 = vshll.u32 %v10598_v13, %v4118_v53  ;;  %v3999_v0 = vmul.u32 %v10589_v26, %v3983_v40 }
 0x2cb   :  { %v8798_v57 = vpop.eup %8797  ;;  %v3940_v46 = vxor.u32 2147483648, %v8796_v7  ;;  %v4121_v17 = vshrl.u32 %v4103_v12, %v4119_v59  ;;  %v4124_v47 = vadd.s32 127, %v4123_v4  ;;  %vm4001_vm8 = vc.u32 %v10651_v16, %v10631_v44 }
 0x2cc   :  { %v3937_v6 = vxor.u32 2147483648, %v8798_v57  ;;  %v4164_v27 = vand.u32 31, %v4162_v55  ;;  %v4003_v15 = vsel %vm4001_vm8, %v4002_v63, %v10632_v19  ;;  %vm3935_vm10 = vcmp.lt.s32.totalorder %v10579_v1, 2 }
 0x2cd   :  { %v3941_v35 = vsel %vm3939_vm7, %v3940_v46, %v8798_v57  ;;  %v4122_v32 = vor.u32 %v4121_v17, %v4120_v10  ;;  %v4125_v61 = vshll.u32 %v4124_v47, 23  ;;  %v4004_v13 = vadd.s32 %v4003_v15, %v3999_v0 }
 0x2ce   :  { %v3938_v58 = vsel %vm3936_vm5, %v8796_v7, %v3937_v6  ;;  %v4165_v38 = vsub.s32 32, %v4164_v27  ;;  %v4136_v26 = vsel %vm10637_vm1, 0, %v4134_v3  ;;  %v10677_v14 = vadd.f32 %v9332_v23, %v10585_v49 }
 0x2cf   :  { %v3942_v36 = vsel %vm3935_vm10, %v3938_v58, %v3941_v35  ;;  %v4126_v34 = vor.u32 4788187, %v4125_v61  ;;  %v4005_v19 = vadd.s32 536870912, %v4004_v13  ;;  %v4158_v12 = vor.u32 8388608, %v4157_v42 }
 0x2d0   :  { %v3943_v45 = vsel %vm3933_vm2, nan, %v3942_v36  ;;  %v4168_v53 = vshrl.u32 %v9029_v29, %v4165_v38  ;;  %v4129_v59 = vcvt.s32.f32 %v4122_v32  ;;  %v4171_v4 = vshrl.u32 %v9030_v31, %v4165_v38 }
 0x2d1   :  { %7985 = vst [vmem:[#allocation2 + $0xc0] sm:$0xff] %v3943_v45  ;;  %v4127_v1 = vand.u32 2147483647, %v4126_v34  ;;  %v4174_v40 = vshrl.u32 %v9031_v33, %v4165_v38  ;;  %v10684_v63 = vshrl.u32 %v4005_v19, 30  ;;  %v4167_v7 = vshll.u32 %v9028_v18, %v4164_v27 }
 0x2d2   :  { %v4170_v49 = vshll.u32 %v9029_v29, %v4164_v27  ;;  %v4177_v56 = vshrl.u32 %v9032_v43, %v4165_v38  ;;  %v4163_v57 = vshrl.u32 %v4162_v55, 5  ;;  %v4173_v42 = vshll.u32 %v9030_v31, %v4164_v27 }
 0x2d3   :  { %v4130_v3 = vmul.f32 %v4129_v59, %v4127_v1  ;;  %v4176_v46 = vshll.u32 %v9031_v33, %v4164_v27  ;;  %v4007_v10 = vshll.u32 %v10684_v63, 30  ;;  %v4169_v17 = vor.u32 %v4168_v53, %v4167_v7 }
 0x2d4   :  { %v4172_v47 = vor.u32 %v4171_v4, %v4170_v49  ;;  %v4180_v6 = vshrl.u32 %v9033_v52, %v4165_v38  ;;  %v4175_v35 = vor.u32 %v4174_v40, %v4173_v42  ;;  %v4179_v61 = vshll.u32 %v9032_v43, %v4164_v27 }
 0x2d5   :  { %v4131_v0 = vxor.u32 2147483648, %v4130_v3  ;;  %v4178_v32 = vor.u32 %v4177_v56, %v4176_v46  ;;  %v10694_v15 = vand.u32 3, %v4136_v26  ;;  %v10696_v58 = vsub.s32 %v4004_v13, %v4007_v10 }
 0x2d6   :  { %v4198_v55 = vshll.u32 %v4158_v12, 8  ;;  %v4166_v34 = vshrl.u32 %v9028_v18, %v4165_v38  ;;  %v4181_v45 = vor.u32 %v4180_v6, %v4179_v61  ;;  %v4668_v19 = vand.u32 2139095040, %v10677_v14 }
 0x2d7   :  { %v4132_v36 = vsel %vm4049_vm3, %v4131_v0, %v4130_v3  ;;  %v4010_v1 = vsub.s32 0, %v10696_v58  ;;  %vm4182_vm9 = vcmp.lt.s32.totalorder %v4163_v57, 1  ;;  %vm4185_vm11 = vcmp.lt.s32.totalorder %v4163_v57, 4 }
 0x2d8   :  { %v4135_v53 = vsel %vm10637_vm1, %v10386_v30, %v4132_v36  ;;  %v4187_v27 = vsel %vm4185_vm11, %v4175_v35, 2102212464  ;;  %v4190_v13 = vsel %vm4182_vm9, %v4169_v17, %v4172_v47  ;;  %v4191_v26 = vsel %vm4185_vm11, %v4178_v32, 920167782 }
 0x2d9   :  { %8799 = vcosq.f32 %v4135_v53  ;;  %v8198_v12 = vmin.u32 %v4010_v1, %v10696_v58  ;;  %vm4183_vm12 = vcmp.lt.s32.totalorder %v4163_v57, 2  ;;  %vm4184_vm13 = vcmp.lt.s32.totalorder %v4163_v57, 3 }
 0x2da   :  { %8801 = vsinq.f32 %v4135_v53  ;;  %v4186_v38 = vsel %vm4182_vm9, %v4166_v34, %v4169_v17  ;;  %v4192_v59 = vsel %vm4184_vm13, %v4175_v35, %v4191_v26  ;;  %v4194_v4 = vsel %vm4182_vm9, %v4172_v47, %v4175_v35 }
 0x2db   :  { %v4195_v40 = vsel %vm4185_vm11, %v4181_v45, 1326507024  ;;  %v4012_v7 = vclz %v8198_v12  ;;  %v4188_v54 = vsel %vm4184_vm13, %v4172_v47, %v4187_v27  ;;  %v4193_v49 = vsel %vm4183_vm12, %v4190_v13, %v4192_v59 }
 0x2dc   :  { %v4196_v56 = vsel %vm4184_vm13, %v4178_v32, %v4195_v40  ;;  %v10709_v42 = vmul.u32.u64.low %v4198_v55, %v4193_v49  ;;  %v10710_v46 = vmul.u32.u64.high %v4198_v55, %v4193_v49, %v10709_v42  ;;  %v4669_v10 = vshrl.u32 %v4668_v19, 23  ;;  %v10725_v32 = vpop.f32.mrb[11].mxu0 }
 0x2dd   :  { %v4197_v3 = vsel %vm4183_vm12, %v4194_v4, %v4196_v56  ;;  %v8199_v6 = vadd.s32 4294967294, %v4012_v7  ;;  %v4030_v0 = vsub.s32 4, %v10684_v63  ;;  %vm4141_vm14 = vcmp.lt.s32.totalorder %v10694_v15, 2 }
 0x2de   :  { %v10714_v61 = vmul.u32.u64.low %v4198_v55, %v4197_v3  ;;  %v10715_v17 = vmul.u32.u64.high %v4198_v55, %v4197_v3, %v10714_v61  ;;  %vm10720_vm15 = vcmp.le.f32.partialorder %v3944_v25, 0.7853982  ;;  %vm3946_vm0 = vcmp.lt.s32.totalorder %v10465_v62, 0 }
 0x2df   :  { %v8225_v35 = vadd.s32 4294967169, %v4669_v10  ;;  %vm4142_vm1 = vcmp.eq.s32.totalorder %v10694_v15, 0  ;;  %vm4145_vm2 = vcmp.eq.s32.totalorder %v10694_v15, 2  ;;  %vm8200_vm3 = vcmp.lt.s32.totalorder %v8199_v6, 0 }
 0x2e0   :  { %v4189_v36 = vsel %vm4183_vm12, %v4186_v38, %v4188_v54  ;;  %v4015_v34 = vsel %vm8200_vm3, 0, %v8199_v6  ;;  %v4208_v45 = vadd.s32 1, %v10710_v46  ;;  %v4665_v25 = vand.u32 2147483647, %v10677_v14 }
 0x2e1   :  { %v4675_v19 = vadd.s32 1, %v8225_v35  ;;  %v4000_v53 = vadd.s32 %v10631_v44, %v10651_v16  ;;  %v4016_v1 = vsub.s32 32, %v4015_v34  ;;  %v4020_v27 = vsub.s32 4294967266, %v4015_v34 }
 0x2e2   :  { %v4031_v13 = vsel %vm3946_vm0, %v4030_v0, %v10684_v63  ;;  %v4017_v12 = vshll.u32 %v10696_v58, %v4015_v34  ;;  %v4205_v57 = vmul.u32 %v4198_v55, %v4189_v36  ;;  %vm4207_vm4 = vc.u32 %v10715_v17, %v10709_v42 }
 0x2e3   :  { %v8800_v26 = vpop.eup %8799  ;;  %vm4676_vm5 = vcmp.gt.s32.totalorder %v4675_v19, 0  ;;  %v4018_v4 = vshrl.u32 %v4000_v53, %v4016_v1  ;;  %v4021_v40 = vadd.s32 127, %v4020_v27  ;;  %v4209_v44 = vsel %vm4207_vm4, %v4208_v45, %v10710_v46 }
 0x2e4   :  { %v8802_v38 = vpop.eup %8801  ;;  %v4146_v59 = vxor.u32 2147483648, %v8800_v26  ;;  %v4210_v7 = vadd.s32 %v4209_v44, %v4205_v57  ;;  %v4672_v54 = vand.u32 8388607, %v4665_v25  ;;  %v4677_v63 = vsel %vm4676_vm5, %v4675_v19, 0 }
 0x2e5   :  { %v4143_v16 = vxor.u32 2147483648, %v8802_v38  ;;  %v4019_v55 = vor.u32 %v4018_v4, %v4017_v12  ;;  %v4022_v49 = vshll.u32 %v4021_v40, 23  ;;  %v4033_v56 = vsel %vm10720_vm15, 0, %v4031_v13 }
 0x2e6   :  { %v4147_v58 = vsel %vm4145_vm2, %v4146_v59, %v8802_v38  ;;  %v4211_v10 = vadd.s32 536870912, %v4210_v7  ;;  %v4679_v6 = vand.u32 31, %v4677_v63  ;;  %v1203_v46 = vmul.f32 %v9326_v21, %v10253_v37 }
 0x2e7   :  { %v4144_v3 = vsel %vm4142_vm1, %v8800_v26, %v4143_v16  ;;  %vm4139_vm6 = vweird.f32 %v10386_v30  ;;  %v4023_v61 = vor.u32 4788187, %v4022_v49  ;;  %v4026_v19 = vcvt.s32.f32 %v4019_v55 }
 0x2e8   :  { %v4148_v0 = vsel %vm4141_vm14, %v4144_v3, %v4147_v58  ;;  %v10754_v36 = vshrl.u32 %v4211_v10, 30  ;;  %v4680_v34 = vsub.s32 32, %v4679_v6  ;;  %v10756_v53 = vand.u32 3, %v4033_v56 }
 0x2e9   :  { %v4149_v35 = vsel %vm4139_vm6, nan, %v4148_v0  ;;  %v4024_v45 = vand.u32 2147483647, %v4023_v61  ;;  %v4673_v1 = vor.u32 8388608, %v4672_v54  ;;  %v4682_v37 = vshll.u32 %v9028_v18, %v4679_v6 }
 0x2ea   :  { %7987 = vst [vmem:[#allocation2 + $0xd0] sm:$0xff] %v4149_v35  ;;  %v4213_v27 = vshll.u32 %v10754_v36, 30  ;;  %v4683_v30 = vshrl.u32 %v9029_v29, %v4680_v34  ;;  %v10762_v15 = vadd.f32 %v9335_v24, %v1203_v46  ;;  %v4686_v26 = vshrl.u32 %v9030_v31, %v4680_v34 }
 0x2eb   :  { %v4027_v13 = vmul.f32 %v4026_v19, %v4024_v45  ;;  %v4689_v12 = vshrl.u32 %v9031_v33, %v4680_v34  ;;  %v4692_v57 = vshrl.u32 %v9032_v43, %v4680_v34  ;;  %v4678_v59 = vshrl.u32 %v4677_v63, 5 }
 0x2ec   :  { %v10767_v38 = vsub.s32 %v4210_v7, %v4213_v27  ;;  %v4685_v4 = vshll.u32 %v9029_v29, %v4679_v6  ;;  %v4688_v40 = vshll.u32 %v9030_v31, %v4679_v6  ;;  %v4684_v16 = vor.u32 %v4683_v30, %v4682_v37  ;;  %v10788_v30 = vpop.f32.mrb[11].mxu1 }
 0x2ed   :  { %v4028_v44 = vxor.u32 2147483648, %v4027_v13  ;;  %v4691_v54 = vshll.u32 %v9031_v33, %v4679_v6  ;;  %v10772_v58 = vshll.u32 %v4673_v1, 8  ;;  %v4695_v3 = vshrl.u32 %v9033_v52, %v4680_v34 }
 0x2ee   :  { %v4216_v55 = vsub.s32 0, %v10767_v38  ;;  %v4687_v49 = vor.u32 %v4686_v26, %v4685_v4  ;;  %v4690_v56 = vor.u32 %v4689_v12, %v4688_v40  ;;  %v4694_v10 = vshll.u32 %v9032_v43, %v4679_v6 }
 0x2ef   :  { %v4029_v7 = vsel %vm3946_vm0, %v4028_v44, %v4027_v13  ;;  %v4693_v63 = vor.u32 %v4692_v57, %v4691_v54  ;;  %v4874_v46 = vand.u32 2139095040, %v10762_v15  ;;  %v4681_v35 = vshrl.u32 %v9028_v18, %v4680_v34 }
 0x2f0   :  { %v4032_v0 = vsel %vm10720_vm15, %v10465_v62, %v4029_v7  ;;  %v8206_v61 = vmin.u32 %v4216_v55, %v10767_v38  ;;  %vm4697_vm7 = vcmp.lt.s32.totalorder %v4678_v59, 1  ;;  %v4696_v45 = vor.u32 %v4695_v3, %v4694_v10 }
 0x2f1   :  { %8803 = vcosq.f32 %v4032_v0  ;;  %vm4698_vm8 = vcmp.lt.s32.totalorder %v4678_v59, 2  ;;  %vm4700_vm10 = vcmp.lt.s32.totalorder %v4678_v59, 4  ;;  %vm4152_vm9 = vcmp.lt.s32.totalorder %v10553_v9, 0 }
 0x2f2   :  { %8805 = vsinq.f32 %v4032_v0  ;;  %v4218_v19 = vclz %v8206_v61  ;;  %v4702_v6 = vsel %vm4700_vm10, %v4690_v56, 2102212464  ;;  %v4705_v1 = vsel %vm4697_vm7, %v4684_v16, %v4687_v49 }
 0x2f3   :  { %vm4699_vm11 = vcmp.lt.s32.totalorder %v4678_v59, 3  ;;  %v4706_v27 = vsel %vm4700_vm10, %v4693_v63, 920167782  ;;  %v4709_v47 = vsel %vm4697_vm7, %v4687_v49, %v4690_v56  ;;  %v4710_v37 = vsel %vm4700_vm10, %v4696_v45, 1326507024 }
 0x2f4   :  { %v8207_v34 = vadd.s32 4294967294, %v4218_v19  ;;  %v4701_v13 = vsel %vm4697_vm7, %v4681_v35, %v4684_v16  ;;  %v4707_v26 = vsel %vm4699_vm11, %v4690_v56, %v4706_v27  ;;  %v4711_v12 = vsel %vm4699_vm11, %v4693_v63, %v4710_v37 }
 0x2f5   :  { %v4703_v57 = vsel %vm4699_vm11, %v4687_v49, %v4702_v6  ;;  %v4708_v4 = vsel %vm4698_vm8, %v4705_v1, %v4707_v26  ;;  %v4712_v40 = vsel %vm4698_vm8, %v4709_v47, %v4711_v12  ;;  %v4875_v44 = vshrl.u32 %v4874_v46, 23 }
 0x2f6   :  { %vm10795_vm12 = vcmp.le.f32.partialorder %v4150_v39, 0.7853982  ;;  %vm8208_vm13 = vcmp.lt.s32.totalorder %v8207_v34, 0  ;;  %v4236_v55 = vsub.s32 4, %v10754_v36  ;;  %vm4038_vm14 = vcmp.lt.s32.totalorder %v10756_v53, 2 }
 0x2f7   :  { %v10801_v3 = vmul.u32.u64.low %v10772_v58, %v4712_v40  ;;  %v10802_v16 = vmul.u32.u64.high %v10772_v58, %v4712_v40, %v10801_v3  ;;  %v4221_v49 = vsel %vm8208_vm13, 0, %v8207_v34  ;;  %v8233_v63 = vadd.s32 4294967169, %v4875_v44 }
 0x2f8   :  { %v10806_v56 = vmul.u32.u64.low %v10772_v58, %v4708_v4  ;;  %v10807_v7 = vmul.u32.u64.high %v10772_v58, %v4708_v4, %v10806_v56  ;;  %vm4036_vm15 = vweird.f32 %v10465_v62  ;;  %v4206_v39 = vadd.s32 %v10709_v42, %v10715_v17 }
 0x2f9   :  { %v4222_v10 = vsub.s32 32, %v4221_v49  ;;  %v4226_v46 = vsub.s32 4294967266, %v4221_v49  ;;  %v4704_v0 = vsel %vm4698_vm8, %v4701_v13, %v4703_v57  ;;  %vm4039_vm0 = vcmp.eq.s32.totalorder %v10756_v53, 0 }
 0x2fa   :  { %vm4042_vm1 = vcmp.eq.s32.totalorder %v10756_v53, 2  ;;  %v4871_v61 = vand.u32 2147483647, %v10762_v15  ;;  %v4881_v35 = vadd.s32 1, %v8233_v63  ;;  %v4223_v45 = vshll.u32 %v10767_v38, %v4221_v49 }
 0x2fb   :  { %v4224_v19 = vshrl.u32 %v4206_v39, %v4222_v10  ;;  %v4227_v6 = vadd.s32 127, %v4226_v46  ;;  %vm4722_vm2 = vc.u32 %v10802_v16, %v10806_v56  ;;  %v8804_v1 = vpop.eup %8803  ;;  %v4237_v42 = vsel %vm4152_vm9, %v4236_v55, %v10754_v36 }
 0x2fc   :  { %v4720_v17 = vmul.u32 %v10772_v58, %v4704_v0  ;;  %v4723_v59 = vadd.s32 1, %v10807_v7  ;;  %vm4882_vm3 = vcmp.gt.s32.totalorder %v4881_v35, 0  ;;  %v8806_v27 = vpop.eup %8805  ;;  %v4043_v47 = vxor.u32 2147483648, %v8804_v1 }
 0x2fd   :  { %v4225_v37 = vor.u32 %v4224_v19, %v4223_v45  ;;  %v4228_v34 = vshll.u32 %v4227_v6, 23  ;;  %v4883_v38 = vsel %vm4882_vm3, %v4881_v35, 0  ;;  %v4040_v13 = vxor.u32 2147483648, %v8806_v27 }
 0x2fe   :  { %v4724_v26 = vsel %vm4722_vm2, %v4723_v59, %v10807_v7  ;;  %v4885_v12 = vand.u32 31, %v4883_v38  ;;  %v1202_v57 = vmul.f32 %v9329_v22, %v10335_v41  ;;  %v4044_v36 = vsel %vm4042_vm1, %v4043_v47, %v8806_v27 }
 0x2ff   :  { %v4229_v4 = vor.u32 4788187, %v4228_v34  ;;  %v4725_v58 = vadd.s32 %v4724_v26, %v4720_v17  ;;  %v10832_v40 = vmul.f32 %v9369_v48, %v10433_v2  ;;  %v4041_v44 = vsel %vm4039_vm0, %v8804_v1, %v4040_v13 }
 0x300   :  { %v4239_v55 = vsel %vm10795_vm12, 0, %v4237_v42  ;;  %v4878_v3 = vand.u32 8388607, %v4871_v61  ;;  %v4886_v49 = vsub.s32 32, %v4885_v12  ;;  %v4045_v41 = vsel %vm4038_vm14, %v4041_v44, %v4044_v36 }
 0x301   :  { %v4230_v7 = vand.u32 2147483647, %v4229_v4  ;;  %v4232_v63 = vcvt.s32.f32 %v4225_v37  ;;  %v4726_v39 = vadd.s32 536870912, %v4725_v58  ;;  %v4046_v2 = vsel %vm4036_vm15, nan, %v4045_v41 }
 0x302   :  { %v4888_v10 = vshll.u32 %v9028_v18, %v4885_v12  ;;  %v4889_v46 = vshrl.u32 %v9029_v29, %v4886_v49  ;;  %v4892_v0 = vshrl.u32 %v9030_v31, %v4886_v49  ;;  %7986 = vst [vmem:[#allocation2 + $0xc8] sm:$0xff] %v4046_v2  ;;  %v4891_v19 = vshll.u32 %v9029_v29, %v4885_v12 }
 0x303   :  { %v4233_v35 = vmul.f32 %v4232_v63, %v4230_v7  ;;  %v10847_v45 = vshrl.u32 %v4726_v39, 30  ;;  %v4895_v53 = vshrl.u32 %v9031_v33, %v4886_v49  ;;  %v4884_v6 = vshrl.u32 %v4883_v38, 5 }
 0x304   :  { %v4894_v1 = vshll.u32 %v9030_v31, %v4885_v12  ;;  %v4897_v62 = vshll.u32 %v9031_v33, %v4885_v12  ;;  %v4898_v42 = vshrl.u32 %v9032_v43, %v4886_v49  ;;  %v4890_v27 = vor.u32 %v4889_v46, %v4888_v10 }
 0x305   :  { %v4234_v17 = vxor.u32 2147483648, %v4233_v35  ;;  %v4728_v59 = vshll.u32 %v10847_v45, 30  ;;  %v4893_v47 = vor.u32 %v4892_v0, %v4891_v19  ;;  %v4900_v13 = vshll.u32 %v9032_v43, %v4885_v12 }
 0x306   :  { %v4896_v37 = vor.u32 %v4895_v53, %v4894_v1  ;;  %v4899_v34 = vor.u32 %v4898_v42, %v4897_v62  ;;  %v4901_v26 = vshrl.u32 %v9033_v52, %v4886_v49  ;;  %v10859_v36 = vand.u32 3, %v4239_v55 }
 0x307   :  { %v4235_v38 = vsel %vm4152_vm9, %v4234_v17, %v4233_v35  ;;  %v10861_v4 = vsub.s32 %v4725_v58, %v4728_v59  ;;  %v4879_v44 = vor.u32 8388608, %v4878_v3  ;;  %v4887_v7 = vshrl.u32 %v9028_v18, %v4886_v49 }
 0x308   :  { %v4238_v41 = vsel %vm10795_vm12, %v10553_v9, %v4235_v38  ;;  %v4902_v63 = vor.u32 %v4901_v26, %v4900_v13  ;;  %v10868_v39 = vadd.f32 %v9339_v28, %v1202_v57  ;;  %vm4903_vm4 = vcmp.lt.s32.totalorder %v4884_v6, 1 }
 0x309   :  { %8807 = vcosq.f32 %v4238_v41  ;;  %v4731_v12 = vsub.s32 0, %v10861_v4  ;;  %vm4906_vm5 = vcmp.lt.s32.totalorder %v4884_v6, 4  ;;  %v4911_v58 = vsel %vm4903_vm4, %v4890_v27, %v4893_v47 }
 0x30a   :  { %8809 = vsinq.f32 %v4238_v41  ;;  %v4908_v55 = vsel %vm4906_vm5, %v4896_v37, 2102212464  ;;  %v4912_v2 = vsel %vm4906_vm5, %v4899_v34, 920167782  ;;  %vm4904_vm6 = vcmp.lt.s32.totalorder %v4884_v6, 2 }
 0x30b   :  { %v8226_v3 = vmin.u32 %v4731_v12, %v10861_v4  ;;  %vm4905_vm7 = vcmp.lt.s32.totalorder %v4884_v6, 3  ;;  %v4919_v54 = vshll.u32 %v4879_v44, 8  ;;  %v4907_v10 = vsel %vm4903_vm4, %v4887_v7, %v4890_v27 }
 0x30c   :  { %v4913_v49 = vsel %vm4905_vm7, %v4896_v37, %v4912_v2  ;;  %v4915_v46 = vsel %vm4903_vm4, %v4893_v47, %v4896_v37  ;;  %v4916_v0 = vsel %vm4906_vm5, %v4902_v63, 1326507024  ;;  %v4909_v35 = vsel %vm4905_vm7, %v4893_v47, %v4908_v55 }
 0x30d   :  { %v4733_v57 = vclz %v8226_v3  ;;  %v4914_v19 = vsel %vm4904_vm6, %v4911_v58, %v4913_v49  ;;  %v4917_v53 = vsel %vm4905_vm7, %v4899_v34, %v4916_v0  ;;  %vm4667_vm8 = vcmp.lt.s32.totalorder %v10677_v14, 0 }
 0x30e   :  { %v4918_v1 = vsel %vm4904_vm6, %v4915_v46, %v4917_v53  ;;  %v10874_v62 = vmul.u32.u64.low %v4919_v54, %v4914_v19  ;;  %v10875_v42 = vmul.u32.u64.high %v4919_v54, %v4914_v19, %v10874_v62  ;;  %vm4242_vm10 = vweird.f32 %v10553_v9  ;;  %v10901_v46 = vpop.f32.mrb[12].mxu0 }
 0x30f   :  { %v8227_v17 = vadd.s32 4294967294, %v4733_v57  ;;  %v10879_v59 = vmul.u32.u64.low %v4919_v54, %v4918_v1  ;;  %v10880_v13 = vmul.u32.u64.high %v4919_v54, %v4918_v1, %v10879_v59  ;;  %vm4244_vm9 = vcmp.lt.s32.totalorder %v10859_v36, 2 }
 0x310   :  { %vm4245_vm11 = vcmp.eq.s32.totalorder %v10859_v36, 0  ;;  %v4910_v27 = vsel %vm4904_vm6, %v4907_v10, %v4909_v35  ;;  %v4771_v47 = vand.u32 2139095040, %v10868_v39  ;;  %vm4248_vm12 = vcmp.eq.s32.totalorder %v10859_v36, 2 }
 0x311   :  { %v4721_v37 = vadd.s32 %v10806_v56, %v10802_v16  ;;  %vm8228_vm13 = vcmp.lt.s32.totalorder %v8227_v17, 0  ;;  %v10892_v34 = vadd.f32 %v9380_v60, %v10832_v40  ;;  %v4929_v38 = vadd.s32 1, %v10875_v42 }
 0x312   :  { %v4736_v26 = vsel %vm8228_vm13, 0, %v8227_v17  ;;  %v4768_v44 = vand.u32 2147483647, %v10868_v39  ;;  %v4772_v41 = vshrl.u32 %v4771_v47, 23  ;;  %v4751_v12 = vsub.s32 4, %v10847_v45  ;;  %v10963_v17 = vpop.f32.mrb[12].mxu1 }
 0x313   :  { %v8808_v6 = vpop.eup %8807  ;;  %v4737_v7 = vsub.s32 32, %v4736_v26  ;;  %v4741_v63 = vsub.s32 4294967266, %v4736_v26  ;;  %v4926_v55 = vmul.u32 %v4919_v54, %v4910_v27  ;;  %v4738_v16 = vshll.u32 %v10861_v4, %v4736_v26 }
 0x314   :  { %v8810_v58 = vpop.eup %8809  ;;  %v4249_v2 = vxor.u32 2147483648, %v8808_v6  ;;  %vm4928_vm14 = vc.u32 %v10880_v13, %v10874_v62  ;;  %v8229_v56 = vadd.s32 4294967169, %v4772_v41  ;;  %v4775_v54 = vand.u32 8388607, %v4768_v44 }
 0x315   :  { %v4246_v40 = vxor.u32 2147483648, %v8810_v58  ;;  %v4739_v3 = vshrl.u32 %v4721_v37, %v4737_v7  ;;  %v4742_v10 = vadd.s32 127, %v4741_v63  ;;  %v4930_v49 = vsel %vm4928_vm14, %v4929_v38, %v10875_v42 }
 0x316   :  { %v4250_v0 = vsel %vm4248_vm12, %v4249_v2, %v8810_v58  ;;  %v4931_v57 = vadd.s32 %v4930_v49, %v4926_v55  ;;  %v4778_v35 = vadd.s32 1, %v8229_v56  ;;  %v4752_v1 = vsel %vm4667_vm8, %v4751_v12, %v10847_v45 }
 0x317   :  { %v4247_v4 = vsel %vm4245_vm11, %v8808_v6, %v4246_v40  ;;  %v4740_v19 = vor.u32 %v4739_v3, %v4738_v16  ;;  %v4743_v53 = vshll.u32 %v4742_v10, 23  ;;  %vm10916_vm15 = vcmp.le.f32.partialorder %v4665_v25, 0.7853982 }
 0x318   :  { %v4251_v42 = vsel %vm4244_vm9, %v4247_v4, %v4250_v0  ;;  %v4932_v59 = vadd.s32 536870912, %v4931_v57  ;;  %vm4779_vm0 = vcmp.gt.s32.totalorder %v4778_v35, 0  ;;  %v4977_v26 = vand.u32 2139095040, %v10892_v34 }
 0x319   :  { %v4252_v27 = vsel %vm4242_vm10, nan, %v4251_v42  ;;  %v4744_v47 = vor.u32 4788187, %v4743_v53  ;;  %v4780_v37 = vsel %vm4779_vm0, %v4778_v35, 0  ;;  %v4754_v45 = vsel %vm10916_vm15, 0, %v4752_v1 }
 0x31a   :  { %7988 = vst [vmem:[#allocation2 + $0xd8] sm:$0xff] %v4252_v27  ;;  %v10925_v36 = vshrl.u32 %v4932_v59, 30  ;;  %v4776_v38 = vor.u32 8388608, %v4775_v54  ;;  %v4782_v25 = vand.u32 31, %v4780_v37  ;;  %v4747_v6 = vcvt.s32.f32 %v4740_v19 }
 0x31b   :  { %v4745_v41 = vand.u32 2147483647, %v4744_v47  ;;  %v10930_v9 = vmul.f32 %v9323_v20, %v10511_v50  ;;  %v10932_v55 = vand.u32 3, %v4754_v45  ;;  %v4974_v58 = vand.u32 2147483647, %v10892_v34 }
 0x31c   :  { %v4934_v7 = vshll.u32 %v10925_v36, 30  ;;  %v4783_v63 = vsub.s32 32, %v4782_v25  ;;  %v4978_v2 = vshrl.u32 %v4977_v26, 23  ;;  %v10937_v56 = vshrl.u32 %v4780_v37, 5 }
 0x31d   :  { %v4748_v12 = vmul.f32 %v4747_v6, %v4745_v41  ;;  %v10940_v3 = vshll.u32 %v4776_v38, 8  ;;  %v4785_v49 = vshll.u32 %v9028_v18, %v4782_v25  ;;  %v4788_v35 = vshll.u32 %v9029_v29, %v4782_v25 }
 0x31e   :  { %v10935_v16 = vsub.s32 %v4931_v57, %v4934_v7  ;;  %v4786_v40 = vshrl.u32 %v9029_v29, %v4783_v63  ;;  %v4789_v50 = vshrl.u32 %v9030_v31, %v4783_v63  ;;  %v4792_v0 = vshrl.u32 %v9031_v33, %v4783_v63 }
 0x31f   :  { %v4749_v10 = vxor.u32 2147483648, %v4748_v12  ;;  %v4791_v57 = vshll.u32 %v9030_v31, %v4782_v25  ;;  %v4795_v4 = vshrl.u32 %v9032_v43, %v4783_v63  ;;  %v4794_v1 = vshll.u32 %v9031_v33, %v4782_v25 }
 0x320   :  { %v4937_v54 = vsub.s32 0, %v10935_v16  ;;  %v4787_v53 = vor.u32 %v4786_v40, %v4785_v49  ;;  %v8237_v42 = vadd.s32 4294967169, %v4978_v2  ;;  %v4790_v47 = vor.u32 %v4789_v50, %v4788_v35 }
 0x321   :  { %v4750_v19 = vsel %vm4667_vm8, %v4749_v10, %v4748_v12  ;;  %v4793_v37 = vor.u32 %v4792_v0, %v4791_v57  ;;  %v4796_v26 = vor.u32 %v4795_v4, %v4794_v1  ;;  %v4797_v45 = vshll.u32 %v9032_v43, %v4782_v25 }
 0x322   :  { %v4753_v59 = vsel %vm10916_vm15, %v10677_v14, %v4750_v19  ;;  %v8234_v27 = vmin.u32 %v4937_v54, %v10935_v16  ;;  %v4798_v38 = vshrl.u32 %v9033_v52, %v4783_v63  ;;  %v4784_v6 = vshrl.u32 %v9028_v18, %v4783_v63 }
 0x323   :  { %8811 = vcosq.f32 %v4753_v59  ;;  %vm4800_vm1 = vcmp.lt.s32.totalorder %v10937_v56, 1  ;;  %vm4801_vm2 = vcmp.lt.s32.totalorder %v10937_v56, 2  ;;  %vm4802_vm3 = vcmp.lt.s32.totalorder %v10937_v56, 3 }
 0x324   :  { %8813 = vsinq.f32 %v4753_v59  ;;  %v4939_v41 = vclz %v8234_v27  ;;  %v4799_v7 = vor.u32 %v4798_v38, %v4797_v45  ;;  %vm4803_vm4 = vcmp.lt.s32.totalorder %v10937_v56, 4 }
 0x325   :  { %v4805_v2 = vsel %vm4803_vm4, %v4793_v37, 2102212464  ;;  %v4808_v25 = vsel %vm4800_vm1, %v4787_v53, %v4790_v47  ;;  %v4809_v40 = vsel %vm4803_vm4, %v4796_v26, 920167782  ;;  %vm4873_vm5 = vcmp.lt.s32.totalorder %v10762_v15, 0 }
 0x326   :  { %v8235_v12 = vadd.s32 4294967294, %v4939_v41  ;;  %v4804_v10 = vsel %vm4800_vm1, %v4784_v6, %v4787_v53  ;;  %v4810_v49 = vsel %vm4802_vm3, %v4793_v37, %v4809_v40  ;;  %v4812_v63 = vsel %vm4800_vm1, %v4790_v47, %v4793_v37 }
 0x327   :  { %v4813_v50 = vsel %vm4803_vm4, %v4799_v7, 1326507024  ;;  %v4806_v0 = vsel %vm4802_vm3, %v4790_v47, %v4805_v2  ;;  %v4811_v54 = vsel %vm4801_vm2, %v4808_v25, %v4810_v49  ;;  %vm4757_vm7 = vweird.f32 %v10677_v14 }
 0x328   :  { %vm8236_vm6 = vcmp.lt.s32.totalorder %v8235_v12, 0  ;;  %v4814_v35 = vsel %vm4802_vm3, %v4796_v26, %v4813_v50  ;;  %v10971_v19 = vmul.u32.u64.low %v10940_v3, %v4811_v54  ;;  %v10972_v1 = vmul.u32.u64.high %v10940_v3, %v4811_v54, %v10971_v19 }
 0x329   :  { %v4942_v57 = vsel %vm8236_vm6, 0, %v8235_v12  ;;  %v4815_v4 = vsel %vm4801_vm2, %v4812_v63, %v4814_v35  ;;  %vm4759_vm8 = vcmp.lt.s32.totalorder %v10932_v55, 2  ;;  %vm10979_vm10 = vcmp.le.f32.partialorder %v4871_v61, 0.7853982 }
 0x32a   :  { %v4927_v59 = vadd.s32 %v10874_v62, %v10880_v13  ;;  %v4943_v27 = vsub.s32 32, %v4942_v57  ;;  %v4947_v47 = vsub.s32 4294967266, %v4942_v57  ;;  %v4957_v37 = vsub.s32 4, %v10925_v36 }
 0x32b   :  { %v10987_v26 = vmul.u32.u64.low %v10940_v3, %v4815_v4  ;;  %v10988_v45 = vmul.u32.u64.high %v10940_v3, %v4815_v4, %v10987_v26  ;;  %v4984_v38 = vadd.s32 1, %v8237_v42  ;;  %v4944_v41 = vshll.u32 %v10935_v16, %v4942_v57 }
 0x32c   :  { %v4945_v6 = vshrl.u32 %v4927_v59, %v4943_v27  ;;  %v4948_v7 = vadd.s32 127, %v4947_v47  ;;  %v4807_v61 = vsel %vm4801_vm2, %v4804_v10, %v4806_v0  ;;  %vm4760_vm9 = vcmp.eq.s32.totalorder %v10932_v55, 0 }
 0x32d   :  { %v8812_v12 = vpop.eup %8811  ;;  %v4826_v62 = vadd.s32 1, %v10972_v1  ;;  %v4981_v13 = vand.u32 8388607, %v4974_v58  ;;  %vm4985_vm11 = vcmp.gt.s32.totalorder %v4984_v38, 0  ;;  %vm4763_vm12 = vcmp.eq.s32.totalorder %v10932_v55, 2 }
 0x32e   :  { %v8814_v2 = vpop.eup %8813  ;;  %v4764_v25 = vxor.u32 2147483648, %v8812_v12  ;;  %v4946_v40 = vor.u32 %v4945_v6, %v4944_v41  ;;  %v4949_v42 = vshll.u32 %v4948_v7, 23  ;;  %v4986_v49 = vsel %vm4985_vm11, %v4984_v38, 0 }
 0x32f   :  { %v4761_v16 = vxor.u32 2147483648, %v8814_v2  ;;  %v4823_v56 = vmul.u32 %v10940_v3, %v4807_v61  ;;  %vm4825_vm13 = vc.u32 %v10988_v45, %v10971_v19  ;;  %v4958_v50 = vsel %vm4873_vm5, %v4957_v37, %v10925_v36 }
 0x330   :  { %v4765_v10 = vsel %vm4763_vm12, %v4764_v25, %v8814_v2  ;;  %v4950_v63 = vor.u32 4788187, %v4949_v42  ;;  %v4827_v0 = vsel %vm4825_vm13, %v4826_v62, %v10972_v1  ;;  %v4982_v57 = vor.u32 8388608, %v4981_v13 }
 0x331   :  { %v4762_v54 = vsel %vm4760_vm9, %v8812_v12, %v4761_v16  ;;  %v4828_v35 = vadd.s32 %v4827_v0, %v4823_v56  ;;  %v4988_v4 = vand.u32 31, %v4986_v49  ;;  %v4953_v27 = vcvt.s32.f32 %v4946_v40 }
 0x332   :  { %v4766_v3 = vsel %vm4759_vm8, %v4762_v54, %v4765_v10  ;;  %v4951_v59 = vand.u32 2147483647, %v4950_v63  ;;  %v11011_v47 = vadd.f32 %v9332_v23, %v10930_v9  ;;  %v4960_v1 = vsel %vm10979_vm10, 0, %v4958_v50 }
 0x333   :  { %v4767_v36 = vsel %vm4757_vm7, nan, %v4766_v3  ;;  %v4829_v37 = vadd.s32 536870912, %v4828_v35  ;;  %v4989_v26 = vsub.s32 32, %v4988_v4  ;;  %v4987_v41 = vshrl.u32 %v4986_v49, 5 }
 0x334   :  { %7993 = vst [vmem:[#allocation2 + $0x100] sm:$0xff] %v4767_v36  ;;  %v4954_v38 = vmul.f32 %v4953_v27, %v4951_v59  ;;  %v4991_v55 = vshll.u32 %v9028_v18, %v4988_v4  ;;  %v4994_v6 = vshll.u32 %v9029_v29, %v4988_v4  ;;  %v4997_v14 = vshll.u32 %v9030_v31, %v4988_v4 }
 0x335   :  { %v4830_v7 = vshrl.u32 %v4829_v37, 30  ;;  %v4992_v61 = vshrl.u32 %v9029_v29, %v4989_v26  ;;  %v4995_v9 = vshrl.u32 %v9030_v31, %v4989_v26  ;;  %v4998_v62 = vshrl.u32 %v9031_v33, %v4989_v26 }
 0x336   :  { %v4955_v12 = vxor.u32 2147483648, %v4954_v38  ;;  %v5000_v13 = vshll.u32 %v9031_v33, %v4988_v4  ;;  %v5001_v2 = vshrl.u32 %v9032_v43, %v4989_v26  ;;  %v5003_v49 = vshll.u32 %v9032_v43, %v4988_v4 }
 0x337   :  { %v4831_v25 = vshll.u32 %v4830_v7, 30  ;;  %v4993_v40 = vor.u32 %v4992_v61, %v4991_v55  ;;  %v4996_v42 = vor.u32 %v4995_v9, %v4994_v6  ;;  %v4999_v56 = vor.u32 %v4998_v62, %v4997_v14  ;;  %v11047_v9 = vpop.f32.mrb[13].mxu0 }
 0x338   :  { %v4956_v16 = vsel %vm4873_vm5, %v4955_v12, %v4954_v38  ;;  %v5002_v10 = vor.u32 %v5001_v2, %v5000_v13  ;;  %v5004_v63 = vshrl.u32 %v9033_v52, %v4989_v26  ;;  %v11032_v0 = vand.u32 3, %v4960_v1 }
 0x339   :  { %v4959_v50 = vsel %vm10979_vm10, %v10762_v15, %v4956_v16  ;;  %vm4770_vm14 = vcmp.lt.s32.totalorder %v10868_v39, 0  ;;  %v11035_v54 = vsub.s32 %v4828_v35, %v4831_v25  ;;  %v5022_v4 = vshll.u32 %v4982_v57, 8 }
 0x33a   :  { %8815 = vcosq.f32 %v4959_v50  ;;  %v5005_v3 = vor.u32 %v5004_v63, %v5003_v49  ;;  %v5492_v59 = vand.u32 2139095040, %v11011_v47  ;;  %vm11040_vm15 = vcmp.le.f32.partialorder %v4768_v44, 0.7853982 }
 0x33b   :  { %8817 = vsinq.f32 %v4959_v50  ;;  %v4834_v53 = vsub.s32 0, %v11035_v54  ;;  %vm5006_vm0 = vcmp.lt.s32.totalorder %v4987_v41, 1  ;;  %vm5009_vm1 = vcmp.lt.s32.totalorder %v4987_v41, 4 }
 0x33c   :  { %v4990_v36 = vshrl.u32 %v9028_v18, %v4989_v26  ;;  %v5011_v35 = vsel %vm5009_vm1, %v4999_v56, 2102212464  ;;  %v5014_v1 = vsel %vm5006_vm0, %v4993_v40, %v4996_v42  ;;  %v5015_v37 = vsel %vm5009_vm1, %v5002_v10, 920167782 }
 0x33d   :  { %v8230_v57 = vmin.u32 %v4834_v53, %v11035_v54  ;;  %v4854_v38 = vsub.s32 4, %v4830_v7  ;;  %vm5008_vm2 = vcmp.lt.s32.totalorder %v4987_v41, 3  ;;  %v5018_v55 = vsel %vm5006_vm0, %v4996_v42, %v4999_v56 }
 0x33e   :  { %vm5007_vm3 = vcmp.lt.s32.totalorder %v4987_v41, 2  ;;  %v5010_v6 = vsel %vm5006_vm0, %v4990_v36, %v4993_v40  ;;  %v5016_v44 = vsel %vm5008_vm2, %v4999_v56, %v5015_v37  ;;  %v5019_v61 = vsel %vm5009_vm1, %v5005_v3, 1326507024 }
 0x33f   :  { %v4836_v14 = vclz %v8230_v57  ;;  %v5012_v12 = vsel %vm5008_vm2, %v4996_v42, %v5011_v35  ;;  %v5017_v62 = vsel %vm5007_vm3, %v5014_v1, %v5016_v44  ;;  %v5020_v13 = vsel %vm5008_vm2, %v5002_v10, %v5019_v61 }
 0x340   :  { %v5021_v26 = vsel %vm5007_vm3, %v5018_v55, %v5020_v13  ;;  %v11051_v2 = vmul.u32.u64.low %v5022_v4, %v5017_v62  ;;  %v11052_v25 = vmul.u32.u64.high %v5022_v4, %v5017_v62, %v11051_v2  ;;  %v5493_v49 = vshrl.u32 %v5492_v59, 23 }
 0x341   :  { %v8231_v16 = vadd.s32 4294967294, %v4836_v14  ;;  %v4855_v40 = vsel %vm4770_vm14, %v4854_v38, %v4830_v7  ;;  %v11057_v56 = vmul.u32.u64.low %v5022_v4, %v5021_v26  ;;  %v11058_v63 = vmul.u32.u64.high %v5022_v4, %v5021_v26, %v11057_v56 }
 0x342   :  { %vm4965_vm4 = vcmp.lt.s32.totalorder %v11032_v0, 2  ;;  %vm4966_vm5 = vcmp.eq.s32.totalorder %v11032_v0, 0  ;;  %v5013_v42 = vsel %vm5007_vm3, %v5010_v6, %v5012_v12  ;;  %v8257_v10 = vadd.s32 4294967169, %v5493_v49 }
 0x343   :  { %vm4969_vm6 = vcmp.eq.s32.totalorder %v11032_v0, 2  ;;  %v4824_v50 = vadd.s32 %v10971_v19, %v10988_v45  ;;  %vm8232_vm7 = vcmp.lt.s32.totalorder %v8231_v16, 0  ;;  %v5489_v3 = vand.u32 2147483647, %v11011_v47 }
 0x344   :  { %v8816_v59 = vpop.eup %8815  ;;  %v4839_v7 = vsel %vm8232_vm7, 0, %v8231_v16  ;;  %v4857_v53 = vsel %vm11040_vm15, 0, %v4855_v40  ;;  %v5032_v36 = vadd.s32 1, %v11052_v25  ;;  %v5499_v35 = vadd.s32 1, %v8257_v10 }
 0x345   :  { %v8818_v1 = vpop.eup %8817  ;;  %v4970_v41 = vxor.u32 2147483648, %v8816_v59  ;;  %v4840_v37 = vsub.s32 32, %v4839_v7  ;;  %v4844_v57 = vsub.s32 4294967266, %v4839_v7  ;;  %v5029_v38 = vmul.u32 %v5022_v4, %v5013_v42 }
 0x346   :  { %v4967_v55 = vxor.u32 2147483648, %v8818_v1  ;;  %v4841_v6 = vshll.u32 %v11035_v54, %v4839_v7  ;;  %vm5031_vm8 = vc.u32 %v11058_v63, %v11051_v2  ;;  %vm5500_vm10 = vcmp.gt.s32.totalorder %v5499_v35, 0 }
 0x347   :  { %v4971_v19 = vsel %vm4969_vm6, %v4970_v41, %v8818_v1  ;;  %v4842_v45 = vshrl.u32 %v4824_v50, %v4840_v37  ;;  %v4845_v44 = vadd.s32 127, %v4844_v57  ;;  %v5033_v61 = vsel %vm5031_vm8, %v5032_v36, %v11052_v25 }
 0x348   :  { %v4968_v14 = vsel %vm4966_vm5, %v8816_v59, %v4967_v55  ;;  %v5034_v12 = vadd.s32 %v5033_v61, %v5029_v38  ;;  %v5496_v4 = vand.u32 8388607, %v5489_v3  ;;  %v5501_v62 = vsel %vm5500_vm10, %v5499_v35, 0 }
 0x349   :  { %vm4963_vm9 = vweird.f32 %v10762_v15  ;;  %v4972_v54 = vsel %vm4965_vm4, %v4968_v14, %v4971_v19  ;;  %v4843_v13 = vor.u32 %v4842_v45, %v4841_v6  ;;  %v4846_v26 = vshll.u32 %v4845_v44, 23 }
 0x34a   :  { %v4973_v49 = vsel %vm4963_vm9, nan, %v4972_v54  ;;  %v5035_v16 = vadd.s32 536870912, %v5034_v12  ;;  %v5503_v40 = vand.u32 31, %v5501_v62  ;;  %v11083_v56 = vand.u32 3, %v4857_v53 }
 0x34b   :  { %7995 = vst [vmem:[#allocation2 + $0x110] sm:$0xff] %v4973_v49  ;;  %v4847_v25 = vor.u32 4788187, %v4846_v26  ;;  %v5497_v10 = vor.u32 8388608, %v5496_v4  ;;  %v1211_v59 = vmul.f32 %v9326_v21, %v10618_v51  ;;  %v4850_v7 = vcvt.s32.f32 %v4843_v13 }
 0x34c   :  { %v11085_v42 = vshrl.u32 %v5035_v16, 30  ;;  %v5504_v50 = vsub.s32 32, %v5503_v40  ;;  %v5502_v0 = vshrl.u32 %v5501_v62, 5  ;;  %v5506_v36 = vshll.u32 %v9028_v18, %v5503_v40 }
 0x34d   :  { %v4848_v15 = vand.u32 2147483647, %v4847_v25  ;;  %v5509_v41 = vshll.u32 %v9029_v29, %v5503_v40  ;;  %v5512_v53 = vshll.u32 %v9030_v31, %v5503_v40  ;;  %v5515_v6 = vshll.u32 %v9031_v33, %v5503_v40 }
 0x34e   :  { %v5037_v35 = vshll.u32 %v11085_v42, 30  ;;  %v5507_v1 = vshrl.u32 %v9029_v29, %v5504_v50  ;;  %v5510_v57 = vshrl.u32 %v9030_v31, %v5504_v50  ;;  %v5513_v38 = vshrl.u32 %v9031_v33, %v5504_v50 }
 0x34f   :  { %v4851_v37 = vmul.f32 %v4850_v7, %v4848_v15  ;;  %v5516_v51 = vshrl.u32 %v9032_v43, %v5504_v50  ;;  %v5518_v19 = vshll.u32 %v9032_v43, %v5503_v40  ;;  %v5519_v45 = vshrl.u32 %v9033_v52, %v5504_v50 }
 0x350   :  { %v11097_v55 = vsub.s32 %v5034_v12, %v5037_v35  ;;  %v5508_v61 = vor.u32 %v5507_v1, %v5506_v36  ;;  %v5511_v14 = vor.u32 %v5510_v57, %v5509_v41  ;;  %v5514_v4 = vor.u32 %v5513_v38, %v5512_v53 }
 0x351   :  { %v4852_v44 = vxor.u32 2147483648, %v4851_v37  ;;  %v5517_v54 = vor.u32 %v5516_v51, %v5515_v6  ;;  %v5537_v13 = vshll.u32 %v5497_v10, 8  ;;  %v11104_v26 = vadd.f32 %v9335_v24, %v1211_v59 }
 0x352   :  { %v5040_v62 = vsub.s32 0, %v11097_v55  ;;  %v5520_v49 = vor.u32 %v5519_v45, %v5518_v19  ;;  %vm5521_vm11 = vcmp.lt.s32.totalorder %v5502_v0, 1  ;;  %vm5522_vm12 = vcmp.lt.s32.totalorder %v5502_v0, 2 }
 0x353   :  { %v4853_v12 = vsel %vm4770_vm14, %v4852_v44, %v4851_v37  ;;  %v5505_v25 = vshrl.u32 %v9028_v18, %v5504_v50  ;;  %vm5524_vm13 = vcmp.lt.s32.totalorder %v5502_v0, 4  ;;  %vm5523_vm0 = vcmp.lt.s32.totalorder %v5502_v0, 3 }
 0x354   :  { %v4856_v16 = vsel %vm11040_vm15, %v10868_v39, %v4853_v12  ;;  %v8238_v40 = vmin.u32 %v5040_v62, %v11097_v55  ;;  %v5526_v10 = vsel %vm5524_vm13, %v5514_v4, 2102212464  ;;  %v5529_v59 = vsel %vm5521_vm11, %v5508_v61, %v5511_v14  ;;  %v11136_v62 = vpop.f32.mrb[13].mxu1 }
 0x355   :  { %8819 = vcosq.f32 %v4856_v16  ;;  %v5525_v7 = vsel %vm5521_vm11, %v5505_v25, %v5508_v61  ;;  %v5530_v36 = vsel %vm5524_vm13, %v5517_v54, 920167782  ;;  %v5527_v35 = vsel %vm5523_vm0, %v5511_v14, %v5526_v10 }
 0x356   :  { %8821 = vsinq.f32 %v4856_v16  ;;  %v5042_v15 = vclz %v8238_v40  ;;  %v5531_v1 = vsel %vm5523_vm0, %v5514_v4, %v5530_v36  ;;  %v5533_v27 = vsel %vm5521_vm11, %v5511_v14, %v5514_v4 }
 0x357   :  { %v5534_v41 = vsel %vm5524_vm13, %v5520_v49, 1326507024  ;;  %vm4976_vm14 = vcmp.lt.s32.totalorder %v10892_v34, 0  ;;  %v5532_v50 = vsel %vm5522_vm12, %v5529_v59, %v5531_v1  ;;  %v5060_v57 = vsub.s32 4, %v11085_v42 }
 0x358   :  { %v8239_v53 = vadd.s32 4294967294, %v5042_v15  ;;  %v5535_v37 = vsel %vm5523_vm0, %v5517_v54, %v5534_v41  ;;  %v11120_v51 = vmul.u32.u64.low %v5537_v13, %v5532_v50  ;;  %v11121_v6 = vmul.u32.u64.high %v5537_v13, %v5532_v50, %v11120_v51 }
 0x359   :  { %v5536_v38 = vsel %vm5522_vm12, %v5533_v27, %v5535_v37  ;;  %v5528_v19 = vsel %vm5522_vm12, %v5525_v7, %v5527_v35  ;;  %vm4862_vm1 = vcmp.lt.s32.totalorder %v11083_v56, 2  ;;  %vm11131_vm2 = vcmp.le.f32.partialorder %v4974_v58, 0.7853982 }
 0x35a   :  { %vm8240_vm15 = vcmp.lt.s32.totalorder %v8239_v53, 0  ;;  %v11125_v45 = vmul.u32.u64.low %v5537_v13, %v5536_v38  ;;  %v11126_v44 = vmul.u32.u64.high %v5537_v13, %v5536_v38, %v11125_v45  ;;  %v5698_v4 = vand.u32 2139095040, %v11104_v26 }
 0x35b   :  { %v5045_v14 = vsel %vm8240_vm15, 0, %v8239_v53  ;;  %vm4860_vm3 = vweird.f32 %v10868_v39  ;;  %v5030_v0 = vadd.s32 %v11051_v2, %v11058_v63  ;;  %v5695_v49 = vand.u32 2147483647, %v11104_v26 }
 0x35c   :  { %v5046_v54 = vsub.s32 32, %v5045_v14  ;;  %v5050_v12 = vsub.s32 4294967266, %v5045_v14  ;;  %v5061_v58 = vsel %vm4976_vm14, %v5060_v57, %v11085_v42  ;;  %v5544_v16 = vmul.u32 %v5537_v13, %v5528_v19 }
 0x35d   :  { %v5547_v40 = vadd.s32 1, %v11121_v6  ;;  %v5699_v25 = vshrl.u32 %v5698_v4, 23  ;;  %v5047_v10 = vshll.u32 %v11097_v55, %v5045_v14  ;;  %vm5546_vm4 = vc.u32 %v11126_v44, %v11120_v51 }
 0x35e   :  { %v5048_v59 = vshrl.u32 %v5030_v0, %v5046_v54  ;;  %v5051_v15 = vadd.s32 127, %v5050_v12  ;;  %vm4863_vm5 = vcmp.eq.s32.totalorder %v11083_v56, 0  ;;  %v1210_v42 = vmul.f32 %v9329_v22, %v10725_v32 }
 0x35f   :  { %v8820_v2 = vpop.eup %8819  ;;  %v5548_v63 = vsel %vm5546_vm4, %v5547_v40, %v11121_v6  ;;  %v8265_v7 = vadd.s32 4294967169, %v5699_v25  ;;  %vm4866_vm6 = vcmp.eq.s32.totalorder %v11083_v56, 2  ;;  %v5063_v41 = vsel %vm11131_vm2, 0, %v5061_v58 }
 0x360   :  { %v8822_v13 = vpop.eup %8821  ;;  %v4867_v36 = vxor.u32 2147483648, %v8820_v2  ;;  %v5049_v35 = vor.u32 %v5048_v59, %v5047_v10  ;;  %v5052_v1 = vshll.u32 %v5051_v15, 23  ;;  %v5549_v27 = vadd.s32 %v5548_v63, %v5544_v16 }
 0x361   :  { %v4864_v55 = vxor.u32 2147483648, %v8822_v13  ;;  %v5705_v53 = vadd.s32 1, %v8265_v7  ;;  %v5702_v38 = vand.u32 8388607, %v5695_v49  ;;  %v11161_v19 = vadd.f32 %v9339_v28, %v1210_v42 }
 0x362   :  { %v4868_v50 = vsel %vm4866_vm6, %v4867_v36, %v8822_v13  ;;  %v5053_v37 = vor.u32 4788187, %v5052_v1  ;;  %v5550_v57 = vadd.s32 536870912, %v5549_v27  ;;  %v5056_v6 = vcvt.s32.f32 %v5049_v35 }
 0x363   :  { %v4865_v32 = vsel %vm4863_vm5, %v8820_v2, %v4864_v55  ;;  %vm5706_vm7 = vcmp.gt.s32.totalorder %v5705_v53, 0  ;;  %v11170_v40 = vand.u32 3, %v5063_v41  ;;  %v5703_v56 = vor.u32 8388608, %v5702_v38 }
 0x364   :  { %v4869_v45 = vsel %vm4862_vm1, %v4865_v32, %v4868_v50  ;;  %v5054_v14 = vand.u32 2147483647, %v5053_v37  ;;  %v11165_v4 = vshrl.u32 %v5550_v57, 30  ;;  %v5707_v0 = vsel %vm5706_vm7, %v5705_v53, 0 }
 0x365   :  { %v4870_v54 = vsel %vm4860_vm3, nan, %v4869_v45  ;;  %v5709_v12 = vand.u32 31, %v5707_v0  ;;  %v5595_v15 = vand.u32 2139095040, %v11161_v19  ;;  %v11175_v2 = vshrl.u32 %v5707_v0, 5 }
 0x366   :  { %7994 = vst [vmem:[#allocation2 + $0x108] sm:$0xff] %v4870_v54  ;;  %v5057_v58 = vmul.f32 %v5056_v6, %v5054_v14  ;;  %v5552_v16 = vshll.u32 %v11165_v4, 30  ;;  %v5545_v57 = vadd.s32 %v11120_v51, %v11126_v44  ;;  %v5743_v54 = vshll.u32 %v5703_v56, 8 }
 0x367   :  { %v5710_v25 = vsub.s32 32, %v5709_v12  ;;  %v5712_v63 = vshll.u32 %v9028_v18, %v5709_v12  ;;  %v5715_v36 = vshll.u32 %v9029_v29, %v5709_v12  ;;  %v5721_v55 = vshll.u32 %v9031_v33, %v5709_v12 }
 0x368   :  { %v5058_v10 = vxor.u32 2147483648, %v5057_v58  ;;  %v11172_v59 = vsub.s32 %v5549_v27, %v5552_v16  ;;  %v5718_v27 = vshll.u32 %v9030_v31, %v5709_v12  ;;  %v5724_v61 = vshll.u32 %v9032_v43, %v5709_v12 }
 0x369   :  { %v5713_v39 = vshrl.u32 %v9029_v29, %v5710_v25  ;;  %v5716_v7 = vshrl.u32 %v9030_v31, %v5710_v25  ;;  %v5719_v35 = vshrl.u32 %v9031_v33, %v5710_v25  ;;  %v5722_v41 = vshrl.u32 %v9032_v43, %v5710_v25 }
 0x36a   :  { %v5059_v42 = vsel %vm4976_vm14, %v5058_v10, %v5057_v58  ;;  %v5555_v13 = vsub.s32 0, %v11172_v59  ;;  %v5725_v45 = vshrl.u32 %v9033_v52, %v5710_v25  ;;  %v5596_v14 = vshrl.u32 %v5595_v15, 23  ;;  %v11199_v58 = vpop.f32.mrb[14].mxu0 }
 0x36b   :  { %v5062_v1 = vsel %vm11131_vm2, %v10892_v34, %v5059_v42  ;;  %v5714_v50 = vor.u32 %v5713_v39, %v5712_v63  ;;  %v5717_v37 = vor.u32 %v5716_v7, %v5715_v36  ;;  %v5720_v38 = vor.u32 %v5719_v35, %v5718_v27 }
 0x36c   :  { %8823 = vcosq.f32 %v5062_v1  ;;  %v8258_v53 = vmin.u32 %v5555_v13, %v11172_v59  ;;  %v5723_v32 = vor.u32 %v5722_v41, %v5721_v55  ;;  %v5711_v0 = vshrl.u32 %v9028_v18, %v5710_v25 }
 0x36d   :  { %8825 = vsinq.f32 %v5062_v1  ;;  %vm5727_vm8 = vcmp.lt.s32.totalorder %v11175_v2, 1  ;;  %vm5728_vm10 = vcmp.lt.s32.totalorder %v11175_v2, 2  ;;  %v5726_v10 = vor.u32 %v5725_v45, %v5724_v61 }
 0x36e   :  { %v5557_v6 = vclz %v8258_v53  ;;  %vm5730_vm9 = vcmp.lt.s32.totalorder %v11175_v2, 4  ;;  %v5735_v51 = vsel %vm5727_vm8, %v5714_v50, %v5717_v37  ;;  %vm5069_vm11 = vcmp.eq.s32.totalorder %v11170_v40, 0 }
 0x36f   :  { %vm5729_vm12 = vcmp.lt.s32.totalorder %v11175_v2, 3  ;;  %v5732_v44 = vsel %vm5730_vm9, %v5720_v38, 2102212464  ;;  %v5736_v12 = vsel %vm5730_vm9, %v5723_v32, 920167782  ;;  %v5739_v25 = vsel %vm5727_vm8, %v5717_v37, %v5720_v38 }
 0x370   :  { %v8259_v16 = vadd.s32 4294967294, %v5557_v6  ;;  %vm5068_vm13 = vcmp.lt.s32.totalorder %v11170_v40, 2  ;;  %vm5491_vm0 = vcmp.lt.s32.totalorder %v11011_v47, 0  ;;  %v5737_v56 = vsel %vm5729_vm12, %v5720_v38, %v5736_v12 }
 0x371   :  { %v5740_v15 = vsel %vm5730_vm9, %v5726_v10, 1326507024  ;;  %v8261_v63 = vadd.s32 4294967169, %v5596_v14  ;;  %vm5066_vm15 = vweird.f32 %v10892_v34  ;;  %v5731_v7 = vsel %vm5727_vm8, %v5711_v0, %v5714_v50 }
 0x372   :  { %vm8260_vm14 = vcmp.lt.s32.totalorder %v8259_v16, 0  ;;  %v5738_v42 = vsel %vm5728_vm10, %v5735_v51, %v5737_v56  ;;  %v5741_v13 = vsel %vm5729_vm12, %v5723_v32, %v5740_v15  ;;  %v5733_v1 = vsel %vm5729_vm12, %v5717_v37, %v5732_v44 }
 0x373   :  { %v5560_v39 = vsel %vm8260_vm14, 0, %v8259_v16  ;;  %v5742_v27 = vsel %vm5728_vm10, %v5739_v25, %v5741_v13  ;;  %v11226_v53 = vmul.u32.u64.low %v5743_v54, %v5738_v42  ;;  %v11227_v38 = vmul.u32.u64.high %v5743_v54, %v5738_v42, %v11226_v53 }
 0x374   :  { %v5561_v36 = vsub.s32 32, %v5560_v39  ;;  %v5565_v35 = vsub.s32 4294967266, %v5560_v39  ;;  %v11223_v55 = vmul.u32.u64.low %v5743_v54, %v5742_v27  ;;  %v11224_v41 = vmul.u32.u64.high %v5743_v54, %v5742_v27, %v11223_v55 }
 0x375   :  { %v5562_v6 = vshll.u32 %v11172_v59, %v5560_v39  ;;  %v5602_v45 = vadd.s32 1, %v8261_v63  ;;  %vm5072_vm1 = vcmp.eq.s32.totalorder %v11170_v40, 2  ;;  %v5575_v0 = vsub.s32 4, %v11165_v4 }
 0x376   :  { %v8824_v50 = vpop.eup %8823  ;;  %v5563_v61 = vshrl.u32 %v5545_v57, %v5561_v36  ;;  %v5566_v32 = vadd.s32 127, %v5565_v35  ;;  %v5734_v16 = vsel %vm5728_vm10, %v5731_v7, %v5733_v1  ;;  %vm5752_vm3 = vc.u32 %v11224_v41, %v11226_v53 }
 0x377   :  { %v8826_v14 = vpop.eup %8825  ;;  %v5073_v37 = vxor.u32 2147483648, %v8824_v50  ;;  %vm5603_vm2 = vcmp.gt.s32.totalorder %v5602_v45, 0  ;;  %v5753_v59 = vadd.s32 1, %v11227_v38  ;;  %v5592_v57 = vand.u32 2147483647, %v11161_v19 }
 0x378   :  { %v5070_v10 = vxor.u32 2147483648, %v8826_v14  ;;  %v5564_v51 = vor.u32 %v5563_v61, %v5562_v6  ;;  %v5567_v44 = vshll.u32 %v5566_v32, 23  ;;  %v5750_v15 = vmul.u32 %v5743_v54, %v5734_v16 }
 0x379   :  { %v5074_v12 = vsel %vm5072_vm1, %v5073_v37, %v8826_v14  ;;  %v5604_v63 = vsel %vm5603_vm2, %v5602_v45, 0  ;;  %v5576_v39 = vsel %vm5491_vm0, %v5575_v0, %v11165_v4  ;;  %v5754_v7 = vsel %vm5752_vm3, %v5753_v59, %v11227_v38 }
 0x37a   :  { %v5071_v25 = vsel %vm5069_vm11, %v8824_v50, %v5070_v10  ;;  %v5568_v56 = vor.u32 4788187, %v5567_v44  ;;  %v5606_v42 = vand.u32 31, %v5604_v63  ;;  %v5571_v35 = vcvt.s32.f32 %v5564_v51 }
 0x37b   :  { %v5075_v2 = vsel %vm5068_vm13, %v5071_v25, %v5074_v12  ;;  %v5755_v1 = vadd.s32 %v5754_v7, %v5750_v15  ;;  %vm11251_vm4 = vcmp.le.f32.partialorder %v5489_v3, 0.7853982  ;;  %v5599_v40 = vand.u32 8388607, %v5592_v57 }
 0x37c   :  { %v5076_v13 = vsel %vm5066_vm15, nan, %v5075_v2  ;;  %v5569_v36 = vand.u32 2147483647, %v5568_v56  ;;  %v5607_v4 = vsub.s32 32, %v5606_v42  ;;  %v1212_v27 = vmul.f32 %v9369_v48, %v10788_v30 }
 0x37d   :  { %7996 = vst [vmem:[#allocation2 + $0x118] sm:$0xff] %v5076_v13  ;;  %v5578_v34 = vsel %vm11251_vm4, 0, %v5576_v39  ;;  %v5756_v38 = vadd.s32 536870912, %v5755_v1  ;;  %v5609_v50 = vshll.u32 %v9028_v18, %v5606_v42  ;;  %v5615_v61 = vshll.u32 %v9030_v31, %v5606_v42 }
 0x37e   :  { %v5572_v55 = vmul.f32 %v5571_v35, %v5569_v36  ;;  %v5610_v6 = vshrl.u32 %v9029_v29, %v5607_v4  ;;  %v5613_v3 = vshrl.u32 %v9030_v31, %v5607_v4  ;;  %v5616_v32 = vshrl.u32 %v9031_v33, %v5607_v4 }
 0x37f   :  { %v11266_v14 = vshrl.u32 %v5756_v38, 30  ;;  %v5619_v30 = vshrl.u32 %v9032_v43, %v5607_v4  ;;  %v5622_v37 = vshrl.u32 %v9033_v52, %v5607_v4  ;;  %v5605_v0 = vshrl.u32 %v5604_v63, 5 }
 0x380   :  { %v5573_v45 = vxor.u32 2147483648, %v5572_v55  ;;  %v5612_v16 = vshll.u32 %v9029_v29, %v5606_v42  ;;  %v5618_v10 = vshll.u32 %v9031_v33, %v5606_v42  ;;  %v5621_v51 = vshll.u32 %v9032_v43, %v5606_v42 }
 0x381   :  { %v5758_v12 = vshll.u32 %v11266_v14, 30  ;;  %v5611_v59 = vor.u32 %v5610_v6, %v5609_v50  ;;  %v5617_v25 = vor.u32 %v5616_v32, %v5615_v61  ;;  %v5600_v7 = vor.u32 8388608, %v5599_v40 }
 0x382   :  { %v5574_v44 = vsel %vm5491_vm0, %v5573_v45, %v5572_v55  ;;  %v5614_v15 = vor.u32 %v5613_v3, %v5612_v16  ;;  %v5620_v2 = vor.u32 %v5619_v30, %v5618_v10  ;;  %v5623_v63 = vor.u32 %v5622_v37, %v5621_v51 }
 0x383   :  { %v5577_v56 = vsel %vm11251_vm4, %v11011_v47, %v5574_v44  ;;  %v11279_v39 = vsub.s32 %v5755_v1, %v5758_v12  ;;  %v5582_v42 = vand.u32 3, %v5578_v34  ;;  %vm5627_vm5 = vcmp.lt.s32.totalorder %v5605_v0, 4 }
 0x384   :  { %8827 = vcosq.f32 %v5577_v56  ;;  %v11282_v13 = vadd.f32 %v9380_v60, %v1212_v27  ;;  %v5608_v35 = vshrl.u32 %v9028_v18, %v5607_v4  ;;  %vm5624_vm6 = vcmp.lt.s32.totalorder %v5605_v0, 1 }
 0x385   :  { %8829 = vsinq.f32 %v5577_v56  ;;  %v5761_v36 = vsub.s32 0, %v11279_v39  ;;  %v5629_v54 = vsel %vm5627_vm5, %v5617_v25, 2102212464  ;;  %v5632_v55 = vsel %vm5624_vm6, %v5611_v59, %v5614_v15 }
 0x386   :  { %v5633_v38 = vsel %vm5627_vm5, %v5620_v2, 920167782  ;;  %v5636_v50 = vsel %vm5624_vm6, %v5614_v15, %v5617_v25  ;;  %v5637_v6 = vsel %vm5627_vm5, %v5623_v63, 1326507024  ;;  %vm5625_vm7 = vcmp.lt.s32.totalorder %v5605_v0, 2 }
 0x387   :  { %v8266_v1 = vmin.u32 %v5761_v36, %v11279_v39  ;;  %vm5626_vm8 = vcmp.lt.s32.totalorder %v5605_v0, 3  ;;  %v5640_v40 = vshll.u32 %v5600_v7, 8  ;;  %v5628_v34 = vsel %vm5624_vm6, %v5608_v35, %v5611_v59 }
 0x388   :  { %v5634_v3 = vsel %vm5626_vm8, %v5617_v25, %v5633_v38  ;;  %v5638_v61 = vsel %vm5626_vm8, %v5620_v2, %v5637_v6  ;;  %v5801_v27 = vand.u32 2139095040, %v11282_v13  ;;  %v5630_v45 = vsel %vm5626_vm8, %v5614_v15, %v5629_v54  ;;  %v11300_v25 = vpop.f32.mrb[14].mxu1 }
 0x389   :  { %v5763_v32 = vclz %v8266_v1  ;;  %v5635_v4 = vsel %vm5625_vm7, %v5632_v55, %v5634_v3  ;;  %v5639_v30 = vsel %vm5625_vm7, %v5636_v50, %v5638_v61  ;;  %vm5581_vm10 = vweird.f32 %v11011_v47 }
 0x38a   :  { %v11290_v37 = vmul.u32.u64.low %v5640_v40, %v5639_v30  ;;  %v11291_v16 = vmul.u32.u64.high %v5640_v40, %v5639_v30, %v11290_v37  ;;  %v11293_v10 = vmul.u32.u64.low %v5640_v40, %v5635_v4  ;;  %v11294_v51 = vmul.u32.u64.high %v5640_v40, %v5635_v4, %v11293_v10 }
 0x38b   :  { %v8267_v44 = vadd.s32 4294967294, %v5763_v32  ;;  %v5802_v12 = vshrl.u32 %v5801_v27, 23  ;;  %v1217_v59 = vmul.f32 %v9323_v20, %v10901_v46  ;;  %vm5583_vm9 = vcmp.lt.s32.totalorder %v5582_v42, 2 }
 0x38c   :  { %vm5584_vm11 = vcmp.eq.s32.totalorder %v5582_v42, 0  ;;  %vm5587_vm12 = vcmp.eq.s32.totalorder %v5582_v42, 2  ;;  %vm5697_vm13 = vcmp.lt.s32.totalorder %v11104_v26, 0  ;;  %v5631_v15 = vsel %vm5625_vm7, %v5628_v34, %v5630_v45 }
 0x38d   :  { %vm8268_vm0 = vcmp.lt.s32.totalorder %v8267_v44, 0  ;;  %v5798_v2 = vand.u32 2147483647, %v11282_v13  ;;  %v8269_v63 = vadd.s32 4294967169, %v5802_v12  ;;  %v5751_v35 = vadd.s32 %v11226_v53, %v11224_v41 }
 0x38e   :  { %v8828_v56 = vpop.eup %8827  ;;  %v5766_v46 = vsel %vm8268_vm0, 0, %v8267_v44  ;;  %v5781_v54 = vsub.s32 4, %v11266_v14  ;;  %vm5649_vm14 = vc.u32 %v11291_v16, %v11293_v10  ;;  %v5647_v6 = vmul.u32 %v5640_v40, %v5631_v15 }
 0x38f   :  { %v8830_v7 = vpop.eup %8829  ;;  %v5588_v36 = vxor.u32 2147483648, %v8828_v56  ;;  %v5767_v38 = vsub.s32 32, %v5766_v46  ;;  %v5771_v50 = vsub.s32 4294967266, %v5766_v46  ;;  %v5650_v1 = vadd.s32 1, %v11294_v51 }
 0x390   :  { %v5585_v55 = vxor.u32 2147483648, %v8830_v7  ;;  %v5808_v34 = vadd.s32 1, %v8269_v63  ;;  %v5768_v61 = vshll.u32 %v11279_v39, %v5766_v46  ;;  %v5782_v32 = vsel %vm5697_vm13, %v5781_v54, %v11266_v14 }
 0x391   :  { %v5589_v0 = vsel %vm5587_vm12, %v5588_v36, %v8830_v7  ;;  %v5769_v41 = vshrl.u32 %v5751_v35, %v5767_v38  ;;  %v5772_v53 = vadd.s32 127, %v5771_v50  ;;  %v5651_v45 = vsel %vm5649_vm14, %v5650_v1, %v11294_v51 }
 0x392   :  { %v5586_v3 = vsel %vm5584_vm11, %v8828_v56, %v5585_v55  ;;  %vm5809_vm15 = vcmp.gt.s32.totalorder %v5808_v34, 0  ;;  %v5652_v37 = vadd.s32 %v5651_v45, %v5647_v6  ;;  %vm11323_vm1 = vcmp.le.f32.partialorder %v5695_v49, 0.7853982 }
 0x393   :  { %v5590_v27 = vsel %vm5583_vm9, %v5586_v3, %v5589_v0  ;;  %v5770_v4 = vor.u32 %v5769_v41, %v5768_v61  ;;  %v5773_v30 = vshll.u32 %v5772_v53, 23  ;;  %v5805_v42 = vand.u32 8388607, %v5798_v2 }
 0x394   :  { %v5591_v40 = vsel %vm5581_vm10, nan, %v5590_v27  ;;  %v5810_v14 = vsel %vm5809_vm15, %v5808_v34, 0  ;;  %v5784_v51 = vsel %vm11323_vm1, 0, %v5782_v32  ;;  %v5653_v47 = vadd.s32 536870912, %v5652_v37 }
 0x395   :  { %8001 = vst [vmem:[#allocation2 + $0x140] sm:$0xff] %v5591_v40  ;;  %v5774_v44 = vor.u32 4788187, %v5773_v30  ;;  %v11332_v12 = vadd.f32 %v9332_v23, %v1217_v59  ;;  %v5812_v56 = vand.u32 31, %v5810_v14  ;;  %v5777_v63 = vcvt.s32.f32 %v5770_v4 }
 0x396   :  { %v11334_v7 = vshrl.u32 %v5653_v47, 30  ;;  %v11336_v49 = vand.u32 3, %v5784_v51  ;;  %v5806_v36 = vor.u32 8388608, %v5805_v42  ;;  %v11340_v46 = vmul.f32 %v9326_v21, %v10963_v17 }
 0x397   :  { %v5775_v15 = vand.u32 2147483647, %v5774_v44  ;;  %v5813_v35 = vsub.s32 32, %v5812_v56  ;;  %v5815_v38 = vshll.u32 %v9028_v18, %v5812_v56  ;;  %v6316_v59 = vand.u32 2139095040, %v11332_v12 }
 0x398   :  { %v5655_v55 = vshll.u32 %v11334_v7, 30  ;;  %v5818_v0 = vshll.u32 %v9029_v29, %v5812_v56  ;;  %v5821_v17 = vshll.u32 %v9030_v31, %v5812_v56  ;;  %v5811_v41 = vshrl.u32 %v5810_v14, 5 }
 0x399   :  { %v5778_v54 = vmul.f32 %v5777_v63, %v5775_v15  ;;  %v5816_v50 = vshrl.u32 %v9029_v29, %v5813_v35  ;;  %v5819_v6 = vshrl.u32 %v9030_v31, %v5813_v35  ;;  %v5822_v1 = vshrl.u32 %v9031_v33, %v5813_v35 }
 0x39a   :  { %v11349_v3 = vsub.s32 %v5652_v37, %v5655_v55  ;;  %v5825_v61 = vshrl.u32 %v9032_v43, %v5813_v35  ;;  %v5824_v27 = vshll.u32 %v9031_v33, %v5812_v56  ;;  %v11354_v32 = vshll.u32 %v5806_v36, 8 }
 0x39b   :  { %v5779_v34 = vxor.u32 2147483648, %v5778_v54  ;;  %v5817_v53 = vor.u32 %v5816_v50, %v5815_v38  ;;  %v5820_v4 = vor.u32 %v5819_v6, %v5818_v0  ;;  %v5823_v30 = vor.u32 %v5822_v1, %v5821_v17 }
 0x39c   :  { %v5658_v40 = vsub.s32 0, %v11349_v3  ;;  %v5826_v42 = vor.u32 %v5825_v61, %v5824_v27  ;;  %v5827_v44 = vshll.u32 %v9032_v43, %v5812_v56  ;;  %v5828_v14 = vshrl.u32 %v9033_v52, %v5813_v35 }
 0x39d   :  { %v5780_v45 = vsel %vm5697_vm13, %v5779_v34, %v5778_v54  ;;  %v6313_v47 = vand.u32 2147483647, %v11332_v12  ;;  %v6317_v15 = vshrl.u32 %v6316_v59, 23  ;;  %v5814_v63 = vshrl.u32 %v9028_v18, %v5813_v35  ;;  %v11367_v54 = vpop.f32.mrb[15].mxu0 }
 0x39e   :  { %v5783_v37 = vsel %vm11323_vm1, %v11104_v26, %v5780_v45  ;;  %v8262_v51 = vmin.u32 %v5658_v40, %v11349_v3  ;;  %v5829_v36 = vor.u32 %v5828_v14, %v5827_v44  ;;  %vm5830_vm2 = vcmp.lt.s32.totalorder %v5811_v41, 1 }
 0x39f   :  { %8831 = vcosq.f32 %v5783_v37  ;;  %vm5832_vm3 = vcmp.lt.s32.totalorder %v5811_v41, 3  ;;  %vm5833_vm4 = vcmp.lt.s32.totalorder %v5811_v41, 4  ;;  %v5838_v55 = vsel %vm5830_vm2, %v5817_v53, %v5820_v4 }
 0x3a0   :  { %8833 = vsinq.f32 %v5783_v37  ;;  %v5660_v39 = vclz %v8262_v51  ;;  %v5835_v56 = vsel %vm5833_vm4, %v5823_v30, 2102212464  ;;  %v5839_v38 = vsel %vm5833_vm4, %v5826_v42, 920167782 }
 0x3a1   :  { %v5842_v50 = vsel %vm5830_vm2, %v5820_v4, %v5823_v30  ;;  %v5843_v0 = vsel %vm5833_vm4, %v5829_v36, 1326507024  ;;  %vm5831_vm5 = vcmp.lt.s32.totalorder %v5811_v41, 2  ;;  %v5840_v1 = vsel %vm5832_vm3, %v5823_v30, %v5839_v38 }
 0x3a2   :  { %v8263_v6 = vadd.s32 4294967294, %v5660_v39  ;;  %v5844_v59 = vsel %vm5832_vm3, %v5826_v42, %v5843_v0  ;;  %vm5790_vm6 = vcmp.eq.s32.totalorder %v11336_v49, 0  ;;  %v5834_v35 = vsel %vm5830_vm2, %v5814_v63, %v5817_v53 }
 0x3a3   :  { %v5841_v34 = vsel %vm5831_vm5, %v5838_v55, %v5840_v1  ;;  %v5845_v17 = vsel %vm5831_vm5, %v5842_v50, %v5844_v59  ;;  %v8289_v61 = vadd.s32 4294967169, %v6317_v15  ;;  %vm5789_vm7 = vcmp.lt.s32.totalorder %v11336_v49, 2 }
 0x3a4   :  { %vm5594_vm8 = vcmp.lt.s32.totalorder %v11161_v19, 0  ;;  %vm8264_vm10 = vcmp.lt.s32.totalorder %v8263_v6, 0  ;;  %v5836_v27 = vsel %vm5832_vm3, %v5820_v4, %v5835_v56  ;;  %vm5787_vm9 = vweird.f32 %v11104_v26 }
 0x3a5   :  { %v11378_v45 = vmul.u32.u64.low %v11354_v32, %v5845_v17  ;;  %v11379_v40 = vmul.u32.u64.high %v11354_v32, %v5845_v17, %v11378_v45  ;;  %v5663_v30 = vsel %vm8264_vm10, 0, %v8263_v6  ;;  %v6323_v42 = vadd.s32 1, %v8289_v61 }
 0x3a6   :  { %v11383_v53 = vmul.u32.u64.low %v11354_v32, %v5841_v34  ;;  %v11384_v37 = vmul.u32.u64.high %v11354_v32, %v5841_v34, %v11383_v53  ;;  %vm5793_vm11 = vcmp.eq.s32.totalorder %v11336_v49, 2  ;;  %v5648_v44 = vadd.s32 %v11293_v10, %v11291_v16 }
 0x3a7   :  { %v5664_v14 = vsub.s32 32, %v5663_v30  ;;  %v5668_v4 = vsub.s32 4294967266, %v5663_v30  ;;  %v5837_v51 = vsel %vm5831_vm5, %v5834_v35, %v5836_v27  ;;  %v6320_v15 = vand.u32 8388607, %v6313_v47 }
 0x3a8   :  { %vm6324_vm12 = vcmp.gt.s32.totalorder %v6323_v42, 0  ;;  %v11395_v63 = vadd.f32 %v9335_v24, %v11340_v46  ;;  %vm11399_vm13 = vcmp.le.f32.partialorder %v5592_v57, 0.7853982  ;;  %v5665_v16 = vshll.u32 %v11349_v3, %v5663_v30 }
 0x3a9   :  { %v8832_v36 = vpop.eup %8831  ;;  %v5666_v10 = vshrl.u32 %v5648_v44, %v5664_v14  ;;  %v5669_v41 = vadd.s32 127, %v5668_v4  ;;  %vm5855_vm0 = vc.u32 %v11379_v40, %v11383_v53  ;;  %v5678_v38 = vsub.s32 4, %v11334_v7 }
 0x3aa   :  { %v8834_v55 = vpop.eup %8833  ;;  %v5794_v56 = vxor.u32 2147483648, %v8832_v36  ;;  %v5856_v46 = vadd.s32 1, %v11384_v37  ;;  %v6325_v50 = vsel %vm6324_vm12, %v6323_v42, 0  ;;  %v5853_v1 = vmul.u32 %v11354_v32, %v5837_v51 }
 0x3ab   :  { %v5791_v0 = vxor.u32 2147483648, %v8834_v55  ;;  %v5667_v6 = vor.u32 %v5666_v10, %v5665_v16  ;;  %v5670_v57 = vshll.u32 %v5669_v41, 23  ;;  %v6321_v35 = vor.u32 8388608, %v6320_v15 }
 0x3ac   :  { %v5795_v3 = vsel %vm5793_vm11, %v5794_v56, %v8834_v55  ;;  %v5857_v59 = vsel %vm5855_vm0, %v5856_v46, %v11384_v37  ;;  %v6327_v34 = vand.u32 31, %v6325_v50  ;;  %v6519_v45 = vand.u32 2147483647, %v11395_v63 }
 0x3ad   :  { %v5792_v17 = vsel %vm5790_vm6, %v8832_v36, %v5791_v0  ;;  %v5671_v61 = vor.u32 4788187, %v5670_v57  ;;  %v5858_v27 = vadd.s32 %v5857_v59, %v5853_v1  ;;  %v5679_v32 = vsel %vm5594_vm8, %v5678_v38, %v11334_v7 }
 0x3ae   :  { %v5796_v30 = vsel %vm5789_vm7, %v5792_v17, %v5795_v3  ;;  %v6328_v42 = vsub.s32 32, %v6327_v34  ;;  %v6522_v44 = vand.u32 2139095040, %v11395_v63  ;;  %v5674_v4 = vcvt.s32.f32 %v5667_v6 }
 0x3af   :  { %v5797_v37 = vsel %vm5787_vm9, nan, %v5796_v30  ;;  %v5672_v14 = vand.u32 2147483647, %v5671_v61  ;;  %v5859_v51 = vadd.s32 536870912, %v5858_v27  ;;  %v6330_v15 = vshll.u32 %v9028_v18, %v6327_v34 }
 0x3b0   :  { %8003 = vst [vmem:[#allocation2 + $0x150] sm:$0xff] %v5797_v37  ;;  %v6331_v36 = vshrl.u32 %v9029_v29, %v6328_v42  ;;  %v6334_v49 = vshrl.u32 %v9030_v31, %v6328_v42  ;;  %v6337_v16 = vshrl.u32 %v9031_v33, %v6328_v42  ;;  %v6333_v41 = vshll.u32 %v9029_v29, %v6327_v34 }
 0x3b1   :  { %v5675_v10 = vmul.f32 %v5674_v4, %v5672_v14  ;;  %v11427_v7 = vshrl.u32 %v5859_v51, 30  ;;  %v6340_v26 = vshrl.u32 %v9032_v43, %v6328_v42  ;;  %v5681_v55 = vsel %vm11399_vm13, 0, %v5679_v32 }
 0x3b2   :  { %v6326_v56 = vshrl.u32 %v6325_v50, 5  ;;  %v6336_v38 = vshll.u32 %v9030_v31, %v6327_v34  ;;  %v6339_v46 = vshll.u32 %v9031_v33, %v6327_v34  ;;  %v6332_v57 = vor.u32 %v6331_v36, %v6330_v15 }
 0x3b3   :  { %v5676_v0 = vxor.u32 2147483648, %v5675_v10  ;;  %v5861_v6 = vshll.u32 %v11427_v7, 30  ;;  %v6335_v1 = vor.u32 %v6334_v49, %v6333_v41  ;;  %v6342_v17 = vshll.u32 %v9032_v43, %v6327_v34 }
 0x3b4   :  { %v6338_v3 = vor.u32 %v6337_v16, %v6336_v38  ;;  %v6341_v59 = vor.u32 %v6340_v26, %v6339_v46  ;;  %v6343_v61 = vshrl.u32 %v9033_v52, %v6328_v42  ;;  %v11440_v32 = vand.u32 3, %v5681_v55 }
 0x3b5   :  { %v5677_v30 = vsel %vm5594_vm8, %v5676_v0, %v5675_v10  ;;  %v11442_v50 = vsub.s32 %v5858_v27, %v5861_v6  ;;  %v6523_v37 = vshrl.u32 %v6522_v44, 23  ;;  %v6329_v4 = vshrl.u32 %v9028_v18, %v6328_v42 }
 0x3b6   :  { %v5680_v14 = vsel %vm11399_vm13, %v11161_v19, %v5677_v30  ;;  %v6344_v51 = vor.u32 %v6343_v61, %v6342_v17  ;;  %v6361_v15 = vshll.u32 %v6321_v35, 8  ;;  %vm6345_vm14 = vcmp.lt.s32.totalorder %v6326_v56, 1 }
 0x3b7   :  { %8835 = vcosq.f32 %v5680_v14  ;;  %v5864_v34 = vsub.s32 0, %v11442_v50  ;;  %vm6348_vm15 = vcmp.lt.s32.totalorder %v6326_v56, 4  ;;  %v6353_v49 = vsel %vm6345_vm14, %v6332_v57, %v6335_v1 }
 0x3b8   :  { %8837 = vsinq.f32 %v5680_v14  ;;  %v6350_v36 = vsel %vm6348_vm15, %v6338_v3, 2102212464  ;;  %v6354_v16 = vsel %vm6348_vm15, %v6341_v59, 920167782  ;;  %vm6346_vm1 = vcmp.lt.s32.totalorder %v6326_v56, 2 }
 0x3b9   :  { %v8270_v27 = vmin.u32 %v5864_v34, %v11442_v50  ;;  %vm6347_vm2 = vcmp.lt.s32.totalorder %v6326_v56, 3  ;;  %v8297_v44 = vadd.s32 4294967169, %v6523_v37  ;;  %v6349_v39 = vsel %vm6345_vm14, %v6329_v4, %v6332_v57  ;;  %v11459_v57 = vpop.f32.mrb[15].mxu1 }
 0x3ba   :  { %v6355_v10 = vsel %vm6347_vm2, %v6338_v3, %v6354_v16  ;;  %v6357_v41 = vsel %vm6345_vm14, %v6335_v1, %v6338_v3  ;;  %v6358_v42 = vsel %vm6348_vm15, %v6344_v51, 1326507024  ;;  %v6351_v35 = vsel %vm6347_vm2, %v6335_v1, %v6350_v36 }
 0x3bb   :  { %v5866_v26 = vclz %v8270_v27  ;;  %v6356_v55 = vsel %vm6346_vm1, %v6353_v49, %v6355_v10  ;;  %v6359_v38 = vsel %vm6347_vm2, %v6341_v59, %v6358_v42  ;;  %v6529_v37 = vadd.s32 1, %v8297_v44 }
 0x3bc   :  { %v6360_v46 = vsel %vm6346_vm1, %v6357_v41, %v6359_v38  ;;  %v11452_v0 = vmul.u32.u64.low %v6361_v15, %v6356_v55  ;;  %v11453_v6 = vmul.u32.u64.high %v6361_v15, %v6356_v55, %v11452_v0  ;;  %vm5684_vm3 = vweird.f32 %v11161_v19 }
 0x3bd   :  { %v8271_v17 = vadd.s32 4294967294, %v5866_v26  ;;  %v11456_v61 = vmul.u32.u64.low %v6361_v15, %v6360_v46  ;;  %v11457_v30 = vmul.u32.u64.high %v6361_v15, %v6360_v46, %v11456_v61  ;;  %vm5800_vm4 = vcmp.lt.s32.totalorder %v11282_v13, 0 }
 0x3be   :  { %v6352_v1 = vsel %vm6346_vm1, %v6349_v39, %v6351_v35  ;;  %v11466_v3 = vmul.f32 %v9329_v22, %v11047_v9  ;;  %vm5690_vm5 = vcmp.eq.s32.totalorder %v11440_v32, 2  ;;  %v6526_v59 = vand.u32 8388607, %v6519_v45 }
 0x3bf   :  { %vm8272_vm6 = vcmp.lt.s32.totalorder %v8271_v17, 0  ;;  %vm6530_vm7 = vcmp.gt.s32.totalorder %v6529_v37, 0  ;;  %v5854_v14 = vadd.s32 %v11383_v53, %v11379_v40  ;;  %v6371_v51 = vadd.s32 1, %v11453_v6 }
 0x3c0   :  { %v5869_v4 = vsel %vm8272_vm6, 0, %v8271_v17  ;;  %v6531_v34 = vsel %vm6530_vm7, %v6529_v37, 0  ;;  %v5884_v9 = vsub.s32 4, %v11427_v7  ;;  %v6368_v16 = vmul.u32 %v6361_v15, %v6352_v1 }
 0x3c1   :  { %v8836_v56 = vpop.eup %8835  ;;  %v5870_v36 = vsub.s32 32, %v5869_v4  ;;  %v5874_v49 = vsub.s32 4294967266, %v5869_v4  ;;  %v5871_v39 = vshll.u32 %v11442_v50, %v5869_v4  ;;  %vm6370_vm8 = vc.u32 %v11457_v30, %v11452_v0 }
 0x3c2   :  { %v8838_v27 = vpop.eup %8837  ;;  %v5691_v44 = vxor.u32 2147483648, %v8836_v56  ;;  %v6533_v10 = vand.u32 31, %v6531_v34  ;;  %vm11480_vm10 = vcmp.le.f32.partialorder %v5798_v2, 0.7853982  ;;  %v6372_v26 = vsel %vm6370_vm8, %v6371_v51, %v11453_v6 }
 0x3c3   :  { %v5688_v41 = vxor.u32 2147483648, %v8838_v27  ;;  %v5872_v53 = vshrl.u32 %v5854_v14, %v5870_v36  ;;  %v5875_v42 = vadd.s32 127, %v5874_v49  ;;  %vm5687_vm9 = vcmp.eq.s32.totalorder %v11440_v32, 0 }
 0x3c4   :  { %v5692_v50 = vsel %vm5690_vm5, %v5691_v44, %v8838_v27  ;;  %v6373_v15 = vadd.s32 %v6372_v26, %v6368_v16  ;;  %v6534_v35 = vsub.s32 32, %v6533_v10  ;;  %vm5686_vm11 = vcmp.lt.s32.totalorder %v11440_v32, 2 }
 0x3c5   :  { %v5689_v55 = vsel %vm5687_vm9, %v8836_v56, %v5688_v41  ;;  %v5873_v38 = vor.u32 %v5872_v53, %v5871_v39  ;;  %v5876_v46 = vshll.u32 %v5875_v42, 23  ;;  %v5885_v17 = vsel %vm5800_vm4, %v5884_v9, %v11427_v7 }
 0x3c6   :  { %v5693_v2 = vsel %vm5686_vm11, %v5689_v55, %v5692_v50  ;;  %v6374_v61 = vadd.s32 536870912, %v6373_v15  ;;  %v6537_v6 = vshrl.u32 %v9029_v29, %v6534_v35  ;;  %v6527_v14 = vor.u32 8388608, %v6526_v59 }
 0x3c7   :  { %v5694_v37 = vsel %vm5684_vm3, nan, %v5693_v2  ;;  %v5877_v1 = vor.u32 4788187, %v5876_v46  ;;  %v6540_v4 = vshrl.u32 %v9030_v31, %v6534_v35  ;;  %v6536_v51 = vshll.u32 %v9028_v18, %v6533_v10 }
 0x3c8   :  { %8002 = vst [vmem:[#allocation2 + $0x148] sm:$0xff] %v5694_v37  ;;  %v11496_v32 = vshrl.u32 %v6374_v61, 30  ;;  %v6539_v56 = vshll.u32 %v9029_v29, %v6533_v10  ;;  %v6543_v36 = vshrl.u32 %v9031_v33, %v6534_v35  ;;  %v5880_v49 = vcvt.s32.f32 %v5873_v38 }
 0x3c9   :  { %v5878_v7 = vand.u32 2147483647, %v5877_v1  ;;  %v6545_v9 = vshll.u32 %v9031_v33, %v6533_v10  ;;  %v6546_v19 = vshrl.u32 %v9032_v43, %v6534_v35  ;;  %v6532_v59 = vshrl.u32 %v6531_v34, 5 }
 0x3ca   :  { %v6376_v16 = vshll.u32 %v11496_v32, 30  ;;  %v6538_v27 = vor.u32 %v6537_v6, %v6536_v51  ;;  %v6542_v44 = vshll.u32 %v9030_v31, %v6533_v10  ;;  %v6541_v41 = vor.u32 %v6540_v4, %v6539_v56 }
 0x3cb   :  { %v5881_v39 = vmul.f32 %v5880_v49, %v5878_v7  ;;  %v6547_v53 = vor.u32 %v6546_v19, %v6545_v9  ;;  %v6549_v42 = vshrl.u32 %v9033_v52, %v6534_v35  ;;  %v5887_v26 = vsel %vm11480_vm10, 0, %v5885_v17 }
 0x3cc   :  { %v11508_v50 = vsub.s32 %v6373_v15, %v6376_v16  ;;  %v6544_v55 = vor.u32 %v6543_v36, %v6542_v44  ;;  %v1220_v38 = vmul.f32 %v9369_v48, %v11136_v62  ;;  %v6548_v34 = vshll.u32 %v9032_v43, %v6533_v10 }
 0x3cd   :  { %v5882_v46 = vxor.u32 2147483648, %v5881_v39  ;;  %v11513_v2 = vshll.u32 %v6527_v14, 8  ;;  %v11517_v61 = vadd.f32 %v9339_v28, %v11466_v3  ;;  %v6535_v37 = vshrl.u32 %v9028_v18, %v6534_v35 }
 0x3ce   :  { %v6379_v6 = vsub.s32 0, %v11508_v50  ;;  %vm6551_vm12 = vcmp.lt.s32.totalorder %v6532_v59, 1  ;;  %vm6554_vm13 = vcmp.lt.s32.totalorder %v6532_v59, 4  ;;  %v6550_v17 = vor.u32 %v6549_v42, %v6548_v34 }
 0x3cf   :  { %v5883_v15 = vsel %vm5800_vm4, %v5882_v46, %v5881_v39  ;;  %v6559_v62 = vsel %vm6551_vm12, %v6538_v27, %v6541_v41  ;;  %v6560_v10 = vsel %vm6554_vm13, %v6547_v53, 920167782  ;;  %vm6553_vm0 = vcmp.lt.s32.totalorder %v6532_v59, 3 }
 0x3d0   :  { %v5886_v1 = vsel %vm11480_vm10, %v11282_v13, %v5883_v15  ;;  %v8290_v3 = vmin.u32 %v6379_v6, %v11508_v50  ;;  %v6556_v14 = vsel %vm6554_vm13, %v6544_v55, 2102212464  ;;  %vm6552_vm14 = vcmp.lt.s32.totalorder %v6532_v59, 2 }
 0x3d1   :  { %8839 = vcosq.f32 %v5886_v1  ;;  %v6555_v35 = vsel %vm6551_vm12, %v6535_v37, %v6538_v27  ;;  %v6561_v4 = vsel %vm6553_vm0, %v6544_v55, %v6560_v10  ;;  %v6563_v36 = vsel %vm6551_vm12, %v6541_v41, %v6544_v55 }
 0x3d2   :  { %8841 = vsinq.f32 %v5886_v1  ;;  %v6381_v51 = vclz %v8290_v3  ;;  %v6562_v56 = vsel %vm6552_vm14, %v6559_v62, %v6561_v4  ;;  %v6557_v40 = vsel %vm6553_vm0, %v6541_v41, %v6556_v14 }
 0x3d3   :  { %v6564_v7 = vsel %vm6554_vm13, %v6550_v17, 1326507024  ;;  %v11537_v49 = vmul.u32.u64.low %v11513_v2, %v6562_v56  ;;  %v11538_v9 = vmul.u32.u64.high %v11513_v2, %v6562_v56, %v11537_v49  ;;  %v5891_v19 = vand.u32 3, %v5887_v26 }
 0x3d4   :  { %vm6315_vm15 = vcmp.lt.s32.totalorder %v11332_v12, 0  ;;  %v8291_v16 = vadd.s32 4294967294, %v6381_v51  ;;  %v6565_v27 = vsel %vm6553_vm0, %v6547_v53, %v6564_v7  ;;  %vm11545_vm1 = vcmp.le.f32.partialorder %v6313_v47, 0.7853982  ;;  %v11560_v47 = vpop.f32.mrb[16].mxu0 }
 0x3d5   :  { %v6399_v39 = vsub.s32 4, %v11496_v32  ;;  %v6566_v41 = vsel %vm6552_vm14, %v6563_v36, %v6565_v27  ;;  %v6419_v42 = vand.u32 2139095040, %v11517_v61  ;;  %v11553_v55 = vadd.f32 %v9380_v60, %v1220_v38 }
 0x3d6   :  { %vm8292_vm2 = vcmp.lt.s32.totalorder %v8291_v16, 0  ;;  %v6558_v26 = vsel %vm6552_vm14, %v6555_v35, %v6557_v40  ;;  %v11557_v53 = vmul.u32.u64.low %v11513_v2, %v6566_v41  ;;  %v11558_v46 = vmul.u32.u64.high %v11513_v2, %v6566_v41, %v11557_v53 }
 0x3d7   :  { %v6384_v34 = vsel %vm8292_vm2, 0, %v8291_v16  ;;  %v6577_v6 = vadd.s32 1, %v11538_v9  ;;  %v6416_v37 = vand.u32 2147483647, %v11517_v61  ;;  %v6420_v15 = vshrl.u32 %v6419_v42, 23 }
 0x3d8   :  { %vm5890_vm3 = vweird.f32 %v11282_v13  ;;  %vm5892_vm4 = vcmp.lt.s32.totalorder %v5891_v19, 2  ;;  %v6369_v38 = vadd.s32 %v11452_v0, %v11457_v30  ;;  %v6385_v59 = vsub.s32 32, %v6384_v34 }
 0x3d9   :  { %v6389_v17 = vsub.s32 4294967266, %v6384_v34  ;;  %v6400_v62 = vsel %vm6315_vm15, %v6399_v39, %v11496_v32  ;;  %v6574_v10 = vmul.u32 %v11513_v2, %v6558_v26  ;;  %v8293_v1 = vadd.s32 4294967169, %v6420_v15 }
 0x3da   :  { %v6625_v3 = vand.u32 2139095040, %v11553_v55  ;;  %v6386_v14 = vshll.u32 %v11508_v50, %v6384_v34  ;;  %v6387_v35 = vshrl.u32 %v6369_v38, %v6385_v59  ;;  %vm6576_vm5 = vc.u32 %v11558_v46, %v11537_v49 }
 0x3db   :  { %v6390_v4 = vadd.s32 127, %v6389_v17  ;;  %v8840_v51 = vpop.eup %8839  ;;  %v6578_v0 = vsel %vm6576_vm5, %v6577_v6, %v11538_v9  ;;  %v6423_v30 = vand.u32 8388607, %v6416_v37  ;;  %v6426_v56 = vadd.s32 1, %v8293_v1 }
 0x3dc   :  { %v6626_v32 = vshrl.u32 %v6625_v3, 23  ;;  %v8842_v36 = vpop.eup %8841  ;;  %v5897_v2 = vxor.u32 2147483648, %v8840_v51  ;;  %v6388_v40 = vor.u32 %v6387_v35, %v6386_v14  ;;  %v6579_v16 = vadd.s32 %v6578_v0, %v6574_v10 }
 0x3dd   :  { %v6391_v7 = vshll.u32 %v6390_v4, 23  ;;  %vm5893_vm6 = vcmp.eq.s32.totalorder %v5891_v19, 0  ;;  %v5894_v50 = vxor.u32 2147483648, %v8842_v36  ;;  %vm5896_vm7 = vcmp.eq.s32.totalorder %v5891_v19, 2 }
 0x3de   :  { %vm6427_vm8 = vcmp.gt.s32.totalorder %v6426_v56, 0  ;;  %v5898_v27 = vsel %vm5896_vm7, %v5897_v2, %v8842_v36  ;;  %v6402_v41 = vsel %vm11545_vm1, 0, %v6400_v62  ;;  %v6580_v9 = vadd.s32 536870912, %v6579_v16 }
 0x3df   :  { %v6392_v39 = vor.u32 4788187, %v6391_v7  ;;  %v5895_v42 = vsel %vm5893_vm6, %v8840_v51, %v5894_v50  ;;  %v6424_v26 = vor.u32 8388608, %v6423_v30  ;;  %v6428_v53 = vsel %vm6427_vm8, %v6426_v56, 0 }
 0x3e0   :  { %v8301_v34 = vadd.s32 4294967169, %v6626_v32  ;;  %v5899_v6 = vsel %vm5892_vm4, %v5895_v42, %v5898_v27  ;;  %v6395_v38 = vcvt.s32.f32 %v6388_v40  ;;  %v11581_v59 = vshrl.u32 %v6580_v9, 30 }
 0x3e1   :  { %v6393_v15 = vand.u32 2147483647, %v6392_v39  ;;  %v5900_v17 = vsel %vm5890_vm3, nan, %v5899_v6  ;;  %v6430_v10 = vand.u32 31, %v6428_v53  ;;  %v11585_v3 = vand.u32 3, %v6402_v41 }
 0x3e2   :  { %8004 = vst [vmem:[#allocation2 + $0x158] sm:$0xff] %v5900_v17  ;;  %v6582_v62 = vshll.u32 %v11581_v59, 30  ;;  %v11590_v14 = vmul.f32 %v9323_v20, %v11199_v58  ;;  %v11592_v35 = vshll.u32 %v6424_v26, 8  ;;  %v6622_v4 = vand.u32 2147483647, %v11553_v55 }
 0x3e3   :  { %v6396_v1 = vmul.f32 %v6395_v38, %v6393_v15  ;;  %v6431_v19 = vsub.s32 32, %v6430_v10  ;;  %v6632_v51 = vadd.s32 1, %v8301_v34  ;;  %v6429_v30 = vshrl.u32 %v6428_v53, 5 }
 0x3e4   :  { %v11595_v13 = vsub.s32 %v6579_v16, %v6582_v62  ;;  %v6433_v56 = vshll.u32 %v9028_v18, %v6430_v10  ;;  %v6436_v36 = vshll.u32 %v9029_v29, %v6430_v10  ;;  %v6439_v20 = vshll.u32 %v9030_v31, %v6430_v10 }
 0x3e5   :  { %v6397_v0 = vxor.u32 2147483648, %v6396_v1  ;;  %v6434_v32 = vshrl.u32 %v9029_v29, %v6431_v19  ;;  %v6437_v2 = vshrl.u32 %v9030_v31, %v6431_v19  ;;  %v6440_v7 = vshrl.u32 %v9031_v33, %v6431_v19 }
 0x3e6   :  { %v6585_v40 = vsub.s32 0, %v11595_v13  ;;  %v6442_v16 = vshll.u32 %v9031_v33, %v6430_v10  ;;  %v6443_v41 = vshrl.u32 %v9032_v43, %v6431_v19  ;;  %v11614_v42 = vand.u32 8388607, %v6622_v4 }
 0x3e7   :  { %v6398_v58 = vsel %vm6315_vm15, %v6397_v0, %v6396_v1  ;;  %v6435_v27 = vor.u32 %v6434_v32, %v6433_v56  ;;  %v6438_v39 = vor.u32 %v6437_v2, %v6436_v36  ;;  %vm6633_vm10 = vcmp.gt.s32.totalorder %v6632_v51, 0 }
 0x3e8   :  { %v6401_v50 = vsel %vm11545_vm1, %v11332_v12, %v6398_v58  ;;  %v8298_v9 = vmin.u32 %v6585_v40, %v11595_v13  ;;  %v6441_v26 = vor.u32 %v6440_v7, %v6439_v20  ;;  %v6444_v53 = vor.u32 %v6443_v41, %v6442_v16  ;;  %v11628_v58 = vpop.f32.mrb[16].mxu1 }
 0x3e9   :  { %8843 = vcosq.f32 %v6401_v50  ;;  %vm6448_vm9 = vcmp.lt.s32.totalorder %v6429_v30, 1  ;;  %v6432_v44 = vshrl.u32 %v9028_v18, %v6431_v19  ;;  %v6445_v6 = vshll.u32 %v9032_v43, %v6430_v10 }
 0x3ea   :  { %8845 = vsinq.f32 %v6401_v50  ;;  %v6587_v34 = vclz %v8298_v9  ;;  %v6446_v15 = vshrl.u32 %v9033_v52, %v6431_v19  ;;  %vm6449_vm11 = vcmp.lt.s32.totalorder %v6429_v30, 2 }
 0x3eb   :  { %vm6450_vm12 = vcmp.lt.s32.totalorder %v6429_v30, 3  ;;  %vm6451_vm13 = vcmp.lt.s32.totalorder %v6429_v30, 4  ;;  %v6456_v38 = vsel %vm6448_vm9, %v6435_v27, %v6438_v39  ;;  %vm6408_vm0 = vcmp.eq.s32.totalorder %v11585_v3, 0 }
 0x3ec   :  { %v8299_v17 = vadd.s32 4294967294, %v6587_v34  ;;  %v6447_v1 = vor.u32 %v6446_v15, %v6445_v6  ;;  %v6453_v62 = vsel %vm6451_vm13, %v6441_v26, 2102212464  ;;  %v6457_v0 = vsel %vm6451_vm13, %v6444_v53, 920167782 }
 0x3ed   :  { %v6452_v56 = vsel %vm6448_vm9, %v6432_v44, %v6435_v27  ;;  %v6454_v32 = vsel %vm6450_vm12, %v6438_v39, %v6453_v62  ;;  %v6458_v36 = vsel %vm6450_vm12, %v6441_v26, %v6457_v0  ;;  %v6460_v10 = vsel %vm6448_vm9, %v6438_v39, %v6441_v26 }
 0x3ee   :  { %vm6407_vm14 = vcmp.lt.s32.totalorder %v11585_v3, 2  ;;  %vm8300_vm15 = vcmp.lt.s32.totalorder %v8299_v17, 0  ;;  %v6459_v19 = vsel %vm6449_vm11, %v6456_v38, %v6458_v36  ;;  %v6461_v2 = vsel %vm6451_vm13, %v6447_v1, 1326507024 }
 0x3ef   :  { %v6634_v20 = vsel %vm6633_vm10, %v6632_v51, 0  ;;  %vm6405_vm1 = vweird.f32 %v11332_v12  ;;  %v6590_v40 = vsel %vm8300_vm15, 0, %v8299_v17  ;;  %v6462_v7 = vsel %vm6450_vm12, %v6444_v53, %v6461_v2 }
 0x3f0   :  { %v11633_v16 = vmul.u32.u64.low %v11592_v35, %v6459_v19  ;;  %v11634_v50 = vmul.u32.u64.high %v11592_v35, %v6459_v19, %v11633_v16  ;;  %v6575_v27 = vadd.s32 %v11537_v49, %v11558_v46  ;;  %v6591_v39 = vsub.s32 32, %v6590_v40 }
 0x3f1   :  { %v6595_v41 = vsub.s32 4294967266, %v6590_v40  ;;  %v6463_v9 = vsel %vm6449_vm11, %v6460_v10, %v6462_v7  ;;  %vm6411_vm2 = vcmp.eq.s32.totalorder %v11585_v3, 2  ;;  %v6455_v51 = vsel %vm6449_vm11, %v6452_v56, %v6454_v32 }
 0x3f2   :  { %v11643_v26 = vmul.u32.u64.low %v11592_v35, %v6463_v9  ;;  %v11644_v34 = vmul.u32.u64.high %v11592_v35, %v6463_v9, %v11643_v26  ;;  %vm6521_vm3 = vcmp.lt.s32.totalorder %v11395_v63, 0  ;;  %v6592_v44 = vshll.u32 %v11595_v13, %v6590_v40 }
 0x3f3   :  { %v8844_v53 = vpop.eup %8843  ;;  %v6593_v6 = vshrl.u32 %v6575_v27, %v6591_v39  ;;  %v6596_v15 = vadd.s32 127, %v6595_v41  ;;  %v6636_v49 = vand.u32 31, %v6634_v20  ;;  %v6605_v17 = vsub.s32 4, %v11581_v59 }
 0x3f4   :  { %v8846_v46 = vpop.eup %8845  ;;  %v6412_v38 = vxor.u32 2147483648, %v8844_v53  ;;  %v6474_v1 = vadd.s32 1, %v11634_v50  ;;  %v6630_v30 = vor.u32 8388608, %v11614_v42  ;;  %v6471_v13 = vmul.u32 %v11592_v35, %v6455_v51 }
 0x3f5   :  { %v6409_v62 = vxor.u32 2147483648, %v8846_v46  ;;  %v6594_v0 = vor.u32 %v6593_v6, %v6592_v44  ;;  %v6597_v56 = vshll.u32 %v6596_v15, 23  ;;  %v6637_v32 = vsub.s32 32, %v6636_v49 }
 0x3f6   :  { %v6413_v36 = vsel %vm6411_vm2, %v6412_v38, %v8846_v46  ;;  %vm6473_vm4 = vc.u32 %v11644_v34, %v11633_v16  ;;  %v11656_v10 = vshrl.u32 %v6634_v20, 5  ;;  %vm11662_vm5 = vcmp.le.f32.partialorder %v6519_v45, 0.7853982 }
 0x3f7   :  { %v6410_v19 = vsel %vm6408_vm0, %v8844_v53, %v6409_v62  ;;  %v6598_v2 = vor.u32 4788187, %v6597_v56  ;;  %v6475_v40 = vsel %vm6473_vm4, %v6474_v1, %v11634_v50  ;;  %v6639_v7 = vshll.u32 %v9028_v18, %v6636_v49 }
 0x3f8   :  { %v6414_v35 = vsel %vm6407_vm14, %v6410_v19, %v6413_v36  ;;  %v6601_v27 = vcvt.s32.f32 %v6594_v0  ;;  %v6476_v20 = vadd.s32 %v6475_v40, %v6471_v13  ;;  %v6640_v39 = vshrl.u32 %v9029_v29, %v6637_v32 }
 0x3f9   :  { %v6415_v41 = vsel %vm6405_vm1, nan, %v6414_v35  ;;  %v6599_v9 = vand.u32 2147483647, %v6598_v2  ;;  %v6642_v45 = vshll.u32 %v9029_v29, %v6636_v49  ;;  %v6643_v51 = vshrl.u32 %v9030_v31, %v6637_v32 }
 0x3fa   :  { %8009 = vst [vmem:[#allocation2 + $0x180] sm:$0xff] %v6415_v41  ;;  %v6477_v26 = vadd.s32 536870912, %v6476_v20  ;;  %v6641_v50 = vor.u32 %v6640_v39, %v6639_v7  ;;  %v6645_v53 = vshll.u32 %v9030_v31, %v6636_v49  ;;  %v6646_v3 = vshrl.u32 %v9031_v33, %v6637_v32 }
 0x3fb   :  { %v6602_v44 = vmul.f32 %v6601_v27, %v6599_v9  ;;  %v6644_v6 = vor.u32 %v6643_v51, %v6642_v45  ;;  %v6648_v15 = vshll.u32 %v9031_v33, %v6636_v49  ;;  %v6649_v46 = vshrl.u32 %v9032_v43, %v6637_v32 }
 0x3fc   :  { %v6606_v12 = vsel %vm6521_vm3, %v6605_v17, %v11581_v59  ;;  %v11682_v38 = vshrl.u32 %v6477_v26, 30  ;;  %v6652_v1 = vshrl.u32 %v9033_v52, %v6637_v32  ;;  %v11687_v62 = vadd.f32 %v9332_v23, %v11590_v14 }
 0x3fd   :  { %v6603_v0 = vxor.u32 2147483648, %v6602_v44  ;;  %v6647_v56 = vor.u32 %v6646_v3, %v6645_v53  ;;  %v6650_v36 = vor.u32 %v6649_v46, %v6648_v15  ;;  %v6651_v13 = vshll.u32 %v9032_v43, %v6636_v49 }
 0x3fe   :  { %v6479_v19 = vshll.u32 %v11682_v38, 30  ;;  %vm6654_vm6 = vcmp.lt.s32.totalorder %v11656_v10, 1  ;;  %vm6657_vm7 = vcmp.lt.s32.totalorder %v11656_v10, 4  ;;  %v11693_v59 = vshll.u32 %v6630_v30, 8 }
 0x3ff   :  { %v6604_v17 = vsel %vm6521_vm3, %v6603_v0, %v6602_v44  ;;  %v6653_v2 = vor.u32 %v6652_v1, %v6651_v13  ;;  %v6662_v23 = vsel %vm6654_vm6, %v6641_v50, %v6644_v6  ;;  %v6663_v14 = vsel %vm6657_vm7, %v6650_v36, 920167782 }
 0x400   :  { %v6607_v49 = vsel %vm11662_vm5, %v11395_v63, %v6604_v17  ;;  %v6608_v40 = vsel %vm11662_vm5, 0, %v6606_v12  ;;  %v11706_v7 = vsub.s32 %v6476_v20, %v6479_v19  ;;  %vm6656_vm8 = vcmp.lt.s32.totalorder %v11656_v10, 3 }
 0x401   :  { %8847 = vcosq.f32 %v6607_v49  ;;  %v6638_v30 = vshrl.u32 %v9028_v18, %v6637_v32  ;;  %vm6655_vm10 = vcmp.lt.s32.totalorder %v11656_v10, 2  ;;  %v6664_v35 = vsel %vm6656_vm8, %v6647_v56, %v6663_v14 }
 0x402   :  { %8849 = vsinq.f32 %v6607_v49  ;;  %v6482_v27 = vsub.s32 0, %v11706_v7  ;;  %v6659_v39 = vsel %vm6657_vm7, %v6647_v56, 2102212464  ;;  %v6665_v42 = vsel %vm6655_vm10, %v6662_v23, %v6664_v35  ;;  %v11755_v23 = vpop.f32.mrb[17].mxu0 }
 0x403   :  { %v6666_v20 = vsel %vm6654_vm6, %v6644_v6, %v6647_v56  ;;  %v6667_v32 = vsel %vm6657_vm7, %v6653_v2, 1326507024  ;;  %v11723_v41 = vmul.u32.u64.low %v11693_v59, %v6665_v42  ;;  %v11724_v9 = vmul.u32.u64.high %v11693_v59, %v6665_v42, %v11723_v41 }
 0x404   :  { %v8294_v45 = vmin.u32 %v6482_v27, %v11706_v7  ;;  %v6612_v51 = vand.u32 3, %v6608_v40  ;;  %v6658_v26 = vsel %vm6654_vm6, %v6638_v30, %v6641_v50  ;;  %v6660_v53 = vsel %vm6656_vm8, %v6644_v6, %v6659_v39 }
 0x405   :  { %v6668_v3 = vsel %vm6656_vm8, %v6650_v36, %v6667_v32  ;;  %v7140_v46 = vand.u32 2139095040, %v11687_v62  ;;  %v1227_v0 = vmul.f32 %v9326_v21, %v11300_v25  ;;  %vm6611_vm9 = vweird.f32 %v11395_v63 }
 0x406   :  { %v6484_v44 = vclz %v8294_v45  ;;  %v6669_v15 = vsel %vm6655_vm10, %v6666_v20, %v6668_v3  ;;  %v6661_v6 = vsel %vm6655_vm10, %v6658_v26, %v6660_v53  ;;  %v7137_v56 = vand.u32 2147483647, %v11687_v62 }
 0x407   :  { %v11738_v12 = vmul.u32.u64.low %v11693_v59, %v6669_v15  ;;  %v11739_v1 = vmul.u32.u64.high %v11693_v59, %v6669_v15, %v11738_v12  ;;  %v7141_v36 = vshrl.u32 %v7140_v46, 23  ;;  %vm6613_vm11 = vcmp.lt.s32.totalorder %v6612_v51, 2 }
 0x408   :  { %v8295_v50 = vadd.s32 4294967294, %v6484_v44  ;;  %vm6614_vm12 = vcmp.eq.s32.totalorder %v6612_v51, 0  ;;  %vm6418_vm13 = vcmp.lt.s32.totalorder %v11517_v61, 0  ;;  %v6680_v13 = vadd.s32 1, %v11724_v9 }
 0x409   :  { %vm6617_vm0 = vcmp.eq.s32.totalorder %v6612_v51, 2  ;;  %v6472_v19 = vadd.s32 %v11633_v16, %v11644_v34  ;;  %v8321_v21 = vadd.s32 4294967169, %v7141_v36  ;;  %v6502_v10 = vsub.s32 4, %v11682_v38 }
 0x40a   :  { %vm8296_vm14 = vcmp.lt.s32.totalorder %v8295_v50, 0  ;;  %v6677_v2 = vmul.u32 %v11693_v59, %v6661_v6  ;;  %vm6679_vm15 = vc.u32 %v11739_v1, %v11723_v41  ;;  %v7144_v16 = vand.u32 8388607, %v7137_v56 }
 0x40b   :  { %v8848_v25 = vpop.eup %8847  ;;  %v6487_v17 = vsel %vm8296_vm14, 0, %v8295_v50  ;;  %v6681_v27 = vsel %vm6679_vm15, %v6680_v13, %v11724_v9  ;;  %v7147_v39 = vadd.s32 1, %v8321_v21  ;;  %v6503_v26 = vsel %vm6418_vm13, %v6502_v10, %v11682_v38 }
 0x40c   :  { %v8850_v14 = vpop.eup %8849  ;;  %v6618_v49 = vxor.u32 2147483648, %v8848_v25  ;;  %v6488_v40 = vsub.s32 32, %v6487_v17  ;;  %v6492_v30 = vsub.s32 4294967266, %v6487_v17  ;;  %v6489_v35 = vshll.u32 %v11706_v7, %v6487_v17 }
 0x40d   :  { %v6615_v34 = vxor.u32 2147483648, %v8850_v14  ;;  %v6682_v32 = vadd.s32 %v6681_v27, %v6677_v2  ;;  %vm7148_vm1 = vcmp.gt.s32.totalorder %v7147_v39, 0  ;;  %v11767_v53 = vadd.f32 %v9335_v24, %v1227_v0 }
 0x40e   :  { %v6619_v59 = vsel %vm6617_vm0, %v6618_v49, %v8850_v14  ;;  %v6490_v42 = vshrl.u32 %v6472_v19, %v6488_v40  ;;  %v6493_v20 = vadd.s32 127, %v6492_v30  ;;  %vm11774_vm2 = vcmp.le.f32.partialorder %v6416_v37, 0.7853982 }
 0x40f   :  { %v6616_v45 = vsel %vm6614_vm12, %v8848_v25, %v6615_v34  ;;  %v6683_v44 = vadd.s32 536870912, %v6682_v32  ;;  %v7145_v12 = vor.u32 8388608, %v7144_v16  ;;  %v7149_v38 = vsel %vm7148_vm1, %v7147_v39, 0 }
 0x410   :  { %v6620_v7 = vsel %vm6613_vm11, %v6616_v45, %v6619_v59  ;;  %v6491_v3 = vor.u32 %v6490_v42, %v6489_v35  ;;  %v6494_v9 = vshll.u32 %v6493_v20, 23  ;;  %v6505_v24 = vsel %vm11774_vm2, 0, %v6503_v26 }
 0x411   :  { %v6621_v15 = vsel %vm6611_vm9, nan, %v6620_v7  ;;  %v11780_v51 = vshrl.u32 %v6683_v44, 30  ;;  %v7151_v0 = vand.u32 31, %v7149_v38  ;;  %v7346_v6 = vand.u32 2139095040, %v11767_v53 }
 0x412   :  { %8011 = vst [vmem:[#allocation2 + $0x190] sm:$0xff] %v6621_v15  ;;  %v6495_v50 = vor.u32 4788187, %v6494_v9  ;;  %v6498_v36 = vcvt.s32.f32 %v6491_v3  ;;  %v11784_v37 = vand.u32 3, %v6505_v24  ;;  %v11786_v21 = vshll.u32 %v7145_v12, 8 }
 0x413   :  { %v6685_v13 = vshll.u32 %v11780_v51, 30  ;;  %v7152_v19 = vsub.s32 32, %v7151_v0  ;;  %v6678_v17 = vadd.s32 %v11723_v41, %v11739_v1  ;;  %v7343_v2 = vand.u32 2147483647, %v11767_v53 }
 0x414   :  { %v6496_v63 = vand.u32 2147483647, %v6495_v50  ;;  %v7154_v14 = vshll.u32 %v9028_v18, %v7151_v0  ;;  %v7347_v30 = vshrl.u32 %v7346_v6, 23  ;;  %v7157_v35 = vshll.u32 %v9029_v29, %v7151_v0 }
 0x415   :  { %v11790_v10 = vsub.s32 %v6682_v32, %v6685_v13  ;;  %v7155_v49 = vshrl.u32 %v9029_v29, %v7152_v19  ;;  %v7158_v40 = vshrl.u32 %v9030_v31, %v7152_v19  ;;  %v7161_v27 = vshrl.u32 %v9031_v33, %v7152_v19  ;;  %v11813_v13 = vpop.f32.mrb[17].mxu1 }
 0x416   :  { %v6499_v25 = vmul.f32 %v6498_v36, %v6496_v63  ;;  %v7150_v39 = vshrl.u32 %v7149_v38, 5  ;;  %v7160_v41 = vshll.u32 %v9030_v31, %v7151_v0  ;;  %v7163_v1 = vshll.u32 %v9031_v33, %v7151_v0 }
 0x417   :  { %v6688_v34 = vsub.s32 0, %v11790_v10  ;;  %v7164_v59 = vshrl.u32 %v9032_v43, %v7152_v19  ;;  %v7156_v32 = vor.u32 %v7155_v49, %v7154_v14  ;;  %v7159_v45 = vor.u32 %v7158_v40, %v7157_v35 }
 0x418   :  { %v6500_v16 = vxor.u32 2147483648, %v6499_v25  ;;  %v7162_v7 = vor.u32 %v7161_v27, %v7160_v41  ;;  %v8329_v9 = vadd.s32 4294967169, %v7347_v30  ;;  %v7166_v15 = vshll.u32 %v9032_v43, %v7151_v0 }
 0x419   :  { %v8302_v20 = vmin.u32 %v6688_v34, %v11790_v10  ;;  %v7165_v3 = vor.u32 %v7164_v59, %v7163_v1  ;;  %v7167_v12 = vshrl.u32 %v9033_v52, %v7152_v19  ;;  %v7153_v38 = vshrl.u32 %v9028_v18, %v7152_v19 }
 0x41a   :  { %v6501_v42 = vsel %vm6418_vm13, %v6500_v16, %v6499_v25  ;;  %vm7169_vm3 = vcmp.lt.s32.totalorder %v7150_v39, 1  ;;  %vm7170_vm4 = vcmp.lt.s32.totalorder %v7150_v39, 2  ;;  %vm7172_vm5 = vcmp.lt.s32.totalorder %v7150_v39, 4 }
 0x41b   :  { %v6504_v26 = vsel %vm11774_vm2, %v11517_v61, %v6501_v42  ;;  %v6690_v44 = vclz %v8302_v20  ;;  %v7168_v24 = vor.u32 %v7167_v12, %v7166_v15  ;;  %v7177_v46 = vsel %vm7169_vm3, %v7156_v32, %v7159_v45 }
 0x41c   :  { %8851 = vcosq.f32 %v6504_v26  ;;  %vm7171_vm6 = vcmp.lt.s32.totalorder %v7150_v39, 3  ;;  %v7174_v6 = vsel %vm7172_vm5, %v7162_v7, 2102212464  ;;  %v7178_v63 = vsel %vm7172_vm5, %v7165_v3, 920167782 }
 0x41d   :  { %8853 = vsinq.f32 %v6504_v26  ;;  %v8303_v50 = vadd.s32 4294967294, %v6690_v44  ;;  %v7181_v36 = vsel %vm7169_vm3, %v7159_v45, %v7162_v7  ;;  %v7179_v0 = vsel %vm7171_vm6, %v7162_v7, %v7178_v63 }
 0x41e   :  { %v7182_v25 = vsel %vm7172_vm5, %v7168_v24, 1326507024  ;;  %v7353_v14 = vadd.s32 1, %v8329_v9  ;;  %v7173_v49 = vsel %vm7169_vm3, %v7153_v38, %v7156_v32  ;;  %v7180_v40 = vsel %vm7170_vm4, %v7177_v46, %v7179_v0 }
 0x41f   :  { %vm8304_vm7 = vcmp.lt.s32.totalorder %v8303_v50, 0  ;;  %v7183_v30 = vsel %vm7171_vm6, %v7165_v3, %v7182_v25  ;;  %vm6510_vm8 = vcmp.lt.s32.totalorder %v11784_v37, 2  ;;  %vm6624_vm10 = vcmp.lt.s32.totalorder %v11553_v55, 0 }
 0x420   :  { %v6693_v19 = vsel %vm8304_vm7, 0, %v8303_v50  ;;  %v7175_v35 = vsel %vm7171_vm6, %v7159_v45, %v7174_v6  ;;  %v7184_v27 = vsel %vm7170_vm4, %v7181_v36, %v7183_v30  ;;  %vm6508_vm9 = vweird.f32 %v11517_v61 }
 0x421   :  { %v6694_v16 = vsub.s32 32, %v6693_v19  ;;  %v6698_v34 = vsub.s32 4294967266, %v6693_v19  ;;  %v11825_v41 = vmul.u32.u64.low %v11786_v21, %v7184_v27  ;;  %v11826_v1 = vmul.u32.u64.high %v11786_v21, %v7184_v27, %v11825_v41 }
 0x422   :  { %v11829_v59 = vmul.u32.u64.low %v11786_v21, %v7180_v40  ;;  %v11830_v42 = vmul.u32.u64.high %v11786_v21, %v7180_v40, %v11829_v59  ;;  %v6695_v20 = vshll.u32 %v11790_v10, %v6693_v19  ;;  %vm7354_vm11 = vcmp.gt.s32.totalorder %v7353_v14, 0 }
 0x423   :  { %v6696_v32 = vshrl.u32 %v6678_v17, %v6694_v16  ;;  %v6699_v26 = vadd.s32 127, %v6698_v34  ;;  %vm6511_vm12 = vcmp.eq.s32.totalorder %v11784_v37, 0  ;;  %v7176_v45 = vsel %vm7170_vm4, %v7173_v49, %v7175_v35 }
 0x424   :  { %v7350_v7 = vand.u32 8388607, %v7343_v2  ;;  %v7355_v3 = vsel %vm7354_vm11, %v7353_v14, 0  ;;  %vm6514_vm13 = vcmp.eq.s32.totalorder %v11784_v37, 2  ;;  %v6708_v17 = vsub.s32 4, %v11780_v51 }
 0x425   :  { %v6697_v44 = vor.u32 %v6696_v32, %v6695_v20  ;;  %v6700_v15 = vshll.u32 %v6699_v26, 23  ;;  %v7357_v12 = vand.u32 31, %v7355_v3  ;;  %vm7194_vm0 = vc.u32 %v11826_v1, %v11829_v59 }
 0x426   :  { %v8852_v9 = vpop.eup %8851  ;;  %v7195_v10 = vadd.s32 1, %v11830_v42  ;;  %vm11845_vm14 = vcmp.le.f32.partialorder %v6622_v4, 0.7853982  ;;  %v7192_v6 = vmul.u32 %v11786_v21, %v7176_v45  ;;  %v7351_v25 = vor.u32 8388608, %v7350_v7 }
 0x427   :  { %v8854_v38 = vpop.eup %8853  ;;  %v6515_v50 = vxor.u32 2147483648, %v8852_v9  ;;  %v6701_v46 = vor.u32 4788187, %v6700_v15  ;;  %v7358_v63 = vsub.s32 32, %v7357_v12  ;;  %v1226_v14 = vmul.f32 %v9329_v22, %v11367_v54 }
 0x428   :  { %v6512_v39 = vxor.u32 2147483648, %v8854_v38  ;;  %v7196_v0 = vsel %vm7194_vm0, %v7195_v10, %v11830_v42  ;;  %v6704_v40 = vcvt.s32.f32 %v6697_v44  ;;  %v6709_v21 = vsel %vm6624_vm10, %v6708_v17, %v11780_v51 }
 0x429   :  { %v6516_v36 = vsel %vm6514_vm13, %v6515_v50, %v8854_v38  ;;  %v6702_v49 = vand.u32 2147483647, %v6701_v46  ;;  %v7197_v4 = vadd.s32 %v7196_v0, %v7192_v6  ;;  %v7361_v16 = vshrl.u32 %v9029_v29, %v7358_v63 }
 0x42a   :  { %v6513_v19 = vsel %vm6511_vm12, %v8852_v9, %v6512_v39  ;;  %v7364_v34 = vshrl.u32 %v9030_v31, %v7358_v63  ;;  %v7367_v27 = vshrl.u32 %v9031_v33, %v7358_v63  ;;  %v7356_v41 = vshrl.u32 %v7355_v3, 5 }
 0x42b   :  { %v6517_v30 = vsel %vm6510_vm8, %v6513_v19, %v6516_v36  ;;  %v6705_v54 = vmul.f32 %v6704_v40, %v6702_v49  ;;  %v7198_v35 = vadd.s32 536870912, %v7197_v4  ;;  %v7360_v37 = vshll.u32 %v9028_v18, %v7357_v12 }
 0x42c   :  { %v6518_v22 = vsel %vm6508_vm9, nan, %v6517_v30  ;;  %v7363_v42 = vshll.u32 %v9029_v29, %v7357_v12  ;;  %v7370_v20 = vshrl.u32 %v9032_v43, %v7358_v63  ;;  %v7366_v26 = vshll.u32 %v9030_v31, %v7357_v12 }
 0x42d   :  { %8010 = vst [vmem:[#allocation2 + $0x188] sm:$0xff] %v6518_v22  ;;  %v6706_v51 = vxor.u32 2147483648, %v6705_v54  ;;  %v7199_v32 = vshrl.u32 %v7198_v35, 30  ;;  %v7369_v45 = vshll.u32 %v9031_v33, %v7357_v12  ;;  %v7362_v61 = vor.u32 %v7361_v16, %v7360_v37 }
 0x42e   :  { %v7365_v7 = vor.u32 %v7364_v34, %v7363_v42  ;;  %v7372_v9 = vshll.u32 %v9032_v43, %v7357_v12  ;;  %v7373_v44 = vshrl.u32 %v9033_v52, %v7358_v63  ;;  %v7368_v38 = vor.u32 %v7367_v27, %v7366_v26 }
 0x42f   :  { %v6707_v3 = vsel %vm6624_vm10, %v6706_v51, %v6705_v54  ;;  %v7200_v15 = vshll.u32 %v7199_v32, 30  ;;  %v7371_v50 = vor.u32 %v7370_v20, %v7369_v45  ;;  %v11877_v39 = vshll.u32 %v7351_v25, 8 }
 0x430   :  { %v6710_v17 = vsel %vm11845_vm14, %v11553_v55, %v6707_v3  ;;  %v7374_v10 = vor.u32 %v7373_v44, %v7372_v9  ;;  %v1228_v46 = vmul.f32 %v9369_v48, %v11459_v57  ;;  %v6711_v12 = vsel %vm11845_vm14, 0, %v6709_v21 }
 0x431   :  { %8855 = vcosq.f32 %v6710_v17  ;;  %v11883_v6 = vsub.s32 %v7197_v4, %v7200_v15  ;;  %v11886_v36 = vadd.f32 %v9339_v28, %v1226_v14  ;;  %vm7375_vm15 = vcmp.lt.s32.totalorder %v7356_v41, 1 }
 0x432   :  { %8857 = vsinq.f32 %v6710_v17  ;;  %vm7377_vm1 = vcmp.lt.s32.totalorder %v7356_v41, 3  ;;  %vm7378_vm2 = vcmp.lt.s32.totalorder %v7356_v41, 4  ;;  %v7383_v19 = vsel %vm7375_vm15, %v7362_v61, %v7365_v7 }
 0x433   :  { %v7203_v0 = vsub.s32 0, %v11883_v6  ;;  %v7380_v25 = vsel %vm7378_vm2, %v7368_v38, 2102212464  ;;  %v7384_v49 = vsel %vm7378_vm2, %v7371_v50, 920167782  ;;  %v7359_v48 = vshrl.u32 %v9028_v18, %v7358_v63 }
 0x434   :  { %v7385_v57 = vsel %vm7377_vm1, %v7368_v38, %v7384_v49  ;;  %v7387_v24 = vsel %vm7375_vm15, %v7365_v7, %v7368_v38  ;;  %v7388_v40 = vsel %vm7378_vm2, %v7374_v10, 1326507024  ;;  %v6715_v4 = vand.u32 3, %v6711_v12  ;;  %v11931_v10 = vpop.f32.mrb[18].mxu0 }
 0x435   :  { %v8322_v30 = vmin.u32 %v7203_v0, %v11883_v6  ;;  %v7223_v28 = vsub.s32 4, %v7199_v32  ;;  %vm7376_vm3 = vcmp.lt.s32.totalorder %v7356_v41, 2  ;;  %v7379_v14 = vsel %vm7375_vm15, %v7359_v48, %v7362_v61  ;;  %v11987_v41 = vpop.f32.mrb[18].mxu1 }
 0x436   :  { %v7381_v21 = vsel %vm7377_vm1, %v7365_v7, %v7380_v25  ;;  %v7386_v16 = vsel %vm7376_vm3, %v7383_v19, %v7385_v57  ;;  %v7389_v34 = vsel %vm7377_vm1, %v7371_v50, %v7388_v40  ;;  %vm6714_vm4 = vweird.f32 %v11553_v55 }
 0x437   :  { %v7205_v22 = vclz %v8322_v30  ;;  %v7390_v54 = vsel %vm7376_vm3, %v7387_v24, %v7389_v34  ;;  %v11895_v35 = vmul.u32.u64.low %v11877_v39, %v7386_v16  ;;  %v11896_v63 = vmul.u32.u64.high %v11877_v39, %v7386_v16, %v11895_v35 }
 0x438   :  { %vm7139_vm5 = vcmp.lt.s32.totalorder %v11687_v62, 0  ;;  %v11902_v27 = vmul.u32.u64.low %v11877_v39, %v7390_v54  ;;  %v11903_v37 = vmul.u32.u64.high %v11877_v39, %v7390_v54, %v11902_v27  ;;  %v7243_v42 = vand.u32 2139095040, %v11886_v36 }
 0x439   :  { %vm6716_vm6 = vcmp.lt.s32.totalorder %v6715_v4, 2  ;;  %vm11908_vm7 = vcmp.le.f32.partialorder %v7137_v56, 0.7853982  ;;  %v8323_v20 = vadd.s32 4294967294, %v7205_v22  ;;  %v7382_v51 = vsel %vm7376_vm3, %v7379_v14, %v7381_v21 }
 0x43a   :  { %v7240_v26 = vand.u32 2147483647, %v11886_v36  ;;  %vm6717_vm8 = vcmp.eq.s32.totalorder %v6715_v4, 0  ;;  %vm6720_vm10 = vcmp.eq.s32.totalorder %v6715_v4, 2  ;;  %v7244_v45 = vshrl.u32 %v7243_v42, 23 }
 0x43b   :  { %v11914_v61 = vadd.f32 %v9380_v60, %v1228_v46  ;;  %v8856_v7 = vpop.eup %8855  ;;  %v7193_v9 = vadd.s32 %v11829_v59, %v11826_v1  ;;  %vm8324_vm9 = vcmp.lt.s32.totalorder %v8323_v20, 0  ;;  %v7224_v56 = vsel %vm7139_vm5, %v7223_v28, %v7199_v32  ;;  %v11927_v60 = vld [vmem:[%s14759_s2 + $0x8] sm:$0xff]  ;;  %s9034_s2 = smov [#allocation2]  }
 0x43c   :  { %v7401_v44 = vadd.s32 1, %v11896_v63  ;;  %v8858_v3 = vpop.eup %8857  ;;  %v6721_v15 = vxor.u32 2147483648, %v8856_v7  ;;  %v7208_v38 = vsel %vm8324_vm9, 0, %v8323_v20  ;;  %v7398_v50 = vmul.u32 %v11877_v39, %v7382_v51  ;;  %s8030_s19 = sshll.u32 %s9034_s2, 4  ;;  %s8031_s19 = int_to_ptr.vmem [resolvable:$true] %s8030_s19 }
 0x43d   :  { %vm7400_vm11 = vc.u32 %v11903_v37, %v11895_v35  ;;  %v6718_v1 = vxor.u32 2147483648, %v8858_v3  ;;  %v7209_v59 = vsub.s32 32, %v7208_v38  ;;  %v7213_v17 = vsub.s32 4294967266, %v7208_v38  ;;  %s9003_s20 = scalar_lea.vmem %s8031_s19, 8192  ;;  %p9008_p1 = scmp.lt.s32.totalorder %s8031_s19, %s8031_s19 }
 0x43e   :  { %v7247_v32 = vand.u32 8388607, %v7240_v26  ;;  %v6722_v46 = vsel %vm6720_vm10, %v6721_v15, %v8858_v3  ;;  %v7210_v39 = vshll.u32 %v11883_v6, %v7208_v38  ;;  %v7402_v12 = vsel %vm7400_vm11, %v7401_v44, %v11896_v63  ;;  %p9004_p0 = scmp.ne.s32.totalorder %s8031_s19, %s9003_s20  ;;  %p9009_p2 = scmp.lt.s32.totalorder %s9003_s20, %s9003_s20 }
 0x43f   :  { %v8325_v0 = vadd.s32 4294967169, %v7244_v45  ;;  %v6719_v25 = vsel %vm6717_vm8, %v8856_v7, %v6718_v1  ;;  %v7211_v19 = vshrl.u32 %v7193_v9, %v7209_v59  ;;  %v7214_v49 = vadd.s32 127, %v7213_v17 }
 0x440   :  { %v7403_v48 = vadd.s32 %v7402_v12, %v7398_v50  ;;  %v6723_v57 = vsel %vm6716_vm6, %v6719_v25, %v6722_v46  ;;  %v7449_v40 = vand.u32 2139095040, %v11914_v61  ;;  %v1116_v30 = vrot.slane %v11927_v60, %v9300_v8  ;;  %p9010_p3 = por %p9009_p2, %p9008_p1 }
 0x441   :  { %v7250_v24 = vadd.s32 1, %v8325_v0  ;;  %v6724_v28 = vsel %vm6714_vm4, nan, %v6723_v57  ;;  %v7212_v6 = vor.u32 %v7211_v19, %v7210_v39  ;;  %v7215_v14 = vshll.u32 %v7214_v49, 23 }
 0x442   :  { %v7404_v21 = vadd.s32 536870912, %v7403_v48  ;;  %8012 = vst [vmem:[#allocation2 + $0x198] sm:$0xff] %v6724_v28  ;;  %v7226_v16 = vsel %vm11908_vm7, 0, %v7224_v56  ;;  %v1252_v4 = vrot.slane %v11927_v60, %v9308_v11  ;;  %v7248_v54 = vor.u32 8388608, %v7247_v32  ;;  %p9011_p4 = pnand %p9010_p3, %p9004_p0 }
 0x443   :  { %vm7251_vm12 = vcmp.gt.s32.totalorder %v7250_v24, 0  ;;  %v7216_v34 = vor.u32 4788187, %v7215_v14  ;;  %v7450_v42 = vshrl.u32 %v7449_v40, 23  ;;  %v7219_v20 = vcvt.s32.f32 %v7212_v6 }
 0x444   :  { %v11947_v22 = vshrl.u32 %v7404_v21, 30  ;;  %v7252_v63 = vsel %vm7251_vm12, %v7250_v24, 0  ;;  %v11951_v45 = vrot.slane %v1116_v30, %v9300_v8  ;;  %v11953_v7 = vand.u32 3, %v7226_v16 }
 0x445   :  { %v7254_v27 = vand.u32 31, %v7252_v63  ;;  %v7217_v55 = vand.u32 2147483647, %v7216_v34  ;;  %v7446_v56 = vand.u32 2147483647, %v11914_v61  ;;  %v11957_v44 = vrot.slane %v1252_v4, %v9308_v11 }
 0x446   :  { %v7406_v51 = vshll.u32 %v11947_v22, 30  ;;  %v7399_v15 = vadd.s32 %v11895_v35, %v11903_v37  ;;  %v11963_v50 = vshll.u32 %v7248_v54, 8  ;;  %v7253_v1 = vshrl.u32 %v7252_v63, 5 }
 0x447   :  { %v7255_v9 = vsub.s32 32, %v7254_v27  ;;  %v7220_v3 = vmul.f32 %v7219_v20, %v7217_v55  ;;  %v8333_v32 = vadd.s32 4294967169, %v7450_v42  ;;  %v7257_v12 = vshll.u32 %v9028_v18, %v7254_v27 }
 0x448   :  { %v11961_v38 = vsub.s32 %v7403_v48, %v7406_v51  ;;  %v7260_v25 = vshll.u32 %v9029_v29, %v7254_v27  ;;  %v7263_v35 = vshll.u32 %v9030_v31, %v7254_v27  ;;  %v7266_v37 = vshll.u32 %v9031_v33, %v7254_v27 }
 0x449   :  { %v7258_v59 = vshrl.u32 %v9029_v29, %v7255_v9  ;;  %v7261_v17 = vshrl.u32 %v9030_v31, %v7255_v9  ;;  %v7221_v46 = vxor.u32 2147483648, %v7220_v3  ;;  %v7264_v0 = vshrl.u32 %v9031_v33, %v7255_v9 }
 0x44a   :  { %v7409_v39 = vsub.s32 0, %v11961_v38  ;;  %v7267_v19 = vshrl.u32 %v9032_v43, %v7255_v9  ;;  %v11979_v24 = vand.u32 8388607, %v7446_v56  ;;  %v7269_v21 = vshll.u32 %v9032_v43, %v7254_v27 }
 0x44b   :  { %v7222_v49 = vsel %vm7139_vm5, %v7221_v46, %v7220_v3  ;;  %v7259_v57 = vor.u32 %v7258_v59, %v7257_v12  ;;  %v7262_v30 = vor.u32 %v7261_v17, %v7260_v25  ;;  %v7265_v28 = vor.u32 %v7264_v0, %v7263_v35 }
 0x44c   :  { %v8330_v48 = vmin.u32 %v7409_v39, %v11961_v38  ;;  %v7225_v40 = vsel %vm11908_vm7, %v11687_v62, %v7222_v49  ;;  %v7268_v6 = vor.u32 %v7267_v19, %v7266_v37  ;;  %v7270_v16 = vshrl.u32 %v9033_v52, %v7255_v9 }
 0x44d   :  { %8859 = vcosq.f32 %v7225_v40  ;;  %v7256_v4 = vshrl.u32 %v9028_v18, %v7255_v9  ;;  %vm7272_vm13 = vcmp.lt.s32.totalorder %v7253_v1, 1  ;;  %v7456_v34 = vadd.s32 1, %v8333_v32 }
 0x44e   :  { %v7411_v14 = vclz %v8330_v48  ;;  %8861 = vsinq.f32 %v7225_v40  ;;  %v7271_v63 = vor.u32 %v7270_v16, %v7269_v21  ;;  %vm7274_vm0 = vcmp.lt.s32.totalorder %v7253_v1, 3 }
 0x44f   :  { %vm7275_vm14 = vcmp.lt.s32.totalorder %v7253_v1, 4  ;;  %v7280_v55 = vsel %vm7272_vm13, %v7259_v57, %v7262_v30  ;;  %v7284_v51 = vsel %vm7272_vm13, %v7262_v30, %v7265_v28  ;;  %vm7273_vm1 = vcmp.lt.s32.totalorder %v7253_v1, 2 }
 0x450   :  { %v8331_v54 = vadd.s32 4294967294, %v7411_v14  ;;  %v7277_v42 = vsel %vm7275_vm14, %v7265_v28, 2102212464  ;;  %v7281_v20 = vsel %vm7275_vm14, %v7268_v6, 920167782  ;;  %vm7232_vm2 = vcmp.eq.s32.totalorder %v11953_v7, 0 }
 0x451   :  { %v7282_v27 = vsel %vm7274_vm0, %v7265_v28, %v7281_v20  ;;  %v7285_v3 = vsel %vm7275_vm14, %v7271_v63, 1326507024  ;;  %v7276_v59 = vsel %vm7272_vm13, %v7256_v4, %v7259_v57  ;;  %vm7231_vm3 = vcmp.lt.s32.totalorder %v11953_v7, 2 }
 0x452   :  { %vm8332_vm15 = vcmp.lt.s32.totalorder %v8331_v54, 0  ;;  %v7283_v17 = vsel %vm7273_vm1, %v7280_v55, %v7282_v27  ;;  %v7286_v32 = vsel %vm7274_vm0, %v7268_v6, %v7285_v3  ;;  %vm7345_vm4 = vcmp.lt.s32.totalorder %v11767_v53, 0 }
 0x453   :  { %v7414_v9 = vsel %vm8332_vm15, 0, %v8331_v54  ;;  %v7278_v12 = vsel %vm7274_vm0, %v7262_v30, %v7277_v42  ;;  %v7287_v0 = vsel %vm7273_vm1, %v7284_v51, %v7286_v32  ;;  %vm7229_vm5 = vweird.f32 %v11687_v62 }
 0x454   :  { %v7415_v46 = vsub.s32 32, %v7414_v9  ;;  %v7419_v39 = vsub.s32 4294967266, %v7414_v9  ;;  %v12002_v25 = vmul.u32.u64.low %v11963_v50, %v7287_v0  ;;  %v12003_v35 = vmul.u32.u64.high %v11963_v50, %v7287_v0, %v12002_v25 }
 0x455   :  { %v12006_v37 = vmul.u32.u64.low %v11963_v50, %v7283_v17  ;;  %v12007_v19 = vmul.u32.u64.high %v11963_v50, %v7283_v17, %v12006_v37  ;;  %v7416_v49 = vshll.u32 %v11961_v38, %v7414_v9  ;;  %vm7457_vm6 = vcmp.gt.s32.totalorder %v7456_v34, 0 }
 0x456   :  { %v7417_v48 = vshrl.u32 %v7399_v15, %v7415_v46  ;;  %v7420_v57 = vadd.s32 127, %v7419_v39  ;;  %v7279_v40 = vsel %vm7273_vm1, %v7276_v59, %v7278_v12  ;;  %v7454_v30 = vor.u32 8388608, %v11979_v24 }
 0x457   :  { %v7458_v28 = vsel %vm7457_vm6, %v7456_v34, 0  ;;  %v1173_v6 = vmul.f32 %v11951_v45, %v11560_v47  ;;  %v8860_v14 = vpop.eup %8859  ;;  %vm7235_vm7 = vcmp.eq.s32.totalorder %v11953_v7, 2  ;;  %v7429_v15 = vsub.s32 4, %v11947_v22 }
 0x458   :  { %v7418_v21 = vor.u32 %v7417_v48, %v7416_v49  ;;  %v7421_v16 = vshll.u32 %v7420_v57, 23  ;;  %v7460_v4 = vand.u32 31, %v7458_v28  ;;  %v8862_v54 = vpop.eup %8861  ;;  %v7236_v63 = vxor.u32 2147483648, %v8860_v14 }
 0x459   :  { %vm7297_vm8 = vc.u32 %v12003_v35, %v12006_v37  ;;  %v7298_v38 = vadd.s32 1, %v12007_v19  ;;  %v7233_v1 = vxor.u32 2147483648, %v8862_v54  ;;  %vm12022_vm10 = vcmp.le.f32.partialorder %v7343_v2, 0.7853982 }
 0x45a   :  { %v7422_v24 = vor.u32 4788187, %v7421_v16  ;;  %v7295_v34 = vmul.u32 %v11963_v50, %v7279_v40  ;;  %v7461_v42 = vsub.s32 32, %v7460_v4  ;;  %v7237_v55 = vsel %vm7235_vm7, %v7236_v63, %v8862_v54 }
 0x45b   :  { %v7299_v20 = vsel %vm7297_vm8, %v7298_v38, %v12007_v19  ;;  %v12028_v51 = vshll.u32 %v7454_v30, 8  ;;  %v12031_v27 = vadd.f32 %v11957_v44, %v1173_v6  ;;  %v7234_v3 = vsel %vm7232_vm2, %v8860_v14, %v7233_v1 }
 0x45c   :  { %v7423_v9 = vand.u32 2147483647, %v7422_v24  ;;  %v7425_v2 = vcvt.s32.f32 %v7418_v21  ;;  %v7300_v59 = vadd.s32 %v7299_v20, %v7295_v34  ;;  %v7238_v17 = vsel %vm7231_vm3, %v7234_v3, %v7237_v55 }
 0x45d   :  { %v7430_v50 = vsel %vm7345_vm4, %v7429_v15, %v11947_v22  ;;  %v7464_v32 = vshrl.u32 %v9029_v29, %v7461_v42  ;;  %v7467_v46 = vshrl.u32 %v9030_v31, %v7461_v42  ;;  %v7239_v39 = vsel %vm7229_vm5, nan, %v7238_v17 }
 0x45e   :  { %v7426_v12 = vmul.f32 %v7425_v2, %v7423_v9  ;;  %v7301_v0 = vadd.s32 536870912, %v7300_v59  ;;  %v7470_v25 = vshrl.u32 %v9031_v33, %v7461_v42  ;;  %8017 = vst [vmem:[#allocation2 + $0x1c0] sm:$0xff] %v7239_v39  ;;  %v7459_v19 = vshrl.u32 %v7458_v28, 5 }
 0x45f   :  { %v7463_v7 = vshll.u32 %v9028_v18, %v7460_v4  ;;  %v7469_v49 = vshll.u32 %v9030_v31, %v7460_v4  ;;  %v7473_v48 = vshrl.u32 %v9032_v43, %v7461_v42  ;;  %vm7242_vm9 = vcmp.lt.s32.totalorder %v11886_v36, 0 }
 0x460   :  { %v7427_v22 = vxor.u32 2147483648, %v7426_v12  ;;  %v7302_v57 = vshrl.u32 %v7301_v0, 30  ;;  %v7466_v40 = vshll.u32 %v9029_v29, %v7460_v4  ;;  %v7472_v62 = vshll.u32 %v9031_v33, %v7460_v4 }
 0x461   :  { %v7465_v30 = vor.u32 %v7464_v32, %v7463_v7  ;;  %v7471_v6 = vor.u32 %v7470_v25, %v7469_v49  ;;  %v7475_v14 = vshll.u32 %v9032_v43, %v7460_v4  ;;  %v7476_v28 = vshrl.u32 %v9033_v52, %v7461_v42 }
 0x462   :  { %v7428_v21 = vsel %vm7345_vm4, %v7427_v22, %v7426_v12  ;;  %v7303_v16 = vshll.u32 %v7302_v57, 30  ;;  %v7468_v54 = vor.u32 %v7467_v46, %v7466_v40  ;;  %v7474_v63 = vor.u32 %v7473_v48, %v7472_v62 }
 0x463   :  { %v7431_v15 = vsel %vm12022_vm10, %v11767_v53, %v7428_v21  ;;  %v7432_v38 = vsel %vm12022_vm10, 0, %v7430_v50  ;;  %v7477_v1 = vor.u32 %v7476_v28, %v7475_v14  ;;  %v1784_v24 = vand.u32 2139095040, %v12031_v27 }
 0x464   :  { %8863 = vcosq.f32 %v7431_v15  ;;  %v12061_v4 = vsub.s32 %v7300_v59, %v7303_v16  ;;  %v7462_v34 = vshrl.u32 %v9028_v18, %v7461_v42  ;;  %vm7481_vm11 = vcmp.lt.s32.totalorder %v7459_v19, 4 }
 0x465   :  { %8865 = vsinq.f32 %v7431_v15  ;;  %v7326_v55 = vsub.s32 4, %v7302_v57  ;;  %vm7478_vm12 = vcmp.lt.s32.totalorder %v7459_v19, 1  ;;  %v7483_v20 = vsel %vm7481_vm11, %v7471_v6, 2102212464 }
 0x466   :  { %v7306_v3 = vsub.s32 0, %v12061_v4  ;;  %vm7480_vm13 = vcmp.lt.s32.totalorder %v7459_v19, 3  ;;  %v7486_v9 = vsel %vm7478_vm12, %v7465_v30, %v7468_v54  ;;  %v7487_v2 = vsel %vm7481_vm11, %v7474_v63, 920167782 }
 0x467   :  { %v7436_v47 = vand.u32 3, %v7432_v38  ;;  %v7488_v17 = vsel %vm7480_vm13, %v7471_v6, %v7487_v2  ;;  %v7490_v50 = vsel %vm7478_vm12, %v7468_v54, %v7471_v6  ;;  %v7491_v32 = vsel %vm7481_vm11, %v7477_v1, 1326507024 }
 0x468   :  { %v8326_v46 = vmin.u32 %v7306_v3, %v12061_v4  ;;  %vm7479_vm0 = vcmp.lt.s32.totalorder %v7459_v19, 2  ;;  %v7482_v59 = vsel %vm7478_vm12, %v7462_v34, %v7465_v30  ;;  %v7484_v39 = vsel %vm7480_vm13, %v7468_v54, %v7483_v20 }
 0x469   :  { %v7327_v42 = vsel %vm7242_vm9, %v7326_v55, %v7302_v57  ;;  %v7489_v12 = vsel %vm7479_vm0, %v7486_v9, %v7488_v17  ;;  %v7492_v0 = vsel %vm7480_vm13, %v7474_v63, %v7491_v32  ;;  %v1785_v25 = vshrl.u32 %v1784_v24, 23 }
 0x46a   :  { %v7308_v7 = vclz %v8326_v46  ;;  %v7493_v49 = vsel %vm7479_vm0, %v7490_v50, %v7492_v0  ;;  %v12069_v48 = vmul.u32.u64.low %v12028_v51, %v7489_v12  ;;  %v12070_v22 = vmul.u32.u64.high %v12028_v51, %v7489_v12, %v12069_v48 }
 0x46b   :  { %vm7435_vm14 = vweird.f32 %v11767_v53  ;;  %v7485_v40 = vsel %vm7479_vm0, %v7482_v59, %v7484_v39  ;;  %v12075_v19 = vmul.u32.u64.low %v12028_v51, %v7493_v49  ;;  %v12076_v62 = vmul.u32.u64.high %v12028_v51, %v7493_v49, %v12075_v19 }
 0x46c   :  { %v8113_v30 = vadd.s32 4294967169, %v1785_v25  ;;  %vm7437_vm15 = vcmp.lt.s32.totalorder %v7436_v47, 2  ;;  %vm12080_vm1 = vcmp.le.f32.partialorder %v7240_v26, 0.7853982  ;;  %v8327_v6 = vadd.s32 4294967294, %v7308_v7 }
 0x46d   :  { %v1781_v14 = vand.u32 2147483647, %v12031_v27  ;;  %vm7438_vm2 = vcmp.eq.s32.totalorder %v7436_v47, 0  ;;  %vm7441_vm3 = vcmp.eq.s32.totalorder %v7436_v47, 2  ;;  %v7296_v28 = vadd.s32 %v12006_v37, %v12003_v35  ;;  %v12096_v37 = vpop.f32.mrb[19].mxu0 }
 0x46e   :  { %v1791_v21 = vadd.s32 1, %v8113_v30  ;;  %v8864_v16 = vpop.eup %8863  ;;  %vm8328_vm4 = vcmp.lt.s32.totalorder %v8327_v6, 0  ;;  %v7329_v54 = vsel %vm12080_vm1, 0, %v7327_v42  ;;  %v7501_v63 = vmul.u32 %v12028_v51, %v7485_v40 }
 0x46f   :  { %v7504_v26 = vadd.s32 1, %v12070_v22  ;;  %v8866_v15 = vpop.eup %8865  ;;  %v7442_v38 = vxor.u32 2147483648, %v8864_v16  ;;  %v7311_v1 = vsel %vm8328_vm4, 0, %v8327_v6  ;;  %vm7503_vm5 = vc.u32 %v12076_v62, %v12069_v48 }
 0x470   :  { %v14833_v24 = vsub.s32 4, %v9297_v5  ;;  %v7439_v34 = vxor.u32 2147483648, %v8866_v15  ;;  %v7312_v55 = vsub.s32 32, %v7311_v1  ;;  %v7316_v20 = vsub.s32 4294967266, %v7311_v1 }
 0x471   :  { %v1788_v51 = vand.u32 8388607, %v1781_v14  ;;  %v7443_v3 = vsel %vm7441_vm3, %v7442_v38, %v8866_v15  ;;  %v7313_v9 = vshll.u32 %v12061_v4, %v7311_v1  ;;  %v7505_v2 = vsel %vm7503_vm5, %v7504_v26, %v12070_v22 }
 0x472   :  { %v1124_v35 = vrot.slane %v11927_v60, %v14833_v24  ;;  %vm1792_vm6 = vcmp.gt.s32.totalorder %v1791_v21, 0  ;;  %v7440_v17 = vsel %vm7438_vm2, %v8864_v16, %v7439_v34  ;;  %v7314_v50 = vshrl.u32 %v7296_v28, %v7312_v55 }
 0x473   :  { %v7317_v32 = vadd.s32 127, %v7316_v20  ;;  %v7506_v46 = vadd.s32 %v7505_v2, %v7501_v63  ;;  %v7444_v59 = vsel %vm7437_vm15, %v7440_v17, %v7443_v3  ;;  %v1793_v39 = vsel %vm1792_vm6, %v1791_v21, 0 }
 0x474   :  { %v12106_v42 = vrot.slane %v1124_v35, %v9300_v8  ;;  %v14834_v12 = vsub.s32 5, %v9297_v5  ;;  %v7445_v4 = vsel %vm7435_vm14, nan, %v7444_v59  ;;  %v7315_v25 = vor.u32 %v7314_v50, %v7313_v9 }
 0x475   :  { %v7318_v7 = vshll.u32 %v7317_v32, 23  ;;  %v7507_v49 = vadd.s32 536870912, %v7506_v46  ;;  %8019 = vst [vmem:[#allocation2 + $0x1d0] sm:$0xff] %v7445_v4  ;;  %v1795_v22 = vand.u32 31, %v1793_v39  ;;  %v12115_v47 = vand.u32 3, %v7329_v54 }
 0x476   :  { %v1260_v0 = vrot.slane %v11927_v60, %v14834_v12  ;;  %v1789_v30 = vor.u32 8388608, %v1788_v51  ;;  %v7322_v16 = vcvt.s32.f32 %v7315_v25  ;;  %v1175_v63 = vmul.f32 %v12106_v42, %v11628_v58 }
 0x477   :  { %v7319_v40 = vor.u32 4788187, %v7318_v7  ;;  %v12113_v19 = vshrl.u32 %v7507_v49, 30  ;;  %v1796_v6 = vsub.s32 32, %v1795_v22  ;;  %v1798_v26 = vshll.u32 %v9028_v18, %v1795_v22 }
 0x478   :  { %v12118_v28 = vrot.slane %v1260_v0, %v9308_v11  ;;  %v1801_v35 = vshll.u32 %v9029_v29, %v1795_v22  ;;  %v1794_v55 = vshrl.u32 %v1793_v39, 5  ;;  %v1804_v20 = vshll.u32 %v9030_v31, %v1795_v22 }
 0x479   :  { %v7320_v21 = vand.u32 2147483647, %v7319_v40  ;;  %v7509_v53 = vshll.u32 %v12113_v19, 30  ;;  %v1799_v15 = vshrl.u32 %v9029_v29, %v1796_v6  ;;  %v1802_v38 = vshrl.u32 %v9030_v31, %v1796_v6 }
 0x47a   :  { %v1805_v54 = vshrl.u32 %v9031_v33, %v1796_v6  ;;  %v1808_v34 = vshrl.u32 %v9032_v43, %v1796_v6  ;;  %v1807_v58 = vshll.u32 %v9031_v33, %v1795_v22  ;;  %v14835_v51 = vsub.s32 2, %v9297_v5 }
 0x47b   :  { %v7323_v1 = vmul.f32 %v7322_v16, %v7320_v21  ;;  %v12127_v24 = vsub.s32 %v7506_v46, %v7509_v53  ;;  %v1800_v17 = vor.u32 %v1799_v15, %v1798_v26  ;;  %v1803_v50 = vor.u32 %v1802_v38, %v1801_v35  ;;  %v12153_v26 = vpop.f32.mrb[19].mxu1 }
 0x47c   :  { %v1120_v3 = vrot.slane %v11927_v60, %v14835_v51  ;;  %v1806_v32 = vor.u32 %v1805_v54, %v1804_v20  ;;  %v1809_v46 = vor.u32 %v1808_v34, %v1807_v58  ;;  %v1810_v59 = vshll.u32 %v9032_v43, %v1795_v22 }
 0x47d   :  { %v7324_v9 = vxor.u32 2147483648, %v7323_v1  ;;  %v7512_v2 = vsub.s32 0, %v12127_v24  ;;  %v1811_v12 = vshrl.u32 %v9033_v52, %v1796_v6  ;;  %v12142_v4 = vshll.u32 %v1789_v30, 8 }
 0x47e   :  { %v12145_v25 = vadd.f32 %v12118_v28, %v1175_v63  ;;  %v1797_v49 = vshrl.u32 %v9028_v18, %v1796_v6  ;;  %vm1813_vm7 = vcmp.lt.s32.totalorder %v1794_v55, 1  ;;  %vm1815_vm8 = vcmp.lt.s32.totalorder %v1794_v55, 3 }
 0x47f   :  { %v7325_v39 = vsel %vm7242_vm9, %v7324_v9, %v7323_v1  ;;  %v8334_v0 = vmin.u32 %v7512_v2, %v12127_v24  ;;  %v1812_v40 = vor.u32 %v1811_v12, %v1810_v59  ;;  %vm1816_vm10 = vcmp.lt.s32.totalorder %v1794_v55, 4 }
 0x480   :  { %v7328_v7 = vsel %vm12080_vm1, %v11886_v36, %v7325_v39  ;;  %vm7448_vm9 = vcmp.lt.s32.totalorder %v11914_v61, 0  ;;  %v1818_v30 = vsel %vm1816_vm10, %v1806_v32, 2102212464  ;;  %v1821_v21 = vsel %vm1813_vm7, %v1800_v17, %v1803_v50 }
 0x481   :  { %8867 = vcosq.f32 %v7328_v7  ;;  %v7514_v22 = vclz %v8334_v0  ;;  %v1822_v16 = vsel %vm1816_vm10, %v1809_v46, 920167782  ;;  %vm1814_vm11 = vcmp.lt.s32.totalorder %v1794_v55, 2 }
 0x482   :  { %8869 = vsinq.f32 %v7328_v7  ;;  %v1823_v63 = vsel %vm1815_vm8, %v1806_v32, %v1822_v16  ;;  %v1825_v57 = vsel %vm1813_vm7, %v1803_v50, %v1806_v32  ;;  %v1817_v6 = vsel %vm1813_vm7, %v1797_v49, %v1800_v17 }
 0x483   :  { %v8335_v53 = vadd.s32 4294967294, %v7514_v22  ;;  %v1819_v15 = vsel %vm1815_vm8, %v1803_v50, %v1818_v30  ;;  %v1824_v38 = vsel %vm1814_vm11, %v1821_v21, %v1823_v63  ;;  %v1826_v54 = vsel %vm1816_vm10, %v1812_v40, 1326507024 }
 0x484   :  { %v1827_v1 = vsel %vm1815_vm8, %v1809_v46, %v1826_v54  ;;  %v12159_v35 = vmul.u32.u64.low %v12142_v4, %v1824_v38  ;;  %v12160_v34 = vmul.u32.u64.high %v12142_v4, %v1824_v38, %v12159_v35  ;;  %vm12165_vm13 = vcmp.le.f32.partialorder %v7446_v56, 0.7853982 }
 0x485   :  { %vm8336_vm12 = vcmp.lt.s32.totalorder %v8335_v53, 0  ;;  %v1828_v51 = vsel %vm1814_vm11, %v1825_v57, %v1827_v1  ;;  %v12171_v9 = vrot.slane %v1120_v3, %v9300_v8  ;;  %v14838_v2 = vsub.s32 3, %v9297_v5 }
 0x486   :  { %v7517_v58 = vsel %vm8336_vm12, 0, %v8335_v53  ;;  %v7502_v50 = vadd.s32 %v12069_v48, %v12076_v62  ;;  %v7532_v56 = vsub.s32 4, %v12113_v19  ;;  %vm7332_vm0 = vweird.f32 %v11886_v36 }
 0x487   :  { %v1256_v17 = vrot.slane %v11927_v60, %v14838_v2  ;;  %v7518_v32 = vsub.s32 32, %v7517_v58  ;;  %v7522_v46 = vsub.s32 4294967266, %v7517_v58  ;;  %v1820_v59 = vsel %vm1814_vm11, %v1817_v6, %v1819_v15 }
 0x488   :  { %v12182_v12 = vmul.u32.u64.low %v12142_v4, %v1828_v51  ;;  %v12183_v39 = vmul.u32.u64.high %v12142_v4, %v1828_v51, %v12182_v12  ;;  %v1990_v3 = vand.u32 2139095040, %v12145_v25  ;;  %v7519_v0 = vshll.u32 %v12127_v24, %v7517_v58 }
 0x489   :  { %v7520_v7 = vshrl.u32 %v7502_v50, %v7518_v32  ;;  %v7523_v49 = vadd.s32 127, %v7522_v46  ;;  %v1839_v48 = vadd.s32 1, %v12160_v34  ;;  %vm7334_vm14 = vcmp.lt.s32.totalorder %v12115_v47, 2 }
 0x48a   :  { %vm7338_vm15 = vcmp.eq.s32.totalorder %v12115_v47, 2  ;;  %v1991_v62 = vshrl.u32 %v1990_v3, 23  ;;  %v1174_v55 = vmul.f32 %v12171_v9, %v11755_v23  ;;  %v7533_v21 = vsel %vm7448_vm9, %v7532_v56, %v12113_v19 }
 0x48b   :  { %v8868_v40 = vpop.eup %8867  ;;  %v7521_v22 = vor.u32 %v7520_v7, %v7519_v0  ;;  %v7524_v30 = vshll.u32 %v7523_v49, 23  ;;  %v1987_v24 = vand.u32 2147483647, %v12145_v25  ;;  %v1836_v63 = vmul.u32 %v12142_v4, %v1820_v59 }
 0x48c   :  { %v8870_v16 = vpop.eup %8869  ;;  %v7339_v53 = vxor.u32 2147483648, %v8868_v40  ;;  %vm1838_vm1 = vc.u32 %v12183_v39, %v12159_v35  ;;  %v8121_v57 = vadd.s32 4294967169, %v1991_v62  ;;  %v12201_v38 = vrot.slane %v1256_v17, %v9308_v11 }
 0x48d   :  { %v7336_v6 = vxor.u32 2147483648, %v8870_v16  ;;  %v7525_v15 = vor.u32 4788187, %v7524_v30  ;;  %v1840_v23 = vsel %vm1838_vm1, %v1839_v48, %v12160_v34  ;;  %vm7335_vm2 = vcmp.eq.s32.totalorder %v12115_v47, 0 }
 0x48e   :  { %v7340_v19 = vsel %vm7338_vm15, %v7339_v53, %v8870_v16  ;;  %v1841_v54 = vadd.s32 %v1840_v23, %v1836_v63  ;;  %v1997_v1 = vadd.s32 1, %v8121_v57  ;;  %v7528_v51 = vcvt.s32.f32 %v7521_v22 }
 0x48f   :  { %v7337_v58 = vsel %vm7335_vm2, %v8868_v40, %v7336_v6  ;;  %v7526_v4 = vand.u32 2147483647, %v7525_v15  ;;  %v7535_v2 = vsel %vm12165_vm13, 0, %v7533_v21  ;;  %v1994_v17 = vand.u32 8388607, %v1987_v24 }
 0x490   :  { %v7341_v50 = vsel %vm7334_vm14, %v7337_v58, %v7340_v19  ;;  %v1842_v34 = vadd.s32 536870912, %v1841_v54  ;;  %vm1998_vm3 = vcmp.gt.s32.totalorder %v1997_v1, 0  ;;  %v12215_v59 = vadd.f32 %v12201_v38, %v1174_v55 }
 0x491   :  { %v7342_v32 = vsel %vm7332_vm0, nan, %v7341_v50  ;;  %v7529_v46 = vmul.f32 %v7528_v51, %v7526_v4  ;;  %v1999_v56 = vsel %vm1998_vm3, %v1997_v1, 0  ;;  %v12219_v47 = vand.u32 3, %v7535_v2 }
 0x492   :  { %8018 = vst [vmem:[#allocation2 + $0x1c8] sm:$0xff] %v7342_v32  ;;  %v12217_v12 = vshrl.u32 %v1842_v34, 30  ;;  %v2001_v3 = vand.u32 31, %v1999_v56  ;;  %v14839_v48 = vsub.s32 6, %v9297_v5  ;;  %v12231_v55 = vadd.s32 %v12159_v35, %v12183_v39 }
 0x493   :  { %v7530_v0 = vxor.u32 2147483648, %v7529_v46  ;;  %v1995_v40 = vor.u32 8388608, %v1994_v17  ;;  %v1887_v22 = vand.u32 2139095040, %v12215_v59  ;;  %v2000_v16 = vshrl.u32 %v1999_v56, 5 }
 0x494   :  { %v1844_v7 = vshll.u32 %v12217_v12, 30  ;;  %v2002_v49 = vsub.s32 32, %v2001_v3  ;;  %v12225_v36 = vrot.slane %v11927_v60, %v14839_v48  ;;  %v2004_v53 = vshll.u32 %v9028_v18, %v2001_v3 }
 0x495   :  { %v7531_v62 = vsel %vm7448_vm9, %v7530_v0, %v7529_v46  ;;  %v2007_v57 = vshll.u32 %v9029_v29, %v2001_v3  ;;  %v2010_v6 = vshll.u32 %v9030_v31, %v2001_v3  ;;  %v2013_v19 = vshll.u32 %v9031_v33, %v2001_v3 }
 0x496   :  { %v7534_v30 = vsel %vm12165_vm13, %v11914_v61, %v7531_v62  ;;  %v12237_v21 = vsub.s32 %v1841_v54, %v1844_v7  ;;  %v2005_v63 = vshrl.u32 %v9029_v29, %v2002_v49  ;;  %v2008_v35 = vshrl.u32 %v9030_v31, %v2002_v49 }
 0x497   :  { %8871 = vcosq.f32 %v7534_v30  ;;  %v2011_v20 = vshrl.u32 %v9031_v33, %v2002_v49  ;;  %v2014_v54 = vshrl.u32 %v9032_v43, %v2002_v49  ;;  %v1867_v58 = vsub.s32 4, %v12217_v12 }
 0x498   :  { %8873 = vsinq.f32 %v7534_v30  ;;  %v1847_v39 = vsub.s32 0, %v12237_v21  ;;  %v2006_v15 = vor.u32 %v2005_v63, %v2004_v53  ;;  %v2009_v23 = vor.u32 %v2008_v35, %v2007_v57 }
 0x499   :  { %v12250_v4 = vshll.u32 %v1995_v40, 8  ;;  %v1888_v51 = vshrl.u32 %v1887_v22, 23  ;;  %vm7544_vm4 = vcmp.eq.s32.totalorder %v12219_v47, 2  ;;  %v2012_v2 = vor.u32 %v2011_v20, %v2010_v6 }
 0x49a   :  { %v8114_v1 = vmin.u32 %v1847_v39, %v12237_v21  ;;  %v2015_v50 = vor.u32 %v2014_v54, %v2013_v19  ;;  %v2016_v34 = vshll.u32 %v9032_v43, %v2001_v3  ;;  %v2017_v17 = vshrl.u32 %v9033_v52, %v2002_v49 }
 0x49b   :  { %vm7541_vm5 = vcmp.eq.s32.totalorder %v12219_v47, 0  ;;  %v2003_v46 = vshrl.u32 %v9028_v18, %v2002_v49  ;;  %vm2019_vm6 = vcmp.lt.s32.totalorder %v2000_v16, 1  ;;  %vm2022_vm7 = vcmp.lt.s32.totalorder %v2000_v16, 4 }
 0x49c   :  { %v1849_v32 = vclz %v8114_v1  ;;  %vm7540_vm8 = vcmp.lt.s32.totalorder %v12219_v47, 2  ;;  %v2018_v56 = vor.u32 %v2017_v17, %v2016_v34  ;;  %vm2020_vm10 = vcmp.lt.s32.totalorder %v2000_v16, 2 }
 0x49d   :  { %v2024_v0 = vsel %vm2022_vm7, %v2012_v2, 2102212464  ;;  %v2027_v7 = vsel %vm2019_vm6, %v2006_v15, %v2009_v23  ;;  %vm7538_vm9 = vweird.f32 %v11914_v61  ;;  %vm2021_vm11 = vcmp.lt.s32.totalorder %v2000_v16, 3 }
 0x49e   :  { %v8115_v48 = vadd.s32 4294967294, %v1849_v32  ;;  %v2028_v3 = vsel %vm2022_vm7, %v2015_v50, 920167782  ;;  %v2031_v62 = vsel %vm2019_vm6, %v2009_v23, %v2012_v2  ;;  %vm1783_vm12 = vcmp.lt.s32.totalorder %v12031_v27, 0 }
 0x49f   :  { %v2023_v40 = vsel %vm2019_vm6, %v2003_v46, %v2006_v15  ;;  %v2025_v22 = vsel %vm2021_vm11, %v2009_v23, %v2024_v0  ;;  %v2029_v30 = vsel %vm2021_vm11, %v2012_v2, %v2028_v3  ;;  %v2032_v49 = vsel %vm2022_vm7, %v2018_v56, 1326507024  ;;  %v12284_v3 = vpop.f32.mrb[20].mxu0 }
 0x4a0   :  { %vm8116_vm13 = vcmp.lt.s32.totalorder %v8115_v48, 0  ;;  %v2030_v53 = vsel %vm2020_vm10, %v2027_v7, %v2029_v30  ;;  %v2033_v63 = vsel %vm2021_vm11, %v2015_v50, %v2032_v49  ;;  %v8117_v57 = vadd.s32 4294967169, %v1888_v51 }
 0x4a1   :  { %v8872_v35 = vpop.eup %8871  ;;  %v1852_v39 = vsel %vm8116_vm13, 0, %v8115_v48  ;;  %v2034_v6 = vsel %vm2020_vm10, %v2031_v62, %v2033_v63  ;;  %v12263_v20 = vmul.u32.u64.low %v12250_v4, %v2030_v53  ;;  %v12264_v19 = vmul.u32.u64.high %v12250_v4, %v2030_v53, %v12263_v20 }
 0x4a2   :  { %v8874_v54 = vpop.eup %8873  ;;  %v7545_v1 = vxor.u32 2147483648, %v8872_v35  ;;  %v1853_v15 = vsub.s32 32, %v1852_v39  ;;  %v1857_v23 = vsub.s32 4294967266, %v1852_v39  ;;  %v2026_v2 = vsel %vm2020_vm10, %v2023_v40, %v2025_v22 }
 0x4a3   :  { %v7542_v34 = vxor.u32 2147483648, %v8874_v54  ;;  %v1854_v17 = vshll.u32 %v12237_v21, %v1852_v39  ;;  %v12270_v51 = vmul.u32.u64.low %v12250_v4, %v2034_v6  ;;  %v12271_v50 = vmul.u32.u64.high %v12250_v4, %v2034_v6, %v12270_v51 }
 0x4a4   :  { %v7546_v32 = vsel %vm7544_vm4, %v7545_v1, %v8874_v54  ;;  %v1855_v46 = vshrl.u32 %v12231_v55, %v1853_v15  ;;  %v1858_v56 = vadd.s32 127, %v1857_v23  ;;  %v1894_v0 = vadd.s32 1, %v8117_v57 }
 0x4a5   :  { %v7543_v7 = vsel %vm7541_vm5, %v8872_v35, %v7542_v34  ;;  %v2045_v16 = vadd.s32 1, %v12264_v19  ;;  %v1884_v48 = vand.u32 2147483647, %v12215_v59  ;;  %v12282_v21 = vrot.slane %v12225_v36, %v9300_v8 }
 0x4a6   :  { %v7547_v62 = vsel %vm7540_vm8, %v7543_v7, %v7546_v32  ;;  %v1856_v40 = vor.u32 %v1855_v46, %v1854_v17  ;;  %v1859_v55 = vshll.u32 %v1858_v56, 23  ;;  %vm1895_vm0 = vcmp.gt.s32.totalorder %v1894_v0, 0 }
 0x4a7   :  { %v7548_v22 = vsel %vm7538_vm9, nan, %v7547_v62  ;;  %v2042_v30 = vmul.u32 %v12250_v4, %v2026_v2  ;;  %vm2044_vm14 = vc.u32 %v12271_v50, %v12263_v20  ;;  %v1896_v49 = vsel %vm1895_vm0, %v1894_v0, 0 }
 0x4a8   :  { %8020 = vst [vmem:[#allocation2 + $0x1d8] sm:$0xff] %v7548_v22  ;;  %vm12295_vm15 = vcmp.le.f32.partialorder %v1781_v14, 0.7853982  ;;  %v1860_v47 = vor.u32 4788187, %v1859_v55  ;;  %v1868_v61 = vsel %vm1783_vm12, %v1867_v58, %v12217_v12  ;;  %v2046_v36 = vsel %vm2044_vm14, %v2045_v16, %v12264_v19 }
 0x4a9   :  { %v2047_v4 = vadd.s32 %v2046_v36, %v2042_v30  ;;  %v1898_v53 = vand.u32 31, %v1896_v49  ;;  %v14842_v63 = vsub.s32 7, %v9297_v5  ;;  %v1181_v14 = vmul.f32 %v11951_v45, %v11931_v10 }
 0x4aa   :  { %v1861_v35 = vand.u32 2147483647, %v1860_v47  ;;  %v1863_v39 = vcvt.s32.f32 %v1856_v40  ;;  %v1891_v6 = vand.u32 8388607, %v1884_v48  ;;  %v1176_v54 = vmul.f32 %v12282_v21, %v11813_v13 }
 0x4ab   :  { %v1264_v57 = vrot.slane %v11927_v60, %v14842_v63  ;;  %v1870_v12 = vsel %vm12295_vm15, 0, %v1868_v61  ;;  %v2048_v58 = vadd.s32 536870912, %v2047_v4  ;;  %v1897_v19 = vshrl.u32 %v1896_v49, 5 }
 0x4ac   :  { %v1899_v1 = vsub.s32 32, %v1898_v53  ;;  %v1864_v5 = vmul.f32 %v1863_v39, %v1861_v35  ;;  %v1901_v60 = vshll.u32 %v9028_v18, %v1898_v53  ;;  %v1904_v15 = vshll.u32 %v9029_v29, %v1898_v53 }
 0x4ad   :  { %v1907_v10 = vshll.u32 %v9030_v31, %v1898_v53  ;;  %v12319_v23 = vshrl.u32 %v2048_v58, 30  ;;  %v1910_v13 = vshll.u32 %v9031_v33, %v1898_v53  ;;  %v1913_v7 = vshll.u32 %v9032_v43, %v1898_v53 }
 0x4ae   :  { %v1902_v2 = vshrl.u32 %v9029_v29, %v1899_v1  ;;  %v1905_v34 = vshrl.u32 %v9030_v31, %v1899_v1  ;;  %v1865_v17 = vxor.u32 2147483648, %v1864_v5  ;;  %v1908_v51 = vshrl.u32 %v9031_v33, %v1899_v1 }
 0x4af   :  { %v1911_v32 = vshrl.u32 %v9032_v43, %v1899_v1  ;;  %v1914_v46 = vshrl.u32 %v9033_v52, %v1899_v1  ;;  %v2050_v56 = vshll.u32 %v12319_v23, 30  ;;  %v12330_v16 = vrot.slane %v1264_v57, %v9308_v11 }
 0x4b0   :  { %v1903_v0 = vor.u32 %v1902_v2, %v1901_v60  ;;  %v1866_v62 = vsel %vm1783_vm12, %v1865_v17, %v1864_v5  ;;  %v1906_v40 = vor.u32 %v1905_v34, %v1904_v15  ;;  %v1909_v55 = vor.u32 %v1908_v51, %v1907_v10  ;;  %v12350_v15 = vpop.f32.mrb[20].mxu1 }
 0x4b1   :  { %v1912_v22 = vor.u32 %v1911_v32, %v1910_v13  ;;  %v1869_v30 = vsel %vm12295_vm15, %v12031_v27, %v1866_v62  ;;  %v12337_v49 = vand.u32 3, %v1870_v12  ;;  %v12339_v47 = vsub.s32 %v2047_v4, %v2050_v56 }
 0x4b2   :  { %vm1919_vm1 = vcmp.lt.s32.totalorder %v1897_v19, 4  ;;  %8875 = vcosq.f32 %v1869_v30  ;;  %v1892_v61 = vor.u32 8388608, %v1891_v6  ;;  %v1915_v36 = vor.u32 %v1914_v46, %v1913_v7 }
 0x4b3   :  { %v1921_v11 = vsel %vm1919_vm1, %v1909_v55, 2102212464  ;;  %8877 = vsinq.f32 %v1869_v30  ;;  %v2053_v53 = vsub.s32 0, %v12339_v47  ;;  %v1900_v63 = vshrl.u32 %v9028_v18, %v1899_v1 }
 0x4b4   :  { %vm1916_vm2 = vcmp.lt.s32.totalorder %v1897_v19, 1  ;;  %vm1918_vm3 = vcmp.lt.s32.totalorder %v1897_v19, 3  ;;  %v1925_v8 = vsel %vm1919_vm1, %v1912_v22, 920167782  ;;  %v12346_v35 = vadd.f32 %v12330_v16, %v1176_v54 }
 0x4b5   :  { %v1924_v57 = vsel %vm1916_vm2, %v1903_v0, %v1906_v40  ;;  %v8122_v4 = vmin.u32 %v2053_v53, %v12339_v47  ;;  %v1920_v39 = vsel %vm1916_vm2, %v1900_v63, %v1903_v0  ;;  %v1922_v6 = vsel %vm1918_vm3, %v1906_v40, %v1921_v11 }
 0x4b6   :  { %v1928_v12 = vsel %vm1916_vm2, %v1906_v40, %v1909_v55  ;;  %vm1917_vm4 = vcmp.lt.s32.totalorder %v1897_v19, 2  ;;  %v1926_v58 = vsel %vm1918_vm3, %v1909_v55, %v1925_v8  ;;  %v1929_v5 = vsel %vm1919_vm1, %v1915_v36, 1326507024 }
 0x4b7   :  { %v1932_v60 = vshll.u32 %v1892_v61, 8  ;;  %v2055_v1 = vclz %v8122_v4  ;;  %v1927_v10 = vsel %vm1917_vm4, %v1924_v57, %v1926_v58  ;;  %v1930_v2 = vsel %vm1918_vm3, %v1912_v22, %v1929_v5 }
 0x4b8   :  { %v12353_v34 = vadd.f32 %v11957_v44, %v1181_v14  ;;  %v1923_v54 = vsel %vm1917_vm4, %v1920_v39, %v1922_v6  ;;  %v1931_v13 = vsel %vm1917_vm4, %v1928_v12, %v1930_v2  ;;  %vm1873_vm5 = vweird.f32 %v12031_v27 }
 0x4b9   :  { %v12355_v17 = vmul.u32.u64.low %v1932_v60, %v1927_v10  ;;  %v12356_v51 = vmul.u32.u64.high %v1932_v60, %v1927_v10, %v12355_v17  ;;  %v8123_v32 = vadd.s32 4294967294, %v2055_v1  ;;  %v2093_v56 = vand.u32 2139095040, %v12346_v35 }
 0x4ba   :  { %v12360_v19 = vmul.u32.u64.low %v1932_v60, %v1931_v13  ;;  %v12361_v46 = vmul.u32.u64.high %v1932_v60, %v1931_v13, %v12360_v19  ;;  %vm1875_vm6 = vcmp.lt.s32.totalorder %v12337_v49, 2  ;;  %vm1876_vm7 = vcmp.eq.s32.totalorder %v12337_v49, 0 }
 0x4bb   :  { %vm1879_vm8 = vcmp.eq.s32.totalorder %v12337_v49, 2  ;;  %vm1989_vm10 = vcmp.lt.s32.totalorder %v12145_v25, 0  ;;  %v2043_v14 = vadd.s32 %v12263_v20, %v12271_v50  ;;  %vm8124_vm9 = vcmp.lt.s32.totalorder %v8123_v32, 0 }
 0x4bc   :  { %v2073_v0 = vsub.s32 4, %v12319_v23  ;;  %v2094_v7 = vshrl.u32 %v2093_v56, 23  ;;  %v8876_v62 = vpop.eup %8875  ;;  %v2058_v40 = vsel %vm8124_vm9, 0, %v8123_v32  ;;  %v1939_v55 = vmul.u32 %v1932_v60, %v1923_v54 }
 0x4bd   :  { %v1942_v22 = vadd.s32 1, %v12356_v51  ;;  %v2090_v30 = vand.u32 2147483647, %v12346_v35  ;;  %v8878_v61 = vpop.eup %8877  ;;  %v1880_v36 = vxor.u32 2147483648, %v8876_v62  ;;  %v2059_v11 = vsub.s32 32, %v2058_v40 }
 0x4be   :  { %v2063_v53 = vsub.s32 4294967266, %v2058_v40  ;;  %v2608_v63 = vand.u32 2139095040, %v12353_v34  ;;  %v1877_v57 = vxor.u32 2147483648, %v8878_v61  ;;  %v2060_v20 = vshll.u32 %v12339_v47, %v2058_v40 }
 0x4bf   :  { %vm1941_vm11 = vc.u32 %v12361_v46, %v12355_v17  ;;  %v8125_v50 = vadd.s32 4294967169, %v2094_v7  ;;  %v1881_v8 = vsel %vm1879_vm8, %v1880_v36, %v8878_v61  ;;  %v2061_v4 = vshrl.u32 %v2043_v14, %v2059_v11 }
 0x4c0   :  { %v2064_v39 = vadd.s32 127, %v2063_v53  ;;  %v1943_v6 = vsel %vm1941_vm11, %v1942_v22, %v12356_v51  ;;  %v1878_v12 = vsel %vm1876_vm7, %v8876_v62, %v1877_v57  ;;  %v2097_v5 = vand.u32 8388607, %v2090_v30 }
 0x4c1   :  { %v1944_v58 = vadd.s32 %v1943_v6, %v1939_v55  ;;  %v2100_v60 = vadd.s32 1, %v8125_v50  ;;  %v1882_v47 = vsel %vm1875_vm6, %v1878_v12, %v1881_v8  ;;  %v2062_v1 = vor.u32 %v2061_v4, %v2060_v20 }
 0x4c2   :  { %v2065_v10 = vshll.u32 %v2064_v39, 23  ;;  %v2074_v2 = vsel %vm1989_vm10, %v2073_v0, %v12319_v23  ;;  %v1883_v54 = vsel %vm1873_vm5, nan, %v1882_v47  ;;  %vm12393_vm13 = vcmp.le.f32.partialorder %v1987_v24, 0.7853982 }
 0x4c3   :  { %v1945_v13 = vadd.s32 536870912, %v1944_v58  ;;  %vm2101_vm12 = vcmp.gt.s32.totalorder %v2100_v60, 0  ;;  %7965 = vst [vmem:[#allocation2 + $0x20] sm:$0xff] %v1883_v54  ;;  %v2609_v19 = vshrl.u32 %v2608_v63, 23  ;;  %v2076_v56 = vsel %vm12393_vm13, 0, %v2074_v2 }
 0x4c4   :  { %v2066_v49 = vor.u32 4788187, %v2065_v10  ;;  %v2102_v32 = vsel %vm2101_vm12, %v2100_v60, 0  ;;  %v2098_v23 = vor.u32 8388608, %v2097_v5  ;;  %v2069_v7 = vcvt.s32.f32 %v2062_v1 }
 0x4c5   :  { %v12399_v14 = vshrl.u32 %v1945_v13, 30  ;;  %v2104_v27 = vand.u32 31, %v2102_v32  ;;  %v12402_v24 = vand.u32 3, %v2076_v56  ;;  %v2605_v22 = vand.u32 2147483647, %v12353_v34 }
 0x4c6   :  { %v2067_v0 = vand.u32 2147483647, %v2066_v49  ;;  %v8145_v61 = vadd.s32 4294967169, %v2609_v19  ;;  %v2103_v11 = vshrl.u32 %v2102_v32, 5  ;;  %v12408_v63 = vshll.u32 %v2098_v23, 8 }
 0x4c7   :  { %v1947_v62 = vshll.u32 %v12399_v14, 30  ;;  %v2105_v40 = vsub.s32 32, %v2104_v27  ;;  %v2107_v20 = vshll.u32 %v9028_v18, %v2104_v27  ;;  %v2110_v39 = vshll.u32 %v9029_v29, %v2104_v27 }
 0x4c8   :  { %v2070_v55 = vmul.f32 %v2069_v7, %v2067_v0  ;;  %v2113_v6 = vshll.u32 %v9030_v31, %v2104_v27  ;;  %v2116_v60 = vshll.u32 %v9031_v33, %v2104_v27  ;;  %v2615_v47 = vadd.s32 1, %v8145_v61 }
 0x4c9   :  { %v12405_v36 = vsub.s32 %v1944_v58, %v1947_v62  ;;  %v2108_v53 = vshrl.u32 %v9029_v29, %v2105_v40  ;;  %v2111_v50 = vshrl.u32 %v9030_v31, %v2105_v40  ;;  %v2114_v8 = vshrl.u32 %v9031_v33, %v2105_v40 }
 0x4ca   :  { %v2071_v57 = vxor.u32 2147483648, %v2070_v55  ;;  %v2117_v12 = vshrl.u32 %v9032_v43, %v2105_v40  ;;  %v2119_v49 = vshll.u32 %v9032_v43, %v2104_v27  ;;  %v2120_v32 = vshrl.u32 %v9033_v52, %v2105_v40 }
 0x4cb   :  { %v1950_v4 = vsub.s32 0, %v12405_v36  ;;  %v2109_v5 = vor.u32 %v2108_v53, %v2107_v20  ;;  %v2112_v2 = vor.u32 %v2111_v50, %v2110_v39  ;;  %v2115_v54 = vor.u32 %v2114_v8, %v2113_v6  ;;  %v12429_v50 = vpop.f32.mrb[21].mxu0 }
 0x4cc   :  { %v2072_v58 = vsel %vm1989_vm10, %v2071_v57, %v2070_v55  ;;  %v2118_v13 = vor.u32 %v2117_v12, %v2116_v60  ;;  %v2106_v56 = vshrl.u32 %v9028_v18, %v2105_v40  ;;  %vm2122_vm0 = vcmp.lt.s32.totalorder %v2103_v11, 1 }
 0x4cd   :  { %v2075_v1 = vsel %vm12393_vm13, %v12145_v25, %v2072_v58  ;;  %v8118_v10 = vmin.u32 %v1950_v4, %v12405_v36  ;;  %vm1886_vm14 = vcmp.lt.s32.totalorder %v12215_v59, 0  ;;  %v2121_v23 = vor.u32 %v2120_v32, %v2119_v49 }
 0x4ce   :  { %8879 = vcosq.f32 %v2075_v1  ;;  %vm2123_vm15 = vcmp.lt.s32.totalorder %v2103_v11, 2  ;;  %vm2124_vm1 = vcmp.lt.s32.totalorder %v2103_v11, 3  ;;  %vm2125_vm2 = vcmp.lt.s32.totalorder %v2103_v11, 4 }
 0x4cf   :  { %8881 = vsinq.f32 %v2075_v1  ;;  %v1952_v19 = vclz %v8118_v10  ;;  %v2127_v0 = vsel %vm2125_vm2, %v2115_v54, 2102212464  ;;  %v2130_v7 = vsel %vm2122_vm0, %v2109_v5, %v2112_v2 }
 0x4d0   :  { %v2131_v62 = vsel %vm2125_vm2, %v2118_v13, 920167782  ;;  %v2126_v55 = vsel %vm2122_vm0, %v2106_v56, %v2109_v5  ;;  %v2134_v27 = vsel %vm2122_vm0, %v2112_v2, %v2115_v54  ;;  %v2135_v53 = vsel %vm2125_vm2, %v2121_v23, 1326507024 }
 0x4d1   :  { %v8119_v51 = vadd.s32 4294967294, %v1952_v19  ;;  %v2132_v61 = vsel %vm2124_vm1, %v2115_v54, %v2131_v62  ;;  %v2128_v57 = vsel %vm2124_vm1, %v2112_v2, %v2127_v0  ;;  %v2136_v40 = vsel %vm2124_vm1, %v2118_v13, %v2135_v53 }
 0x4d2   :  { %v2133_v20 = vsel %vm2123_vm15, %v2130_v7, %v2132_v61  ;;  %vm12433_vm4 = vcmp.le.f32.partialorder %v1884_v48, 0.7853982  ;;  %v2137_v39 = vsel %vm2123_vm15, %v2134_v27, %v2136_v40  ;;  %vm2079_vm5 = vweird.f32 %v12145_v25 }
 0x4d3   :  { %vm8120_vm3 = vcmp.lt.s32.totalorder %v8119_v51, 0  ;;  %v12439_v6 = vmul.u32.u64.low %v12408_v63, %v2133_v20  ;;  %v12440_v12 = vmul.u32.u64.high %v12408_v63, %v2133_v20, %v12439_v6  ;;  %v1940_v58 = vadd.s32 %v12355_v17, %v12361_v46 }
 0x4d4   :  { %v1955_v4 = vsel %vm8120_vm3, 0, %v8119_v51  ;;  %v1970_v48 = vsub.s32 4, %v12399_v14  ;;  %v2129_v1 = vsel %vm2123_vm15, %v2126_v55, %v2128_v57  ;;  %vm2616_vm6 = vcmp.gt.s32.totalorder %v2615_v47, 0 }
 0x4d5   :  { %v1956_v5 = vsub.s32 32, %v1955_v4  ;;  %v1960_v60 = vsub.s32 4294967266, %v1955_v4  ;;  %v12449_v10 = vmul.u32.u64.low %v12408_v63, %v2137_v39  ;;  %v12450_v2 = vmul.u32.u64.high %v12408_v63, %v2137_v39, %v12449_v10 }
 0x4d6   :  { %v1957_v54 = vshll.u32 %v12405_v36, %v1955_v4  ;;  %v2617_v32 = vsel %vm2616_vm6, %v2615_v47, 0  ;;  %vm2085_vm7 = vcmp.eq.s32.totalorder %v12402_v24, 2  ;;  %v2148_v17 = vadd.s32 1, %v12440_v12 }
 0x4d7   :  { %v1958_v13 = vshrl.u32 %v1940_v58, %v1956_v5  ;;  %v1961_v49 = vadd.s32 127, %v1960_v60  ;;  %v2612_v46 = vand.u32 8388607, %v2605_v22  ;;  %v2619_v11 = vand.u32 31, %v2617_v32 }
 0x4d8   :  { %v8880_v19 = vpop.eup %8879  ;;  %v1971_v36 = vsel %vm1886_vm14, %v1970_v48, %v12399_v14  ;;  %v2145_v47 = vmul.u32 %v12408_v63, %v2129_v1  ;;  %vm2147_vm8 = vc.u32 %v12450_v2, %v12439_v6  ;;  %vm2082_vm10 = vcmp.eq.s32.totalorder %v12402_v24, 0 }
 0x4d9   :  { %v8882_v56 = vpop.eup %8881  ;;  %v2086_v23 = vxor.u32 2147483648, %v8880_v19  ;;  %v1959_v51 = vor.u32 %v1958_v13, %v1957_v54  ;;  %v1962_v0 = vshll.u32 %v1961_v49, 23  ;;  %v2620_v62 = vsub.s32 32, %v2619_v11 }
 0x4da   :  { %v2083_v7 = vxor.u32 2147483648, %v8882_v56  ;;  %v2149_v27 = vsel %vm2147_vm8, %v2148_v17, %v12440_v12  ;;  %vm2081_vm9 = vcmp.lt.s32.totalorder %v12402_v24, 2  ;;  %v2613_v20 = vor.u32 8388608, %v2612_v46 }
 0x4db   :  { %v2087_v55 = vsel %vm2085_vm7, %v2086_v23, %v8882_v56  ;;  %v1963_v61 = vor.u32 4788187, %v1962_v0  ;;  %v2150_v57 = vadd.s32 %v2149_v27, %v2145_v47  ;;  %v1966_v4 = vcvt.s32.f32 %v1959_v51 }
 0x4dc   :  { %v2084_v53 = vsel %vm2082_vm10, %v8880_v19, %v2083_v7  ;;  %v1973_v63 = vsel %vm12433_vm4, 0, %v1971_v36  ;;  %v12470_v5 = vshrl.u32 %v2617_v32, 5  ;;  %v2623_v60 = vshrl.u32 %v9029_v29, %v2620_v62 }
 0x4dd   :  { %v2088_v40 = vsel %vm2081_vm9, %v2084_v53, %v2087_v55  ;;  %v1964_v14 = vand.u32 2147483647, %v1963_v61  ;;  %v2151_v58 = vadd.s32 536870912, %v2150_v57  ;;  %v2622_v24 = vshll.u32 %v9028_v18, %v2619_v11 }
 0x4de   :  { %v2089_v39 = vsel %vm2079_vm5, nan, %v2088_v40  ;;  %v2626_v48 = vshrl.u32 %v9030_v31, %v2620_v62  ;;  %v2629_v1 = vshrl.u32 %v9031_v33, %v2620_v62  ;;  %v2625_v54 = vshll.u32 %v9029_v29, %v2619_v11 }
 0x4df   :  { %7967 = vst [vmem:[#allocation2 + $0x30] sm:$0xff] %v2089_v39  ;;  %v1967_v12 = vmul.f32 %v1966_v4, %v1964_v14  ;;  %v12476_v10 = vshrl.u32 %v2151_v58, 30  ;;  %v2628_v25 = vshll.u32 %v9030_v31, %v2619_v11  ;;  %v2632_v13 = vshrl.u32 %v9032_v43, %v2620_v62 }
 0x4e0   :  { %v2631_v32 = vshll.u32 %v9031_v33, %v2619_v11  ;;  %v2634_v19 = vshll.u32 %v9032_v43, %v2619_v11  ;;  %v2635_v17 = vshrl.u32 %v9033_v52, %v2620_v62  ;;  %v2624_v56 = vor.u32 %v2623_v60, %v2622_v24 }
 0x4e1   :  { %v1968_v49 = vxor.u32 2147483648, %v1967_v12  ;;  %v2153_v46 = vshll.u32 %v12476_v10, 30  ;;  %v2630_v23 = vor.u32 %v2629_v1, %v2628_v25  ;;  %v1183_v51 = vmul.f32 %v12106_v42, %v11987_v41 }
 0x4e2   :  { %v2627_v36 = vor.u32 %v2626_v48, %v2625_v54  ;;  %v2633_v7 = vor.u32 %v2632_v13, %v2631_v32  ;;  %v2636_v47 = vor.u32 %v2635_v17, %v2634_v19  ;;  %v12492_v11 = vand.u32 3, %v1973_v63 }
 0x4e3   :  { %v1969_v0 = vsel %vm1886_vm14, %v1968_v49, %v1967_v12  ;;  %v12494_v61 = vsub.s32 %v2150_v57, %v2153_v46  ;;  %v1182_v27 = vmul.f32 %v12171_v9, %v12096_v37  ;;  %v2621_v41 = vshrl.u32 %v9028_v18, %v2620_v62  ;;  %v12528_v46 = vpop.f32.mrb[21].mxu1 }
 0x4e4   :  { %v1972_v55 = vsel %vm12433_vm4, %v12215_v59, %v1969_v0  ;;  %vm2640_vm11 = vcmp.lt.s32.totalorder %v12470_v5, 4  ;;  %v2653_v53 = vshll.u32 %v2613_v20, 8  ;;  %vm2637_vm12 = vcmp.lt.s32.totalorder %v12470_v5, 1 }
 0x4e5   :  { %8883 = vcosq.f32 %v1972_v55  ;;  %v2156_v40 = vsub.s32 0, %v12494_v61  ;;  %v2642_v8 = vsel %vm2640_vm11, %v2630_v23, 2102212464  ;;  %v2645_v14 = vsel %vm2637_vm12, %v2624_v56, %v2627_v36 }
 0x4e6   :  { %8885 = vsinq.f32 %v1972_v55  ;;  %v2646_v4 = vsel %vm2640_vm11, %v2633_v7, 920167782  ;;  %v2649_v63 = vsel %vm2637_vm12, %v2627_v36, %v2630_v23  ;;  %v2650_v57 = vsel %vm2640_vm11, %v2636_v47, 1326507024 }
 0x4e7   :  { %v8126_v39 = vmin.u32 %v2156_v40, %v12494_v61  ;;  %v2176_v37 = vsub.s32 4, %v12476_v10  ;;  %vm2639_vm13 = vcmp.lt.s32.totalorder %v12470_v5, 3  ;;  %v12506_v62 = vadd.f32 %v12118_v28, %v1183_v51 }
 0x4e8   :  { %vm2638_vm0 = vcmp.lt.s32.totalorder %v12470_v5, 2  ;;  %v2641_v20 = vsel %vm2637_vm12, %v2621_v41, %v2624_v56  ;;  %v2647_v58 = vsel %vm2639_vm13, %v2630_v23, %v2646_v4  ;;  %v2651_v60 = vsel %vm2639_vm13, %v2633_v7, %v2650_v57 }
 0x4e9   :  { %v2158_v12 = vclz %v8126_v39  ;;  %v2643_v24 = vsel %vm2639_vm13, %v2627_v36, %v2642_v8  ;;  %v2648_v48 = vsel %vm2638_vm0, %v2645_v14, %v2647_v58  ;;  %v2652_v1 = vsel %vm2638_vm0, %v2649_v63, %v2651_v60 }
 0x4ea   :  { %v12513_v54 = vmul.u32.u64.low %v2653_v53, %v2652_v1  ;;  %v12514_v25 = vmul.u32.u64.high %v2653_v53, %v2652_v1, %v12513_v54  ;;  %v12516_v13 = vmul.u32.u64.low %v2653_v53, %v2648_v48  ;;  %v12517_v49 = vmul.u32.u64.high %v2653_v53, %v2648_v48, %v12516_v13 }
 0x4eb   :  { %vm1976_vm14 = vweird.f32 %v12215_v59  ;;  %vm12522_vm15 = vcmp.le.f32.partialorder %v2090_v30, 0.7853982  ;;  %vm2092_vm1 = vcmp.lt.s32.totalorder %v12346_v35, 0  ;;  %v8127_v19 = vadd.s32 4294967294, %v2158_v12 }
 0x4ec   :  { %v2814_v17 = vand.u32 2139095040, %v12506_v62  ;;  %vm1979_vm2 = vcmp.eq.s32.totalorder %v12492_v11, 0  ;;  %vm1982_vm3 = vcmp.eq.s32.totalorder %v12492_v11, 2  ;;  %v2644_v56 = vsel %vm2638_vm0, %v2641_v20, %v2643_v24 }
 0x4ed   :  { %v12535_v23 = vadd.f32 %v12201_v38, %v1182_v27  ;;  %v2146_v30 = vadd.s32 %v12439_v6, %v12450_v2  ;;  %vm8128_vm4 = vcmp.lt.s32.totalorder %v8127_v19, 0  ;;  %v2811_v51 = vand.u32 2147483647, %v12506_v62 }
 0x4ee   :  { %v2815_v0 = vshrl.u32 %v2814_v17, 23  ;;  %v2161_v7 = vsel %vm8128_vm4, 0, %v8127_v19  ;;  %v2177_v47 = vsel %vm2092_vm1, %v2176_v37, %v12476_v10  ;;  %vm2662_vm5 = vc.u32 %v12514_v25, %v12516_v13 }
 0x4ef   :  { %v8884_v36 = vpop.eup %8883  ;;  %v2663_v5 = vadd.s32 1, %v12517_v49  ;;  %v2162_v41 = vsub.s32 32, %v2161_v7  ;;  %v2166_v40 = vsub.s32 4294967266, %v2161_v7  ;;  %v2660_v8 = vmul.u32 %v2653_v53, %v2644_v56 }
 0x4f0   :  { %v8886_v55 = vpop.eup %8885  ;;  %v1983_v27 = vxor.u32 2147483648, %v8884_v36  ;;  %v2163_v2 = vshll.u32 %v12494_v61, %v2161_v7  ;;  %v8153_v4 = vadd.s32 4294967169, %v2815_v0  ;;  %vm1978_vm6 = vcmp.lt.s32.totalorder %v12492_v11, 2 }
 0x4f1   :  { %v1980_v6 = vxor.u32 2147483648, %v8886_v55  ;;  %v2664_v14 = vsel %vm2662_vm5, %v2663_v5, %v12517_v49  ;;  %v2164_v57 = vshrl.u32 %v2146_v30, %v2162_v41  ;;  %v2167_v10 = vadd.s32 127, %v2166_v40 }
 0x4f2   :  { %v1984_v63 = vsel %vm1982_vm3, %v1983_v27, %v8886_v55  ;;  %v2665_v39 = vadd.s32 %v2664_v14, %v2660_v8  ;;  %v2821_v20 = vadd.s32 1, %v8153_v4  ;;  %v2711_v53 = vand.u32 2139095040, %v12535_v23 }
 0x4f3   :  { %v1981_v37 = vsel %vm1979_vm2, %v8884_v36, %v1980_v6  ;;  %v2165_v60 = vor.u32 %v2164_v57, %v2163_v2  ;;  %v2168_v61 = vshll.u32 %v2167_v10, 23  ;;  %v2179_v48 = vsel %vm12522_vm15, 0, %v2177_v47 }
 0x4f4   :  { %v1985_v58 = vsel %vm1978_vm6, %v1981_v37, %v1984_v63  ;;  %v2666_v12 = vadd.s32 536870912, %v2665_v39  ;;  %vm2822_vm7 = vcmp.gt.s32.totalorder %v2821_v20, 0  ;;  %v2818_v11 = vand.u32 8388607, %v2811_v51 }
 0x4f5   :  { %v1986_v24 = vsel %vm1976_vm14, nan, %v1985_v58  ;;  %v2169_v1 = vor.u32 4788187, %v2168_v61  ;;  %v2823_v49 = vsel %vm2822_vm7, %v2821_v20, 0  ;;  %v2712_v17 = vshrl.u32 %v2711_v53, 23 }
 0x4f6   :  { %7966 = vst [vmem:[#allocation2 + $0x28] sm:$0xff] %v1986_v24  ;;  %v12557_v54 = vshrl.u32 %v2666_v12, 30  ;;  %v2825_v19 = vand.u32 31, %v2823_v49  ;;  %v2172_v30 = vcvt.s32.f32 %v2165_v60  ;;  %v12562_v59 = vand.u32 3, %v2179_v48 }
 0x4f7   :  { %v2170_v56 = vand.u32 2147483647, %v2169_v1  ;;  %v2661_v47 = vadd.s32 %v12516_v13, %v12514_v25  ;;  %v2819_v55 = vor.u32 8388608, %v2818_v11  ;;  %v2824_v27 = vshrl.u32 %v2823_v49, 5  ;;  %v12587_v49 = vpop.f32.mrb[22].mxu0 }
 0x4f8   :  { %v2668_v0 = vshll.u32 %v12557_v54, 30  ;;  %v2826_v36 = vsub.s32 32, %v2825_v19  ;;  %v8149_v8 = vadd.s32 4294967169, %v2712_v17  ;;  %v2828_v14 = vshll.u32 %v9028_v18, %v2825_v19 }
 0x4f9   :  { %v2173_v7 = vmul.f32 %v2172_v30, %v2170_v56  ;;  %v2831_v63 = vshll.u32 %v9029_v29, %v2825_v19  ;;  %v2834_v25 = vshll.u32 %v9030_v31, %v2825_v19  ;;  %v2837_v13 = vshll.u32 %v9031_v33, %v2825_v19 }
 0x4fa   :  { %v12565_v5 = vsub.s32 %v2665_v39, %v2668_v0  ;;  %v2829_v41 = vshrl.u32 %v9029_v29, %v2826_v36  ;;  %v2832_v40 = vshrl.u32 %v9030_v31, %v2826_v36  ;;  %v2835_v4 = vshrl.u32 %v9031_v33, %v2826_v36 }
 0x4fb   :  { %v2174_v6 = vxor.u32 2147483648, %v2173_v7  ;;  %v2838_v57 = vshrl.u32 %v9032_v43, %v2826_v36  ;;  %v12579_v20 = vshll.u32 %v2819_v55, 8  ;;  %v2840_v24 = vshll.u32 %v9032_v43, %v2825_v19 }
 0x4fc   :  { %v2671_v2 = vsub.s32 0, %v12565_v5  ;;  %v2830_v37 = vor.u32 %v2829_v41, %v2828_v14  ;;  %v2833_v58 = vor.u32 %v2832_v40, %v2831_v63  ;;  %v2836_v60 = vor.u32 %v2835_v4, %v2834_v25 }
 0x4fd   :  { %v2175_v10 = vsel %vm2092_vm1, %v2174_v6, %v2173_v7  ;;  %v2839_v61 = vor.u32 %v2838_v57, %v2837_v13  ;;  %v2841_v48 = vshrl.u32 %v9033_v52, %v2826_v36  ;;  %v2827_v1 = vshrl.u32 %v9028_v18, %v2826_v36 }
 0x4fe   :  { %v8146_v39 = vmin.u32 %v2671_v2, %v12565_v5  ;;  %v2178_v53 = vsel %vm12522_vm15, %v12346_v35, %v2175_v10  ;;  %vm2843_vm8 = vcmp.lt.s32.totalorder %v2824_v27, 1  ;;  %v2718_v11 = vadd.s32 1, %v8149_v8 }
 0x4ff   :  { %8887 = vcosq.f32 %v2178_v53  ;;  %v2842_v56 = vor.u32 %v2841_v48, %v2840_v24  ;;  %vm2845_vm10 = vcmp.lt.s32.totalorder %v2824_v27, 3  ;;  %vm2846_vm9 = vcmp.lt.s32.totalorder %v2824_v27, 4 }
 0x500   :  { %v2673_v12 = vclz %v8146_v39  ;;  %8889 = vsinq.f32 %v2178_v53  ;;  %v2848_v32 = vsel %vm2846_vm9, %v2836_v60, 2102212464  ;;  %v2851_v30 = vsel %vm2843_vm8, %v2830_v37, %v2833_v58 }
 0x501   :  { %v2852_v0 = vsel %vm2846_vm9, %v2839_v61, 920167782  ;;  %v2855_v7 = vsel %vm2843_vm8, %v2833_v58, %v2836_v60  ;;  %vm2844_vm12 = vcmp.lt.s32.totalorder %v2824_v27, 2  ;;  %v2856_v55 = vsel %vm2846_vm9, %v2842_v56, 1326507024 }
 0x502   :  { %v8147_v17 = vadd.s32 4294967294, %v2673_v12  ;;  %v2853_v19 = vsel %vm2845_vm10, %v2836_v60, %v2852_v0  ;;  %vm2185_vm13 = vcmp.eq.s32.totalorder %v12562_v59, 0  ;;  %v2847_v41 = vsel %vm2843_vm8, %v2827_v1, %v2830_v37 }
 0x503   :  { %v2854_v40 = vsel %vm2844_vm12, %v2851_v30, %v2853_v19  ;;  %v2857_v8 = vsel %vm2845_vm10, %v2839_v61, %v2856_v55  ;;  %vm2184_vm0 = vcmp.lt.s32.totalorder %v12562_v59, 2  ;;  %vm2607_vm14 = vcmp.lt.s32.totalorder %v12353_v34, 0 }
 0x504   :  { %vm8148_vm11 = vcmp.lt.s32.totalorder %v8147_v17, 0  ;;  %v2849_v14 = vsel %vm2845_vm10, %v2833_v58, %v2848_v32  ;;  %v2858_v4 = vsel %vm2844_vm12, %v2855_v7, %v2857_v8  ;;  %vm2182_vm15 = vweird.f32 %v12346_v35 }
 0x505   :  { %v2676_v36 = vsel %vm8148_vm11, 0, %v8147_v17  ;;  %v12602_v63 = vmul.u32.u64.low %v12579_v20, %v2858_v4  ;;  %v12603_v25 = vmul.u32.u64.high %v12579_v20, %v2858_v4, %v12602_v63  ;;  %vm2719_vm1 = vcmp.gt.s32.totalorder %v2718_v11, 0 }
 0x506   :  { %v2677_v6 = vsub.s32 32, %v2676_v36  ;;  %v2681_v2 = vsub.s32 4294967266, %v2676_v36  ;;  %v12606_v13 = vmul.u32.u64.low %v12579_v20, %v2854_v40  ;;  %v12607_v57 = vmul.u32.u64.high %v12579_v20, %v2854_v40, %v12606_v13 }
 0x507   :  { %v2678_v10 = vshll.u32 %v12565_v5, %v2676_v36  ;;  %v2850_v53 = vsel %vm2844_vm12, %v2847_v41, %v2849_v14  ;;  %v2708_v58 = vand.u32 2147483647, %v12535_v23  ;;  %v2720_v60 = vsel %vm2719_vm1, %v2718_v11, 0 }
 0x508   :  { %v2679_v39 = vshrl.u32 %v2661_v47, %v2677_v6  ;;  %v2682_v37 = vadd.s32 127, %v2681_v2  ;;  %v1184_v61 = vmul.f32 %v12282_v21, %v12153_v26  ;;  %vm2188_vm2 = vcmp.eq.s32.totalorder %v12562_v59, 2 }
 0x509   :  { %v8888_v12 = vpop.eup %8887  ;;  %v2722_v1 = vand.u32 31, %v2720_v60  ;;  %v2691_v47 = vsub.s32 4, %v12557_v54  ;;  %vm2868_vm3 = vc.u32 %v12603_v25, %v12606_v13  ;;  %v2869_v5 = vadd.s32 1, %v12607_v57 }
 0x50a   :  { %v2680_v24 = vor.u32 %v2679_v39, %v2678_v10  ;;  %v2683_v48 = vshll.u32 %v2682_v37, 23  ;;  %v8890_v17 = vpop.eup %8889  ;;  %v2189_v56 = vxor.u32 2147483648, %v8888_v12  ;;  %vm12622_vm4 = vcmp.le.f32.partialorder %v2605_v22, 0.7853982 }
 0x50b   :  { %v2186_v27 = vxor.u32 2147483648, %v8890_v17  ;;  %v2866_v32 = vmul.u32 %v12579_v20, %v2850_v53  ;;  %v2723_v30 = vsub.s32 32, %v2722_v1  ;;  %v2870_v7 = vsel %vm2868_vm3, %v2869_v5, %v12607_v57 }
 0x50c   :  { %v2684_v11 = vor.u32 4788187, %v2683_v48  ;;  %v2190_v0 = vsel %vm2188_vm2, %v2189_v56, %v8890_v17  ;;  %v2715_v19 = vand.u32 8388607, %v2708_v58  ;;  %v12631_v55 = vadd.f32 %v12330_v16, %v1184_v61 }
 0x50d   :  { %v2187_v36 = vsel %vm2185_vm13, %v8888_v12, %v2186_v27  ;;  %v2687_v41 = vcvt.s32.f32 %v2680_v24  ;;  %v2871_v40 = vadd.s32 %v2870_v7, %v2866_v32  ;;  %v2692_v20 = vsel %vm2607_vm14, %v2691_v47, %v12557_v54 }
 0x50e   :  { %v2685_v22 = vand.u32 2147483647, %v2684_v11  ;;  %v2191_v8 = vsel %vm2184_vm0, %v2187_v36, %v2190_v0  ;;  %v2726_v6 = vshrl.u32 %v9029_v29, %v2723_v30  ;;  %v2729_v2 = vshrl.u32 %v9030_v31, %v2723_v30 }
 0x50f   :  { %v2192_v14 = vsel %vm2182_vm15, nan, %v2191_v8  ;;  %v2872_v63 = vadd.s32 536870912, %v2871_v40  ;;  %v2732_v57 = vshrl.u32 %v9031_v33, %v2723_v30  ;;  %v2721_v10 = vshrl.u32 %v2720_v60, 5 }
 0x510   :  { %v2688_v4 = vmul.f32 %v2687_v41, %v2685_v22  ;;  %7968 = vst [vmem:[#allocation2 + $0x38] sm:$0xff] %v2192_v14  ;;  %v2725_v59 = vshll.u32 %v9028_v18, %v2722_v1  ;;  %v2728_v39 = vshll.u32 %v9029_v29, %v2722_v1  ;;  %v2735_v37 = vshrl.u32 %v9032_v43, %v2723_v30 }
 0x511   :  { %v12648_v53 = vshrl.u32 %v2872_v63, 30  ;;  %v2731_v61 = vshll.u32 %v9030_v31, %v2722_v1  ;;  %v2734_v35 = vshll.u32 %v9031_v33, %v2722_v1  ;;  %v2737_v48 = vshll.u32 %v9032_v43, %v2722_v1 }
 0x512   :  { %v2689_v54 = vxor.u32 2147483648, %v2688_v4  ;;  %v2727_v12 = vor.u32 %v2726_v6, %v2725_v59  ;;  %v2730_v24 = vor.u32 %v2729_v2, %v2728_v39  ;;  %v2738_v17 = vshrl.u32 %v9033_v52, %v2723_v30 }
 0x513   :  { %v2874_v56 = vshll.u32 %v12648_v53, 30  ;;  %v2733_v47 = vor.u32 %v2732_v57, %v2731_v61  ;;  %v2736_v5 = vor.u32 %v2735_v37, %v2734_v35  ;;  %v2694_v11 = vsel %vm12622_vm4, 0, %v2692_v20 }
 0x514   :  { %v2690_v60 = vsel %vm2607_vm14, %v2689_v54, %v2688_v4  ;;  %v2716_v32 = vor.u32 8388608, %v2715_v19  ;;  %v2739_v0 = vor.u32 %v2738_v17, %v2737_v48  ;;  %v2724_v7 = vshrl.u32 %v9028_v18, %v2723_v30 }
 0x515   :  { %v2693_v27 = vsel %vm12622_vm4, %v12353_v34, %v2690_v60  ;;  %v12662_v1 = vsub.s32 %v2871_v40, %v2874_v56  ;;  %v2917_v36 = vand.u32 2139095040, %v12631_v55  ;;  %vm2740_vm5 = vcmp.lt.s32.totalorder %v2721_v10, 1  ;;  %v12683_v60 = vpop.f32.mrb[22].mxu1 }
 0x516   :  { %8891 = vcosq.f32 %v2693_v27  ;;  %vm2742_vm6 = vcmp.lt.s32.totalorder %v2721_v10, 3  ;;  %vm2743_vm7 = vcmp.lt.s32.totalorder %v2721_v10, 4  ;;  %v2748_v8 = vsel %vm2740_vm5, %v2727_v12, %v2730_v24 }
 0x517   :  { %8893 = vsinq.f32 %v2693_v27  ;;  %v2877_v22 = vsub.s32 0, %v12662_v1  ;;  %v2745_v41 = vsel %vm2743_vm7, %v2733_v47, 2102212464  ;;  %v2749_v6 = vsel %vm2743_vm7, %v2736_v5, 920167782 }
 0x518   :  { %v2698_v26 = vand.u32 3, %v2694_v11  ;;  %v2750_v19 = vsel %vm2742_vm6, %v2733_v47, %v2749_v6  ;;  %v2752_v20 = vsel %vm2740_vm5, %v2730_v24, %v2733_v47  ;;  %v2753_v2 = vsel %vm2743_vm7, %v2739_v0, 1326507024 }
 0x519   :  { %v8154_v40 = vmin.u32 %v2877_v22, %v12662_v1  ;;  %vm2741_vm8 = vcmp.lt.s32.totalorder %v2721_v10, 2  ;;  %v2744_v30 = vsel %vm2740_vm5, %v2724_v7, %v2727_v12  ;;  %v2756_v14 = vshll.u32 %v2716_v32, 8 }
 0x51a   :  { %v2746_v4 = vsel %vm2742_vm6, %v2730_v24, %v2745_v41  ;;  %v2751_v63 = vsel %vm2741_vm8, %v2748_v8, %v2750_v19  ;;  %v2754_v57 = vsel %vm2742_vm6, %v2736_v5, %v2753_v2  ;;  %v2918_v59 = vshrl.u32 %v2917_v36, 23 }
 0x51b   :  { %v2879_v39 = vclz %v8154_v40  ;;  %v2755_v37 = vsel %vm2741_vm8, %v2752_v20, %v2754_v57  ;;  %v12673_v54 = vmul.u32.u64.low %v2756_v14, %v2751_v63  ;;  %v12674_v61 = vmul.u32.u64.high %v2756_v14, %v2751_v63, %v12673_v54 }
 0x51c   :  { %v2897_v35 = vsub.s32 4, %v12648_v53  ;;  %v12678_v48 = vmul.u32.u64.low %v2756_v14, %v2755_v37  ;;  %v12679_v17 = vmul.u32.u64.high %v2756_v14, %v2755_v37, %v12678_v48  ;;  %v8157_v12 = vadd.s32 4294967169, %v2918_v59 }
 0x51d   :  { %vm2697_vm10 = vweird.f32 %v12353_v34  ;;  %vm2699_vm9 = vcmp.lt.s32.totalorder %v2698_v26, 2  ;;  %vm2813_vm11 = vcmp.lt.s32.totalorder %v12506_v62, 0  ;;  %v8155_v24 = vadd.s32 4294967294, %v2879_v39 }
 0x51e   :  { %vm2700_vm12 = vcmp.eq.s32.totalorder %v2698_v26, 0  ;;  %vm2703_vm13 = vcmp.eq.s32.totalorder %v2698_v26, 2  ;;  %v2747_v56 = vsel %vm2741_vm8, %v2744_v30, %v2746_v4  ;;  %v2924_v47 = vadd.s32 1, %v8157_v12 }
 0x51f   :  { %v2867_v27 = vadd.s32 %v12606_v13, %v12603_v25  ;;  %vm8156_vm0 = vcmp.lt.s32.totalorder %v8155_v24, 0  ;;  %v2766_v11 = vadd.s32 1, %v12674_v61  ;;  %v2914_v32 = vand.u32 2147483647, %v12631_v55 }
 0x520   :  { %v8892_v5 = vpop.eup %8891  ;;  %v2882_v36 = vsel %vm8156_vm0, 0, %v8155_v24  ;;  %v12693_v22 = vsel %vm2813_vm11, %v2897_v35, %v12648_v53  ;;  %vm2765_vm14 = vc.u32 %v12679_v17, %v12673_v54  ;;  %v2763_v25 = vmul.u32 %v2756_v14, %v2747_v56 }
 0x521   :  { %v8894_v0 = vpop.eup %8893  ;;  %v2704_v7 = vxor.u32 2147483648, %v8892_v5  ;;  %v2883_v41 = vsub.s32 32, %v2882_v36  ;;  %v2887_v8 = vsub.s32 4294967266, %v2882_v36  ;;  %v2884_v6 = vshll.u32 %v12662_v1, %v2882_v36 }
 0x522   :  { %v2701_v10 = vxor.u32 2147483648, %v8894_v0  ;;  %v2767_v19 = vsel %vm2765_vm14, %v2766_v11, %v12674_v61  ;;  %vm2925_vm15 = vcmp.gt.s32.totalorder %v2924_v47, 0  ;;  %v2921_v4 = vand.u32 8388607, %v2914_v32 }
 0x523   :  { %v2705_v13 = vsel %vm2703_vm13, %v2704_v7, %v8894_v0  ;;  %v2885_v2 = vshrl.u32 %v2867_v27, %v2883_v41  ;;  %v2888_v40 = vadd.s32 127, %v2887_v8  ;;  %v2768_v53 = vadd.s32 %v2767_v19, %v2763_v25 }
 0x524   :  { %v2702_v20 = vsel %vm2700_vm12, %v8892_v5, %v2701_v10  ;;  %v2926_v63 = vsel %vm2925_vm15, %v2924_v47, 0  ;;  %v1189_v14 = vmul.f32 %v11951_v45, %v12284_v3  ;;  %vm12710_vm1 = vcmp.le.f32.partialorder %v2811_v51, 0.7853982 }
 0x525   :  { %v2706_v30 = vsel %vm2699_vm9, %v2702_v20, %v2705_v13  ;;  %v2886_v57 = vor.u32 %v2885_v2, %v2884_v6  ;;  %v2889_v59 = vshll.u32 %v2888_v40, 23  ;;  %v2769_v39 = vadd.s32 536870912, %v2768_v53 }
 0x526   :  { %v2707_v1 = vsel %vm2697_vm10, nan, %v2706_v30  ;;  %v2928_v37 = vand.u32 31, %v2926_v63  ;;  %v2900_v3 = vsel %vm12710_vm1, 0, %v12693_v22  ;;  %v2922_v34 = vor.u32 8388608, %v2921_v4 }
 0x527   :  { %7973 = vst [vmem:[#allocation2 + $0x60] sm:$0xff] %v2707_v1  ;;  %v2890_v61 = vor.u32 4788187, %v2889_v59  ;;  %v12714_v35 = vshrl.u32 %v2769_v39, 30  ;;  %v2893_v24 = vcvt.s32.f32 %v2886_v57  ;;  %v12721_v47 = vadd.f32 %v11957_v44, %v1189_v14 }
 0x528   :  { %v2929_v48 = vsub.s32 32, %v2928_v37  ;;  %v2931_v51 = vshll.u32 %v9028_v18, %v2928_v37  ;;  %v2934_v36 = vshll.u32 %v9029_v29, %v2928_v37  ;;  %v2927_v10 = vshrl.u32 %v2926_v63, 5 }
 0x529   :  { %v2891_v12 = vand.u32 2147483647, %v2890_v61  ;;  %v2771_v56 = vshll.u32 %v12714_v35, 30  ;;  %v2937_v41 = vshll.u32 %v9030_v31, %v2928_v37  ;;  %v2940_v8 = vshll.u32 %v9031_v33, %v2928_v37 }
 0x52a   :  { %v2932_v5 = vshrl.u32 %v9029_v29, %v2929_v48  ;;  %v2935_v27 = vshrl.u32 %v9030_v31, %v2929_v48  ;;  %v2938_v11 = vshrl.u32 %v9031_v33, %v2929_v48  ;;  %v2941_v22 = vshrl.u32 %v9032_v43, %v2929_v48 }
 0x52b   :  { %v2894_v0 = vmul.f32 %v2893_v24, %v2891_v12  ;;  %v12727_v7 = vsub.s32 %v2768_v53, %v2771_v56  ;;  %v12733_v25 = vshll.u32 %v2922_v34, 8  ;;  %v2943_v53 = vshll.u32 %v9032_v43, %v2928_v37  ;;  %v12746_v37 = vpop.f32.mrb[23].mxu0 }
 0x52c   :  { %v2933_v19 = vor.u32 %v2932_v5, %v2931_v51  ;;  %v2936_v20 = vor.u32 %v2935_v27, %v2934_v36  ;;  %v2939_v2 = vor.u32 %v2938_v11, %v2937_v41  ;;  %v2942_v40 = vor.u32 %v2941_v22, %v2940_v8 }
 0x52d   :  { %v2895_v13 = vxor.u32 2147483648, %v2894_v0  ;;  %v2774_v6 = vsub.s32 0, %v12727_v7  ;;  %v2944_v30 = vshrl.u32 %v9033_v52, %v2929_v48  ;;  %v2930_v14 = vshrl.u32 %v9028_v18, %v2929_v48 }
 0x52e   :  { %v3432_v1 = vand.u32 2139095040, %v12721_v47  ;;  %vm2946_vm2 = vcmp.lt.s32.totalorder %v2927_v10, 1  ;;  %vm2947_vm3 = vcmp.lt.s32.totalorder %v2927_v10, 2  ;;  %vm2948_vm4 = vcmp.lt.s32.totalorder %v2927_v10, 3 }
 0x52f   :  { %v2896_v4 = vsel %vm2813_vm11, %v2895_v13, %v2894_v0  ;;  %v8150_v63 = vmin.u32 %v2774_v6, %v12727_v7  ;;  %v2945_v59 = vor.u32 %v2944_v30, %v2943_v53  ;;  %vm2949_vm5 = vcmp.lt.s32.totalorder %v2927_v10, 4 }
 0x530   :  { %v2899_v57 = vsel %vm12710_vm1, %v12506_v62, %v2896_v4  ;;  %v2951_v61 = vsel %vm2949_vm5, %v2939_v2, 2102212464  ;;  %v2954_v34 = vsel %vm2946_vm2, %v2933_v19, %v2936_v20  ;;  %v2955_v12 = vsel %vm2949_vm5, %v2942_v40, 920167782 }
 0x531   :  { %8895 = vcosq.f32 %v2899_v57  ;;  %v2776_v39 = vclz %v8150_v63  ;;  %v2950_v24 = vsel %vm2946_vm2, %v2930_v14, %v2933_v19  ;;  %v2956_v56 = vsel %vm2948_vm4, %v2939_v2, %v2955_v12 }
 0x532   :  { %8897 = vsinq.f32 %v2899_v57  ;;  %v2958_v51 = vsel %vm2946_vm2, %v2936_v20, %v2939_v2  ;;  %v2952_v26 = vsel %vm2948_vm4, %v2936_v20, %v2951_v61  ;;  %v2957_v5 = vsel %vm2947_vm3, %v2954_v34, %v2956_v56 }
 0x533   :  { %v8151_v48 = vadd.s32 4294967294, %v2776_v39  ;;  %v2959_v27 = vsel %vm2949_vm5, %v2945_v59, 1326507024  ;;  %v3433_v11 = vshrl.u32 %v3432_v1, 23  ;;  %vm2710_vm6 = vcmp.lt.s32.totalorder %v12535_v23, 0 }
 0x534   :  { %v2960_v0 = vsel %vm2948_vm4, %v2942_v40, %v2959_v27  ;;  %v12754_v36 = vmul.u32.u64.low %v12733_v25, %v2957_v5  ;;  %v12755_v22 = vmul.u32.u64.high %v12733_v25, %v2957_v5, %v12754_v36  ;;  %v2904_v41 = vand.u32 3, %v2900_v3 }
 0x535   :  { %vm8152_vm7 = vcmp.lt.s32.totalorder %v8151_v48, 0  ;;  %v2961_v13 = vsel %vm2947_vm3, %v2958_v51, %v2960_v0  ;;  %v8177_v6 = vadd.s32 4294967169, %v3433_v11  ;;  %v2764_v19 = vadd.s32 %v12673_v54, %v12679_v17 }
 0x536   :  { %v2779_v8 = vsel %vm8152_vm7, 0, %v8151_v48  ;;  %v3429_v53 = vand.u32 2147483647, %v12721_v47  ;;  %vm2903_vm8 = vweird.f32 %v12506_v62  ;;  %v2953_v40 = vsel %vm2947_vm3, %v2950_v24, %v2952_v26 }
 0x537   :  { %v2780_v20 = vsub.s32 32, %v2779_v8  ;;  %v2784_v2 = vsub.s32 4294967266, %v2779_v8  ;;  %v12765_v30 = vmul.u32.u64.low %v12733_v25, %v2961_v13  ;;  %v12766_v4 = vmul.u32.u64.high %v12733_v25, %v2961_v13, %v12765_v30 }
 0x538   :  { %v3439_v3 = vadd.s32 1, %v8177_v6  ;;  %v2781_v63 = vshll.u32 %v12727_v7, %v2779_v8  ;;  %v2972_v57 = vadd.s32 1, %v12755_v22  ;;  %vm2905_vm10 = vcmp.lt.s32.totalorder %v2904_v41, 2 }
 0x539   :  { %v2782_v14 = vshrl.u32 %v2764_v19, %v2780_v20  ;;  %v2785_v1 = vadd.s32 127, %v2784_v2  ;;  %vm2906_vm9 = vcmp.eq.s32.totalorder %v2904_v41, 0  ;;  %v2794_v54 = vsub.s32 4, %v12714_v35 }
 0x53a   :  { %vm3440_vm11 = vcmp.gt.s32.totalorder %v3439_v3, 0  ;;  %vm12773_vm12 = vcmp.le.f32.partialorder %v2708_v58, 0.7853982  ;;  %v3436_v7 = vand.u32 8388607, %v3429_v53  ;;  %vm2909_vm13 = vcmp.eq.s32.totalorder %v2904_v41, 2 }
 0x53b   :  { %v8896_v17 = vpop.eup %8895  ;;  %v2783_v59 = vor.u32 %v2782_v14, %v2781_v63  ;;  %v2786_v39 = vshll.u32 %v2785_v1, 23  ;;  %v3441_v61 = vsel %vm3440_vm11, %v3439_v3, 0  ;;  %v2969_v48 = vmul.u32 %v12733_v25, %v2953_v40 }
 0x53c   :  { %v8898_v34 = vpop.eup %8897  ;;  %v2910_v12 = vxor.u32 2147483648, %v8896_v17  ;;  %vm2971_vm0 = vc.u32 %v12766_v4, %v12754_v36  ;;  %v1191_v51 = vmul.f32 %v12106_v42, %v12350_v15  ;;  %v2795_v5 = vsel %vm2710_vm6, %v2794_v54, %v12714_v35 }
 0x53d   :  { %v2907_v24 = vxor.u32 2147483648, %v8898_v34  ;;  %v2787_v56 = vor.u32 4788187, %v2786_v39  ;;  %v2973_v58 = vsel %vm2971_vm0, %v2972_v57, %v12755_v22  ;;  %v3443_v11 = vand.u32 31, %v3441_v61 }
 0x53e   :  { %v2911_v26 = vsel %vm2909_vm13, %v2910_v12, %v8898_v34  ;;  %v2974_v27 = vadd.s32 %v2973_v58, %v2969_v48  ;;  %v2790_v8 = vcvt.s32.f32 %v2783_v59  ;;  %v3437_v13 = vor.u32 8388608, %v3436_v7 }
 0x53f   :  { %v2908_v0 = vsel %vm2906_vm9, %v8896_v17, %v2907_v24  ;;  %v2788_v25 = vand.u32 2147483647, %v2787_v56  ;;  %v12790_v20 = vshrl.u32 %v3441_v61, 5  ;;  %v3444_v22 = vsub.s32 32, %v3443_v11 }
 0x540   :  { %v2912_v6 = vsel %vm2905_vm10, %v2908_v0, %v2911_v26  ;;  %v2975_v19 = vadd.s32 536870912, %v2974_v27  ;;  %v3446_v40 = vshll.u32 %v9028_v18, %v3443_v11  ;;  %v3449_v35 = vshll.u32 %v9029_v29, %v3443_v11 }
 0x541   :  { %v2913_v15 = vsel %vm2903_vm8, nan, %v2912_v6  ;;  %v2791_v2 = vmul.f32 %v2790_v8, %v2788_v25  ;;  %v3447_v3 = vshrl.u32 %v9029_v29, %v3444_v22  ;;  %v3450_v41 = vshrl.u32 %v9030_v31, %v3444_v22 }
 0x542   :  { %7975 = vst [vmem:[#allocation2 + $0x70] sm:$0xff] %v2913_v15  ;;  %v12796_v30 = vshrl.u32 %v2975_v19, 30  ;;  %v3452_v63 = vshll.u32 %v9030_v31, %v3443_v11  ;;  %v3453_v1 = vshrl.u32 %v9031_v33, %v3444_v22  ;;  %v3455_v62 = vshll.u32 %v9031_v33, %v3443_v11 }
 0x543   :  { %v2792_v14 = vxor.u32 2147483648, %v2791_v2  ;;  %v3456_v57 = vshrl.u32 %v9032_v43, %v3444_v22  ;;  %v2797_v54 = vsel %vm12773_vm12, 0, %v2795_v5  ;;  %v3448_v59 = vor.u32 %v3447_v3, %v3446_v40 }
 0x544   :  { %v2977_v17 = vshll.u32 %v12796_v30, 30  ;;  %v12808_v39 = vadd.f32 %v12118_v28, %v1191_v51  ;;  %v3451_v61 = vor.u32 %v3450_v41, %v3449_v35  ;;  %v3454_v34 = vor.u32 %v3453_v1, %v3452_v63 }
 0x545   :  { %v2793_v7 = vsel %vm2710_vm6, %v2792_v14, %v2791_v2  ;;  %v3457_v12 = vor.u32 %v3456_v57, %v3455_v62  ;;  %v3458_v56 = vshll.u32 %v9032_v43, %v3443_v11  ;;  %v3459_v58 = vshrl.u32 %v9033_v52, %v3444_v22  ;;  %v12845_v62 = vpop.f32.mrb[23].mxu1 }
 0x546   :  { %v2796_v48 = vsel %vm12773_vm12, %v12535_v23, %v2793_v7  ;;  %v12815_v24 = vsub.s32 %v2974_v27, %v2977_v17  ;;  %v12819_v26 = vand.u32 3, %v2797_v54  ;;  %vm3461_vm14 = vcmp.lt.s32.totalorder %v12790_v20, 1 }
 0x547   :  { %8899 = vcosq.f32 %v2796_v48  ;;  %v3477_v51 = vshll.u32 %v3437_v13, 8  ;;  %vm2916_vm15 = vcmp.lt.s32.totalorder %v12631_v55, 0  ;;  %v3460_v0 = vor.u32 %v3459_v58, %v3458_v56 }
 0x548   :  { %8901 = vsinq.f32 %v2796_v48  ;;  %v2980_v5 = vsub.s32 0, %v12815_v24  ;;  %vm3464_vm1 = vcmp.lt.s32.totalorder %v12790_v20, 4  ;;  %v3445_v10 = vshrl.u32 %v9028_v18, %v3444_v22 }
 0x549   :  { %v3466_v27 = vsel %vm3464_vm1, %v3454_v34, 2102212464  ;;  %v3469_v11 = vsel %vm3461_vm14, %v3448_v59, %v3451_v61  ;;  %v3470_v25 = vsel %vm3464_vm1, %v3457_v12, 920167782  ;;  %vm3463_vm2 = vcmp.lt.s32.totalorder %v12790_v20, 3 }
 0x54a   :  { %v8158_v8 = vmin.u32 %v2980_v5, %v12815_v24  ;;  %v3473_v13 = vsel %vm3461_vm14, %v3451_v61, %v3454_v34  ;;  %v3638_v6 = vand.u32 2139095040, %v12808_v39  ;;  %vm3462_vm3 = vcmp.lt.s32.totalorder %v12790_v20, 2 }
 0x54b   :  { %v3465_v19 = vsel %vm3461_vm14, %v3445_v10, %v3448_v59  ;;  %v3471_v22 = vsel %vm3463_vm2, %v3454_v34, %v3470_v25  ;;  %v3474_v15 = vsel %vm3464_vm1, %v3460_v0, 1326507024  ;;  %v3467_v40 = vsel %vm3463_vm2, %v3451_v61, %v3466_v27 }
 0x54c   :  { %v2982_v2 = vclz %v8158_v8  ;;  %v3472_v35 = vsel %vm3462_vm3, %v3469_v11, %v3471_v22  ;;  %v3475_v3 = vsel %vm3463_vm2, %v3457_v12, %v3474_v15  ;;  %v3000_v41 = vsub.s32 4, %v12796_v30 }
 0x54d   :  { %v3476_v63 = vsel %vm3462_vm3, %v3473_v13, %v3475_v3  ;;  %v12841_v14 = vmul.u32.u64.low %v3477_v51, %v3472_v35  ;;  %v12842_v1 = vmul.u32.u64.high %v3477_v51, %v3472_v35, %v12841_v14  ;;  %vm2800_vm4 = vweird.f32 %v12535_v23 }
 0x54e   :  { %v8159_v57 = vadd.s32 4294967294, %v2982_v2  ;;  %v12848_v54 = vmul.u32.u64.low %v3477_v51, %v3476_v63  ;;  %v12849_v17 = vmul.u32.u64.high %v3477_v51, %v3476_v63, %v12848_v54  ;;  %v3639_v59 = vshrl.u32 %v3638_v6, 23 }
 0x54f   :  { %vm2802_vm5 = vcmp.lt.s32.totalorder %v12819_v26, 2  ;;  %vm2803_vm6 = vcmp.eq.s32.totalorder %v12819_v26, 0  ;;  %vm12855_vm7 = vcmp.le.f32.partialorder %v2914_v32, 0.7853982  ;;  %v3468_v61 = vsel %vm3462_vm3, %v3465_v19, %v3467_v40 }
 0x550   :  { %vm2806_vm8 = vcmp.eq.s32.totalorder %v12819_v26, 2  ;;  %vm8160_vm10 = vcmp.lt.s32.totalorder %v8159_v57, 0  ;;  %v3635_v34 = vand.u32 2147483647, %v12808_v39  ;;  %v8185_v12 = vadd.s32 4294967169, %v3639_v59 }
 0x551   :  { %v8900_v48 = vpop.eup %8899  ;;  %v2970_v56 = vadd.s32 %v12754_v36, %v12766_v4  ;;  %v2985_v58 = vsel %vm8160_vm10, 0, %v8159_v57  ;;  %v3001_v32 = vsel %vm2916_vm15, %v3000_v41, %v12796_v30  ;;  %v3487_v5 = vadd.s32 1, %v12842_v1 }
 0x552   :  { %v8902_v0 = vpop.eup %8901  ;;  %v2807_v20 = vxor.u32 2147483648, %v8900_v48  ;;  %v2986_v10 = vsub.s32 32, %v2985_v58  ;;  %v2990_v27 = vsub.s32 4294967266, %v2985_v58  ;;  %v3484_v11 = vmul.u32 %v3477_v51, %v3468_v61 }
 0x553   :  { %v2804_v25 = vxor.u32 2147483648, %v8902_v0  ;;  %v2987_v8 = vshll.u32 %v12815_v24, %v2985_v58  ;;  %vm3486_vm9 = vc.u32 %v12849_v17, %v12841_v14  ;;  %v3645_v13 = vadd.s32 1, %v8185_v12 }
 0x554   :  { %v2808_v36 = vsel %vm2806_vm8, %v2807_v20, %v8902_v0  ;;  %v2988_v4 = vshrl.u32 %v2970_v56, %v2986_v10  ;;  %v2991_v6 = vadd.s32 127, %v2990_v27  ;;  %v3488_v30 = vsel %vm3486_vm9, %v3487_v5, %v12842_v1 }
 0x555   :  { %v2805_v19 = vsel %vm2803_vm6, %v8900_v48, %v2804_v25  ;;  %v3003_v51 = vsel %vm12855_vm7, 0, %v3001_v32  ;;  %v3489_v22 = vadd.s32 %v3488_v30, %v3484_v11  ;;  %vm3646_vm11 = vcmp.gt.s32.totalorder %v3645_v13, 0 }
 0x556   :  { %v2809_v24 = vsel %vm2802_vm5, %v2805_v19, %v2808_v36  ;;  %v2989_v15 = vor.u32 %v2988_v4, %v2987_v8  ;;  %v2992_v2 = vshll.u32 %v2991_v6, 23  ;;  %v3647_v40 = vsel %vm3646_vm11, %v3645_v13, 0 }
 0x557   :  { %v2810_v35 = vsel %vm2800_vm4, nan, %v2809_v24  ;;  %v3490_v3 = vadd.s32 536870912, %v3489_v22  ;;  %v3642_v41 = vand.u32 8388607, %v3635_v34  ;;  %v3649_v63 = vand.u32 31, %v3647_v40 }
 0x558   :  { %7974 = vst [vmem:[#allocation2 + $0x68] sm:$0xff] %v2810_v35  ;;  %v2993_v1 = vor.u32 4788187, %v2992_v2  ;;  %v1190_v26 = vmul.f32 %v12171_v9, %v12429_v50  ;;  %v2996_v61 = vcvt.s32.f32 %v2989_v15  ;;  %v12889_v12 = vand.u32 3, %v3003_v51 }
 0x559   :  { %v12885_v57 = vshrl.u32 %v3490_v3, 30  ;;  %v3650_v54 = vsub.s32 32, %v3649_v63  ;;  %v12893_v23 = vmul.f32 %v12282_v21, %v12528_v46  ;;  %v3643_v56 = vor.u32 8388608, %v3642_v41 }
 0x55a   :  { %v2994_v59 = vand.u32 2147483647, %v2993_v1  ;;  %v12896_v58 = vshrl.u32 %v3647_v40, 5  ;;  %v3652_v27 = vshll.u32 %v9028_v18, %v3649_v63  ;;  %v3655_v46 = vshll.u32 %v9029_v29, %v3649_v63 }
 0x55b   :  { %v3492_v48 = vshll.u32 %v12885_v57, 30  ;;  %v3653_v32 = vshrl.u32 %v9029_v29, %v3650_v54  ;;  %v3656_v0 = vshrl.u32 %v9030_v31, %v3650_v54  ;;  %v3659_v50 = vshrl.u32 %v9031_v33, %v3650_v54 }
 0x55c   :  { %v2997_v5 = vmul.f32 %v2996_v61, %v2994_v59  ;;  %v3662_v20 = vshrl.u32 %v9032_v43, %v3650_v54  ;;  %v3665_v11 = vshrl.u32 %v9033_v52, %v3650_v54  ;;  %v3658_v8 = vshll.u32 %v9030_v31, %v3649_v63 }
 0x55d   :  { %v12902_v10 = vsub.s32 %v3489_v22, %v3492_v48  ;;  %v3661_v13 = vshll.u32 %v9031_v33, %v3649_v63  ;;  %v3664_v36 = vshll.u32 %v9032_v43, %v3649_v63  ;;  %v3654_v6 = vor.u32 %v3653_v32, %v3652_v27 }
 0x55e   :  { %v2998_v25 = vxor.u32 2147483648, %v2997_v5  ;;  %v3657_v30 = vor.u32 %v3656_v0, %v3655_v46  ;;  %v12912_v19 = vadd.f32 %v12201_v38, %v1190_v26  ;;  %v3660_v22 = vor.u32 %v3659_v50, %v3658_v8 }
 0x55f   :  { %v3495_v4 = vsub.s32 0, %v12902_v10  ;;  %v3663_v24 = vor.u32 %v3662_v20, %v3661_v13  ;;  %v3666_v15 = vor.u32 %v3665_v11, %v3664_v36  ;;  %v3515_v35 = vsub.s32 4, %v12885_v57  ;;  %v12961_v36 = vpop.f32.mrb[24].mxu0 }
 0x560   :  { %v2999_v51 = vsel %vm2916_vm15, %v2998_v25, %v2997_v5  ;;  %v12921_v3 = vshll.u32 %v3643_v56, 8  ;;  %v3651_v41 = vshrl.u32 %v9028_v18, %v3650_v54  ;;  %vm3667_vm12 = vcmp.lt.s32.totalorder %v12896_v58, 1 }
 0x561   :  { %v3002_v2 = vsel %vm12855_vm7, %v12631_v55, %v2999_v51  ;;  %v8178_v40 = vmin.u32 %v3495_v4, %v12902_v10  ;;  %vm3669_vm13 = vcmp.lt.s32.totalorder %v12896_v58, 3  ;;  %vm3431_vm0 = vcmp.lt.s32.totalorder %v12721_v47, 0 }
 0x562   :  { %8903 = vcosq.f32 %v3002_v2  ;;  %vm3670_vm14 = vcmp.lt.s32.totalorder %v12896_v58, 4  ;;  %v3675_v7 = vsel %vm3667_vm12, %v3654_v6, %v3657_v30  ;;  %v3679_v59 = vsel %vm3667_vm12, %v3657_v30, %v3660_v22 }
 0x563   :  { %8905 = vsinq.f32 %v3002_v2  ;;  %v3497_v63 = vclz %v8178_v40  ;;  %v3672_v1 = vsel %vm3670_vm14, %v3660_v22, 2102212464  ;;  %v3676_v26 = vsel %vm3670_vm14, %v3663_v24, 920167782 }
 0x564   :  { %v3680_v61 = vsel %vm3670_vm14, %v3666_v15, 1326507024  ;;  %vm3668_vm15 = vcmp.lt.s32.totalorder %v12896_v58, 2  ;;  %v3677_v48 = vsel %vm3669_vm13, %v3660_v22, %v3676_v26  ;;  %vm12939_vm1 = vcmp.le.f32.partialorder %v3429_v53, 0.7853982 }
 0x565   :  { %v8179_v54 = vadd.s32 4294967294, %v3497_v63  ;;  %v3681_v56 = vsel %vm3669_vm13, %v3663_v24, %v3680_v61  ;;  %v3671_v5 = vsel %vm3667_vm12, %v3651_v41, %v3654_v6  ;;  %v3678_v0 = vsel %vm3668_vm15, %v3675_v7, %v3677_v48 }
 0x566   :  { %v3682_v50 = vsel %vm3668_vm15, %v3679_v59, %v3681_v56  ;;  %v3535_v20 = vand.u32 2139095040, %v12912_v19  ;;  %v3673_v27 = vsel %vm3669_vm13, %v3657_v30, %v3672_v1  ;;  %vm3006_vm3 = vweird.f32 %v12631_v55 }
 0x567   :  { %vm8180_vm2 = vcmp.lt.s32.totalorder %v8179_v54, 0  ;;  %v12953_v53 = vmul.u32.u64.low %v12921_v3, %v3682_v50  ;;  %v12954_v46 = vmul.u32.u64.high %v12921_v3, %v3682_v50, %v12953_v53  ;;  %vm3008_vm4 = vcmp.lt.s32.totalorder %v12889_v12, 2 }
 0x568   :  { %v3500_v11 = vsel %vm8180_vm2, 0, %v8179_v54  ;;  %v12957_v25 = vmul.u32.u64.low %v12921_v3, %v3678_v0  ;;  %v12958_v8 = vmul.u32.u64.high %v12921_v3, %v3678_v0, %v12957_v25  ;;  %v3536_v13 = vshrl.u32 %v3535_v20, 23 }
 0x569   :  { %v3485_v4 = vadd.s32 %v12841_v14, %v12849_v17  ;;  %v3501_v6 = vsub.s32 32, %v3500_v11  ;;  %v3505_v30 = vsub.s32 4294967266, %v3500_v11  ;;  %vm3009_vm5 = vcmp.eq.s32.totalorder %v12889_v12, 0 }
 0x56a   :  { %v3674_v51 = vsel %vm3668_vm15, %v3671_v5, %v3673_v27  ;;  %v8181_v22 = vadd.s32 4294967169, %v3536_v13  ;;  %v12972_v24 = vadd.f32 %v12330_v16, %v12893_v23  ;;  %v3502_v15 = vshll.u32 %v12902_v10, %v3500_v11 }
 0x56b   :  { %v3503_v2 = vshrl.u32 %v3485_v4, %v3501_v6  ;;  %v3506_v40 = vadd.s32 127, %v3505_v30  ;;  %vm3692_vm6 = vc.u32 %v12954_v46, %v12957_v25  ;;  %v3516_v17 = vsel %vm3431_vm0, %v3515_v35, %v12885_v57 }
 0x56c   :  { %v8904_v14 = vpop.eup %8903  ;;  %v3693_v58 = vadd.s32 1, %v12958_v8  ;;  %v3532_v41 = vand.u32 2147483647, %v12912_v19  ;;  %v3542_v63 = vadd.s32 1, %v8181_v22  ;;  %v3690_v10 = vmul.u32 %v12921_v3, %v3674_v51 }
 0x56d   :  { %v8906_v7 = vpop.eup %8905  ;;  %v3013_v23 = vxor.u32 2147483648, %v8904_v14  ;;  %v3504_v1 = vor.u32 %v3503_v2, %v3502_v15  ;;  %v3507_v26 = vshll.u32 %v3506_v40, 23  ;;  %vm3012_vm7 = vcmp.eq.s32.totalorder %v12889_v12, 2 }
 0x56e   :  { %v3010_v59 = vxor.u32 2147483648, %v8906_v7  ;;  %v3694_v61 = vsel %vm3692_vm6, %v3693_v58, %v12958_v8  ;;  %vm3543_vm8 = vcmp.gt.s32.totalorder %v3542_v63, 0  ;;  %v3518_v57 = vsel %vm12939_vm1, 0, %v3516_v17 }
 0x56f   :  { %v3014_v54 = vsel %vm3012_vm7, %v3013_v23, %v8906_v7  ;;  %v3508_v48 = vor.u32 4788187, %v3507_v26  ;;  %v3695_v35 = vadd.s32 %v3694_v61, %v3690_v10  ;;  %v3539_v5 = vand.u32 8388607, %v3532_v41 }
 0x570   :  { %v3011_v56 = vsel %vm3009_vm5, %v8904_v14, %v3010_v59  ;;  %v3544_v0 = vsel %vm3543_vm8, %v3542_v63, 0  ;;  %v3741_v3 = vand.u32 2139095040, %v12972_v24  ;;  %v3511_v27 = vcvt.s32.f32 %v3504_v1 }
 0x571   :  { %v3015_v50 = vsel %vm3008_vm4, %v3011_v56, %v3014_v54  ;;  %v3509_v20 = vand.u32 2147483647, %v3508_v48  ;;  %v3696_v53 = vadd.s32 536870912, %v3695_v35  ;;  %v3546_v8 = vand.u32 31, %v3544_v0 }
 0x572   :  { %v3016_v11 = vsel %vm3006_vm3, nan, %v3015_v50  ;;  %v12998_v6 = vand.u32 3, %v3518_v57  ;;  %v3540_v30 = vor.u32 8388608, %v3539_v5  ;;  %v3742_v22 = vshrl.u32 %v3741_v3, 23 }
 0x573   :  { %7976 = vst [vmem:[#allocation2 + $0x78] sm:$0xff] %v3016_v11  ;;  %v3512_v13 = vmul.f32 %v3511_v27, %v3509_v20  ;;  %v12996_v4 = vshrl.u32 %v3696_v53, 30  ;;  %v3547_v51 = vsub.s32 32, %v3546_v8  ;;  %v13001_v2 = vshrl.u32 %v3544_v0, 5 }
 0x574   :  { %v3549_v40 = vshll.u32 %v9028_v18, %v3546_v8  ;;  %v3552_v14 = vshll.u32 %v9029_v29, %v3546_v8  ;;  %v3555_v23 = vshll.u32 %v9030_v31, %v3546_v8  ;;  %v3558_v59 = vshll.u32 %v9031_v33, %v3546_v8 }
 0x575   :  { %v3513_v15 = vxor.u32 2147483648, %v3512_v13  ;;  %v3698_v12 = vshll.u32 %v12996_v4, 30  ;;  %v3550_v55 = vshrl.u32 %v9029_v29, %v3547_v51  ;;  %v3553_v17 = vshrl.u32 %v9030_v31, %v3547_v51 }
 0x576   :  { %v3556_v58 = vshrl.u32 %v9031_v33, %v3547_v51  ;;  %v3559_v1 = vshrl.u32 %v9032_v43, %v3547_v51  ;;  %v3738_v61 = vand.u32 2147483647, %v12972_v24  ;;  %v3561_v56 = vshll.u32 %v9032_v43, %v3546_v8 }
 0x577   :  { %v3514_v63 = vsel %vm3431_vm0, %v3513_v15, %v3512_v13  ;;  %v13010_v7 = vsub.s32 %v3695_v35, %v3698_v12  ;;  %v3551_v10 = vor.u32 %v3550_v55, %v3549_v40  ;;  %v3554_v48 = vor.u32 %v3553_v17, %v3552_v14 }
 0x578   :  { %v3517_v26 = vsel %vm12939_vm1, %v12721_v47, %v3514_v63  ;;  %v3557_v57 = vor.u32 %v3556_v58, %v3555_v23  ;;  %v3560_v35 = vor.u32 %v3559_v1, %v3558_v59  ;;  %v3562_v5 = vshrl.u32 %v9033_v52, %v3547_v51  ;;  %v13052_v63 = vpop.f32.mrb[24].mxu1 }
 0x579   :  { %8907 = vcosq.f32 %v3517_v26  ;;  %v3701_v54 = vsub.s32 0, %v13010_v7  ;;  %vm3564_vm10 = vcmp.lt.s32.totalorder %v13001_v2, 1  ;;  %v3580_v32 = vshll.u32 %v3540_v30, 8 }
 0x57a   :  { %8909 = vsinq.f32 %v3517_v26  ;;  %v8189_v3 = vadd.s32 4294967169, %v3742_v22  ;;  %v3548_v50 = vshrl.u32 %v9028_v18, %v3547_v51  ;;  %v3563_v20 = vor.u32 %v3562_v5, %v3561_v56 }
 0x57b   :  { %v8186_v0 = vmin.u32 %v3701_v54, %v13010_v7  ;;  %vm3566_vm9 = vcmp.lt.s32.totalorder %v13001_v2, 3  ;;  %vm3567_vm11 = vcmp.lt.s32.totalorder %v13001_v2, 4  ;;  %v3572_v11 = vsel %vm3564_vm10, %v3551_v10, %v3554_v48 }
 0x57c   :  { %v3569_v53 = vsel %vm3567_vm11, %v3557_v57, 2102212464  ;;  %v3573_v8 = vsel %vm3567_vm11, %v3560_v35, 920167782  ;;  %vm3524_vm12 = vcmp.eq.s32.totalorder %v12998_v6, 0  ;;  %vm3565_vm13 = vcmp.lt.s32.totalorder %v13001_v2, 2 }
 0x57d   :  { %v3703_v27 = vclz %v8186_v0  ;;  %v3574_v13 = vsel %vm3566_vm9, %v3557_v57, %v3573_v8  ;;  %v3576_v30 = vsel %vm3564_vm10, %v3554_v48, %v3557_v57  ;;  %v3577_v51 = vsel %vm3567_vm11, %v3563_v20, 1326507024 }
 0x57e   :  { %vm3523_vm0 = vcmp.lt.s32.totalorder %v12998_v6, 2  ;;  %vm3637_vm14 = vcmp.lt.s32.totalorder %v12808_v39, 0  ;;  %v3568_v15 = vsel %vm3564_vm10, %v3548_v50, %v3551_v10  ;;  %v3575_v12 = vsel %vm3565_vm13, %v3572_v11, %v3574_v13 }
 0x57f   :  { %v8187_v22 = vadd.s32 4294967294, %v3703_v27  ;;  %v3578_v40 = vsel %vm3566_vm9, %v3560_v35, %v3577_v51  ;;  %vm3521_vm15 = vweird.f32 %v12721_v47  ;;  %v3570_v55 = vsel %vm3566_vm9, %v3554_v48, %v3569_v53 }
 0x580   :  { %v3579_v14 = vsel %vm3565_vm13, %v3576_v30, %v3578_v40  ;;  %v13048_v17 = vmul.u32.u64.low %v3580_v32, %v3575_v12  ;;  %v13049_v58 = vmul.u32.u64.high %v3580_v32, %v3575_v12, %v13048_v17  ;;  %v3748_v26 = vadd.s32 1, %v8189_v3 }
 0x581   :  { %vm8188_vm1 = vcmp.lt.s32.totalorder %v8187_v22, 0  ;;  %v13054_v23 = vmul.u32.u64.low %v3580_v32, %v3579_v14  ;;  %v13055_v1 = vmul.u32.u64.high %v3580_v32, %v3579_v14, %v13054_v23  ;;  %vm3527_vm2 = vcmp.eq.s32.totalorder %v12998_v6, 2 }
 0x582   :  { %vm13060_vm3 = vcmp.le.f32.partialorder %v3635_v34, 0.7853982  ;;  %v3691_v59 = vadd.s32 %v12957_v25, %v12954_v46  ;;  %v3706_v54 = vsel %vm8188_vm1, 0, %v8187_v22  ;;  %v3745_v48 = vand.u32 8388607, %v3738_v61 }
 0x583   :  { %v8908_v57 = vpop.eup %8907  ;;  %v3707_v35 = vsub.s32 32, %v3706_v54  ;;  %v3711_v56 = vsub.s32 4294967266, %v3706_v54  ;;  %v3571_v5 = vsel %vm3565_vm13, %v3568_v15, %v3570_v55  ;;  %vm3749_vm4 = vcmp.gt.s32.totalorder %v3748_v26, 0 }
 0x584   :  { %v8910_v0 = vpop.eup %8909  ;;  %v3528_v3 = vxor.u32 2147483648, %v8908_v57  ;;  %v3721_v34 = vsub.s32 4, %v12996_v4  ;;  %v3590_v50 = vadd.s32 1, %v13049_v58  ;;  %v3750_v20 = vsel %vm3749_vm4, %v3748_v26, 0 }
 0x585   :  { %v3525_v27 = vxor.u32 2147483648, %v8910_v0  ;;  %v3708_v46 = vshll.u32 %v13010_v7, %v3706_v54  ;;  %v3709_v25 = vshrl.u32 %v3691_v59, %v3707_v35  ;;  %v3712_v53 = vadd.s32 127, %v3711_v56 }
 0x586   :  { %v3529_v11 = vsel %vm3527_vm2, %v3528_v3, %v8910_v0  ;;  %v3587_v8 = vmul.u32 %v3580_v32, %v3571_v5  ;;  %vm3589_vm5 = vc.u32 %v13055_v1, %v13048_v17  ;;  %v3752_v2 = vand.u32 31, %v3750_v20 }
 0x587   :  { %v3526_v13 = vsel %vm3524_vm12, %v8908_v57, %v3525_v27  ;;  %v3710_v30 = vor.u32 %v3709_v25, %v3708_v46  ;;  %v3713_v51 = vshll.u32 %v3712_v53, 23  ;;  %v3591_v22 = vsel %vm3589_vm5, %v3590_v50, %v13049_v58 }
 0x588   :  { %v3530_v7 = vsel %vm3523_vm0, %v3526_v13, %v3529_v11  ;;  %v3722_v15 = vsel %vm3637_vm14, %v3721_v34, %v12996_v4  ;;  %v3592_v12 = vadd.s32 %v3591_v22, %v3587_v8  ;;  %v3753_v32 = vsub.s32 32, %v3752_v2 }
 0x589   :  { %v3531_v40 = vsel %vm3521_vm15, nan, %v3530_v7  ;;  %v3714_v55 = vor.u32 4788187, %v3713_v51  ;;  %v1197_v14 = vmul.f32 %v11951_v45, %v12587_v49  ;;  %v1199_v23 = vmul.f32 %v12106_v42, %v12683_v60 }
 0x58a   :  { %7981 = vst [vmem:[#allocation2 + $0xa0] sm:$0xff] %v3531_v40  ;;  %v3593_v58 = vadd.s32 536870912, %v3592_v12  ;;  %v3746_v6 = vor.u32 8388608, %v3745_v48  ;;  %v3756_v26 = vshrl.u32 %v9029_v29, %v3753_v32  ;;  %v3759_v59 = vshrl.u32 %v9030_v31, %v3753_v32 }
 0x58b   :  { %v3715_v4 = vand.u32 2147483647, %v3714_v55  ;;  %v3717_v54 = vcvt.s32.f32 %v3710_v30  ;;  %v3724_v47 = vsel %vm13060_vm3, 0, %v3722_v15  ;;  %v3762_v57 = vshrl.u32 %v9031_v33, %v3753_v32 }
 0x58c   :  { %v13096_v35 = vshrl.u32 %v3593_v58, 30  ;;  %v3755_v49 = vshll.u32 %v9028_v18, %v3752_v2  ;;  %v3758_v60 = vshll.u32 %v9029_v29, %v3752_v2  ;;  %v3765_v56 = vshrl.u32 %v9032_v43, %v3753_v32 }
 0x58d   :  { %v3718_v48 = vmul.f32 %v3717_v54, %v3715_v4  ;;  %v3761_v5 = vshll.u32 %v9030_v31, %v3752_v2  ;;  %v3764_v0 = vshll.u32 %v9031_v33, %v3752_v2  ;;  %v3768_v3 = vshrl.u32 %v9033_v52, %v3753_v32  ;;  %v13126_v4 = vpop.f32.mrb[25].mxu0 }
 0x58e   :  { %v3595_v34 = vshll.u32 %v13096_v35, 30  ;;  %v3751_v50 = vshrl.u32 %v3750_v20, 5  ;;  %v3757_v27 = vor.u32 %v3756_v26, %v3755_v49  ;;  %v3760_v46 = vor.u32 %v3759_v59, %v3758_v60 }
 0x58f   :  { %v3719_v25 = vxor.u32 2147483648, %v3718_v48  ;;  %v3763_v53 = vor.u32 %v3762_v57, %v3761_v5  ;;  %v3766_v11 = vor.u32 %v3765_v56, %v3764_v0  ;;  %v3767_v8 = vshll.u32 %v9032_v43, %v3752_v2 }
 0x590   :  { %v13106_v13 = vand.u32 3, %v3724_v47  ;;  %v13108_v30 = vsub.s32 %v3592_v12, %v3595_v34  ;;  %v13110_v51 = vshll.u32 %v3746_v6, 8  ;;  %v13113_v22 = vadd.f32 %v11957_v44, %v1197_v14 }
 0x591   :  { %v3720_v7 = vsel %vm3637_vm14, %v3719_v25, %v3718_v48  ;;  %v3754_v20 = vshrl.u32 %v9028_v18, %v3753_v32  ;;  %v3769_v15 = vor.u32 %v3768_v3, %v3767_v8  ;;  %v13119_v40 = vadd.f32 %v12118_v28, %v1199_v23 }
 0x592   :  { %v3723_v2 = vsel %vm13060_vm3, %v12808_v39, %v3720_v7  ;;  %v3598_v12 = vsub.s32 0, %v13108_v30  ;;  %vm3770_vm6 = vcmp.lt.s32.totalorder %v3751_v50, 1  ;;  %vm3773_vm7 = vcmp.lt.s32.totalorder %v3751_v50, 4 }
 0x593   :  { %8911 = vcosq.f32 %v3723_v2  ;;  %v3775_v55 = vsel %vm3773_vm7, %v3763_v53, 2102212464  ;;  %v3778_v14 = vsel %vm3770_vm6, %v3757_v27, %v3760_v46  ;;  %v3779_v58 = vsel %vm3773_vm7, %v3766_v11, 920167782 }
 0x594   :  { %8913 = vsinq.f32 %v3723_v2  ;;  %v8182_v6 = vmin.u32 %v3598_v12, %v13108_v30  ;;  %vm3772_vm8 = vcmp.lt.s32.totalorder %v3751_v50, 3  ;;  %v3782_v32 = vsel %vm3770_vm6, %v3760_v46, %v3763_v53 }
 0x595   :  { %vm3771_vm10 = vcmp.lt.s32.totalorder %v3751_v50, 2  ;;  %v3774_v23 = vsel %vm3770_vm6, %v3754_v20, %v3757_v27  ;;  %v3780_v26 = vsel %vm3772_vm8, %v3763_v53, %v3779_v58  ;;  %v3783_v59 = vsel %vm3773_vm7, %v3769_v15, 1326507024 }
 0x596   :  { %v3600_v10 = vclz %v8182_v6  ;;  %v3776_v54 = vsel %vm3772_vm8, %v3760_v46, %v3775_v55  ;;  %v3781_v47 = vsel %vm3771_vm10, %v3778_v14, %v3780_v26  ;;  %v3784_v57 = vsel %vm3772_vm8, %v3766_v11, %v3783_v59 }
 0x597   :  { %v3618_v49 = vsub.s32 4, %v13096_v35  ;;  %v3785_v60 = vsel %vm3771_vm10, %v3782_v32, %v3784_v57  ;;  %v13132_v56 = vmul.u32.u64.low %v13110_v51, %v3781_v47  ;;  %v13133_v48 = vmul.u32.u64.high %v13110_v51, %v3781_v47, %v13132_v56 }
 0x598   :  { %v8183_v5 = vadd.s32 4294967294, %v3600_v10  ;;  %v13137_v0 = vmul.u32.u64.low %v13110_v51, %v3785_v60  ;;  %v13138_v3 = vmul.u32.u64.high %v13110_v51, %v3785_v60, %v13137_v0  ;;  %v4256_v34 = vand.u32 2139095040, %v13113_v22 }
 0x599   :  { %vm3729_vm9 = vcmp.lt.s32.totalorder %v13106_v13, 2  ;;  %vm13144_vm11 = vcmp.le.f32.partialorder %v3532_v41, 0.7853982  ;;  %vm3534_vm12 = vcmp.lt.s32.totalorder %v12912_v19, 0  ;;  %v3777_v46 = vsel %vm3771_vm10, %v3774_v23, %v3776_v54 }
 0x59a   :  { %vm3727_vm13 = vweird.f32 %v12808_v39  ;;  %vm3733_vm0 = vcmp.eq.s32.totalorder %v13106_v13, 2  ;;  %vm8184_vm14 = vcmp.lt.s32.totalorder %v8183_v5, 0  ;;  %v4257_v25 = vshrl.u32 %v4256_v34, 23 }
 0x59b   :  { %v4462_v53 = vand.u32 2139095040, %v13119_v40  ;;  %v3588_v11 = vadd.s32 %v13048_v17, %v13055_v1  ;;  %v3603_v8 = vsel %vm8184_vm14, 0, %v8183_v5  ;;  %v3796_v41 = vadd.s32 1, %v13133_v48 }
 0x59c   :  { %v4253_v7 = vand.u32 2147483647, %v13113_v22  ;;  %v3604_v20 = vsub.s32 32, %v3603_v8  ;;  %v3608_v15 = vsub.s32 4294967266, %v3603_v8  ;;  %v3619_v50 = vsel %vm3534_vm12, %v3618_v49, %v13096_v35 }
 0x59d   :  { %v3793_v2 = vmul.u32 %v13110_v51, %v3777_v46  ;;  %v8912_v12 = vpop.eup %8911  ;;  %v3605_v55 = vshll.u32 %v13108_v30, %v3603_v8  ;;  %vm3795_vm15 = vc.u32 %v13138_v3, %v13132_v56  ;;  %v8209_v17 = vadd.s32 4294967169, %v4257_v25 }
 0x59e   :  { %v4463_v1 = vshrl.u32 %v4462_v53, 23  ;;  %v8914_v14 = vpop.eup %8913  ;;  %v3734_v58 = vxor.u32 2147483648, %v8912_v12  ;;  %v3606_v6 = vshrl.u32 %v3588_v11, %v3604_v20  ;;  %v3609_v32 = vadd.s32 127, %v3608_v15 }
 0x59f   :  { %v3797_v23 = vsel %vm3795_vm15, %v3796_v41, %v13133_v48  ;;  %v3731_v26 = vxor.u32 2147483648, %v8914_v14  ;;  %v4260_v35 = vand.u32 8388607, %v4253_v7  ;;  %v4263_v51 = vadd.s32 1, %v8209_v17 }
 0x5a0   :  { %v3798_v59 = vadd.s32 %v3797_v23, %v3793_v2  ;;  %vm3730_vm1 = vcmp.eq.s32.totalorder %v13106_v13, 0  ;;  %v3735_v30 = vsel %vm3733_vm0, %v3734_v58, %v8914_v14  ;;  %v3607_v10 = vor.u32 %v3606_v6, %v3605_v55 }
 0x5a1   :  { %v3610_v54 = vshll.u32 %v3609_v32, 23  ;;  %v3732_v47 = vsel %vm3730_vm1, %v8912_v12, %v3731_v26  ;;  %v3621_v57 = vsel %vm13144_vm11, 0, %v3619_v50  ;;  %vm4264_vm2 = vcmp.gt.s32.totalorder %v4263_v51, 0 }
 0x5a2   :  { %v3799_v49 = vadd.s32 536870912, %v3798_v59  ;;  %v3736_v60 = vsel %vm3729_vm9, %v3732_v47, %v3735_v30  ;;  %v4265_v5 = vsel %vm4264_vm2, %v4263_v51, 0  ;;  %v8217_v0 = vadd.s32 4294967169, %v4463_v1 }
 0x5a3   :  { %v3611_v48 = vor.u32 4788187, %v3610_v54  ;;  %v3737_v34 = vsel %vm3727_vm13, nan, %v3736_v60  ;;  %v4261_v25 = vor.u32 8388608, %v4260_v35  ;;  %v4267_v53 = vand.u32 31, %v4265_v5 }
 0x5a4   :  { %v13176_v46 = vshrl.u32 %v3799_v49, 30  ;;  %7983 = vst [vmem:[#allocation2 + $0xb0] sm:$0xff] %v3737_v34  ;;  %v3614_v8 = vcvt.s32.f32 %v3607_v10  ;;  %v13181_v13 = vmul.f32 %v12171_v9, %v12746_v37  ;;  %v13183_v50 = vand.u32 3, %v3621_v57  ;;  %v13208_v34 = vpop.f32.mrb[25].mxu1 }
 0x5a5   :  { %v3612_v11 = vand.u32 2147483647, %v3611_v48  ;;  %v4268_v20 = vsub.s32 32, %v4267_v53  ;;  %v4459_v39 = vand.u32 2147483647, %v13119_v40  ;;  %v4469_v2 = vadd.s32 1, %v8217_v0 }
 0x5a6   :  { %v3801_v41 = vshll.u32 %v13176_v46, 30  ;;  %v4266_v55 = vshrl.u32 %v4265_v5, 5  ;;  %v13189_v1 = vshll.u32 %v4261_v25, 8  ;;  %v4270_v58 = vshll.u32 %v9028_v18, %v4267_v53 }
 0x5a7   :  { %v3615_v15 = vmul.f32 %v3614_v8, %v3612_v11  ;;  %v4271_v17 = vshrl.u32 %v9029_v29, %v4268_v20  ;;  %v4274_v6 = vshrl.u32 %v9030_v31, %v4268_v20  ;;  %v4277_v37 = vshrl.u32 %v9031_v33, %v4268_v20 }
 0x5a8   :  { %v13186_v12 = vsub.s32 %v3798_v59, %v3801_v41  ;;  %v4273_v23 = vshll.u32 %v9029_v29, %v4267_v53  ;;  %v4276_v26 = vshll.u32 %v9030_v31, %v4267_v53  ;;  %v4280_v59 = vshrl.u32 %v9032_v43, %v4268_v20 }
 0x5a9   :  { %v3616_v14 = vxor.u32 2147483648, %v3615_v15  ;;  %v4272_v51 = vor.u32 %v4271_v17, %v4270_v58  ;;  %v4279_v30 = vshll.u32 %v9031_v33, %v4267_v53  ;;  %vm4470_vm3 = vcmp.gt.s32.totalorder %v4469_v2, 0 }
 0x5aa   :  { %v3804_v32 = vsub.s32 0, %v13186_v12  ;;  %v4275_v47 = vor.u32 %v4274_v6, %v4273_v23  ;;  %v4278_v57 = vor.u32 %v4277_v37, %v4276_v26  ;;  %v4282_v60 = vshll.u32 %v9032_v43, %v4267_v53 }
 0x5ab   :  { %v3617_v35 = vsel %vm3534_vm12, %v3616_v14, %v3615_v15  ;;  %v4281_v49 = vor.u32 %v4280_v59, %v4279_v30  ;;  %v4283_v48 = vshrl.u32 %v9033_v52, %v4268_v20  ;;  %v4269_v0 = vshrl.u32 %v9028_v18, %v4268_v20 }
 0x5ac   :  { %v3620_v10 = vsel %vm13144_vm11, %v12912_v19, %v3617_v35  ;;  %v8190_v54 = vmin.u32 %v3804_v32, %v13186_v12  ;;  %vm4285_vm4 = vcmp.lt.s32.totalorder %v4266_v55, 1  ;;  %vm3740_vm5 = vcmp.lt.s32.totalorder %v12972_v24, 0 }
 0x5ad   :  { %8915 = vcosq.f32 %v3620_v10  ;;  %v4284_v27 = vor.u32 %v4283_v48, %v4282_v60  ;;  %vm4286_vm6 = vcmp.lt.s32.totalorder %v4266_v55, 2  ;;  %vm4287_vm7 = vcmp.lt.s32.totalorder %v4266_v55, 3 }
 0x5ae   :  { %8917 = vsinq.f32 %v3620_v10  ;;  %v3806_v5 = vclz %v8190_v54  ;;  %vm4288_vm8 = vcmp.lt.s32.totalorder %v4266_v55, 4  ;;  %v4293_v8 = vsel %vm4285_vm4, %v4272_v51, %v4275_v47 }
 0x5af   :  { %v4290_v11 = vsel %vm4288_vm8, %v4278_v57, 2102212464  ;;  %v4294_v41 = vsel %vm4288_vm8, %v4281_v49, 920167782  ;;  %v4289_v53 = vsel %vm4285_vm4, %v4269_v0, %v4272_v51  ;;  %v4297_v17 = vsel %vm4285_vm4, %v4275_v47, %v4278_v57 }
 0x5b0   :  { %v8191_v25 = vadd.s32 4294967294, %v3806_v5  ;;  %v4295_v15 = vsel %vm4287_vm7, %v4278_v57, %v4294_v41  ;;  %v4298_v14 = vsel %vm4288_vm8, %v4284_v27, 1326507024  ;;  %v4291_v58 = vsel %vm4287_vm7, %v4275_v47, %v4290_v11 }
 0x5b1   :  { %v4296_v20 = vsel %vm4286_vm6, %v4293_v8, %v4295_v15  ;;  %v4299_v6 = vsel %vm4287_vm7, %v4281_v49, %v4298_v14  ;;  %vm13214_vm9 = vcmp.le.f32.partialorder %v3738_v61, 0.7853982  ;;  %vm3624_vm11 = vweird.f32 %v12912_v19 }
 0x5b2   :  { %vm8192_vm10 = vcmp.lt.s32.totalorder %v8191_v25, 0  ;;  %v4300_v23 = vsel %vm4286_vm6, %v4297_v17, %v4299_v6  ;;  %v13220_v26 = vmul.u32.u64.low %v13189_v1, %v4296_v20  ;;  %v13221_v59 = vmul.u32.u64.high %v13189_v1, %v4296_v20, %v13220_v26 }
 0x5b3   :  { %v3809_v32 = vsel %vm8192_vm10, 0, %v8191_v25  ;;  %v3794_v35 = vadd.s32 %v13132_v56, %v13138_v3  ;;  %v3824_v61 = vsub.s32 4, %v13176_v46  ;;  %v4292_v10 = vsel %vm4286_vm6, %v4289_v53, %v4291_v58 }
 0x5b4   :  { %v3810_v51 = vsub.s32 32, %v3809_v32  ;;  %v3814_v30 = vsub.s32 4294967266, %v3809_v32  ;;  %v13230_v54 = vmul.u32.u64.low %v13189_v1, %v4300_v23  ;;  %v13231_v47 = vmul.u32.u64.high %v13189_v1, %v4300_v23, %v13230_v54 }
 0x5b5   :  { %v4471_v57 = vsel %vm4470_vm3, %v4469_v2, 0  ;;  %v3811_v49 = vshll.u32 %v13186_v12, %v3809_v32  ;;  %vm3626_vm12 = vcmp.lt.s32.totalorder %v13183_v50, 2  ;;  %vm3630_vm13 = vcmp.eq.s32.totalorder %v13183_v50, 2 }
 0x5b6   :  { %v3812_v60 = vshrl.u32 %v3794_v35, %v3810_v51  ;;  %v3815_v48 = vadd.s32 127, %v3814_v30  ;;  %v4473_v5 = vand.u32 31, %v4471_v57  ;;  %v4311_v56 = vadd.s32 1, %v13221_v59 }
 0x5b7   :  { %v8916_v0 = vpop.eup %8915  ;;  %v4466_v3 = vand.u32 8388607, %v4459_v39  ;;  %v3825_v2 = vsel %vm3740_vm5, %v3824_v61, %v13176_v46  ;;  %v4308_v8 = vmul.u32 %v13189_v1, %v4292_v10  ;;  %vm4310_vm0 = vc.u32 %v13231_v47, %v13220_v26 }
 0x5b8   :  { %v8918_v55 = vpop.eup %8917  ;;  %v3631_v27 = vxor.u32 2147483648, %v8916_v0  ;;  %v3813_v25 = vor.u32 %v3812_v60, %v3811_v49  ;;  %v3816_v11 = vshll.u32 %v3815_v48, 23  ;;  %v4474_v41 = vsub.s32 32, %v4473_v5 }
 0x5b9   :  { %v3628_v12 = vxor.u32 2147483648, %v8918_v55  ;;  %vm3627_vm14 = vcmp.eq.s32.totalorder %v13183_v50, 0  ;;  %v4312_v17 = vsel %vm4310_vm0, %v4311_v56, %v13221_v59  ;;  %v4467_v20 = vor.u32 8388608, %v4466_v3 }
 0x5ba   :  { %v3632_v53 = vsel %vm3630_vm13, %v3631_v27, %v8918_v55  ;;  %v3817_v15 = vor.u32 4788187, %v3816_v11  ;;  %v4313_v58 = vadd.s32 %v4312_v17, %v4308_v8  ;;  %v13250_v6 = vadd.f32 %v12201_v38, %v13181_v13 }
 0x5bb   :  { %v3629_v14 = vsel %vm3627_vm14, %v8916_v0, %v3628_v12  ;;  %v3820_v32 = vcvt.s32.f32 %v3813_v25  ;;  %v3827_v23 = vsel %vm13214_vm9, 0, %v3825_v2  ;;  %v13258_v59 = vshrl.u32 %v4471_v57, 5 }
 0x5bc   :  { %v3633_v46 = vsel %vm3626_vm12, %v3629_v14, %v3632_v53  ;;  %v3818_v1 = vand.u32 2147483647, %v3817_v15  ;;  %v4314_v51 = vadd.s32 536870912, %v4313_v58  ;;  %v4477_v30 = vshrl.u32 %v9029_v29, %v4474_v41 }
 0x5bd   :  { %v3634_v35 = vsel %vm3624_vm11, nan, %v3633_v46  ;;  %v4476_v13 = vshll.u32 %v9028_v18, %v4473_v5  ;;  %v4480_v50 = vshrl.u32 %v9030_v31, %v4474_v41  ;;  %v4483_v10 = vshrl.u32 %v9031_v33, %v4474_v41 }
 0x5be   :  { %7982 = vst [vmem:[#allocation2 + $0xa8] sm:$0xff] %v3634_v35  ;;  %v3821_v61 = vmul.f32 %v3820_v32, %v3818_v1  ;;  %v4315_v54 = vshrl.u32 %v4314_v51, 30  ;;  %v4482_v49 = vshll.u32 %v9030_v31, %v4473_v5  ;;  %v4486_v60 = vshrl.u32 %v9032_v43, %v4474_v41 }
 0x5bf   :  { %v4489_v19 = vshrl.u32 %v9033_v52, %v4474_v41  ;;  %v4479_v57 = vshll.u32 %v9029_v29, %v4473_v5  ;;  %v4485_v0 = vshll.u32 %v9031_v33, %v4473_v5  ;;  %v4488_v56 = vshll.u32 %v9032_v43, %v4473_v5 }
 0x5c0   :  { %v3822_v48 = vxor.u32 2147483648, %v3821_v61  ;;  %v4316_v3 = vshll.u32 %v4315_v54, 30  ;;  %v4478_v55 = vor.u32 %v4477_v30, %v4476_v13  ;;  %v4484_v27 = vor.u32 %v4483_v10, %v4482_v49 }
 0x5c1   :  { %vm4255_vm15 = vcmp.lt.s32.totalorder %v13113_v22, 0  ;;  %v4481_v11 = vor.u32 %v4480_v50, %v4479_v57  ;;  %v4487_v2 = vor.u32 %v4486_v60, %v4485_v0  ;;  %v4490_v12 = vor.u32 %v4489_v19, %v4488_v56 }
 0x5c2   :  { %v3823_v25 = vsel %vm3740_vm5, %v3822_v48, %v3821_v61  ;;  %v13276_v53 = vand.u32 3, %v3827_v23  ;;  %v13278_v15 = vsub.s32 %v4313_v58, %v4316_v3  ;;  %v4507_v5 = vshll.u32 %v4467_v20, 8 }
 0x5c3   :  { %v3826_v8 = vsel %vm13214_vm9, %v12972_v24, %v3823_v25  ;;  %v4475_v17 = vshrl.u32 %v9028_v18, %v4474_v41  ;;  %vm4494_vm1 = vcmp.lt.s32.totalorder %v13258_v59, 4  ;;  %v4359_v14 = vand.u32 2139095040, %v13250_v6  ;;  %v13313_v25 = vpop.f32.mrb[26].mxu0 }
 0x5c4   :  { %8919 = vcosq.f32 %v3826_v8  ;;  %v4319_v46 = vsub.s32 0, %v13278_v15  ;;  %vm4491_vm2 = vcmp.lt.s32.totalorder %v13258_v59, 1  ;;  %v4496_v1 = vsel %vm4494_vm1, %v4484_v27, 2102212464 }
 0x5c5   :  { %8921 = vsinq.f32 %v3826_v8  ;;  %v4499_v37 = vsel %vm4491_vm2, %v4478_v55, %v4481_v11  ;;  %v4500_v32 = vsel %vm4494_vm1, %v4487_v2, 920167782  ;;  %v4503_v23 = vsel %vm4491_vm2, %v4481_v11, %v4484_v27 }
 0x5c6   :  { %v4504_v35 = vsel %vm4494_vm1, %v4490_v12, 1326507024  ;;  %v8210_v58 = vmin.u32 %v4319_v46, %v13278_v15  ;;  %v4339_v20 = vsub.s32 4, %v4315_v54  ;;  %vm4492_vm3 = vcmp.lt.s32.totalorder %v13258_v59, 2 }
 0x5c7   :  { %vm4493_vm4 = vcmp.lt.s32.totalorder %v13258_v59, 3  ;;  %v4495_v41 = vsel %vm4491_vm2, %v4475_v17, %v4478_v55  ;;  %v4360_v61 = vshrl.u32 %v4359_v14, 23  ;;  %vm3830_vm5 = vweird.f32 %v12972_v24 }
 0x5c8   :  { %v4501_v51 = vsel %vm4493_vm4, %v4484_v27, %v4500_v32  ;;  %v4505_v30 = vsel %vm4493_vm4, %v4487_v2, %v4504_v35  ;;  %v4321_v13 = vclz %v8210_v58  ;;  %v4497_v50 = vsel %vm4493_vm4, %v4481_v11, %v4496_v1 }
 0x5c9   :  { %v4502_v10 = vsel %vm4492_vm3, %v4499_v37, %v4501_v51  ;;  %v4506_v49 = vsel %vm4492_vm3, %v4503_v23, %v4505_v30  ;;  %vm13302_vm6 = vcmp.le.f32.partialorder %v4253_v7, 0.7853982  ;;  %v4340_v3 = vsel %vm4255_vm15, %v4339_v20, %v4315_v54 }
 0x5ca   :  { %v13292_v60 = vmul.u32.u64.low %v4507_v5, %v4506_v49  ;;  %v13293_v19 = vmul.u32.u64.high %v4507_v5, %v4506_v49, %v13292_v60  ;;  %v13295_v48 = vmul.u32.u64.low %v4507_v5, %v4502_v10  ;;  %v13296_v57 = vmul.u32.u64.high %v4507_v5, %v4502_v10, %v13295_v48 }
 0x5cb   :  { %v8211_v56 = vadd.s32 4294967294, %v4321_v13  ;;  %v8213_v55 = vadd.s32 4294967169, %v4360_v61  ;;  %vm3832_vm7 = vcmp.lt.s32.totalorder %v13276_v53, 2  ;;  %vm3833_vm8 = vcmp.eq.s32.totalorder %v13276_v53, 0 }
 0x5cc   :  { %vm3836_vm10 = vcmp.eq.s32.totalorder %v13276_v53, 2  ;;  %v4498_v27 = vsel %vm4492_vm3, %v4495_v41, %v4497_v50  ;;  %v4309_v7 = vadd.s32 %v13220_v26, %v13231_v47  ;;  %v4356_v11 = vand.u32 2147483647, %v13250_v6 }
 0x5cd   :  { %vm8212_vm9 = vcmp.lt.s32.totalorder %v8211_v56, 0  ;;  %v4366_v2 = vadd.s32 1, %v8213_v55  ;;  %v4342_v8 = vsel %vm13302_vm6, 0, %v4340_v3  ;;  %vm4516_vm11 = vc.u32 %v13293_v19, %v13295_v48 }
 0x5ce   :  { %v8920_v54 = vpop.eup %8919  ;;  %v4324_v12 = vsel %vm8212_vm9, 0, %v8211_v56  ;;  %v4517_v59 = vadd.s32 1, %v13296_v57  ;;  %v4514_v37 = vmul.u32 %v4507_v5, %v4498_v27  ;;  %v4363_v51 = vand.u32 8388607, %v4356_v11 }
 0x5cf   :  { %v8922_v17 = vpop.eup %8921  ;;  %v3837_v14 = vxor.u32 2147483648, %v8920_v54  ;;  %v4325_v46 = vsub.s32 32, %v4324_v12  ;;  %v4329_v1 = vsub.s32 4294967266, %v4324_v12  ;;  %v4326_v47 = vshll.u32 %v13278_v15, %v4324_v12 }
 0x5d0   :  { %v3834_v26 = vxor.u32 2147483648, %v8922_v17  ;;  %v4518_v32 = vsel %vm4516_vm11, %v4517_v59, %v13296_v57  ;;  %vm4367_vm12 = vcmp.gt.s32.totalorder %v4366_v2, 0  ;;  %v1200_v5 = vmul.f32 %v12282_v21, %v12845_v62 }
 0x5d1   :  { %v3838_v23 = vsel %vm3836_vm10, %v3837_v14, %v8922_v17  ;;  %v4327_v35 = vshrl.u32 %v4309_v7, %v4325_v46  ;;  %v4330_v58 = vadd.s32 127, %v4329_v1  ;;  %v4519_v20 = vadd.s32 %v4518_v32, %v4514_v37 }
 0x5d2   :  { %v3835_v41 = vsel %vm3833_vm8, %v8920_v54, %v3834_v26  ;;  %v4368_v30 = vsel %vm4367_vm12, %v4366_v2, 0  ;;  %v13339_v56 = vand.u32 3, %v4342_v8  ;;  %v4364_v3 = vor.u32 8388608, %v4363_v51 }
 0x5d3   :  { %v3839_v15 = vsel %vm3832_vm7, %v3835_v41, %v3838_v23  ;;  %v4328_v61 = vor.u32 %v4327_v35, %v4326_v47  ;;  %v4331_v13 = vshll.u32 %v4330_v58, 23  ;;  %v4520_v50 = vadd.s32 536870912, %v4519_v20 }
 0x5d4   :  { %v3840_v10 = vsel %vm3830_vm5, nan, %v3839_v15  ;;  %v4370_v49 = vand.u32 31, %v4368_v30  ;;  %v13343_v7 = vadd.f32 %v12330_v16, %v1200_v5  ;;  %v4369_v46 = vshrl.u32 %v4368_v30, 5 }
 0x5d5   :  { %7984 = vst [vmem:[#allocation2 + $0xb8] sm:$0xff] %v3840_v10  ;;  %v4332_v60 = vor.u32 4788187, %v4331_v13  ;;  %v13337_v57 = vshrl.u32 %v4520_v50, 30  ;;  %v4335_v62 = vcvt.s32.f32 %v4328_v61  ;;  %v13355_v26 = vshll.u32 %v4364_v3, 8 }
 0x5d6   :  { %v4371_v55 = vsub.s32 32, %v4370_v49  ;;  %v4373_v2 = vshll.u32 %v9028_v18, %v4370_v49  ;;  %v4376_v17 = vshll.u32 %v9029_v29, %v4370_v49  ;;  %v4379_v1 = vshll.u32 %v9030_v31, %v4370_v49 }
 0x5d7   :  { %v4333_v27 = vand.u32 2147483647, %v4332_v60  ;;  %v4522_v53 = vshll.u32 %v13337_v57, 30  ;;  %v4382_v37 = vshll.u32 %v9031_v33, %v4370_v49  ;;  %v4565_v61 = vand.u32 2139095040, %v13343_v7 }
 0x5d8   :  { %v4374_v24 = vshrl.u32 %v9029_v29, %v4371_v55  ;;  %v4377_v54 = vshrl.u32 %v9030_v31, %v4371_v55  ;;  %v4380_v12 = vshrl.u32 %v9031_v33, %v4371_v55  ;;  %v4383_v14 = vshrl.u32 %v9032_v43, %v4371_v55 }
 0x5d9   :  { %v4336_v59 = vmul.f32 %v4335_v62, %v4333_v27  ;;  %v13349_v8 = vsub.s32 %v4519_v20, %v4522_v53  ;;  %v4385_v20 = vshll.u32 %v9032_v43, %v4370_v49  ;;  %v4386_v51 = vshrl.u32 %v9033_v52, %v4371_v55  ;;  %v13368_v49 = vpop.f32.mrb[26].mxu1 }
 0x5da   :  { %v4375_v23 = vor.u32 %v4374_v24, %v4373_v2  ;;  %v4378_v35 = vor.u32 %v4377_v54, %v4376_v17  ;;  %v4381_v58 = vor.u32 %v4380_v12, %v4379_v1  ;;  %v4384_v41 = vor.u32 %v4383_v14, %v4382_v37 }
 0x5db   :  { %v4337_v47 = vxor.u32 2147483648, %v4336_v59  ;;  %v4525_v32 = vsub.s32 0, %v13349_v8  ;;  %v4372_v15 = vshrl.u32 %v9028_v18, %v4371_v55  ;;  %v4387_v50 = vor.u32 %v4386_v51, %v4385_v20 }
 0x5dc   :  { %vm4388_vm13 = vcmp.lt.s32.totalorder %v4369_v46, 1  ;;  %vm4389_vm0 = vcmp.lt.s32.totalorder %v4369_v46, 2  ;;  %vm4390_vm14 = vcmp.lt.s32.totalorder %v4369_v46, 3  ;;  %vm4391_vm1 = vcmp.lt.s32.totalorder %v4369_v46, 4 }
 0x5dd   :  { %v4338_v30 = vsel %vm4255_vm15, %v4337_v47, %v4336_v59  ;;  %v8218_v5 = vmin.u32 %v4525_v32, %v13349_v8  ;;  %v4393_v60 = vsel %vm4391_vm1, %v4381_v58, 2102212464  ;;  %v4396_v3 = vsel %vm4388_vm13, %v4375_v23, %v4378_v35 }
 0x5de   :  { %v4341_v13 = vsel %vm13302_vm6, %v13113_v22, %v4338_v30  ;;  %v4397_v27 = vsel %vm4391_vm1, %v4384_v41, 920167782  ;;  %v4392_v62 = vsel %vm4388_vm13, %v4372_v15, %v4375_v23  ;;  %v4400_v2 = vsel %vm4388_vm13, %v4378_v35, %v4381_v58 }
 0x5df   :  { %8923 = vcosq.f32 %v4341_v13  ;;  %v4527_v10 = vclz %v8218_v5  ;;  %v4398_v53 = vsel %vm4390_vm14, %v4381_v58, %v4397_v27  ;;  %v4394_v0 = vsel %vm4390_vm14, %v4378_v35, %v4393_v60 }
 0x5e0   :  { %8925 = vsinq.f32 %v4341_v13  ;;  %v4399_v24 = vsel %vm4389_vm0, %v4396_v3, %v4398_v53  ;;  %v4401_v54 = vsel %vm4391_vm1, %v4387_v50, 1326507024  ;;  %v4566_v12 = vshrl.u32 %v4565_v61, 23 }
 0x5e1   :  { %v8219_v55 = vadd.s32 4294967294, %v4527_v10  ;;  %v4402_v59 = vsel %vm4390_vm14, %v4384_v41, %v4401_v54  ;;  %v13375_v17 = vmul.u32.u64.low %v13355_v26, %v4399_v24  ;;  %v13376_v14 = vmul.u32.u64.high %v13355_v26, %v4399_v24, %v13375_v17 }
 0x5e2   :  { %vm4461_vm2 = vcmp.lt.s32.totalorder %v13119_v40, 0  ;;  %v4403_v37 = vsel %vm4389_vm0, %v4400_v2, %v4402_v59  ;;  %v8221_v47 = vadd.s32 4294967169, %v4566_v12  ;;  %vm4347_vm3 = vcmp.lt.s32.totalorder %v13339_v56, 2 }
 0x5e3   :  { %vm8220_vm15 = vcmp.lt.s32.totalorder %v8219_v55, 0  ;;  %v4515_v32 = vadd.s32 %v13295_v48, %v13293_v19  ;;  %vm4345_vm4 = vweird.f32 %v13113_v22  ;;  %v4395_v58 = vsel %vm4389_vm0, %v4392_v62, %v4394_v0 }
 0x5e4   :  { %v4530_v1 = vsel %vm8220_vm15, 0, %v8219_v55  ;;  %v13387_v41 = vmul.u32.u64.low %v13355_v26, %v4403_v37  ;;  %v13388_v20 = vmul.u32.u64.high %v13355_v26, %v4403_v37, %v13387_v41  ;;  %v4572_v51 = vadd.s32 1, %v8221_v47 }
 0x5e5   :  { %v4531_v23 = vsub.s32 32, %v4530_v1  ;;  %v4535_v35 = vsub.s32 4294967266, %v4530_v1  ;;  %v4532_v30 = vshll.u32 %v13349_v8, %v4530_v1  ;;  %v4414_v61 = vadd.s32 1, %v13376_v14 }
 0x5e6   :  { %vm4348_vm5 = vcmp.eq.s32.totalorder %v13339_v56, 0  ;;  %vm4351_vm6 = vcmp.eq.s32.totalorder %v13339_v56, 2  ;;  %v4545_v19 = vsub.s32 4, %v13337_v57  ;;  %vm4573_vm7 = vcmp.gt.s32.totalorder %v4572_v51, 0 }
 0x5e7   :  { %v4533_v5 = vshrl.u32 %v4515_v32, %v4531_v23  ;;  %v4536_v15 = vadd.s32 127, %v4535_v35  ;;  %vm13397_vm8 = vcmp.le.f32.partialorder %v4459_v39, 0.7853982  ;;  %v4562_v50 = vand.u32 2147483647, %v13343_v7 }
 0x5e8   :  { %v4574_v10 = vsel %vm4573_vm7, %v4572_v51, 0  ;;  %v4411_v27 = vmul.u32 %v13355_v26, %v4395_v58  ;;  %vm4413_vm10 = vc.u32 %v13388_v20, %v13375_v17  ;;  %v1205_v55 = vmul.f32 %v11951_v45, %v12961_v36 }
 0x5e9   :  { %v8924_v48 = vpop.eup %8923  ;;  %v4534_v13 = vor.u32 %v4533_v5, %v4532_v30  ;;  %v4537_v8 = vshll.u32 %v4536_v15, 23  ;;  %v4415_v53 = vsel %vm4413_vm10, %v4414_v61, %v13376_v14  ;;  %v13410_v2 = vmul.f32 %v12106_v42, %v13052_v63 }
 0x5ea   :  { %v8926_v60 = vpop.eup %8925  ;;  %v4352_v3 = vxor.u32 2147483648, %v8924_v48  ;;  %v4546_v26 = vsel %vm4461_vm2, %v4545_v19, %v13337_v57  ;;  %v4416_v24 = vadd.s32 %v4415_v53, %v4411_v27  ;;  %v4576_v54 = vand.u32 31, %v4574_v10 }
 0x5eb   :  { %v4349_v62 = vxor.u32 2147483648, %v8926_v60  ;;  %v4538_v39 = vor.u32 4788187, %v4537_v8  ;;  %v4541_v59 = vcvt.s32.f32 %v4534_v13  ;;  %v4569_v14 = vand.u32 8388607, %v4562_v50 }
 0x5ec   :  { %v4353_v0 = vsel %vm4351_vm6, %v4352_v3, %v8926_v60  ;;  %v4417_v1 = vadd.s32 536870912, %v4416_v24  ;;  %v4575_v37 = vshrl.u32 %v4574_v10, 5  ;;  %v4577_v47 = vsub.s32 32, %v4576_v54 }
 0x5ed   :  { %v4350_v36 = vsel %vm4348_vm5, %v8924_v48, %v4349_v62  ;;  %v4539_v12 = vand.u32 2147483647, %v4538_v39  ;;  %v4579_v23 = vshll.u32 %v9028_v18, %v4576_v54  ;;  %v4582_v35 = vshll.u32 %v9029_v29, %v4576_v54 }
 0x5ee   :  { %v4354_v63 = vsel %vm4347_vm3, %v4350_v36, %v4353_v0  ;;  %v13427_v58 = vshrl.u32 %v4417_v1, 30  ;;  %v4580_v41 = vshrl.u32 %v9029_v29, %v4577_v47  ;;  %v4583_v51 = vshrl.u32 %v9030_v31, %v4577_v47 }
 0x5ef   :  { %v4355_v32 = vsel %vm4345_vm4, nan, %v4354_v63  ;;  %v4542_v57 = vmul.f32 %v4541_v59, %v4539_v12  ;;  %v4585_v56 = vshll.u32 %v9030_v31, %v4576_v54  ;;  %v4586_v5 = vshrl.u32 %v9031_v33, %v4577_v47 }
 0x5f0   :  { %7989 = vst [vmem:[#allocation2 + $0xe0] sm:$0xff] %v4355_v32  ;;  %v4588_v22 = vshll.u32 %v9031_v33, %v4576_v54  ;;  %v4589_v15 = vshrl.u32 %v9032_v43, %v4577_v47  ;;  %v4548_v61 = vsel %vm13397_vm8, 0, %v4546_v26  ;;  %v4419_v19 = vshll.u32 %v13427_v58, 30 }
 0x5f1   :  { %v4543_v30 = vxor.u32 2147483648, %v4542_v57  ;;  %v4570_v48 = vor.u32 8388608, %v4569_v14  ;;  %v4581_v13 = vor.u32 %v4580_v41, %v4579_v23  ;;  %v4584_v10 = vor.u32 %v4583_v51, %v4582_v35 }
 0x5f2   :  { %v4587_v60 = vor.u32 %v4586_v5, %v4585_v56  ;;  %v4590_v3 = vor.u32 %v4589_v15, %v4588_v22  ;;  %v13443_v62 = vsub.s32 %v4416_v24, %v4419_v19  ;;  %v4591_v39 = vshll.u32 %v9032_v43, %v4576_v54 }
 0x5f3   :  { %v4544_v8 = vsel %vm4461_vm2, %v4543_v30, %v4542_v57  ;;  %v4592_v53 = vshrl.u32 %v9033_v52, %v4577_v47  ;;  %v13447_v0 = vand.u32 3, %v4548_v61  ;;  %vm4594_vm9 = vcmp.lt.s32.totalorder %v4575_v37, 1 }
 0x5f4   :  { %v4547_v27 = vsel %vm13397_vm8, %v13119_v40, %v4544_v8  ;;  %v13450_v26 = vadd.f32 %v11957_v44, %v1205_v55  ;;  %v4422_v36 = vsub.s32 0, %v13443_v62  ;;  %vm4597_vm11 = vcmp.lt.s32.totalorder %v4575_v37, 4 }
 0x5f5   :  { %8927 = vcosq.f32 %v4547_v27  ;;  %v4593_v12 = vor.u32 %v4592_v53, %v4591_v39  ;;  %v4578_v46 = vshrl.u32 %v9028_v18, %v4577_v47  ;;  %v4599_v24 = vsel %vm4597_vm11, %v4587_v60, 2102212464 }
 0x5f6   :  { %8929 = vsinq.f32 %v4547_v27  ;;  %v4602_v59 = vsel %vm4594_vm9, %v4581_v13, %v4584_v10  ;;  %v4603_v14 = vsel %vm4597_vm11, %v4590_v3, 920167782  ;;  %v8214_v54 = vmin.u32 %v4422_v36, %v13443_v62 }
 0x5f7   :  { %vm4596_vm12 = vcmp.lt.s32.totalorder %v4575_v37, 3  ;;  %v4606_v63 = vsel %vm4594_vm9, %v4584_v10, %v4587_v60  ;;  %v4610_v1 = vshll.u32 %v4570_v48, 8  ;;  %vm4595_vm13 = vcmp.lt.s32.totalorder %v4575_v37, 2  ;;  %v13471_v48 = vpop.f32.mrb[27].mxu0 }
 0x5f8   :  { %v4598_v32 = vsel %vm4594_vm9, %v4578_v46, %v4581_v13  ;;  %v4604_v57 = vsel %vm4596_vm12, %v4587_v60, %v4603_v14  ;;  %v4607_v55 = vsel %vm4597_vm11, %v4593_v12, 1326507024  ;;  %v4424_v23 = vclz %v8214_v54 }
 0x5f9   :  { %v4600_v35 = vsel %vm4596_vm12, %v4584_v10, %v4599_v24  ;;  %v4605_v41 = vsel %vm4595_vm13, %v4602_v59, %v4604_v57  ;;  %v4608_v51 = vsel %vm4596_vm12, %v4590_v3, %v4607_v55  ;;  %vm4358_vm0 = vcmp.lt.s32.totalorder %v13250_v6, 0 }
 0x5fa   :  { %v4609_v47 = vsel %vm4595_vm13, %v4606_v63, %v4608_v51  ;;  %v13458_v56 = vmul.u32.u64.low %v4610_v1, %v4605_v41  ;;  %v13459_v30 = vmul.u32.u64.high %v4610_v1, %v4605_v41, %v13458_v56  ;;  %vm4551_vm14 = vweird.f32 %v13119_v40 }
 0x5fb   :  { %vm4553_vm1 = vcmp.lt.s32.totalorder %v13447_v0, 2  ;;  %v8215_v5 = vadd.s32 4294967294, %v4424_v23  ;;  %v13464_v22 = vmul.u32.u64.low %v4610_v1, %v4609_v47  ;;  %v13465_v15 = vmul.u32.u64.high %v4610_v1, %v4609_v47, %v13464_v22 }
 0x5fc   :  { %vm4554_vm15 = vcmp.eq.s32.totalorder %v13447_v0, 0  ;;  %vm4557_vm2 = vcmp.eq.s32.totalorder %v13447_v0, 2  ;;  %v4601_v61 = vsel %vm4595_vm13, %v4598_v32, %v4600_v35  ;;  %v5080_v19 = vand.u32 2139095040, %v13450_v26 }
 0x5fd   :  { %v4412_v13 = vadd.s32 %v13375_v17, %v13388_v20  ;;  %vm8216_vm3 = vcmp.lt.s32.totalorder %v8215_v5, 0  ;;  %v4442_v8 = vsub.s32 4, %v13427_v58  ;;  %v13478_v10 = vadd.f32 %v12118_v28, %v13410_v2 }
 0x5fe   :  { %v4427_v3 = vsel %vm8216_vm3, 0, %v8215_v5  ;;  %v4620_v27 = vadd.s32 1, %v13459_v30  ;;  %v5077_v37 = vand.u32 2147483647, %v13450_v26  ;;  %v5081_v39 = vshrl.u32 %v5080_v19, 23 }
 0x5ff   :  { %v8928_v60 = vpop.eup %8927  ;;  %v4428_v12 = vsub.s32 32, %v4427_v3  ;;  %v4432_v46 = vsub.s32 4294967266, %v4427_v3  ;;  %v4617_v24 = vmul.u32 %v4610_v1, %v4601_v61  ;;  %v4429_v20 = vshll.u32 %v13443_v62, %v4427_v3 }
 0x600   :  { %v8930_v53 = vpop.eup %8929  ;;  %v4558_v36 = vxor.u32 2147483648, %v8928_v60  ;;  %vm4619_vm4 = vc.u32 %v13465_v15, %v13458_v56  ;;  %v8241_v2 = vadd.s32 4294967169, %v5081_v39  ;;  %v5084_v1 = vand.u32 8388607, %v5077_v37 }
 0x601   :  { %v4555_v17 = vxor.u32 2147483648, %v8930_v53  ;;  %v4430_v14 = vshrl.u32 %v4412_v13, %v4428_v12  ;;  %v4433_v54 = vadd.s32 127, %v4432_v46  ;;  %v4621_v63 = vsel %vm4619_vm4, %v4620_v27, %v13459_v30  ;;  %v13544_v30 = vpop.f32.mrb[27].mxu1 }
 0x602   :  { %v4559_v59 = vsel %vm4557_vm2, %v4558_v36, %v8930_v53  ;;  %v4622_v57 = vadd.s32 %v4621_v63, %v4617_v24  ;;  %v5087_v55 = vadd.s32 1, %v8241_v2  ;;  %v4443_v41 = vsel %vm4358_vm0, %v4442_v8, %v13427_v58 }
 0x603   :  { %v4556_v32 = vsel %vm4554_vm15, %v8928_v60, %v4555_v17  ;;  %v4431_v23 = vor.u32 %v4430_v14, %v4429_v20  ;;  %v4434_v35 = vshll.u32 %v4433_v54, 23  ;;  %vm13501_vm6 = vcmp.le.f32.partialorder %v4356_v11, 0.7853982 }
 0x604   :  { %v4560_v62 = vsel %vm4553_vm1, %v4556_v32, %v4559_v59  ;;  %v4623_v47 = vadd.s32 536870912, %v4622_v57  ;;  %vm5088_vm5 = vcmp.gt.s32.totalorder %v5087_v55, 0  ;;  %v5286_v22 = vand.u32 2139095040, %v13478_v10 }
 0x605   :  { %v4561_v51 = vsel %vm4551_vm14, nan, %v4560_v62  ;;  %v4435_v0 = vor.u32 4788187, %v4434_v35  ;;  %v5089_v5 = vsel %vm5088_vm5, %v5087_v55, 0  ;;  %v4445_v61 = vsel %vm13501_vm6, 0, %v4443_v41 }
 0x606   :  { %7991 = vst [vmem:[#allocation2 + $0xf0] sm:$0xff] %v4561_v51  ;;  %v13508_v58 = vshrl.u32 %v4623_v47, 30  ;;  %v5085_v40 = vor.u32 8388608, %v5084_v1  ;;  %v5091_v19 = vand.u32 31, %v5089_v5  ;;  %v4438_v8 = vcvt.s32.f32 %v4431_v23 }
 0x607   :  { %v4436_v13 = vand.u32 2147483647, %v4435_v0  ;;  %v1206_v11 = vmul.f32 %v12171_v9, %v13126_v4  ;;  %v13513_v39 = vand.u32 3, %v4445_v61  ;;  %v5283_v53 = vand.u32 2147483647, %v13478_v10 }
 0x608   :  { %v4625_v60 = vshll.u32 %v13508_v58, 30  ;;  %v5092_v3 = vsub.s32 32, %v5091_v19  ;;  %v5287_v36 = vshrl.u32 %v5286_v22, 23  ;;  %v13518_v46 = vshrl.u32 %v5089_v5, 5 }
 0x609   :  { %v4439_v27 = vmul.f32 %v4438_v8, %v4436_v13  ;;  %v13521_v17 = vshll.u32 %v5085_v40, 8  ;;  %v5094_v2 = vshll.u32 %v9028_v18, %v5091_v19  ;;  %v5097_v54 = vshll.u32 %v9029_v29, %v5091_v19 }
 0x60a   :  { %v13516_v12 = vsub.s32 %v4622_v57, %v4625_v60  ;;  %v5095_v24 = vshrl.u32 %v9029_v29, %v5092_v3  ;;  %v5098_v59 = vshrl.u32 %v9030_v31, %v5092_v3  ;;  %v5101_v4 = vshrl.u32 %v9031_v33, %v5092_v3 }
 0x60b   :  { %v4440_v20 = vxor.u32 2147483648, %v4439_v27  ;;  %v5100_v63 = vshll.u32 %v9030_v31, %v5091_v19  ;;  %v5104_v32 = vshrl.u32 %v9032_v43, %v5092_v3  ;;  %v5103_v55 = vshll.u32 %v9031_v33, %v5091_v19 }
 0x60c   :  { %v4628_v14 = vsub.s32 0, %v13516_v12  ;;  %v5096_v1 = vor.u32 %v5095_v24, %v5094_v2  ;;  %v8249_v62 = vadd.s32 4294967169, %v5287_v36  ;;  %v5099_v41 = vor.u32 %v5098_v59, %v5097_v54 }
 0x60d   :  { %v4441_v57 = vsel %vm4358_vm0, %v4440_v20, %v4439_v27  ;;  %v5102_v51 = vor.u32 %v5101_v4, %v5100_v63  ;;  %v5105_v47 = vor.u32 %v5104_v32, %v5103_v55  ;;  %v5106_v0 = vshll.u32 %v9032_v43, %v5091_v19 }
 0x60e   :  { %v4444_v23 = vsel %vm13501_vm6, %v13250_v6, %v4441_v57  ;;  %v8222_v35 = vmin.u32 %v4628_v14, %v13516_v12  ;;  %v5107_v5 = vshrl.u32 %v9033_v52, %v5092_v3  ;;  %v5093_v61 = vshrl.u32 %v9028_v18, %v5092_v3 }
 0x60f   :  { %8931 = vcosq.f32 %v4444_v23  ;;  %vm5109_vm7 = vcmp.lt.s32.totalorder %v13518_v46, 1  ;;  %vm5110_vm8 = vcmp.lt.s32.totalorder %v13518_v46, 2  ;;  %vm5111_vm10 = vcmp.lt.s32.totalorder %v13518_v46, 3 }
 0x610   :  { %8933 = vsinq.f32 %v4444_v23  ;;  %v4630_v22 = vclz %v8222_v35  ;;  %v5108_v40 = vor.u32 %v5107_v5, %v5106_v0  ;;  %vm5112_vm9 = vcmp.lt.s32.totalorder %v13518_v46, 4 }
 0x611   :  { %v5114_v8 = vsel %vm5112_vm9, %v5102_v51, 2102212464  ;;  %v5117_v19 = vsel %vm5109_vm7, %v5096_v1, %v5099_v41  ;;  %v5118_v60 = vsel %vm5112_vm9, %v5105_v47, 920167782  ;;  %vm4564_vm11 = vcmp.lt.s32.totalorder %v13343_v7, 0 }
 0x612   :  { %v8223_v13 = vadd.s32 4294967294, %v4630_v22  ;;  %v5113_v27 = vsel %vm5109_vm7, %v5093_v61, %v5096_v1  ;;  %v5119_v36 = vsel %vm5111_vm10, %v5102_v51, %v5118_v60  ;;  %v5121_v3 = vsel %vm5109_vm7, %v5099_v41, %v5102_v51 }
 0x613   :  { %v5122_v24 = vsel %vm5112_vm9, %v5108_v40, 1326507024  ;;  %v5115_v20 = vsel %vm5111_vm10, %v5099_v41, %v5114_v8  ;;  %v5120_v2 = vsel %vm5110_vm8, %v5117_v19, %v5119_v36  ;;  %vm4448_vm13 = vweird.f32 %v13250_v6 }
 0x614   :  { %vm8224_vm12 = vcmp.lt.s32.totalorder %v8223_v13, 0  ;;  %v5123_v59 = vsel %vm5111_vm10, %v5105_v47, %v5122_v24  ;;  %v13552_v54 = vmul.u32.u64.low %v13521_v17, %v5120_v2  ;;  %v13553_v63 = vmul.u32.u64.high %v13521_v17, %v5120_v2, %v13552_v54 }
 0x615   :  { %v4633_v4 = vsel %vm8224_vm12, 0, %v8223_v13  ;;  %v5124_v14 = vsel %vm5110_vm8, %v5121_v3, %v5123_v59  ;;  %vm13559_vm0 = vcmp.le.f32.partialorder %v4562_v50, 0.7853982  ;;  %v4618_v57 = vadd.s32 %v13458_v56, %v13465_v15 }
 0x616   :  { %v4634_v1 = vsub.s32 32, %v4633_v4  ;;  %v4638_v55 = vsub.s32 4294967266, %v4633_v4  ;;  %v13566_v23 = vadd.f32 %v12201_v38, %v1206_v11  ;;  %v4648_v35 = vsub.s32 4, %v13508_v58 }
 0x617   :  { %v13570_v41 = vmul.u32.u64.low %v13521_v17, %v5124_v14  ;;  %v13571_v51 = vmul.u32.u64.high %v13521_v17, %v5124_v14, %v13570_v41  ;;  %v5293_v47 = vadd.s32 1, %v8249_v62  ;;  %v4635_v50 = vshll.u32 %v13516_v12, %v4633_v4 }
 0x618   :  { %v4636_v0 = vshrl.u32 %v4618_v57, %v4634_v1  ;;  %v4639_v5 = vadd.s32 127, %v4638_v55  ;;  %v5116_v22 = vsel %vm5110_vm8, %v5113_v27, %v5115_v20  ;;  %vm4451_vm14 = vcmp.eq.s32.totalorder %v13513_v39, 0 }
 0x619   :  { %v8932_v56 = vpop.eup %8931  ;;  %v5135_v15 = vadd.s32 1, %v13553_v63  ;;  %v5290_v11 = vand.u32 8388607, %v5283_v53  ;;  %vm5294_vm1 = vcmp.gt.s32.totalorder %v5293_v47, 0  ;;  %vm4454_vm15 = vcmp.eq.s32.totalorder %v13513_v39, 2 }
 0x61a   :  { %v8934_v61 = vpop.eup %8933  ;;  %v4455_v40 = vxor.u32 2147483648, %v8932_v56  ;;  %v4637_v13 = vor.u32 %v4636_v0, %v4635_v50  ;;  %v4640_v62 = vshll.u32 %v4639_v5, 23  ;;  %v5295_v8 = vsel %vm5294_vm1, %v5293_v47, 0 }
 0x61b   :  { %v4452_v12 = vxor.u32 2147483648, %v8934_v61  ;;  %v5132_v46 = vmul.u32 %v13521_v17, %v5116_v22  ;;  %vm5134_vm2 = vc.u32 %v13571_v51, %v13552_v54  ;;  %v4649_v27 = vsel %vm4564_vm11, %v4648_v35, %v13508_v58 }
 0x61c   :  { %v4456_v19 = vsel %vm4454_vm15, %v4455_v40, %v8934_v61  ;;  %v4641_v60 = vor.u32 4788187, %v4640_v62  ;;  %v5136_v36 = vsel %vm5134_vm2, %v5135_v15, %v13553_v63  ;;  %vm4450_vm3 = vcmp.lt.s32.totalorder %v13513_v39, 2 }
 0x61d   :  { %v4453_v3 = vsel %vm4451_vm14, %v8932_v56, %v4452_v12  ;;  %v5137_v24 = vadd.s32 %v5136_v36, %v5132_v46  ;;  %v5297_v20 = vand.u32 31, %v5295_v8  ;;  %v4644_v59 = vcvt.s32.f32 %v4637_v13 }
 0x61e   :  { %v4457_v2 = vsel %vm4450_vm3, %v4453_v3, %v4456_v19  ;;  %v4642_v17 = vand.u32 2147483647, %v4641_v60  ;;  %v5291_v4 = vor.u32 8388608, %v5290_v11  ;;  %v4651_v57 = vsel %vm13559_vm0, 0, %v4649_v27 }
 0x61f   :  { %v4458_v14 = vsel %vm4448_vm13, nan, %v4457_v2  ;;  %v5138_v58 = vadd.s32 536870912, %v5137_v24  ;;  %v5298_v1 = vsub.s32 32, %v5297_v20  ;;  %v5296_v55 = vshrl.u32 %v5295_v8, 5 }
 0x620   :  { %7990 = vst [vmem:[#allocation2 + $0xe8] sm:$0xff] %v4458_v14  ;;  %v4645_v63 = vmul.f32 %v4644_v59, %v4642_v17  ;;  %v5300_v39 = vshll.u32 %v9028_v18, %v5297_v20  ;;  %v5303_v35 = vshll.u32 %v9029_v29, %v5297_v20  ;;  %v5306_v6 = vshll.u32 %v9030_v31, %v5297_v20 }
 0x621   :  { %v13597_v41 = vshrl.u32 %v5138_v58, 30  ;;  %v5301_v47 = vshrl.u32 %v9029_v29, %v5298_v1  ;;  %v5304_v50 = vshrl.u32 %v9030_v31, %v5298_v1  ;;  %v5307_v5 = vshrl.u32 %v9031_v33, %v5298_v1 }
 0x622   :  { %v4646_v0 = vxor.u32 2147483648, %v4645_v63  ;;  %v5309_v22 = vshll.u32 %v9031_v33, %v5297_v20  ;;  %v5310_v56 = vshrl.u32 %v9032_v43, %v5298_v1  ;;  %v5312_v40 = vshll.u32 %v9032_v43, %v5297_v20 }
 0x623   :  { %v5140_v15 = vshll.u32 %v13597_v41, 30  ;;  %v5302_v11 = vor.u32 %v5301_v47, %v5300_v39  ;;  %v5305_v61 = vor.u32 %v5304_v50, %v5303_v35  ;;  %v5308_v62 = vor.u32 %v5307_v5, %v5306_v6 }
 0x624   :  { %v4647_v13 = vsel %vm4564_vm11, %v4646_v0, %v4645_v63  ;;  %v5311_v8 = vor.u32 %v5310_v56, %v5309_v22  ;;  %v5313_v12 = vshrl.u32 %v9033_v52, %v5298_v1  ;;  %v13613_v19 = vand.u32 3, %v4651_v57 }
 0x625   :  { %v4650_v46 = vsel %vm13559_vm0, %v13343_v7, %v4647_v13  ;;  %v13615_v60 = vsub.s32 %v5137_v24, %v5140_v15  ;;  %v5331_v36 = vshll.u32 %v5291_v4, 8  ;;  %v5183_v3 = vand.u32 2139095040, %v13566_v23 }
 0x626   :  { %8935 = vcosq.f32 %v4650_v46  ;;  %v5314_v27 = vor.u32 %v5313_v12, %v5312_v40  ;;  %vm5315_vm4 = vcmp.lt.s32.totalorder %v5296_v55, 1  ;;  %vm5318_vm5 = vcmp.lt.s32.totalorder %v5296_v55, 4 }
 0x627   :  { %8937 = vsinq.f32 %v4650_v46  ;;  %v5143_v20 = vsub.s32 0, %v13615_v60  ;;  %v5299_v2 = vshrl.u32 %v9028_v18, %v5298_v1  ;;  %v5320_v17 = vsel %vm5318_vm5, %v5308_v62, 2102212464 }
 0x628   :  { %v5323_v59 = vsel %vm5315_vm4, %v5302_v11, %v5305_v61  ;;  %v5324_v32 = vsel %vm5318_vm5, %v5311_v8, 920167782  ;;  %vm5316_vm6 = vcmp.lt.s32.totalorder %v5296_v55, 2  ;;  %vm5317_vm7 = vcmp.lt.s32.totalorder %v5296_v55, 3 }
 0x629   :  { %v8242_v14 = vmin.u32 %v5143_v20, %v13615_v60  ;;  %v5327_v24 = vsel %vm5315_vm4, %v5305_v61, %v5308_v62  ;;  %v5319_v57 = vsel %vm5315_vm4, %v5299_v2, %v5302_v11  ;;  %v5325_v58 = vsel %vm5317_vm7, %v5308_v62, %v5324_v32 }
 0x62a   :  { %v5328_v4 = vsel %vm5318_vm5, %v5314_v27, 1326507024  ;;  %v5184_v63 = vshrl.u32 %v5183_v3, 23  ;;  %v5321_v35 = vsel %vm5317_vm7, %v5305_v61, %v5320_v17  ;;  %v5326_v47 = vsel %vm5316_vm6, %v5323_v59, %v5325_v58 }
 0x62b   :  { %v5145_v39 = vclz %v8242_v14  ;;  %v5329_v50 = vsel %vm5317_vm7, %v5311_v8, %v5328_v4  ;;  %v13623_v1 = vmul.u32.u64.low %v5331_v36, %v5326_v47  ;;  %v13624_v0 = vmul.u32.u64.high %v5331_v36, %v5326_v47, %v13623_v1 }
 0x62c   :  { %v5330_v6 = vsel %vm5316_vm6, %v5327_v24, %v5329_v50  ;;  %v8245_v5 = vadd.s32 4294967169, %v5184_v63  ;;  %vm4654_vm8 = vweird.f32 %v13343_v7  ;;  %vm5079_vm10 = vcmp.lt.s32.totalorder %v13450_v26, 0 }
 0x62d   :  { %v8243_v22 = vadd.s32 4294967294, %v5145_v39  ;;  %v13629_v56 = vmul.u32.u64.low %v5331_v36, %v5330_v6  ;;  %v13630_v15 = vmul.u32.u64.high %v5331_v36, %v5330_v6, %v13629_v56  ;;  %vm4656_vm9 = vcmp.lt.s32.totalorder %v13613_v19, 2  ;;  %v13708_v39 = vpop.f32.mrb[28].mxu1 }
 0x62e   :  { %v5322_v11 = vsel %vm5316_vm6, %v5319_v57, %v5321_v35  ;;  %v5180_v61 = vand.u32 2147483647, %v13566_v23  ;;  %v5190_v40 = vadd.s32 1, %v8245_v5  ;;  %vm4657_vm11 = vcmp.eq.s32.totalorder %v13613_v19, 0  ;;  %v13647_v57 = vpop.f32.mrb[28].mxu0 }
 0x62f   :  { %vm4660_vm12 = vcmp.eq.s32.totalorder %v13613_v19, 2  ;;  %v5133_v13 = vadd.s32 %v13552_v54, %v13571_v51  ;;  %vm8244_vm13 = vcmp.lt.s32.totalorder %v8243_v22, 0  ;;  %v5163_v12 = vsub.s32 4, %v13597_v41 }
 0x630   :  { %v8936_v62 = vpop.eup %8935  ;;  %v5148_v8 = vsel %vm8244_vm13, 0, %v8243_v22  ;;  %v5341_v46 = vadd.s32 1, %v13624_v0  ;;  %vm5191_vm0 = vcmp.gt.s32.totalorder %v5190_v40, 0  ;;  %v5338_v2 = vmul.u32 %v5331_v36, %v5322_v11 }
 0x631   :  { %v8938_v55 = vpop.eup %8937  ;;  %v4661_v27 = vxor.u32 2147483648, %v8936_v62  ;;  %v5149_v3 = vsub.s32 32, %v5148_v8  ;;  %v5153_v20 = vsub.s32 4294967266, %v5148_v8  ;;  %v5150_v59 = vshll.u32 %v13615_v60, %v5148_v8 }
 0x632   :  { %v4658_v17 = vxor.u32 2147483648, %v8938_v55  ;;  %vm5340_vm14 = vc.u32 %v13630_v15, %v13623_v1  ;;  %v5192_v54 = vsel %vm5191_vm0, %v5190_v40, 0  ;;  %v13654_v60 = vsel %vm5079_vm10, %v5163_v12, %v13597_v41 }
 0x633   :  { %v4662_v51 = vsel %vm4660_vm12, %v4661_v27, %v8938_v55  ;;  %v5151_v32 = vshrl.u32 %v5133_v13, %v5149_v3  ;;  %v5154_v14 = vadd.s32 127, %v5153_v20  ;;  %v5342_v24 = vsel %vm5340_vm14, %v5341_v46, %v13624_v0 }
 0x634   :  { %v4659_v58 = vsel %vm4657_vm11, %v8936_v62, %v4658_v17  ;;  %v5343_v36 = vadd.s32 %v5342_v24, %v5338_v2  ;;  %v5194_v4 = vand.u32 31, %v5192_v54  ;;  %vm13660_vm1 = vcmp.le.f32.partialorder %v5077_v37, 0.7853982 }
 0x635   :  { %v4663_v63 = vsel %vm4656_vm9, %v4659_v58, %v4662_v51  ;;  %v5152_v35 = vor.u32 %v5151_v32, %v5150_v59  ;;  %v5155_v47 = vshll.u32 %v5154_v14, 23  ;;  %v5187_v41 = vand.u32 8388607, %v5180_v61 }
 0x636   :  { %v4664_v50 = vsel %vm4654_vm8, nan, %v4663_v63  ;;  %v5344_v6 = vadd.s32 536870912, %v5343_v36  ;;  %v5195_v0 = vsub.s32 32, %v5194_v4  ;;  %v5166_v19 = vsel %vm13660_vm1, 0, %v13654_v60 }
 0x637   :  { %7992 = vst [vmem:[#allocation2 + $0xf8] sm:$0xff] %v4664_v50  ;;  %v5156_v5 = vor.u32 4788187, %v5155_v47  ;;  %v1208_v37 = vmul.f32 %v12282_v21, %v13208_v34  ;;  %v5197_v56 = vshll.u32 %v9028_v18, %v5194_v4  ;;  %v5159_v13 = vcvt.s32.f32 %v5152_v35 }
 0x638   :  { %v13673_v22 = vshrl.u32 %v5344_v6, 30  ;;  %v5198_v7 = vshrl.u32 %v9029_v29, %v5195_v0  ;;  %v5201_v11 = vshrl.u32 %v9030_v31, %v5195_v0  ;;  %v5204_v62 = vshrl.u32 %v9031_v33, %v5195_v0 }
 0x639   :  { %v5157_v40 = vand.u32 2147483647, %v5156_v5  ;;  %v5207_v8 = vshrl.u32 %v9032_v43, %v5195_v0  ;;  %v5188_v46 = vor.u32 8388608, %v5187_v41  ;;  %v5200_v55 = vshll.u32 %v9029_v29, %v5194_v4 }
 0x63a   :  { %v5346_v12 = vshll.u32 %v13673_v22, 30  ;;  %v5203_v34 = vshll.u32 %v9030_v31, %v5194_v4  ;;  %v5193_v3 = vshrl.u32 %v5192_v54, 5  ;;  %v5199_v20 = vor.u32 %v5198_v7, %v5197_v56 }
 0x63b   :  { %v5160_v27 = vmul.f32 %v5159_v13, %v5157_v40  ;;  %v5206_v2 = vshll.u32 %v9031_v33, %v5194_v4  ;;  %v5202_v59 = vor.u32 %v5201_v11, %v5200_v55  ;;  %v5210_v32 = vshrl.u32 %v9033_v52, %v5195_v0 }
 0x63c   :  { %v13684_v17 = vsub.s32 %v5343_v36, %v5346_v12  ;;  %v5205_v51 = vor.u32 %v5204_v62, %v5203_v34  ;;  %v5209_v58 = vshll.u32 %v9032_v43, %v5194_v4  ;;  %v13689_v60 = vadd.f32 %v12330_v16, %v1208_v37 }
 0x63d   :  { %v5161_v14 = vxor.u32 2147483648, %v5160_v27  ;;  %v5208_v24 = vor.u32 %v5207_v8, %v5206_v2  ;;  %v5196_v54 = vshrl.u32 %v9028_v18, %v5195_v0  ;;  %v13693_v35 = vshll.u32 %v5188_v46, 8 }
 0x63e   :  { %v5349_v63 = vsub.s32 0, %v13684_v17  ;;  %v1213_v36 = vmul.f32 %v11951_v45, %v13313_v25  ;;  %v5211_v50 = vor.u32 %v5210_v32, %v5209_v58  ;;  %vm5212_vm15 = vcmp.lt.s32.totalorder %v5193_v3, 1 }
 0x63f   :  { %v5162_v47 = vsel %vm5079_vm10, %v5161_v14, %v5160_v27  ;;  %vm5215_vm2 = vcmp.lt.s32.totalorder %v5193_v3, 4  ;;  %v5220_v0 = vsel %vm5212_vm15, %v5199_v20, %v5202_v59  ;;  %vm5213_vm3 = vcmp.lt.s32.totalorder %v5193_v3, 2 }
 0x640   :  { %v5165_v4 = vsel %vm13660_vm1, %v13450_v26, %v5162_v47  ;;  %v8250_v6 = vmin.u32 %v5349_v63, %v13684_v17  ;;  %v5217_v41 = vsel %vm5215_vm2, %v5205_v51, 2102212464  ;;  %vm5214_vm4 = vcmp.lt.s32.totalorder %v5193_v3, 3 }
 0x641   :  { %8939 = vcosq.f32 %v5165_v4  ;;  %v5221_v25 = vsel %vm5215_vm2, %v5208_v24, 920167782  ;;  %vm5285_vm5 = vcmp.lt.s32.totalorder %v13478_v10, 0  ;;  %v5216_v37 = vsel %vm5212_vm15, %v5196_v54, %v5199_v20 }
 0x642   :  { %8941 = vsinq.f32 %v5165_v4  ;;  %v5351_v5 = vclz %v8250_v6  ;;  %v5222_v56 = vsel %vm5214_vm4, %v5205_v51, %v5221_v25  ;;  %v5218_v7 = vsel %vm5214_vm4, %v5202_v59, %v5217_v41 }
 0x643   :  { %v5223_v11 = vsel %vm5213_vm3, %v5220_v0, %v5222_v56  ;;  %v5224_v40 = vsel %vm5212_vm15, %v5202_v59, %v5205_v51  ;;  %v5225_v13 = vsel %vm5215_vm2, %v5211_v50, 1326507024  ;;  %v5170_v55 = vand.u32 3, %v5166_v19 }
 0x644   :  { %v8251_v62 = vadd.s32 4294967294, %v5351_v5  ;;  %v5226_v8 = vsel %vm5214_vm4, %v5208_v24, %v5225_v13  ;;  %v13714_v12 = vmul.u32.u64.low %v13693_v35, %v5223_v11  ;;  %v13715_v46 = vmul.u32.u64.high %v13693_v35, %v5223_v11, %v13714_v12 }
 0x645   :  { %vm13720_vm6 = vcmp.le.f32.partialorder %v5283_v53, 0.7853982  ;;  %v5227_v27 = vsel %vm5213_vm3, %v5224_v40, %v5226_v8  ;;  %v5389_v20 = vand.u32 2139095040, %v13689_v60  ;;  %v5219_v2 = vsel %vm5213_vm3, %v5216_v37, %v5218_v7 }
 0x646   :  { %vm8252_vm7 = vcmp.lt.s32.totalorder %v8251_v62, 0  ;;  %v13728_v59 = vmul.u32.u64.low %v13693_v35, %v5227_v27  ;;  %v13729_v51 = vmul.u32.u64.high %v13693_v35, %v5227_v27, %v13728_v59  ;;  %v5369_v19 = vsub.s32 4, %v13673_v22 }
 0x647   :  { %v5354_v32 = vsel %vm8252_vm7, 0, %v8251_v62  ;;  %v5390_v14 = vshrl.u32 %v5389_v20, 23  ;;  %v13733_v53 = vadd.f32 %v11957_v44, %v1213_v36  ;;  %vm5169_vm8 = vweird.f32 %v13450_v26 }
 0x648   :  { %v5339_v24 = vadd.s32 %v13623_v1, %v13630_v15  ;;  %v5355_v58 = vsub.s32 32, %v5354_v32  ;;  %v5359_v63 = vsub.s32 4294967266, %v5354_v32  ;;  %v5238_v3 = vadd.s32 1, %v13715_v46 }
 0x649   :  { %vm5171_vm10 = vcmp.lt.s32.totalorder %v5170_v55, 2  ;;  %v5235_v54 = vmul.u32 %v13693_v35, %v5219_v2  ;;  %v5386_v47 = vand.u32 2147483647, %v13689_v60  ;;  %v8253_v50 = vadd.s32 4294967169, %v5390_v14 }
 0x64a   :  { %v5356_v4 = vshll.u32 %v13684_v17, %v5354_v32  ;;  %v5357_v6 = vshrl.u32 %v5339_v24, %v5355_v58  ;;  %v5360_v36 = vadd.s32 127, %v5359_v63  ;;  %vm5237_vm9 = vc.u32 %v13729_v51, %v13714_v12 }
 0x64b   :  { %v8940_v41 = vpop.eup %8939  ;;  %v5370_v1 = vsel %vm5285_vm5, %v5369_v19, %v13673_v22  ;;  %v5239_v15 = vsel %vm5237_vm9, %v5238_v3, %v13715_v46  ;;  %v5396_v0 = vadd.s32 1, %v8253_v50  ;;  %v5904_v35 = vand.u32 2139095040, %v13733_v53 }
 0x64c   :  { %v8942_v25 = vpop.eup %8941  ;;  %v5176_v5 = vxor.u32 2147483648, %v8940_v41  ;;  %v5358_v37 = vor.u32 %v5357_v6, %v5356_v4  ;;  %v5361_v56 = vshll.u32 %v5360_v36, 23  ;;  %v5240_v17 = vadd.s32 %v5239_v15, %v5235_v54 }
 0x64d   :  { %vm5172_vm11 = vcmp.eq.s32.totalorder %v5170_v55, 0  ;;  %v5173_v7 = vxor.u32 2147483648, %v8942_v25  ;;  %vm5175_vm12 = vcmp.eq.s32.totalorder %v5170_v55, 2  ;;  %vm5397_vm13 = vcmp.gt.s32.totalorder %v5396_v0, 0 }
 0x64e   :  { %v5177_v11 = vsel %vm5175_vm12, %v5176_v5, %v8942_v25  ;;  %v5362_v40 = vor.u32 4788187, %v5361_v56  ;;  %v5372_v13 = vsel %vm13720_vm6, 0, %v5370_v1  ;;  %v5241_v22 = vadd.s32 536870912, %v5240_v17 }
 0x64f   :  { %v5174_v62 = vsel %vm5172_vm11, %v8940_v41, %v5173_v7  ;;  %v5393_v8 = vand.u32 8388607, %v5386_v47  ;;  %v5398_v46 = vsel %vm5397_vm13, %v5396_v0, 0  ;;  %v5905_v27 = vshrl.u32 %v5904_v35, 23 }
 0x650   :  { %v5178_v20 = vsel %vm5171_vm10, %v5174_v62, %v5177_v11  ;;  %v5363_v2 = vand.u32 2147483647, %v5362_v40  ;;  %v5365_v59 = vcvt.s32.f32 %v5358_v37  ;;  %v13754_v32 = vshrl.u32 %v5241_v22, 30 }
 0x651   :  { %v5179_v19 = vsel %vm5169_vm8, nan, %v5178_v20  ;;  %v5400_v14 = vand.u32 31, %v5398_v46  ;;  %v13761_v63 = vmul.f32 %v12106_v42, %v13368_v49  ;;  %v13763_v3 = vand.u32 3, %v5372_v13 }
 0x652   :  { %7997 = vst [vmem:[#allocation2 + $0x120] sm:$0xff] %v5179_v19  ;;  %v5366_v24 = vmul.f32 %v5365_v59, %v5363_v2  ;;  %v5243_v58 = vshll.u32 %v13754_v32, 30  ;;  %v5394_v55 = vor.u32 8388608, %v5393_v8  ;;  %v8273_v50 = vadd.s32 4294967169, %v5905_v27 }
 0x653   :  { %v5401_v54 = vsub.s32 32, %v5400_v14  ;;  %v5399_v36 = vshrl.u32 %v5398_v46, 5  ;;  %v5403_v26 = vshll.u32 %v9028_v18, %v5400_v14  ;;  %v5406_v1 = vshll.u32 %v9029_v29, %v5400_v14 }
 0x654   :  { %v5367_v4 = vxor.u32 2147483648, %v5366_v24  ;;  %v13765_v6 = vsub.s32 %v5240_v17, %v5243_v58  ;;  %v5409_v49 = vshll.u32 %v9030_v31, %v5400_v14  ;;  %v5412_v5 = vshll.u32 %v9031_v33, %v5400_v14  ;;  %v13788_v58 = vpop.f32.mrb[29].mxu0 }
 0x655   :  { %v5404_v41 = vshrl.u32 %v9029_v29, %v5401_v54  ;;  %v5407_v15 = vshrl.u32 %v9030_v31, %v5401_v54  ;;  %v5410_v25 = vshrl.u32 %v9031_v33, %v5401_v54  ;;  %v5413_v7 = vshrl.u32 %v9032_v43, %v5401_v54 }
 0x656   :  { %v5368_v0 = vsel %vm5285_vm5, %v5367_v4, %v5366_v24  ;;  %v5246_v35 = vsub.s32 0, %v13765_v6  ;;  %v13782_v40 = vshll.u32 %v5394_v55, 8  ;;  %v5911_v13 = vadd.s32 1, %v8273_v50 }
 0x657   :  { %v5371_v37 = vsel %vm13720_vm6, %v13478_v10, %v5368_v0  ;;  %v5405_v56 = vor.u32 %v5404_v41, %v5403_v26  ;;  %v5408_v17 = vor.u32 %v5407_v15, %v5406_v1  ;;  %v5411_v22 = vor.u32 %v5410_v25, %v5409_v49 }
 0x658   :  { %8943 = vcosq.f32 %v5371_v37  ;;  %v8246_v11 = vmin.u32 %v5246_v35, %v13765_v6  ;;  %v5414_v62 = vor.u32 %v5413_v7, %v5412_v5  ;;  %vm5418_vm0 = vcmp.lt.s32.totalorder %v5399_v36, 1 }
 0x659   :  { %8945 = vsinq.f32 %v5371_v37  ;;  %v5402_v46 = vshrl.u32 %v9028_v18, %v5401_v54  ;;  %v5415_v34 = vshll.u32 %v9032_v43, %v5400_v14  ;;  %v5416_v27 = vshrl.u32 %v9033_v52, %v5401_v54 }
 0x65a   :  { %v5248_v8 = vclz %v8246_v11  ;;  %vm5419_vm14 = vcmp.lt.s32.totalorder %v5399_v36, 2  ;;  %vm5420_vm1 = vcmp.lt.s32.totalorder %v5399_v36, 3  ;;  %vm5421_vm15 = vcmp.lt.s32.totalorder %v5399_v36, 4 }
 0x65b   :  { %v5426_v20 = vsel %vm5418_vm0, %v5405_v56, %v5408_v17  ;;  %v5417_v59 = vor.u32 %v5416_v27, %v5415_v34  ;;  %v5423_v19 = vsel %vm5421_vm15, %v5411_v22, 2102212464  ;;  %v5427_v24 = vsel %vm5421_vm15, %v5414_v62, 920167782 }
 0x65c   :  { %v8247_v2 = vadd.s32 4294967294, %v5248_v8  ;;  %vm5378_vm2 = vcmp.eq.s32.totalorder %v13763_v3, 0  ;;  %v5422_v55 = vsel %vm5418_vm0, %v5402_v46, %v5405_v56  ;;  %v5424_v50 = vsel %vm5420_vm1, %v5408_v17, %v5423_v19 }
 0x65d   :  { %v5428_v14 = vsel %vm5420_vm1, %v5411_v22, %v5427_v24  ;;  %v5430_v54 = vsel %vm5418_vm0, %v5408_v17, %v5411_v22  ;;  %vm5182_vm3 = vcmp.lt.s32.totalorder %v13566_v23, 0  ;;  %v5431_v26 = vsel %vm5421_vm15, %v5417_v59, 1326507024 }
 0x65e   :  { %vm8248_vm4 = vcmp.lt.s32.totalorder %v8247_v2, 0  ;;  %v5429_v4 = vsel %vm5419_vm14, %v5426_v20, %v5428_v14  ;;  %vm5912_vm5 = vcmp.gt.s32.totalorder %v5911_v13, 0  ;;  %vm5375_vm6 = vweird.f32 %v13478_v10 }
 0x65f   :  { %v5251_v41 = vsel %vm8248_vm4, 0, %v8247_v2  ;;  %v5432_v1 = vsel %vm5420_vm1, %v5414_v62, %v5431_v26  ;;  %v13800_v15 = vmul.u32.u64.low %v13782_v40, %v5429_v4  ;;  %v13801_v49 = vmul.u32.u64.high %v13782_v40, %v5429_v4, %v13800_v15 }
 0x660   :  { %v5236_v0 = vadd.s32 %v13714_v12, %v13729_v51  ;;  %v5252_v35 = vsub.s32 32, %v5251_v41  ;;  %v5256_v25 = vsub.s32 4294967266, %v5251_v41  ;;  %v5433_v5 = vsel %vm5419_vm14, %v5430_v54, %v5432_v1 }
 0x661   :  { %v5425_v37 = vsel %vm5419_vm14, %v5422_v55, %v5424_v50  ;;  %v13809_v56 = vmul.u32.u64.low %v13782_v40, %v5433_v5  ;;  %v13810_v17 = vmul.u32.u64.high %v13782_v40, %v5433_v5, %v13809_v56  ;;  %v5913_v7 = vsel %vm5912_vm5, %v5911_v13, 0 }
 0x662   :  { %v8944_v11 = vpop.eup %8943  ;;  %v5253_v22 = vshll.u32 %v13765_v6, %v5251_v41  ;;  %v5254_v62 = vshrl.u32 %v5236_v0, %v5252_v35  ;;  %v5257_v8 = vadd.s32 127, %v5256_v25  ;;  %v5915_v46 = vand.u32 31, %v5913_v7 }
 0x663   :  { %v8946_v34 = vpop.eup %8945  ;;  %v5382_v27 = vxor.u32 2147483648, %v8944_v11  ;;  %v5266_v12 = vsub.s32 4, %v13754_v32  ;;  %v5444_v51 = vadd.s32 1, %v13801_v49  ;;  %v5901_v36 = vand.u32 2147483647, %v13733_v53 }
 0x664   :  { %v5379_v20 = vxor.u32 2147483648, %v8946_v34  ;;  %vm5381_vm7 = vcmp.eq.s32.totalorder %v13763_v3, 2  ;;  %v5255_v2 = vor.u32 %v5254_v62, %v5253_v22  ;;  %v5258_v59 = vshll.u32 %v5257_v8, 23 }
 0x665   :  { %v5383_v13 = vsel %vm5381_vm7, %v5382_v27, %v8946_v34  ;;  %v5441_v19 = vmul.u32 %v13782_v40, %v5425_v37  ;;  %vm5443_vm8 = vc.u32 %v13810_v17, %v13800_v15  ;;  %v5916_v6 = vsub.s32 32, %v5915_v46 }
 0x666   :  { %vm5377_vm10 = vcmp.lt.s32.totalorder %v13763_v3, 2  ;;  %v5380_v24 = vsel %vm5378_vm2, %v8944_v11, %v5379_v20  ;;  %v5259_v55 = vor.u32 4788187, %v5258_v59  ;;  %v5445_v50 = vsel %vm5443_vm8, %v5444_v51, %v13801_v49 }
 0x667   :  { %v5384_v14 = vsel %vm5377_vm10, %v5380_v24, %v5383_v13  ;;  %v5267_v54 = vsel %vm5182_vm3, %v5266_v12, %v13754_v32  ;;  %v5446_v4 = vadd.s32 %v5445_v50, %v5441_v19  ;;  %v5908_v40 = vand.u32 8388607, %v5901_v36 }
 0x668   :  { %v5385_v26 = vsel %vm5375_vm6, nan, %v5384_v14  ;;  %v5260_v41 = vand.u32 2147483647, %v5259_v55  ;;  %v5262_v1 = vcvt.s32.f32 %v5255_v2  ;;  %v5914_v0 = vshrl.u32 %v5913_v7, 5 }
 0x669   :  { %7999 = vst [vmem:[#allocation2 + $0x130] sm:$0xff] %v5385_v26  ;;  %v5447_v3 = vadd.s32 536870912, %v5446_v4  ;;  %v5919_v35 = vshrl.u32 %v9029_v29, %v5916_v6  ;;  %v5922_v49 = vshrl.u32 %v9030_v31, %v5916_v6  ;;  %v5925_v25 = vshrl.u32 %v9031_v33, %v5916_v6 }
 0x66a   :  { %v5263_v5 = vmul.f32 %v5262_v1, %v5260_v41  ;;  %v5918_v32 = vshll.u32 %v9028_v18, %v5915_v46  ;;  %v5927_v37 = vshll.u32 %v9031_v33, %v5915_v46  ;;  %v5928_v56 = vshrl.u32 %v9032_v43, %v5916_v6 }
 0x66b   :  { %v13837_v10 = vshrl.u32 %v5447_v3, 30  ;;  %v5921_v11 = vshll.u32 %v9029_v29, %v5915_v46  ;;  %v5924_v7 = vshll.u32 %v9030_v31, %v5915_v46  ;;  %v5931_v22 = vshrl.u32 %v9033_v52, %v5916_v6 }
 0x66c   :  { %vm13844_vm9 = vcmp.le.f32.partialorder %v5180_v61, 0.7853982  ;;  %v5264_v8 = vxor.u32 2147483648, %v5263_v5  ;;  %v5929_v34 = vor.u32 %v5928_v56, %v5927_v37  ;;  %v5930_v27 = vshll.u32 %v9032_v43, %v5915_v46 }
 0x66d   :  { %v5449_v12 = vshll.u32 %v13837_v10, 30  ;;  %v5920_v51 = vor.u32 %v5919_v35, %v5918_v32  ;;  %v5923_v20 = vor.u32 %v5922_v49, %v5921_v11  ;;  %v5926_v2 = vor.u32 %v5925_v25, %v5924_v7 }
 0x66e   :  { %v5265_v59 = vsel %vm5182_vm3, %v5264_v8, %v5263_v5  ;;  %v5269_v13 = vsel %vm13844_vm9, 0, %v5267_v54  ;;  %v5909_v19 = vor.u32 8388608, %v5908_v40  ;;  %v5932_v61 = vor.u32 %v5931_v22, %v5930_v27  ;;  %v13876_v8 = vpop.f32.mrb[29].mxu1 }
 0x66f   :  { %v5268_v24 = vsel %vm13844_vm9, %v13566_v23, %v5265_v59  ;;  %v13857_v55 = vsub.s32 %v5446_v4, %v5449_v12  ;;  %vm5936_vm11 = vcmp.lt.s32.totalorder %v5914_v0, 4  ;;  %v13861_v46 = vadd.f32 %v12118_v28, %v13761_v63 }
 0x670   :  { %8947 = vcosq.f32 %v5268_v24  ;;  %vm5933_vm12 = vcmp.lt.s32.totalorder %v5914_v0, 1  ;;  %vm5935_vm13 = vcmp.lt.s32.totalorder %v5914_v0, 3  ;;  %v5942_v50 = vsel %vm5936_vm11, %v5929_v34, 920167782 }
 0x671   :  { %8949 = vsinq.f32 %v5268_v24  ;;  %v5452_v14 = vsub.s32 0, %v13857_v55  ;;  %v5938_v54 = vsel %vm5936_vm11, %v5926_v2, 2102212464  ;;  %v5941_v40 = vsel %vm5933_vm12, %v5920_v51, %v5923_v20 }
 0x672   :  { %v5917_v26 = vshrl.u32 %v9028_v18, %v5916_v6  ;;  %v5943_v41 = vsel %vm5935_vm13, %v5926_v2, %v5942_v50  ;;  %v5945_v4 = vsel %vm5933_vm12, %v5923_v20, %v5926_v2  ;;  %v5946_v1 = vsel %vm5936_vm11, %v5932_v61, 1326507024 }
 0x673   :  { %v5273_v3 = vand.u32 3, %v5269_v13  ;;  %v8254_v35 = vmin.u32 %v5452_v14, %v13857_v55  ;;  %vm5934_vm0 = vcmp.lt.s32.totalorder %v5914_v0, 2  ;;  %v5949_v63 = vshll.u32 %v5909_v19, 8 }
 0x674   :  { %v5937_v49 = vsel %vm5933_vm12, %v5917_v26, %v5920_v51  ;;  %v5939_v25 = vsel %vm5935_vm13, %v5923_v20, %v5938_v54  ;;  %v5944_v5 = vsel %vm5934_vm0, %v5941_v40, %v5943_v41  ;;  %v5947_v32 = vsel %vm5935_vm13, %v5929_v34, %v5946_v1 }
 0x675   :  { %v5454_v37 = vclz %v8254_v35  ;;  %v5948_v56 = vsel %vm5934_vm0, %v5945_v4, %v5947_v32  ;;  %v13869_v11 = vmul.u32.u64.low %v5949_v63, %v5944_v5  ;;  %v13870_v7 = vmul.u32.u64.high %v5949_v63, %v5944_v5, %v13869_v11 }
 0x676   :  { %v13872_v6 = vmul.u32.u64.low %v5949_v63, %v5948_v56  ;;  %v13873_v22 = vmul.u32.u64.high %v5949_v63, %v5948_v56, %v13872_v6  ;;  %v6110_v62 = vand.u32 2139095040, %v13861_v46  ;;  %vm5272_vm14 = vweird.f32 %v13566_v23 }
 0x677   :  { %v8255_v27 = vadd.s32 4294967294, %v5454_v37  ;;  %v5940_v12 = vsel %vm5934_vm0, %v5937_v49, %v5939_v25  ;;  %v6107_v51 = vand.u32 2147483647, %v13861_v46  ;;  %v1214_v0 = vmul.f32 %v12171_v9, %v13471_v48 }
 0x678   :  { %vm5275_vm1 = vcmp.eq.s32.totalorder %v5273_v3, 0  ;;  %vm5278_vm15 = vcmp.eq.s32.totalorder %v5273_v3, 2  ;;  %vm5388_vm2 = vcmp.lt.s32.totalorder %v13689_v60, 0  ;;  %v6111_v34 = vshrl.u32 %v6110_v62, 23 }
 0x679   :  { %v5442_v20 = vadd.s32 %v13800_v15, %v13810_v17  ;;  %vm8256_vm3 = vcmp.lt.s32.totalorder %v8255_v27, 0  ;;  %v5472_v2 = vsub.s32 4, %v13837_v10  ;;  %v5959_v59 = vadd.s32 1, %v13870_v7 }
 0x67a   :  { %v8948_v13 = vpop.eup %8947  ;;  %v5457_v19 = vsel %vm8256_vm3, 0, %v8255_v27  ;;  %v5956_v61 = vmul.u32 %v5949_v63, %v5940_v12  ;;  %vm5958_vm4 = vc.u32 %v13873_v22, %v13869_v11  ;;  %v8281_v24 = vadd.s32 4294967169, %v6111_v34 }
 0x67b   :  { %v8950_v48 = vpop.eup %8949  ;;  %v5279_v50 = vxor.u32 2147483648, %v8948_v13  ;;  %v5458_v14 = vsub.s32 32, %v5457_v19  ;;  %v5462_v54 = vsub.s32 4294967266, %v5457_v19  ;;  %v6114_v40 = vand.u32 8388607, %v6107_v51 }
 0x67c   :  { %v5276_v26 = vxor.u32 2147483648, %v8950_v48  ;;  %v5459_v15 = vshll.u32 %v13857_v55, %v5457_v19  ;;  %v5960_v17 = vsel %vm5958_vm4, %v5959_v59, %v13870_v7  ;;  %v6117_v41 = vadd.s32 1, %v8281_v24 }
 0x67d   :  { %v5280_v4 = vsel %vm5278_vm15, %v5279_v50, %v8950_v48  ;;  %v5460_v1 = vshrl.u32 %v5442_v20, %v5458_v14  ;;  %v5463_v35 = vadd.s32 127, %v5462_v54  ;;  %v5961_v63 = vadd.s32 %v5960_v17, %v5956_v61 }
 0x67e   :  { %vm5274_vm5 = vcmp.lt.s32.totalorder %v5273_v3, 2  ;;  %v5277_v49 = vsel %vm5275_vm1, %v8948_v13, %v5276_v26  ;;  %v5473_v25 = vsel %vm5388_vm2, %v5472_v2, %v13837_v10  ;;  %vm6118_vm6 = vcmp.gt.s32.totalorder %v6117_v41, 0 }
 0x67f   :  { %v5281_v5 = vsel %vm5274_vm5, %v5277_v49, %v5280_v4  ;;  %v5461_v32 = vor.u32 %v5460_v1, %v5459_v15  ;;  %v5464_v37 = vshll.u32 %v5463_v35, 23  ;;  %v5962_v55 = vadd.s32 536870912, %v5961_v63 }
 0x680   :  { %v5282_v56 = vsel %vm5272_vm14, nan, %v5281_v5  ;;  %vm13901_vm7 = vcmp.le.f32.partialorder %v5386_v47, 0.7853982  ;;  %v6119_v3 = vsel %vm6118_vm6, %v6117_v41, 0  ;;  %v13906_v6 = vadd.f32 %v12201_v38, %v1214_v0 }
 0x681   :  { %7998 = vst [vmem:[#allocation2 + $0x128] sm:$0xff] %v5282_v56  ;;  %v5465_v10 = vor.u32 4788187, %v5464_v37  ;;  %v5475_v62 = vsel %vm13901_vm7, 0, %v5473_v25  ;;  %v13910_v27 = vshrl.u32 %v5962_v55, 30  ;;  %v6115_v12 = vor.u32 8388608, %v6114_v40 }
 0x682   :  { %v6121_v23 = vand.u32 31, %v6119_v3  ;;  %v5468_v20 = vcvt.s32.f32 %v5461_v32  ;;  %v13913_v2 = vand.u32 3, %v5475_v62  ;;  %v6004_v13 = vand.u32 2147483647, %v13906_v6  ;;  %v13940_v62 = vpop.f32.mrb[30].mxu0 }
 0x683   :  { %v5466_v34 = vand.u32 2147483647, %v5465_v10  ;;  %v5964_v47 = vshll.u32 %v13910_v27, 30  ;;  %v5957_v19 = vadd.s32 %v13869_v11, %v13873_v22  ;;  %v13919_v24 = vshll.u32 %v6115_v12, 8 }
 0x684   :  { %v6122_v59 = vsub.s32 32, %v6121_v23  ;;  %v6124_v48 = vshll.u32 %v9028_v18, %v6121_v23  ;;  %v6007_v54 = vand.u32 2139095040, %v13906_v6  ;;  %v6127_v15 = vshll.u32 %v9029_v29, %v6121_v23 }
 0x685   :  { %v5469_v0 = vmul.f32 %v5468_v20, %v5466_v34  ;;  %v13917_v61 = vsub.s32 %v5961_v63, %v5964_v47  ;;  %v6120_v11 = vshrl.u32 %v6119_v3, 5  ;;  %v6130_v22 = vshll.u32 %v9030_v31, %v6121_v23 }
 0x686   :  { %v6125_v50 = vshrl.u32 %v9029_v29, %v6122_v59  ;;  %v6128_v14 = vshrl.u32 %v9030_v31, %v6122_v59  ;;  %v6131_v17 = vshrl.u32 %v9031_v33, %v6122_v59  ;;  %v6133_v41 = vshll.u32 %v9031_v33, %v6121_v23 }
 0x687   :  { %v5470_v40 = vxor.u32 2147483648, %v5469_v0  ;;  %v5967_v26 = vsub.s32 0, %v13917_v61  ;;  %v6134_v4 = vshrl.u32 %v9032_v43, %v6122_v59  ;;  %v6008_v37 = vshrl.u32 %v6007_v54, 23 }
 0x688   :  { %v6126_v63 = vor.u32 %v6125_v50, %v6124_v48  ;;  %v6129_v49 = vor.u32 %v6128_v14, %v6127_v15  ;;  %v6132_v5 = vor.u32 %v6131_v17, %v6130_v22  ;;  %v6136_v56 = vshll.u32 %v9032_v43, %v6121_v23 }
 0x689   :  { %v5471_v1 = vsel %vm5388_vm2, %v5470_v40, %v5469_v0  ;;  %v8274_v35 = vmin.u32 %v5967_v26, %v13917_v61  ;;  %v6135_v32 = vor.u32 %v6134_v4, %v6133_v41  ;;  %v6137_v3 = vshrl.u32 %v9033_v52, %v6122_v59 }
 0x68a   :  { %v5474_v25 = vsel %vm13901_vm7, %v13689_v60, %v5471_v1  ;;  %v6123_v10 = vshrl.u32 %v9028_v18, %v6122_v59  ;;  %vm6139_vm8 = vcmp.lt.s32.totalorder %v6120_v11, 1  ;;  %vm6140_vm10 = vcmp.lt.s32.totalorder %v6120_v11, 2 }
 0x68b   :  { %8951 = vcosq.f32 %v5474_v25  ;;  %v5969_v55 = vclz %v8274_v35  ;;  %v6138_v34 = vor.u32 %v6137_v3, %v6136_v56  ;;  %vm6142_vm9 = vcmp.lt.s32.totalorder %v6120_v11, 4 }
 0x68c   :  { %8953 = vsinq.f32 %v5474_v25  ;;  %v6147_v7 = vsel %vm6139_vm8, %v6126_v63, %v6129_v49  ;;  %vm6141_vm11 = vcmp.lt.s32.totalorder %v6120_v11, 3  ;;  %v6144_v20 = vsel %vm6142_vm9, %v6132_v5, 2102212464 }
 0x68d   :  { %v8275_v12 = vadd.s32 4294967294, %v5969_v55  ;;  %v6148_v47 = vsel %vm6142_vm9, %v6135_v32, 920167782  ;;  %v6151_v0 = vsel %vm6139_vm8, %v6129_v49, %v6132_v5  ;;  %v6152_v48 = vsel %vm6142_vm9, %v6138_v34, 1326507024 }
 0x68e   :  { %v6149_v23 = vsel %vm6141_vm11, %v6132_v5, %v6148_v47  ;;  %v8277_v50 = vadd.s32 4294967169, %v6008_v37  ;;  %v6143_v59 = vsel %vm6139_vm8, %v6123_v10, %v6126_v63  ;;  %v6153_v40 = vsel %vm6141_vm11, %v6135_v32, %v6152_v48 }
 0x68f   :  { %vm8276_vm12 = vcmp.lt.s32.totalorder %v8275_v12, 0  ;;  %v6150_v54 = vsel %vm6140_vm10, %v6147_v7, %v6149_v23  ;;  %v6145_v17 = vsel %vm6141_vm11, %v6129_v49, %v6144_v20  ;;  %v6154_v22 = vsel %vm6140_vm10, %v6151_v0, %v6153_v40 }
 0x690   :  { %v5972_v14 = vsel %vm8276_vm12, 0, %v8275_v12  ;;  %vm5478_vm13 = vweird.f32 %v13689_v60  ;;  %v13949_v41 = vmul.u32.u64.low %v13919_v24, %v6154_v22  ;;  %v13950_v4 = vmul.u32.u64.high %v13919_v24, %v6154_v22, %v13949_v41 }
 0x691   :  { %v5973_v26 = vsub.s32 32, %v5972_v14  ;;  %v5977_v15 = vsub.s32 4294967266, %v5972_v14  ;;  %v13953_v1 = vmul.u32.u64.low %v13919_v24, %v6150_v54  ;;  %v13954_v35 = vmul.u32.u64.high %v13919_v24, %v6150_v54, %v13953_v1 }
 0x692   :  { %v5974_v63 = vshll.u32 %v13917_v61, %v5972_v14  ;;  %v6014_v32 = vadd.s32 1, %v8277_v50  ;;  %vm5480_vm0 = vcmp.lt.s32.totalorder %v13913_v2, 2  ;;  %vm5484_vm14 = vcmp.eq.s32.totalorder %v13913_v2, 2 }
 0x693   :  { %v5975_v25 = vshrl.u32 %v5957_v19, %v5973_v26  ;;  %v5978_v5 = vadd.s32 127, %v5977_v15  ;;  %vm5903_vm1 = vcmp.lt.s32.totalorder %v13733_v53, 0  ;;  %v6146_v49 = vsel %vm6140_vm10, %v6143_v59, %v6145_v17 }
 0x694   :  { %vm13964_vm15 = vcmp.le.f32.partialorder %v5901_v36, 0.7853982  ;;  %v6011_v19 = vand.u32 8388607, %v6004_v13  ;;  %vm6015_vm2 = vcmp.gt.s32.totalorder %v6014_v32, 0  ;;  %v5987_v12 = vsub.s32 4, %v13910_v27 }
 0x695   :  { %v8952_v37 = vpop.eup %8951  ;;  %v5976_v56 = vor.u32 %v5975_v25, %v5974_v63  ;;  %v5979_v61 = vshll.u32 %v5978_v5, 23  ;;  %vm6164_vm3 = vc.u32 %v13950_v4, %v13953_v1  ;;  %v6165_v11 = vadd.s32 1, %v13954_v35 }
 0x696   :  { %v8954_v3 = vpop.eup %8953  ;;  %v5485_v10 = vxor.u32 2147483648, %v8952_v37  ;;  %v6162_v7 = vmul.u32 %v13919_v24, %v6146_v49  ;;  %v6016_v20 = vsel %vm6015_vm2, %v6014_v32, 0  ;;  %vm5481_vm4 = vcmp.eq.s32.totalorder %v13913_v2, 0 }
 0x697   :  { %v5482_v34 = vxor.u32 2147483648, %v8954_v3  ;;  %v5980_v36 = vor.u32 4788187, %v5979_v61  ;;  %v6166_v0 = vsel %vm6164_vm3, %v6165_v11, %v13954_v35  ;;  %v6018_v23 = vand.u32 31, %v6016_v20 }
 0x698   :  { %v5486_v47 = vsel %vm5484_vm14, %v5485_v10, %v8954_v3  ;;  %v5983_v14 = vcvt.s32.f32 %v5976_v56  ;;  %v6167_v59 = vadd.s32 %v6166_v0, %v6162_v7  ;;  %v5988_v24 = vsel %vm5903_vm1, %v5987_v12, %v13910_v27 }
 0x699   :  { %v5483_v48 = vsel %vm5481_vm4, %v8952_v37, %v5482_v34  ;;  %v5981_v50 = vand.u32 2147483647, %v5980_v36  ;;  %v6012_v40 = vor.u32 8388608, %v6011_v19  ;;  %v6019_v26 = vsub.s32 32, %v6018_v23 }
 0x69a   :  { %v5487_v54 = vsel %vm5480_vm0, %v5483_v48, %v5486_v47  ;;  %v6168_v22 = vadd.s32 536870912, %v6167_v59  ;;  %v6021_v41 = vshll.u32 %v9028_v18, %v6018_v23  ;;  %v6024_v63 = vshll.u32 %v9029_v29, %v6018_v23 }
 0x69b   :  { %v5488_v15 = vsel %vm5478_vm13, nan, %v5487_v54  ;;  %v5984_v17 = vmul.f32 %v5983_v14, %v5981_v50  ;;  %v6022_v35 = vshrl.u32 %v9029_v29, %v6019_v26  ;;  %v6025_v2 = vshrl.u32 %v9030_v31, %v6019_v26 }
 0x69c   :  { %8000 = vst [vmem:[#allocation2 + $0x138] sm:$0xff] %v5488_v15  ;;  %v6028_v25 = vshrl.u32 %v9031_v33, %v6019_v26  ;;  %v13991_v27 = vshrl.u32 %v6168_v22, 30  ;;  %v6027_v32 = vshll.u32 %v9030_v31, %v6018_v23  ;;  %v6031_v60 = vshrl.u32 %v9032_v43, %v6019_v26 }
 0x69d   :  { %v5985_v5 = vxor.u32 2147483648, %v5984_v17  ;;  %v5990_v49 = vsel %vm13964_vm15, 0, %v5988_v24  ;;  %v6017_v37 = vshrl.u32 %v6016_v20, 5  ;;  %v6023_v56 = vor.u32 %v6022_v35, %v6021_v41 }
 0x69e   :  { %v6030_v61 = vshll.u32 %v9031_v33, %v6018_v23  ;;  %v6170_v3 = vshll.u32 %v13991_v27, 30  ;;  %v6026_v10 = vor.u32 %v6025_v2, %v6024_v63  ;;  %v6029_v12 = vor.u32 %v6028_v25, %v6027_v32  ;;  %v14026_v32 = vpop.f32.mrb[30].mxu1 }
 0x69f   :  { %v5986_v19 = vsel %vm5903_vm1, %v5985_v5, %v5984_v17  ;;  %v6033_v36 = vshll.u32 %v9032_v43, %v6018_v23  ;;  %v6034_v7 = vshrl.u32 %v9033_v52, %v6019_v26  ;;  %v1216_v47 = vmul.f32 %v12282_v21, %v13544_v30 }
 0x6a0   :  { %v5989_v11 = vsel %vm13964_vm15, %v13733_v53, %v5986_v19  ;;  %v6032_v34 = vor.u32 %v6031_v60, %v6030_v61  ;;  %v14006_v20 = vsub.s32 %v6167_v59, %v6170_v3  ;;  %v5994_v0 = vand.u32 3, %v5990_v49 }
 0x6a1   :  { %8955 = vcosq.f32 %v5989_v11  ;;  %v6035_v48 = vor.u32 %v6034_v7, %v6033_v36  ;;  %v1221_v50 = vmul.f32 %v11951_v45, %v13647_v57  ;;  %vm6036_vm5 = vcmp.lt.s32.totalorder %v6017_v37, 1 }
 0x6a2   :  { %8957 = vsinq.f32 %v5989_v11  ;;  %v6173_v55 = vsub.s32 0, %v14006_v20  ;;  %vm6039_vm6 = vcmp.lt.s32.totalorder %v6017_v37, 4  ;;  %v6052_v14 = vshll.u32 %v6012_v40, 8 }
 0x6a3   :  { %v6020_v23 = vshrl.u32 %v9028_v18, %v6019_v26  ;;  %v6041_v54 = vsel %vm6039_vm6, %v6029_v12, 2102212464  ;;  %v6044_v24 = vsel %vm6036_vm5, %v6023_v56, %v6026_v10  ;;  %v6045_v59 = vsel %vm6039_vm6, %v6032_v34, 920167782 }
 0x6a4   :  { %v8282_v15 = vmin.u32 %v6173_v55, %v14006_v20  ;;  %vm6038_vm7 = vcmp.lt.s32.totalorder %v6017_v37, 3  ;;  %v6048_v30 = vsel %vm6036_vm5, %v6026_v10, %v6029_v12  ;;  %v14016_v17 = vadd.f32 %v12330_v16, %v1216_v47 }
 0x6a5   :  { %vm6037_vm8 = vcmp.lt.s32.totalorder %v6017_v37, 2  ;;  %v6040_v22 = vsel %vm6036_vm5, %v6020_v23, %v6023_v56  ;;  %v6046_v57 = vsel %vm6038_vm7, %v6029_v12, %v6045_v59  ;;  %v6049_v41 = vsel %vm6039_vm6, %v6035_v48, 1326507024 }
 0x6a6   :  { %v6175_v35 = vclz %v8282_v15  ;;  %v6042_v63 = vsel %vm6038_vm7, %v6026_v10, %v6041_v54  ;;  %v6047_v40 = vsel %vm6037_vm8, %v6044_v24, %v6046_v57  ;;  %v6050_v2 = vsel %vm6038_vm7, %v6032_v34, %v6049_v41 }
 0x6a7   :  { %vm5993_vm10 = vweird.f32 %v13733_v53  ;;  %vm5995_vm9 = vcmp.lt.s32.totalorder %v5994_v0, 2  ;;  %vm6109_vm11 = vcmp.lt.s32.totalorder %v13861_v46, 0  ;;  %v6051_v26 = vsel %vm6037_vm8, %v6048_v30, %v6050_v2 }
 0x6a8   :  { %v14022_v25 = vmul.u32.u64.low %v6052_v14, %v6047_v40  ;;  %v14023_v5 = vmul.u32.u64.high %v6052_v14, %v6047_v40, %v14022_v25  ;;  %v8283_v60 = vadd.s32 4294967294, %v6175_v35  ;;  %v6213_v61 = vand.u32 2139095040, %v14016_v17 }
 0x6a9   :  { %v14028_v49 = vmul.u32.u64.low %v6052_v14, %v6051_v26  ;;  %v14029_v56 = vmul.u32.u64.high %v6052_v14, %v6051_v26, %v14028_v49  ;;  %vm5996_vm12 = vcmp.eq.s32.totalorder %v5994_v0, 0  ;;  %vm5999_vm13 = vcmp.eq.s32.totalorder %v5994_v0, 2 }
 0x6aa   :  { %v6043_v19 = vsel %vm6037_vm8, %v6040_v22, %v6042_v63  ;;  %v14034_v3 = vadd.f32 %v11957_v44, %v1221_v50  ;;  %v6163_v12 = vadd.s32 %v13953_v1, %v13950_v4  ;;  %vm8284_vm0 = vcmp.lt.s32.totalorder %v8283_v60, 0 }
 0x6ab   :  { %v8956_v10 = vpop.eup %8955  ;;  %v6210_v11 = vand.u32 2147483647, %v14016_v17  ;;  %v6214_v34 = vshrl.u32 %v6213_v61, 23  ;;  %v6178_v47 = vsel %vm8284_vm0, 0, %v8283_v60  ;;  %v6193_v48 = vsub.s32 4, %v13991_v27 }
 0x6ac   :  { %v8958_v36 = vpop.eup %8957  ;;  %v6000_v7 = vxor.u32 2147483648, %v8956_v10  ;;  %v6062_v55 = vadd.s32 1, %v14023_v5  ;;  %v6179_v23 = vsub.s32 32, %v6178_v47  ;;  %v6183_v54 = vsub.s32 4294967266, %v6178_v47 }
 0x6ad   :  { %v5997_v37 = vxor.u32 2147483648, %v8958_v36  ;;  %v6059_v50 = vmul.u32 %v6052_v14, %v6043_v19  ;;  %v6180_v59 = vshll.u32 %v14006_v20, %v6178_v47  ;;  %vm6061_vm14 = vc.u32 %v14029_v56, %v14022_v25 }
 0x6ae   :  { %v6001_v24 = vsel %vm5999_vm13, %v6000_v7, %v8958_v36  ;;  %v8285_v4 = vadd.s32 4294967169, %v6214_v34  ;;  %v6181_v15 = vshrl.u32 %v6163_v12, %v6179_v23  ;;  %v6184_v30 = vadd.s32 127, %v6183_v54 }
 0x6af   :  { %v5998_v1 = vsel %vm5996_vm12, %v8956_v10, %v5997_v37  ;;  %v6063_v22 = vsel %vm6061_vm14, %v6062_v55, %v14023_v5  ;;  %v6217_v14 = vand.u32 8388607, %v6210_v11  ;;  %v6194_v2 = vsel %vm6109_vm11, %v6193_v48, %v13991_v27 }
 0x6b0   :  { %v6002_v57 = vsel %vm5995_vm9, %v5998_v1, %v6001_v24  ;;  %v6064_v41 = vadd.s32 %v6063_v22, %v6059_v50  ;;  %v6220_v35 = vadd.s32 1, %v8285_v4  ;;  %v6182_v63 = vor.u32 %v6181_v15, %v6180_v59 }
 0x6b1   :  { %v6003_v20 = vsel %vm5993_vm10, nan, %v6002_v57  ;;  %v6185_v40 = vshll.u32 %v6184_v30, 23  ;;  %v1223_v0 = vmul.f32 %v12106_v42, %v13708_v39  ;;  %vm14059_vm15 = vcmp.le.f32.partialorder %v6107_v51, 0.7853982 }
 0x6b2   :  { %8005 = vst [vmem:[#allocation2 + $0x160] sm:$0xff] %v6003_v20  ;;  %v6065_v26 = vadd.s32 536870912, %v6064_v41  ;;  %vm6221_vm1 = vcmp.gt.s32.totalorder %v6220_v35, 0  ;;  %v6728_v49 = vand.u32 2139095040, %v14034_v3  ;;  %v6196_v61 = vsel %vm14059_vm15, 0, %v6194_v2 }
 0x6b3   :  { %v6186_v53 = vor.u32 4788187, %v6185_v40  ;;  %v6222_v60 = vsel %vm6221_vm1, %v6220_v35, 0  ;;  %v6218_v19 = vor.u32 8388608, %v6217_v14  ;;  %v6189_v34 = vcvt.s32.f32 %v6182_v63 }
 0x6b4   :  { %v14066_v27 = vshrl.u32 %v6065_v26, 30  ;;  %v6224_v10 = vand.u32 31, %v6222_v60  ;;  %v14070_v51 = vadd.f32 %v12118_v28, %v1223_v0  ;;  %v14072_v47 = vand.u32 3, %v6196_v61  ;;  %v14096_v0 = vpop.f32.mrb[31].mxu0 }
 0x6b5   :  { %v6187_v12 = vand.u32 2147483647, %v6186_v53  ;;  %v6725_v48 = vand.u32 2147483647, %v14034_v3  ;;  %v6729_v55 = vshrl.u32 %v6728_v49, 23  ;;  %v14077_v23 = vshrl.u32 %v6222_v60, 5 }
 0x6b6   :  { %v6067_v39 = vshll.u32 %v14066_v27, 30  ;;  %v6225_v36 = vsub.s32 32, %v6224_v10  ;;  %v14080_v50 = vshll.u32 %v6218_v19, 8  ;;  %v6227_v59 = vshll.u32 %v9028_v18, %v6224_v10 }
 0x6b7   :  { %v6190_v7 = vmul.f32 %v6189_v34, %v6187_v12  ;;  %v6230_v30 = vshll.u32 %v9029_v29, %v6224_v10  ;;  %v6233_v22 = vshll.u32 %v9030_v31, %v6224_v10  ;;  %v6236_v35 = vshll.u32 %v9031_v33, %v6224_v10 }
 0x6b8   :  { %v14075_v37 = vsub.s32 %v6064_v41, %v6067_v39  ;;  %v6228_v54 = vshrl.u32 %v9029_v29, %v6225_v36  ;;  %v6231_v4 = vshrl.u32 %v9030_v31, %v6225_v36  ;;  %v6234_v1 = vshrl.u32 %v9031_v33, %v6225_v36 }
 0x6b9   :  { %v6191_v24 = vxor.u32 2147483648, %v6190_v7  ;;  %v6237_v57 = vshrl.u32 %v9032_v43, %v6225_v36  ;;  %v8305_v20 = vadd.s32 4294967169, %v6729_v55  ;;  %v6239_v60 = vshll.u32 %v9032_v43, %v6224_v10 }
 0x6ba   :  { %v6070_v15 = vsub.s32 0, %v14075_v37  ;;  %v6229_v14 = vor.u32 %v6228_v54, %v6227_v59  ;;  %v6232_v2 = vor.u32 %v6231_v4, %v6230_v30  ;;  %v6235_v26 = vor.u32 %v6234_v1, %v6233_v22 }
 0x6bb   :  { %v6192_v41 = vsel %vm6109_vm11, %v6191_v24, %v6190_v7  ;;  %v6238_v53 = vor.u32 %v6237_v57, %v6236_v35  ;;  %v6240_v49 = vshrl.u32 %v9033_v52, %v6225_v36  ;;  %v6226_v19 = vshrl.u32 %v9028_v18, %v6225_v36 }
 0x6bc   :  { %v6195_v63 = vsel %vm14059_vm15, %v13861_v46, %v6192_v41  ;;  %v8278_v40 = vmin.u32 %v6070_v15, %v14075_v37  ;;  %vm6242_vm2 = vcmp.lt.s32.totalorder %v14077_v23, 1  ;;  %vm6243_vm3 = vcmp.lt.s32.totalorder %v14077_v23, 2 }
 0x6bd   :  { %8959 = vcosq.f32 %v6195_v63  ;;  %v6241_v5 = vor.u32 %v6240_v49, %v6239_v60  ;;  %vm6244_vm4 = vcmp.lt.s32.totalorder %v14077_v23, 3  ;;  %vm6245_vm5 = vcmp.lt.s32.totalorder %v14077_v23, 4 }
 0x6be   :  { %8961 = vsinq.f32 %v6195_v63  ;;  %v6072_v61 = vclz %v8278_v40  ;;  %v6247_v34 = vsel %vm6245_vm5, %v6235_v26, 2102212464  ;;  %v6250_v39 = vsel %vm6242_vm2, %v6229_v14, %v6232_v2 }
 0x6bf   :  { %v6251_v7 = vsel %vm6245_vm5, %v6238_v53, 920167782  ;;  %vm6006_vm6 = vcmp.lt.s32.totalorder %v13906_v6, 0  ;;  %v6246_v10 = vsel %vm6242_vm2, %v6226_v19, %v6229_v14  ;;  %v6254_v54 = vsel %vm6242_vm2, %v6232_v2, %v6235_v26 }
 0x6c0   :  { %v8279_v12 = vadd.s32 4294967294, %v6072_v61  ;;  %v6252_v55 = vsel %vm6244_vm4, %v6235_v26, %v6251_v7  ;;  %v6255_v24 = vsel %vm6245_vm5, %v6241_v5, 1326507024  ;;  %v6248_v36 = vsel %vm6244_vm4, %v6232_v2, %v6247_v34 }
 0x6c1   :  { %v6253_v59 = vsel %vm6243_vm3, %v6250_v39, %v6252_v55  ;;  %v6256_v4 = vsel %vm6244_vm4, %v6238_v53, %v6255_v24  ;;  %vm6199_vm8 = vweird.f32 %v13861_v46  ;;  %vm14118_vm10 = vcmp.le.f32.partialorder %v6004_v13, 0.7853982 }
 0x6c2   :  { %vm8280_vm7 = vcmp.lt.s32.totalorder %v8279_v12, 0  ;;  %v6257_v15 = vsel %vm6243_vm3, %v6254_v54, %v6256_v4  ;;  %v14111_v30 = vmul.u32.u64.low %v14080_v50, %v6253_v59  ;;  %v14112_v22 = vmul.u32.u64.high %v14080_v50, %v6253_v59, %v14111_v30 }
 0x6c3   :  { %v6075_v1 = vsel %vm8280_vm7, 0, %v8279_v12  ;;  %v6060_v41 = vadd.s32 %v14022_v25, %v14029_v56  ;;  %v14126_v63 = vmul.f32 %v12171_v9, %v13788_v58  ;;  %v6090_v40 = vsub.s32 4, %v14066_v27 }
 0x6c4   :  { %v6076_v14 = vsub.s32 32, %v6075_v1  ;;  %v6080_v35 = vsub.s32 4294967266, %v6075_v1  ;;  %v14130_v2 = vmul.u32.u64.low %v14080_v50, %v6257_v15  ;;  %v14131_v26 = vmul.u32.u64.high %v14080_v50, %v6257_v15, %v14130_v2 }
 0x6c5   :  { %v6735_v53 = vadd.s32 1, %v8305_v20  ;;  %v6077_v13 = vshll.u32 %v14075_v37, %v6075_v1  ;;  %v6249_v25 = vsel %vm6243_vm3, %v6246_v10, %v6248_v36  ;;  %vm6202_vm9 = vcmp.eq.s32.totalorder %v14072_v47, 0 }
 0x6c6   :  { %v6078_v60 = vshrl.u32 %v6060_v41, %v6076_v14  ;;  %v6081_v49 = vadd.s32 127, %v6080_v35  ;;  %v6268_v58 = vadd.s32 1, %v14112_v22  ;;  %v6732_v61 = vand.u32 8388607, %v6725_v48 }
 0x6c7   :  { %v8960_v56 = vpop.eup %8959  ;;  %vm6736_vm11 = vcmp.gt.s32.totalorder %v6735_v53, 0  ;;  %vm6205_vm12 = vcmp.eq.s32.totalorder %v14072_v47, 2  ;;  %v6265_v23 = vmul.u32 %v14080_v50, %v6249_v25  ;;  %vm6267_vm13 = vc.u32 %v14131_v26, %v14111_v30 }
 0x6c8   :  { %v8962_v19 = vpop.eup %8961  ;;  %v6206_v5 = vxor.u32 2147483648, %v8960_v56  ;;  %v6079_v12 = vor.u32 %v6078_v60, %v6077_v13  ;;  %v6082_v20 = vshll.u32 %v6081_v49, 23  ;;  %v6737_v34 = vsel %vm6736_vm11, %v6735_v53, 0 }
 0x6c9   :  { %v6203_v37 = vxor.u32 2147483648, %v8962_v19  ;;  %v6091_v10 = vsel %vm6006_vm6, %v6090_v40, %v14066_v27  ;;  %v6269_v55 = vsel %vm6267_vm13, %v6268_v58, %v14112_v22  ;;  %vm6201_vm0 = vcmp.lt.s32.totalorder %v14072_v47, 2 }
 0x6ca   :  { %v6207_v39 = vsel %vm6205_vm12, %v6206_v5, %v8962_v19  ;;  %v6083_v7 = vor.u32 4788187, %v6082_v20  ;;  %v6270_v24 = vadd.s32 %v6269_v55, %v6265_v23  ;;  %v6739_v36 = vand.u32 31, %v6737_v34 }
 0x6cb   :  { %v6204_v54 = vsel %vm6202_vm9, %v8960_v56, %v6203_v37  ;;  %v6086_v4 = vcvt.s32.f32 %v6079_v12  ;;  %v6733_v1 = vor.u32 8388608, %v6732_v61  ;;  %v6093_v41 = vsel %vm14118_vm10, 0, %v6091_v10 }
 0x6cc   :  { %v6208_v59 = vsel %vm6201_vm0, %v6204_v54, %v6207_v39  ;;  %v6084_v50 = vand.u32 2147483647, %v6083_v7  ;;  %v6271_v27 = vadd.s32 536870912, %v6270_v24  ;;  %v6740_v14 = vsub.s32 32, %v6739_v36 }
 0x6cd   :  { %v6209_v15 = vsel %vm6199_vm8, nan, %v6208_v59  ;;  %v6738_v35 = vshrl.u32 %v6737_v34, 5  ;;  %v6742_v47 = vshll.u32 %v9028_v18, %v6739_v36  ;;  %v6745_v40 = vshll.u32 %v9029_v29, %v6739_v36 }
 0x6ce   :  { %8007 = vst [vmem:[#allocation2 + $0x170] sm:$0xff] %v6209_v15  ;;  %v6087_v22 = vmul.f32 %v6086_v4, %v6084_v50  ;;  %v14157_v2 = vshrl.u32 %v6271_v27, 30  ;;  %v6743_v53 = vshrl.u32 %v9029_v29, %v6740_v14  ;;  %v6746_v13 = vshrl.u32 %v9030_v31, %v6740_v14 }
 0x6cf   :  { %v6748_v46 = vshll.u32 %v9030_v31, %v6739_v36  ;;  %v6749_v49 = vshrl.u32 %v9031_v33, %v6740_v14  ;;  %v6751_v25 = vshll.u32 %v9031_v33, %v6739_v36  ;;  %v6752_v56 = vshrl.u32 %v9032_v43, %v6740_v14 }
 0x6d0   :  { %v6088_v60 = vxor.u32 2147483648, %v6087_v22  ;;  %v6273_v58 = vshll.u32 %v14157_v2, 30  ;;  %v6744_v61 = vor.u32 %v6743_v53, %v6742_v47  ;;  %v6747_v19 = vor.u32 %v6746_v13, %v6745_v40 }
 0x6d1   :  { %v6754_v5 = vshll.u32 %v9032_v43, %v6739_v36  ;;  %v6750_v20 = vor.u32 %v6749_v49, %v6748_v46  ;;  %v6753_v34 = vor.u32 %v6752_v56, %v6751_v25  ;;  %v6755_v37 = vshrl.u32 %v9033_v52, %v6740_v14 }
 0x6d2   :  { %v6089_v12 = vsel %vm6006_vm6, %v6088_v60, %v6087_v22  ;;  %v14173_v39 = vand.u32 3, %v6093_v41  ;;  %v14175_v7 = vsub.s32 %v6270_v24, %v6273_v58  ;;  %v6931_v10 = vand.u32 2147483647, %v14070_v51  ;;  %v14183_v60 = vpop.f32.mrb[31].mxu1 }
 0x6d3   :  { %v6092_v23 = vsel %vm14118_vm10, %v13906_v6, %v6089_v12  ;;  %v6756_v55 = vor.u32 %v6755_v37, %v6754_v5  ;;  %v6773_v54 = vshll.u32 %v6733_v1, 8  ;;  %v6934_v36 = vand.u32 2139095040, %v14070_v51 }
 0x6d4   :  { %8963 = vcosq.f32 %v6092_v23  ;;  %v6276_v59 = vsub.s32 0, %v14175_v7  ;;  %vm6757_vm14 = vcmp.lt.s32.totalorder %v6738_v35, 1  ;;  %vm6760_vm1 = vcmp.lt.s32.totalorder %v6738_v35, 4 }
 0x6d5   :  { %8965 = vsinq.f32 %v6092_v23  ;;  %v6741_v50 = vshrl.u32 %v9028_v18, %v6740_v14  ;;  %v6762_v57 = vsel %vm6760_vm1, %v6750_v20, 2102212464  ;;  %v6765_v4 = vsel %vm6757_vm14, %v6744_v61, %v6747_v19 }
 0x6d6   :  { %v6766_v15 = vsel %vm6760_vm1, %v6753_v34, 920167782  ;;  %v8286_v24 = vmin.u32 %v6276_v59, %v14175_v7  ;;  %vm6758_vm15 = vcmp.lt.s32.totalorder %v6738_v35, 2  ;;  %vm6759_vm2 = vcmp.lt.s32.totalorder %v6738_v35, 3 }
 0x6d7   :  { %v6769_v41 = vsel %vm6757_vm14, %v6747_v19, %v6750_v20  ;;  %v6761_v27 = vsel %vm6757_vm14, %v6741_v50, %v6744_v61  ;;  %v6767_v22 = vsel %vm6759_vm2, %v6750_v20, %v6766_v15  ;;  %v6770_v1 = vsel %vm6760_vm1, %v6756_v55, 1326507024 }
 0x6d8   :  { %v6935_v47 = vshrl.u32 %v6934_v36, 23  ;;  %v6278_v40 = vclz %v8286_v24  ;;  %v6763_v53 = vsel %vm6759_vm2, %v6747_v19, %v6762_v57  ;;  %v6768_v13 = vsel %vm6758_vm15, %v6765_v4, %v6767_v22 }
 0x6d9   :  { %v6771_v46 = vsel %vm6759_vm2, %v6753_v34, %v6770_v1  ;;  %v14186_v49 = vmul.u32.u64.low %v6773_v54, %v6768_v13  ;;  %v14187_v25 = vmul.u32.u64.high %v6773_v54, %v6768_v13, %v14186_v49  ;;  %vm6096_vm3 = vweird.f32 %v13906_v6 }
 0x6da   :  { %v6772_v14 = vsel %vm6758_vm15, %v6769_v41, %v6771_v46  ;;  %v8313_v56 = vadd.s32 4294967169, %v6935_v47  ;;  %vm6212_vm4 = vcmp.lt.s32.totalorder %v14016_v17, 0  ;;  %v8287_v58 = vadd.s32 4294967294, %v6278_v40 }
 0x6db   :  { %v14192_v61 = vmul.u32.u64.low %v6773_v54, %v6772_v14  ;;  %v14193_v5 = vmul.u32.u64.high %v6773_v54, %v6772_v14, %v14192_v61  ;;  %vm6098_vm5 = vcmp.lt.s32.totalorder %v14173_v39, 2  ;;  %vm6099_vm6 = vcmp.eq.s32.totalorder %v14173_v39, 0 }
 0x6dc   :  { %v6764_v19 = vsel %vm6758_vm15, %v6761_v27, %v6763_v53  ;;  %v6941_v12 = vadd.s32 1, %v8313_v56  ;;  %vm6102_vm7 = vcmp.eq.s32.totalorder %v14173_v39, 2  ;;  %v6266_v20 = vadd.s32 %v14111_v30, %v14131_v26 }
 0x6dd   :  { %vm8288_vm8 = vcmp.lt.s32.totalorder %v8287_v58, 0  ;;  %v6938_v34 = vand.u32 8388607, %v6931_v10  ;;  %v6296_v55 = vsub.s32 4, %v14157_v2  ;;  %v6783_v36 = vadd.s32 1, %v14187_v25 }
 0x6de   :  { %v8964_v37 = vpop.eup %8963  ;;  %v6281_v23 = vsel %vm8288_vm8, 0, %v8287_v58  ;;  %vm6942_vm10 = vcmp.gt.s32.totalorder %v6941_v12, 0  ;;  %v6780_v4 = vmul.u32 %v6773_v54, %v6764_v19  ;;  %vm6782_vm9 = vc.u32 %v14193_v5, %v14186_v49 }
 0x6df   :  { %v8966_v59 = vpop.eup %8965  ;;  %v6103_v35 = vxor.u32 2147483648, %v8964_v37  ;;  %v6282_v50 = vsub.s32 32, %v6281_v23  ;;  %v6286_v57 = vsub.s32 4294967266, %v6281_v23  ;;  %v6283_v24 = vshll.u32 %v14175_v7, %v6281_v23 }
 0x6e0   :  { %v6100_v15 = vxor.u32 2147483648, %v8966_v59  ;;  %v6943_v30 = vsel %vm6942_vm10, %v6941_v12, 0  ;;  %v6784_v22 = vsel %vm6782_vm9, %v6783_v36, %v14187_v25  ;;  %v14216_v54 = vsel %vm6212_vm4, %v6296_v55, %v14157_v2 }
 0x6e1   :  { %v6104_v26 = vsel %vm6102_vm7, %v6103_v35, %v8966_v59  ;;  %v6284_v41 = vshrl.u32 %v6266_v20, %v6282_v50  ;;  %v6287_v27 = vadd.s32 127, %v6286_v57  ;;  %v6785_v7 = vadd.s32 %v6784_v22, %v6780_v4 }
 0x6e2   :  { %v6101_v1 = vsel %vm6099_vm6, %v8964_v37, %v6100_v15  ;;  %v6945_v47 = vand.u32 31, %v6943_v30  ;;  %vm14222_vm11 = vcmp.le.f32.partialorder %v6210_v11, 0.7853982  ;;  %v14230_v2 = vadd.f32 %v12201_v38, %v14126_v63 }
 0x6e3   :  { %v6105_v40 = vsel %vm6098_vm5, %v6101_v1, %v6104_v26  ;;  %v6285_v13 = vor.u32 %v6284_v41, %v6283_v24  ;;  %v6288_v46 = vshll.u32 %v6287_v27, 23  ;;  %v6786_v25 = vadd.s32 536870912, %v6785_v7 }
 0x6e4   :  { %v6106_v14 = vsel %vm6096_vm3, nan, %v6105_v40  ;;  %v6946_v56 = vsub.s32 32, %v6945_v47  ;;  %v6299_v11 = vsel %vm14222_vm11, 0, %v14216_v54  ;;  %v6939_v58 = vor.u32 8388608, %v6938_v34 }
 0x6e5   :  { %8006 = vst [vmem:[#allocation2 + $0x168] sm:$0xff] %v6106_v14  ;;  %v6289_v39 = vor.u32 4788187, %v6288_v46  ;;  %v14237_v61 = vmul.f32 %v12282_v21, %v13876_v8  ;;  %v14239_v19 = vshrl.u32 %v6786_v25, 30  ;;  %v6948_v6 = vshll.u32 %v9028_v18, %v6945_v47 }
 0x6e6   :  { %v6949_v12 = vshrl.u32 %v9029_v29, %v6946_v56  ;;  %v6952_v63 = vshrl.u32 %v9030_v31, %v6946_v56  ;;  %v6292_v37 = vcvt.s32.f32 %v6285_v13  ;;  %v6955_v23 = vshrl.u32 %v9031_v33, %v6946_v56 }
 0x6e7   :  { %v6290_v20 = vand.u32 2147483647, %v6289_v39  ;;  %v6958_v55 = vshrl.u32 %v9032_v43, %v6946_v56  ;;  %v6788_v34 = vshll.u32 %v14239_v19, 30  ;;  %v6951_v36 = vshll.u32 %v9029_v29, %v6945_v47 }
 0x6e8   :  { %v6954_v8 = vshll.u32 %v9030_v31, %v6945_v47  ;;  %v6831_v59 = vand.u32 2139095040, %v14230_v2  ;;  %v6944_v50 = vshrl.u32 %v6943_v30, 5  ;;  %v6950_v57 = vor.u32 %v6949_v12, %v6948_v6 }
 0x6e9   :  { %v6293_v35 = vmul.f32 %v6292_v37, %v6290_v20  ;;  %v6957_v4 = vshll.u32 %v9031_v33, %v6945_v47  ;;  %v14251_v15 = vsub.s32 %v6785_v7, %v6788_v34  ;;  %v6953_v24 = vor.u32 %v6952_v63, %v6951_v36 }
 0x6ea   :  { %v6956_v26 = vor.u32 %v6955_v23, %v6954_v8  ;;  %v6961_v41 = vshrl.u32 %v9033_v52, %v6946_v56  ;;  %v6960_v1 = vshll.u32 %v9032_v43, %v6945_v47  ;;  %v14255_v40 = vshll.u32 %v6939_v58, 8 }
 0x6eb   :  { %v6294_v27 = vxor.u32 2147483648, %v6293_v35  ;;  %v6959_v22 = vor.u32 %v6958_v55, %v6957_v4  ;;  %v6791_v13 = vsub.s32 0, %v14251_v15  ;;  %v6811_v46 = vsub.s32 4, %v14239_v19 }
 0x6ec   :  { %v6947_v30 = vshrl.u32 %v9028_v18, %v6946_v56  ;;  %v6832_v14 = vshrl.u32 %v6831_v59, 23  ;;  %vm6727_vm12 = vcmp.lt.s32.totalorder %v14034_v3, 0  ;;  %v6962_v25 = vor.u32 %v6961_v41, %v6960_v1 }
 0x6ed   :  { %v6295_v7 = vsel %vm6212_vm4, %v6294_v27, %v6293_v35  ;;  %vm6963_vm13 = vcmp.lt.s32.totalorder %v6944_v50, 1  ;;  %vm6966_vm0 = vcmp.lt.s32.totalorder %v6944_v50, 4  ;;  %v8306_v39 = vmin.u32 %v6791_v13, %v14251_v15 }
 0x6ee   :  { %v6298_v47 = vsel %vm14222_vm11, %v14016_v17, %v6295_v7  ;;  %v6968_v58 = vsel %vm6966_vm0, %v6956_v26, 2102212464  ;;  %v6971_v6 = vsel %vm6963_vm13, %v6950_v57, %v6953_v24  ;;  %vm6964_vm14 = vcmp.lt.s32.totalorder %v6944_v50, 2 }
 0x6ef   :  { %8967 = vcosq.f32 %v6298_v47  ;;  %vm6965_vm1 = vcmp.lt.s32.totalorder %v6944_v50, 3  ;;  %v6972_v56 = vsel %vm6966_vm0, %v6959_v22, 920167782  ;;  %v6793_v12 = vclz %v8306_v39 }
 0x6f0   :  { %8969 = vsinq.f32 %v6298_v47  ;;  %v6967_v63 = vsel %vm6963_vm13, %v6947_v30, %v6950_v57  ;;  %v6973_v20 = vsel %vm6965_vm1, %v6956_v26, %v6972_v56  ;;  %v6969_v37 = vsel %vm6965_vm1, %v6953_v24, %v6968_v58 }
 0x6f1   :  { %v6974_v23 = vsel %vm6964_vm14, %v6971_v6, %v6973_v20  ;;  %v6975_v55 = vsel %vm6963_vm13, %v6953_v24, %v6956_v26  ;;  %v6976_v34 = vsel %vm6966_vm0, %v6962_v25, 1326507024  ;;  %v8307_v36 = vadd.s32 4294967294, %v6793_v12 }
 0x6f2   :  { %v6977_v8 = vsel %vm6965_vm1, %v6959_v22, %v6976_v34  ;;  %v14275_v59 = vmul.u32.u64.low %v14255_v40, %v6974_v23  ;;  %v14276_v35 = vmul.u32.u64.high %v14255_v40, %v6974_v23, %v14275_v59  ;;  %vm14281_vm15 = vcmp.le.f32.partialorder %v6725_v48, 0.7853982 }
 0x6f3   :  { %v6978_v57 = vsel %vm6964_vm14, %v6975_v55, %v6977_v8  ;;  %v6828_v41 = vand.u32 2147483647, %v14230_v2  ;;  %v8309_v24 = vadd.s32 4294967169, %v6832_v14  ;;  %vm8308_vm2 = vcmp.lt.s32.totalorder %v8307_v36, 0 }
 0x6f4   :  { %v6970_v26 = vsel %vm6964_vm14, %v6967_v63, %v6969_v37  ;;  %v14289_v27 = vmul.u32.u64.low %v14255_v40, %v6978_v57  ;;  %v14290_v22 = vmul.u32.u64.high %v14255_v40, %v6978_v57, %v14289_v27  ;;  %v6303_v48 = vand.u32 3, %v6299_v11 }
 0x6f5   :  { %v6781_v1 = vadd.s32 %v14186_v49, %v14193_v5  ;;  %v6796_v13 = vsel %vm8308_vm2, 0, %v8307_v36  ;;  %v6838_v30 = vadd.s32 1, %v8309_v24  ;;  %vm6302_vm3 = vweird.f32 %v14016_v17 }
 0x6f6   :  { %v6797_v14 = vsub.s32 32, %v6796_v13  ;;  %v6801_v7 = vsub.s32 4294967266, %v6796_v13  ;;  %v6812_v50 = vsel %vm6727_vm12, %v6811_v46, %v14239_v19  ;;  %v6989_v25 = vadd.s32 1, %v14276_v35 }
 0x6f7   :  { %v6986_v53 = vmul.u32 %v14255_v40, %v6970_v26  ;;  %v6835_v54 = vand.u32 8388607, %v6828_v41  ;;  %vm6839_vm4 = vcmp.gt.s32.totalorder %v6838_v30, 0  ;;  %v14308_v49 = vadd.f32 %v12330_v16, %v14237_v61 }
 0x6f8   :  { %v6798_v5 = vshll.u32 %v14251_v15, %v6796_v13  ;;  %v6799_v11 = vshrl.u32 %v6781_v1, %v6797_v14  ;;  %v6802_v47 = vadd.s32 127, %v6801_v7  ;;  %vm6988_vm5 = vc.u32 %v14290_v22, %v14275_v59 }
 0x6f9   :  { %v8968_v19 = vpop.eup %8967  ;;  %vm6305_vm6 = vcmp.eq.s32.totalorder %v6303_v48, 0  ;;  %v6814_v40 = vsel %vm14281_vm15, 0, %v6812_v50  ;;  %v6990_v46 = vsel %vm6988_vm5, %v6989_v25, %v14276_v35  ;;  %v6840_v39 = vsel %vm6839_vm4, %v6838_v30, 0 }
 0x6fa   :  { %v8970_v58 = vpop.eup %8969  ;;  %v6309_v6 = vxor.u32 2147483648, %v8968_v19  ;;  %v6800_v56 = vor.u32 %v6799_v11, %v6798_v5  ;;  %v6803_v61 = vshll.u32 %v6802_v47, 23  ;;  %v6991_v12 = vadd.s32 %v6990_v46, %v6986_v53 }
 0x6fb   :  { %v6306_v63 = vxor.u32 2147483648, %v8970_v58  ;;  %vm6308_vm7 = vcmp.eq.s32.totalorder %v6303_v48, 2  ;;  %v6836_v15 = vor.u32 8388608, %v6835_v54  ;;  %v6842_v20 = vand.u32 31, %v6840_v39 }
 0x6fc   :  { %v6310_v37 = vsel %vm6308_vm7, %v6309_v6, %v8970_v58  ;;  %v6804_v23 = vor.u32 4788187, %v6803_v61  ;;  %v6992_v55 = vadd.s32 536870912, %v6991_v12  ;;  %v7037_v34 = vand.u32 2139095040, %v14308_v49 }
 0x6fd   :  { %vm6304_vm8 = vcmp.lt.s32.totalorder %v6303_v48, 2  ;;  %v6307_v36 = vsel %vm6305_vm6, %v8968_v19, %v6306_v63  ;;  %v14318_v8 = vand.u32 3, %v6814_v40  ;;  %v6843_v35 = vsub.s32 32, %v6842_v20 }
 0x6fe   :  { %v6311_v57 = vsel %vm6304_vm8, %v6307_v36, %v6310_v37  ;;  %v6805_v24 = vand.u32 2147483647, %v6804_v23  ;;  %v6807_v26 = vcvt.s32.f32 %v6800_v56  ;;  %v14320_v27 = vshrl.u32 %v6992_v55, 30 }
 0x6ff   :  { %v6312_v1 = vsel %vm6302_vm3, nan, %v6311_v57  ;;  %v6846_v13 = vshrl.u32 %v9029_v29, %v6843_v35  ;;  %v6849_v30 = vshrl.u32 %v9030_v31, %v6843_v35  ;;  %v14326_v14 = vshll.u32 %v6836_v15, 8 }
 0x700   :  { %8008 = vst [vmem:[#allocation2 + $0x178] sm:$0xff] %v6312_v1  ;;  %v6808_v48 = vmul.f32 %v6807_v26, %v6805_v24  ;;  %v6994_v7 = vshll.u32 %v14320_v27, 30  ;;  %v6852_v50 = vshrl.u32 %v9031_v33, %v6843_v35  ;;  %v7038_v25 = vshrl.u32 %v7037_v34, 23 }
 0x701   :  { %v6841_v53 = vshrl.u32 %v6840_v39, 5  ;;  %v6845_v54 = vshll.u32 %v9028_v18, %v6842_v20  ;;  %v6848_v5 = vshll.u32 %v9029_v29, %v6842_v20  ;;  %v6855_v17 = vshrl.u32 %v9032_v43, %v6843_v35 }
 0x702   :  { %v6809_v11 = vxor.u32 2147483648, %v6808_v48  ;;  %v14333_v47 = vsub.s32 %v6991_v12, %v6994_v7  ;;  %v6851_v19 = vshll.u32 %v9030_v31, %v6842_v20  ;;  %v6854_v40 = vshll.u32 %v9031_v33, %v6842_v20 }
 0x703   :  { %v6847_v46 = vor.u32 %v6846_v13, %v6845_v54  ;;  %v6850_v58 = vor.u32 %v6849_v30, %v6848_v5  ;;  %v6857_v6 = vshll.u32 %v9032_v43, %v6842_v20  ;;  %v6858_v56 = vshrl.u32 %v9033_v52, %v6843_v35 }
 0x704   :  { %v6810_v39 = vsel %vm6727_vm12, %v6809_v11, %v6808_v48  ;;  %v6997_v61 = vsub.s32 0, %v14333_v47  ;;  %v6853_v63 = vor.u32 %v6852_v50, %v6851_v19  ;;  %v6856_v15 = vor.u32 %v6855_v17, %v6854_v40 }
 0x705   :  { %v6813_v12 = vsel %vm14281_vm15, %v14034_v3, %v6810_v39  ;;  %v6844_v37 = vshrl.u32 %v9028_v18, %v6843_v35  ;;  %v6859_v23 = vor.u32 %v6858_v56, %v6857_v6  ;;  %v8317_v55 = vadd.s32 4294967169, %v7038_v25 }
 0x706   :  { %8971 = vcosq.f32 %v6813_v12  ;;  %v8314_v20 = vmin.u32 %v6997_v61, %v14333_v47  ;;  %vm6860_vm10 = vcmp.lt.s32.totalorder %v6841_v53, 1  ;;  %vm6861_vm9 = vcmp.lt.s32.totalorder %v6841_v53, 2 }
 0x707   :  { %8973 = vsinq.f32 %v6813_v12  ;;  %vm6862_vm11 = vcmp.lt.s32.totalorder %v6841_v53, 3  ;;  %vm6863_vm12 = vcmp.lt.s32.totalorder %v6841_v53, 4  ;;  %v6864_v34 = vsel %vm6860_vm10, %v6844_v37, %v6847_v46 }
 0x708   :  { %v6999_v36 = vclz %v8314_v20  ;;  %v6865_v57 = vsel %vm6863_vm12, %v6853_v63, 2102212464  ;;  %v6868_v24 = vsel %vm6860_vm10, %v6847_v46, %v6850_v58  ;;  %v6869_v26 = vsel %vm6863_vm12, %v6856_v15, 920167782 }
 0x709   :  { %v6866_v1 = vsel %vm6862_vm11, %v6850_v58, %v6865_v57  ;;  %v6870_v4 = vsel %vm6862_vm11, %v6853_v63, %v6869_v26  ;;  %v6872_v13 = vsel %vm6860_vm10, %v6850_v58, %v6853_v63  ;;  %v6873_v30 = vsel %vm6863_vm12, %v6859_v23, 1326507024 }
 0x70a   :  { %v8315_v35 = vadd.s32 4294967294, %v6999_v36  ;;  %v6871_v48 = vsel %vm6861_vm9, %v6868_v24, %v6870_v4  ;;  %v6874_v7 = vsel %vm6862_vm11, %v6856_v15, %v6873_v30  ;;  %v7034_v50 = vand.u32 2147483647, %v14308_v49 }
 0x70b   :  { %v6867_v25 = vsel %vm6861_vm9, %v6864_v34, %v6866_v1  ;;  %v6875_v54 = vsel %vm6861_vm9, %v6872_v13, %v6874_v7  ;;  %v14352_v5 = vmul.u32.u64.low %v14326_v14, %v6871_v48  ;;  %v14353_v17 = vmul.u32.u64.high %v14326_v14, %v6871_v48, %v14352_v5 }
 0x70c   :  { %vm14358_vm13 = vcmp.le.f32.partialorder %v6931_v10, 0.7853982  ;;  %vm8316_vm0 = vcmp.lt.s32.totalorder %v8315_v35, 0  ;;  %v14363_v19 = vmul.u32.u64.low %v14326_v14, %v6875_v54  ;;  %v14364_v40 = vmul.u32.u64.high %v14326_v14, %v6875_v54, %v14363_v19 }
 0x70d   :  { %v7044_v46 = vadd.s32 1, %v8317_v55  ;;  %vm6817_vm14 = vweird.f32 %v14034_v3  ;;  %vm6823_vm1 = vcmp.eq.s32.totalorder %v14318_v8, 2  ;;  %vm6933_vm15 = vcmp.lt.s32.totalorder %v14070_v51, 0 }
 0x70e   :  { %v7002_v53 = vsel %vm8316_vm0, 0, %v8315_v35  ;;  %v7017_v58 = vsub.s32 4, %v14320_v27  ;;  %v6987_v10 = vadd.s32 %v14275_v59, %v14290_v22  ;;  %v6883_v39 = vmul.u32 %v14326_v14, %v6867_v25 }
 0x70f   :  { %v7003_v6 = vsub.s32 32, %v7002_v53  ;;  %v7007_v56 = vsub.s32 4294967266, %v7002_v53  ;;  %vm7045_vm2 = vcmp.gt.s32.totalorder %v7044_v46, 0  ;;  %v6886_v61 = vadd.s32 1, %v14353_v17 }
 0x710   :  { %v7041_v63 = vand.u32 8388607, %v7034_v50  ;;  %v7046_v15 = vsel %vm7045_vm2, %v7044_v46, 0  ;;  %v8972_v12 = vpop.eup %8971  ;;  %v7004_v37 = vshll.u32 %v14333_v47, %v7002_v53  ;;  %vm6885_vm3 = vc.u32 %v14364_v40, %v14352_v5 }
 0x711   :  { %v7005_v23 = vshrl.u32 %v6987_v10, %v7003_v6  ;;  %v7008_v55 = vadd.s32 127, %v7007_v56  ;;  %v8974_v59 = vpop.eup %8973  ;;  %v6824_v22 = vxor.u32 2147483648, %v8972_v12  ;;  %v7018_v14 = vsel %vm6933_vm15, %v7017_v58, %v14320_v27 }
 0x712   :  { %v6887_v20 = vsel %vm6885_vm3, %v6886_v61, %v14353_v17  ;;  %v7048_v34 = vand.u32 31, %v7046_v15  ;;  %v6821_v36 = vxor.u32 2147483648, %v8974_v59  ;;  %vm6819_vm4 = vcmp.lt.s32.totalorder %v14318_v8, 2 }
 0x713   :  { %v7006_v57 = vor.u32 %v7005_v23, %v7004_v37  ;;  %v7009_v24 = vshll.u32 %v7008_v55, 23  ;;  %v6888_v26 = vadd.s32 %v6887_v20, %v6883_v39  ;;  %vm6820_vm5 = vcmp.eq.s32.totalorder %v14318_v8, 0 }
 0x714   :  { %v6825_v47 = vsel %vm6823_vm1, %v6824_v22, %v8974_v59  ;;  %v7049_v1 = vsub.s32 32, %v7048_v34  ;;  %v6822_v4 = vsel %vm6820_vm5, %v8972_v12, %v6821_v36  ;;  %v7042_v35 = vor.u32 8388608, %v7041_v63 }
 0x715   :  { %v7010_v13 = vor.u32 4788187, %v7009_v24  ;;  %v6889_v30 = vadd.s32 536870912, %v6888_v26  ;;  %v6826_v27 = vsel %vm6819_vm4, %v6822_v4, %v6825_v47  ;;  %v7013_v48 = vcvt.s32.f32 %v7006_v57 }
 0x716   :  { %v7020_v7 = vsel %vm14358_vm13, 0, %v7018_v14  ;;  %v7052_v25 = vshrl.u32 %v9029_v29, %v7049_v1  ;;  %v6827_v54 = vsel %vm6817_vm14, nan, %v6826_v27  ;;  %v7055_v8 = vshrl.u32 %v9030_v31, %v7049_v1 }
 0x717   :  { %v7011_v17 = vand.u32 2147483647, %v7010_v13  ;;  %v14392_v19 = vshrl.u32 %v6889_v30, 30  ;;  %8013 = vst [vmem:[#allocation2 + $0x1a0] sm:$0xff] %v6827_v54  ;;  %v7051_v46 = vshll.u32 %v9028_v18, %v7048_v34  ;;  %v7054_v53 = vshll.u32 %v9029_v29, %v7048_v34 }
 0x718   :  { %v7058_v58 = vshrl.u32 %v9031_v33, %v7049_v1  ;;  %v1229_v10 = vmul.f32 %v11951_v45, %v13940_v62  ;;  %v7057_v3 = vshll.u32 %v9030_v31, %v7048_v34  ;;  %v7061_v39 = vshrl.u32 %v9032_v43, %v7049_v1 }
 0x719   :  { %v7014_v6 = vmul.f32 %v7013_v48, %v7011_v17  ;;  %v6891_v56 = vshll.u32 %v14392_v19, 30  ;;  %v7047_v61 = vshrl.u32 %v7046_v15, 5  ;;  %v7053_v63 = vor.u32 %v7052_v25, %v7051_v46 }
 0x71a   :  { %v7060_v12 = vshll.u32 %v9031_v33, %v7048_v34  ;;  %v7064_v37 = vshrl.u32 %v9033_v52, %v7049_v1  ;;  %v7056_v59 = vor.u32 %v7055_v8, %v7054_v53  ;;  %v7059_v22 = vor.u32 %v7058_v58, %v7057_v3 }
 0x71b   :  { %v7015_v23 = vxor.u32 2147483648, %v7014_v6  ;;  %v14405_v55 = vsub.s32 %v6888_v26, %v6891_v56  ;;  %v14407_v14 = vand.u32 3, %v7020_v7  ;;  %v7063_v62 = vshll.u32 %v9032_v43, %v7048_v34 }
 0x71c   :  { %v7062_v45 = vor.u32 %v7061_v39, %v7060_v12  ;;  %v7082_v36 = vshll.u32 %v7042_v35, 8  ;;  %v14414_v57 = vadd.f32 %v11957_v44, %v1229_v10  ;;  %vm7066_vm6 = vcmp.lt.s32.totalorder %v7047_v61, 1 }
 0x71d   :  { %v7016_v20 = vsel %vm6933_vm15, %v7015_v23, %v7014_v6  ;;  %v6894_v15 = vsub.s32 0, %v14405_v55  ;;  %v7065_v26 = vor.u32 %v7064_v37, %v7063_v62  ;;  %vm7069_vm7 = vcmp.lt.s32.totalorder %v7047_v61, 4 }
 0x71e   :  { %v7019_v24 = vsel %vm14358_vm13, %v14070_v51, %v7016_v20  ;;  %v7071_v34 = vsel %vm7069_vm7, %v7059_v22, 2102212464  ;;  %v7074_v4 = vsel %vm7066_vm6, %v7053_v63, %v7056_v59  ;;  %v7050_v13 = vshrl.u32 %v9028_v18, %v7049_v1 }
 0x71f   :  { %8975 = vcosq.f32 %v7019_v24  ;;  %v8310_v47 = vmin.u32 %v6894_v15, %v14405_v55  ;;  %vm7068_vm8 = vcmp.lt.s32.totalorder %v7047_v61, 3  ;;  %v7075_v44 = vsel %vm7069_vm7, %v7062_v45, 920167782 }
 0x720   :  { %8977 = vsinq.f32 %v7019_v24  ;;  %vm7067_vm10 = vcmp.lt.s32.totalorder %v7047_v61, 2  ;;  %v7076_v35 = vsel %vm7068_vm8, %v7059_v22, %v7075_v44  ;;  %v7078_v11 = vsel %vm7066_vm6, %v7056_v59, %v7059_v22 }
 0x721   :  { %v6896_v30 = vclz %v8310_v47  ;;  %v7070_v27 = vsel %vm7066_vm6, %v7050_v13, %v7053_v63  ;;  %v7072_v48 = vsel %vm7068_vm8, %v7056_v59, %v7071_v34  ;;  %v7077_v7 = vsel %vm7067_vm10, %v7074_v4, %v7076_v35 }
 0x722   :  { %v7079_v25 = vsel %vm7069_vm7, %v7065_v26, 1326507024  ;;  %v14425_v8 = vmul.u32.u64.low %v7082_v36, %v7077_v7  ;;  %v14426_v46 = vmul.u32.u64.high %v7082_v36, %v7077_v7, %v14425_v8  ;;  %vm6830_vm9 = vcmp.lt.s32.totalorder %v14230_v2, 0 }
 0x723   :  { %v8311_v54 = vadd.s32 4294967294, %v6896_v30  ;;  %v7080_v17 = vsel %vm7068_vm8, %v7062_v45, %v7079_v25  ;;  %v6914_v1 = vsub.s32 4, %v14392_v19  ;;  %v7552_v58 = vand.u32 2139095040, %v14414_v57 }
 0x724   :  { %v7081_v53 = vsel %vm7067_vm10, %v7078_v11, %v7080_v17  ;;  %vm14434_vm11 = vcmp.le.f32.partialorder %v6828_v41, 0.7853982  ;;  %v7073_v6 = vsel %vm7067_vm10, %v7070_v27, %v7072_v48  ;;  %vm7023_vm13 = vweird.f32 %v14070_v51 }
 0x725   :  { %vm8312_vm12 = vcmp.lt.s32.totalorder %v8311_v54, 0  ;;  %v14439_v56 = vmul.u32.u64.low %v7082_v36, %v7081_v53  ;;  %v14440_v3 = vmul.u32.u64.high %v7082_v36, %v7081_v53, %v14439_v56  ;;  %vm7029_vm0 = vcmp.eq.s32.totalorder %v14407_v14, 2 }
 0x726   :  { %v6899_v39 = vsel %vm8312_vm12, 0, %v8311_v54  ;;  %v7553_v63 = vshrl.u32 %v7552_v58, 23  ;;  %v1231_v12 = vmul.f32 %v12106_v42, %v14026_v32  ;;  %v6884_v41 = vadd.s32 %v14352_v5, %v14364_v40 }
 0x727   :  { %v6900_v37 = vsub.s32 32, %v6899_v39  ;;  %v6904_v23 = vsub.s32 4294967266, %v6899_v39  ;;  %v7092_v61 = vadd.s32 1, %v14426_v46  ;;  %v6915_v59 = vsel %vm6830_vm9, %v6914_v1, %v14392_v19 }
 0x728   :  { %v7089_v22 = vmul.u32 %v7082_v36, %v7073_v6  ;;  %v7549_v45 = vand.u32 2147483647, %v14414_v57  ;;  %v8337_v62 = vadd.s32 4294967169, %v7553_v63  ;;  %v6901_v15 = vshll.u32 %v14405_v55, %v6899_v39 }
 0x729   :  { %v8976_v20 = vpop.eup %8975  ;;  %v6902_v24 = vshrl.u32 %v6884_v41, %v6900_v37  ;;  %v6905_v42 = vadd.s32 127, %v6904_v23  ;;  %vm7091_vm14 = vc.u32 %v14440_v3, %v14425_v8  ;;  %v14457_v47 = vadd.f32 %v12118_v28, %v1231_v12 }
 0x72a   :  { %v8978_v32 = vpop.eup %8977  ;;  %v7030_v5 = vxor.u32 2147483648, %v8976_v20  ;;  %v7093_v40 = vsel %vm7091_vm14, %v7092_v61, %v14426_v46  ;;  %v7559_v26 = vadd.s32 1, %v8337_v62  ;;  %vm7025_vm1 = vcmp.lt.s32.totalorder %v14407_v14, 2 }
 0x72b   :  { %v7027_v19 = vxor.u32 2147483648, %v8978_v32  ;;  %v6903_v36 = vor.u32 %v6902_v24, %v6901_v15  ;;  %v6906_v34 = vshll.u32 %v6905_v42, 23  ;;  %v7094_v4 = vadd.s32 %v7093_v40, %v7089_v22 }
 0x72c   :  { %vm7026_vm15 = vcmp.eq.s32.totalorder %v14407_v14, 0  ;;  %v7031_v55 = vsel %vm7029_vm0, %v7030_v5, %v8978_v32  ;;  %vm7560_vm2 = vcmp.gt.s32.totalorder %v7559_v26, 0  ;;  %v7556_v35 = vand.u32 8388607, %v7549_v45 }
 0x72d   :  { %v7028_v13 = vsel %vm7026_vm15, %v8976_v20, %v7027_v19  ;;  %v6907_v44 = vor.u32 4788187, %v6906_v34  ;;  %v7095_v30 = vadd.s32 536870912, %v7094_v4  ;;  %v6917_v11 = vsel %vm14434_vm11, 0, %v6915_v59 }
 0x72e   :  { %v7032_v28 = vsel %vm7025_vm1, %v7028_v13, %v7031_v55  ;;  %v7561_v27 = vsel %vm7560_vm2, %v7559_v26, 0  ;;  %v7758_v48 = vand.u32 2139095040, %v14457_v47  ;;  %v6910_v14 = vcvt.s32.f32 %v6903_v36 }
 0x72f   :  { %v7033_v7 = vsel %vm7023_vm13, nan, %v7032_v28  ;;  %v6908_v25 = vand.u32 2147483647, %v6907_v44  ;;  %v14470_v54 = vshrl.u32 %v7095_v30, 30  ;;  %v7563_v17 = vand.u32 31, %v7561_v27 }
 0x730   :  { %8015 = vst [vmem:[#allocation2 + $0x1b0] sm:$0xff] %v7033_v7  ;;  %v14472_v1 = vand.u32 3, %v6917_v11  ;;  %v7557_v58 = vor.u32 8388608, %v7556_v35  ;;  %v14476_v6 = vadd.s32 %v14425_v8, %v14440_v3  ;;  %v7755_v39 = vand.u32 2147483647, %v14457_v47 }
 0x731   :  { %v6911_v46 = vmul.f32 %v6910_v14, %v6908_v25  ;;  %v7097_v53 = vshll.u32 %v14470_v54, 30  ;;  %v7564_v56 = vsub.s32 32, %v7563_v17  ;;  %v7759_v51 = vshrl.u32 %v7758_v48, 23 }
 0x732   :  { %v7562_v41 = vshrl.u32 %v7561_v27, 5  ;;  %v7566_v37 = vshll.u32 %v9028_v18, %v7563_v17  ;;  %v7569_v61 = vshll.u32 %v9029_v29, %v7563_v17  ;;  %v7572_v22 = vshll.u32 %v9030_v31, %v7563_v17 }
 0x733   :  { %v6912_v63 = vxor.u32 2147483648, %v6911_v46  ;;  %v14479_v12 = vsub.s32 %v7094_v4, %v7097_v53  ;;  %v7567_v23 = vshrl.u32 %v9029_v29, %v7564_v56  ;;  %v7570_v59 = vshrl.u32 %v9030_v31, %v7564_v56 }
 0x734   :  { %v7573_v62 = vshrl.u32 %v9031_v33, %v7564_v56  ;;  %v7575_v20 = vshll.u32 %v9031_v33, %v7563_v17  ;;  %v7576_v32 = vshrl.u32 %v9032_v43, %v7564_v56  ;;  %v14496_v40 = vshll.u32 %v7557_v58, 8 }
 0x735   :  { %v6913_v8 = vsel %vm6830_vm9, %v6912_v63, %v6911_v46  ;;  %v7100_v3 = vsub.s32 0, %v14479_v12  ;;  %v7568_v24 = vor.u32 %v7567_v23, %v7566_v37  ;;  %v7571_v42 = vor.u32 %v7570_v59, %v7569_v61 }
 0x736   :  { %v6916_v15 = vsel %vm14434_vm11, %v14230_v2, %v6913_v8  ;;  %v8345_v26 = vadd.s32 4294967169, %v7759_v51  ;;  %v7574_v19 = vor.u32 %v7573_v62, %v7572_v22  ;;  %v7577_v36 = vor.u32 %v7576_v32, %v7575_v20 }
 0x737   :  { %8979 = vcosq.f32 %v6916_v15  ;;  %v8318_v5 = vmin.u32 %v7100_v3, %v14479_v12  ;;  %vm7581_vm3 = vcmp.lt.s32.totalorder %v7562_v41, 1  ;;  %v7565_v4 = vshrl.u32 %v9028_v18, %v7564_v56 }
 0x738   :  { %8981 = vsinq.f32 %v6916_v15  ;;  %v7578_v10 = vshll.u32 %v9032_v43, %v7563_v17  ;;  %v7579_v55 = vshrl.u32 %v9033_v52, %v7564_v56  ;;  %vm7582_vm4 = vcmp.lt.s32.totalorder %v7562_v41, 2 }
 0x739   :  { %v7102_v34 = vclz %v8318_v5  ;;  %vm7583_vm5 = vcmp.lt.s32.totalorder %v7562_v41, 3  ;;  %vm7584_vm6 = vcmp.lt.s32.totalorder %v7562_v41, 4  ;;  %v7589_v13 = vsel %vm7581_vm3, %v7568_v24, %v7571_v42 }
 0x73a   :  { %v7580_v30 = vor.u32 %v7579_v55, %v7578_v10  ;;  %v7586_v35 = vsel %vm7584_vm6, %v7574_v19, 2102212464  ;;  %v7590_v28 = vsel %vm7584_vm6, %v7577_v36, 920167782  ;;  %vm6923_vm7 = vcmp.eq.s32.totalorder %v14472_v1, 0 }
 0x73b   :  { %v8319_v44 = vadd.s32 4294967294, %v7102_v34  ;;  %vm7036_vm8 = vcmp.lt.s32.totalorder %v14308_v49, 0  ;;  %v7585_v11 = vsel %vm7581_vm3, %v7565_v4, %v7568_v24  ;;  %v7591_v27 = vsel %vm7583_vm5, %v7574_v19, %v7590_v28 }
 0x73c   :  { %v7593_v48 = vsel %vm7581_vm3, %v7571_v42, %v7574_v19  ;;  %v7765_v7 = vadd.s32 1, %v8345_v26  ;;  %vm6922_vm10 = vcmp.lt.s32.totalorder %v14472_v1, 2  ;;  %v7587_v25 = vsel %vm7583_vm5, %v7571_v42, %v7586_v35 }
 0x73d   :  { %vm8320_vm9 = vcmp.lt.s32.totalorder %v8319_v44, 0  ;;  %v7592_v14 = vsel %vm7582_vm4, %v7589_v13, %v7591_v27  ;;  %v7594_v17 = vsel %vm7584_vm6, %v7580_v30, 1326507024  ;;  %v7120_v37 = vsub.s32 4, %v14470_v54 }
 0x73e   :  { %v7105_v46 = vsel %vm8320_vm9, 0, %v8319_v44  ;;  %v7595_v53 = vsel %vm7583_vm5, %v7577_v36, %v7594_v17  ;;  %v14515_v58 = vmul.u32.u64.low %v14496_v40, %v7592_v14  ;;  %v14516_v56 = vmul.u32.u64.high %v14496_v40, %v7592_v14, %v14515_v58 }
 0x73f   :  { %v7106_v51 = vsub.s32 32, %v7105_v46  ;;  %v7110_v63 = vsub.s32 4294967266, %v7105_v46  ;;  %v7596_v23 = vsel %vm7582_vm4, %v7593_v48, %v7595_v53  ;;  %v7588_v61 = vsel %vm7582_vm4, %v7585_v11, %v7587_v25 }
 0x740   :  { %v14523_v59 = vmul.u32.u64.low %v14496_v40, %v7596_v23  ;;  %v14524_v22 = vmul.u32.u64.high %v14496_v40, %v7596_v23, %v14523_v59  ;;  %vm7766_vm11 = vcmp.gt.s32.totalorder %v7765_v7, 0  ;;  %v7107_v3 = vshll.u32 %v14479_v12, %v7105_v46 }
 0x741   :  { %v8980_v8 = vpop.eup %8979  ;;  %v7108_v62 = vshrl.u32 %v14476_v6, %v7106_v51  ;;  %v7111_v20 = vadd.s32 127, %v7110_v63  ;;  %v7767_v15 = vsel %vm7766_vm11, %v7765_v7, 0  ;;  %vm6926_vm12 = vcmp.eq.s32.totalorder %v14472_v1, 2 }
 0x742   :  { %v8982_v24 = vpop.eup %8981  ;;  %v6927_v42 = vxor.u32 2147483648, %v8980_v8  ;;  %v7607_v32 = vadd.s32 1, %v14516_v56  ;;  %v7769_v41 = vand.u32 31, %v7767_v15  ;;  %v7762_v36 = vand.u32 8388607, %v7755_v39 }
 0x743   :  { %v6924_v5 = vxor.u32 2147483648, %v8982_v24  ;;  %v7109_v26 = vor.u32 %v7108_v62, %v7107_v3  ;;  %v7112_v19 = vshll.u32 %v7111_v20, 23  ;;  %v7604_v12 = vmul.u32 %v14496_v40, %v7588_v61 }
 0x744   :  { %v6928_v34 = vsel %vm6926_vm12, %v6927_v42, %v8982_v24  ;;  %vm7606_vm13 = vc.u32 %v14524_v22, %v14515_v58  ;;  %v7770_v6 = vsub.s32 32, %v7769_v41  ;;  %v7121_v55 = vsel %vm7036_vm8, %v7120_v37, %v14470_v54 }
 0x745   :  { %v6925_v4 = vsel %vm6923_vm7, %v8980_v8, %v6924_v5  ;;  %v7113_v10 = vor.u32 4788187, %v7112_v19  ;;  %v7608_v13 = vsel %vm7606_vm13, %v7607_v32, %v14516_v56  ;;  %vm6920_vm0 = vweird.f32 %v14230_v2 }
 0x746   :  { %v6929_v44 = vsel %vm6922_vm10, %v6925_v4, %v6928_v34  ;;  %vm14546_vm14 = vcmp.le.f32.partialorder %v7034_v50, 0.7853982  ;;  %v7609_v30 = vadd.s32 %v7608_v13, %v7604_v12  ;;  %v7116_v11 = vcvt.s32.f32 %v7109_v26 }
 0x747   :  { %v6930_v35 = vsel %vm6920_vm0, nan, %v6929_v44  ;;  %v7114_v28 = vand.u32 2147483647, %v7113_v10  ;;  %v7763_v27 = vor.u32 8388608, %v7762_v36  ;;  %v7123_v54 = vsel %vm14546_vm14, 0, %v7121_v55 }
 0x748   :  { %8014 = vst [vmem:[#allocation2 + $0x1a8] sm:$0xff] %v6930_v35  ;;  %v7610_v48 = vadd.s32 536870912, %v7609_v30  ;;  %v7773_v2 = vshrl.u32 %v9029_v29, %v7770_v6  ;;  %v7779_v1 = vshrl.u32 %v9031_v33, %v7770_v6  ;;  %v7768_v25 = vshrl.u32 %v7767_v15, 5 }
 0x749   :  { %v7117_v7 = vmul.f32 %v7116_v11, %v7114_v28  ;;  %v7776_v50 = vshrl.u32 %v9030_v31, %v7770_v6  ;;  %v7782_v14 = vshrl.u32 %v9032_v43, %v7770_v6  ;;  %v7772_v46 = vshll.u32 %v9028_v18, %v7769_v41 }
 0x74a   :  { %v7611_v17 = vshrl.u32 %v7610_v48, 30  ;;  %v7775_v53 = vshll.u32 %v9029_v29, %v7769_v41  ;;  %v7778_v56 = vshll.u32 %v9030_v31, %v7769_v41  ;;  %v7781_v63 = vshll.u32 %v9031_v33, %v7769_v41 }
 0x74b   :  { %v7118_v51 = vxor.u32 2147483648, %v7117_v7  ;;  %v7784_v37 = vshll.u32 %v9032_v43, %v7769_v41  ;;  %v7785_v23 = vshrl.u32 %v9033_v52, %v7770_v6  ;;  %v7774_v59 = vor.u32 %v7773_v2, %v7772_v46 }
 0x74c   :  { %v7612_v61 = vshll.u32 %v7611_v17, 30  ;;  %v7780_v8 = vor.u32 %v7779_v1, %v7778_v56  ;;  %v7777_v62 = vor.u32 %v7776_v50, %v7775_v53  ;;  %v7783_v20 = vor.u32 %v7782_v14, %v7781_v63 }
 0x74d   :  { %v7119_v3 = vsel %vm7036_vm8, %v7118_v51, %v7117_v7  ;;  %v7786_v15 = vor.u32 %v7785_v23, %v7784_v37  ;;  %v14567_v42 = vand.u32 3, %v7123_v54  ;;  %v7803_v41 = vshll.u32 %v7763_v27, 8 }
 0x74e   :  { %v7122_v24 = vsel %vm14546_vm14, %v14308_v49, %v7119_v3  ;;  %v14569_v32 = vsub.s32 %v7609_v30, %v7612_v61  ;;  %v7771_v5 = vshrl.u32 %v9028_v18, %v7770_v6  ;;  %vm7790_vm1 = vcmp.lt.s32.totalorder %v7768_v25, 4 }
 0x74f   :  { %8983 = vcosq.f32 %v7122_v24  ;;  %v1230_v26 = vmul.f32 %v12171_v9, %v14096_v0  ;;  %vm7787_vm15 = vcmp.lt.s32.totalorder %v7768_v25, 1  ;;  %v7792_v36 = vsel %vm7790_vm1, %v7780_v8, 2102212464 }
 0x750   :  { %8985 = vsinq.f32 %v7122_v24  ;;  %v7615_v19 = vsub.s32 0, %v14569_v32  ;;  %v7795_v34 = vsel %vm7787_vm15, %v7774_v59, %v7777_v62  ;;  %v7796_v12 = vsel %vm7790_vm1, %v7783_v20, 920167782 }
 0x751   :  { %v7799_v4 = vsel %vm7787_vm15, %v7777_v62, %v7780_v8  ;;  %v7800_v10 = vsel %vm7790_vm1, %v7786_v15, 1326507024  ;;  %vm7788_vm2 = vcmp.lt.s32.totalorder %v7768_v25, 2  ;;  %vm7789_vm3 = vcmp.lt.s32.totalorder %v7768_v25, 3 }
 0x752   :  { %v8338_v55 = vmin.u32 %v7615_v19, %v14569_v32  ;;  %v7791_v13 = vsel %vm7787_vm15, %v7771_v5, %v7774_v59  ;;  %v7793_v44 = vsel %vm7789_vm3, %v7777_v62, %v7792_v36  ;;  %v7797_v6 = vsel %vm7789_vm3, %v7780_v8, %v7796_v12 }
 0x753   :  { %v7801_v40 = vsel %vm7789_vm3, %v7783_v20, %v7800_v10  ;;  %v14577_v30 = vadd.f32 %v12201_v38, %v1230_v26  ;;  %v7635_v0 = vsub.s32 4, %v7611_v17  ;;  %v7798_v35 = vsel %vm7788_vm2, %v7795_v34, %v7797_v6 }
 0x754   :  { %v7617_v9 = vclz %v8338_v55  ;;  %v7802_v28 = vsel %vm7788_vm2, %v7799_v4, %v7801_v40  ;;  %v14582_v54 = vmul.u32.u64.low %v7803_v41, %v7798_v35  ;;  %v14583_v48 = vmul.u32.u64.high %v7803_v41, %v7798_v35, %v14582_v54 }
 0x755   :  { %v14579_v11 = vmul.u32.u64.low %v7803_v41, %v7802_v28  ;;  %v14580_v27 = vmul.u32.u64.high %v7803_v41, %v7802_v28, %v14579_v11  ;;  %v7794_v1 = vsel %vm7788_vm2, %v7791_v13, %v7793_v44  ;;  %v7655_v7 = vand.u32 2139095040, %v14577_v30 }
 0x756   :  { %v8339_v2 = vadd.s32 4294967294, %v7617_v9  ;;  %vm7126_vm4 = vweird.f32 %v14308_v49  ;;  %vm7129_vm5 = vcmp.eq.s32.totalorder %v14567_v42, 0  ;;  %vm7132_vm6 = vcmp.eq.s32.totalorder %v14567_v42, 2 }
 0x757   :  { %vm7551_vm7 = vcmp.lt.s32.totalorder %v14414_v57, 0  ;;  %v7605_v38 = vadd.s32 %v14515_v58, %v14524_v22  ;;  %v7656_v50 = vshrl.u32 %v7655_v7, 23  ;;  %v7810_v53 = vmul.u32 %v7803_v41, %v7794_v1 }
 0x758   :  { %vm8340_vm8 = vcmp.lt.s32.totalorder %v8339_v2, 0  ;;  %v7636_v25 = vsel %vm7551_vm7, %v7635_v0, %v7611_v17  ;;  %vm7812_vm10 = vc.u32 %v14580_v27, %v14582_v54  ;;  %v7813_v56 = vadd.s32 1, %v14583_v48 }
 0x759   :  { %v8984_v14 = vpop.eup %8983  ;;  %v7620_v46 = vsel %vm8340_vm8, 0, %v8339_v2  ;;  %v7652_v61 = vand.u32 2147483647, %v14577_v30  ;;  %v8341_v17 = vadd.s32 4294967169, %v7656_v50  ;;  %vm7128_vm9 = vcmp.lt.s32.totalorder %v14567_v42, 2 }
 0x75a   :  { %v8986_v51 = vpop.eup %8985  ;;  %v7133_v63 = vxor.u32 2147483648, %v8984_v14  ;;  %v7621_v37 = vsub.s32 32, %v7620_v46  ;;  %v7625_v23 = vsub.s32 4294967266, %v7620_v46  ;;  %v7622_v58 = vshll.u32 %v14569_v32, %v7620_v46 }
 0x75b   :  { %v7130_v59 = vxor.u32 2147483648, %v8986_v51  ;;  %v7814_v22 = vsel %vm7812_vm10, %v7813_v56, %v14583_v48  ;;  %vm14606_vm11 = vcmp.le.f32.partialorder %v7549_v45, 0.7853982  ;;  %v7662_v32 = vadd.s32 1, %v8341_v17 }
 0x75c   :  { %v7134_v8 = vsel %vm7132_vm6, %v7133_v63, %v8986_v51  ;;  %v7623_v3 = vshrl.u32 %v7605_v38, %v7621_v37  ;;  %v7626_v62 = vadd.s32 127, %v7625_v23  ;;  %v7815_v20 = vadd.s32 %v7814_v22, %v7810_v53 }
 0x75d   :  { %v7131_v15 = vsel %vm7129_vm5, %v8984_v14, %v7130_v59  ;;  %v7638_v34 = vsel %vm14606_vm11, 0, %v7636_v25  ;;  %vm7663_vm12 = vcmp.gt.s32.totalorder %v7662_v32, 0  ;;  %v1232_v42 = vmul.f32 %v12282_v21, %v14183_v60 }
 0x75e   :  { %v7135_v41 = vsel %vm7128_vm9, %v7131_v15, %v7134_v8  ;;  %v7624_v5 = vor.u32 %v7623_v3, %v7622_v58  ;;  %v7627_v26 = vshll.u32 %v7626_v62, 23  ;;  %v7816_v19 = vadd.s32 536870912, %v7815_v20 }
 0x75f   :  { %v7136_v36 = vsel %vm7126_vm4, nan, %v7135_v41  ;;  %v7659_v4 = vand.u32 8388607, %v7652_v61  ;;  %v7664_v10 = vsel %vm7663_vm12, %v7662_v32, 0  ;;  %v14621_v6 = vand.u32 3, %v7638_v34 }
 0x760   :  { %8016 = vst [vmem:[#allocation2 + $0x1b8] sm:$0xff] %v7136_v36  ;;  %v7628_v45 = vor.u32 4788187, %v7627_v26  ;;  %v14616_v12 = vshrl.u32 %v7816_v19, 30  ;;  %v7666_v55 = vand.u32 31, %v7664_v10  ;;  %v7631_v44 = vcvt.s32.f32 %v7624_v5 }
 0x761   :  { %v7660_v21 = vor.u32 8388608, %v7659_v4  ;;  %v14626_v60 = vadd.f32 %v12330_v16, %v1232_v42  ;;  %v7811_v35 = vadd.s32 %v14582_v54, %v14580_v27  ;;  %v7665_v28 = vshrl.u32 %v7664_v10, 5 }
 0x762   :  { %v7629_v13 = vand.u32 2147483647, %v7628_v45  ;;  %v7818_v49 = vshll.u32 %v14616_v12, 30  ;;  %v7667_v40 = vsub.s32 32, %v7666_v55  ;;  %v7669_v7 = vshll.u32 %v9028_v18, %v7666_v55 }
 0x763   :  { %v7672_v25 = vshll.u32 %v9029_v29, %v7666_v55  ;;  %v7675_v50 = vshll.u32 %v9030_v31, %v7666_v55  ;;  %v7678_v16 = vshll.u32 %v9031_v33, %v7666_v55  ;;  %v14641_v53 = vshll.u32 %v7660_v21, 8 }
 0x764   :  { %v7632_v9 = vmul.f32 %v7631_v44, %v7629_v13  ;;  %v14623_v0 = vsub.s32 %v7815_v20, %v7818_v49  ;;  %v7670_v11 = vshrl.u32 %v9029_v29, %v7667_v40  ;;  %v7673_v48 = vshrl.u32 %v9030_v31, %v7667_v40 }
 0x765   :  { %v7676_v38 = vshrl.u32 %v9031_v33, %v7667_v40  ;;  %v7679_v27 = vshrl.u32 %v9032_v43, %v7667_v40  ;;  %v7681_v59 = vshll.u32 %v9032_v43, %v7666_v55  ;;  %v7682_v58 = vshrl.u32 %v9033_v52, %v7667_v40 }
 0x766   :  { %v7633_v2 = vxor.u32 2147483648, %v7632_v9  ;;  %v7821_v1 = vsub.s32 0, %v14623_v0  ;;  %v7671_v46 = vor.u32 %v7670_v11, %v7669_v7  ;;  %v7674_v51 = vor.u32 %v7673_v48, %v7672_v25 }
 0x767   :  { %v7677_v63 = vor.u32 %v7676_v38, %v7675_v50  ;;  %v7680_v37 = vor.u32 %v7679_v27, %v7678_v16  ;;  %v7668_v22 = vshrl.u32 %v9028_v18, %v7667_v40  ;;  %vm7684_vm13 = vcmp.lt.s32.totalorder %v7665_v28, 1 }
 0x768   :  { %v7634_v54 = vsel %vm7551_vm7, %v7633_v2, %v7632_v9  ;;  %v8346_v14 = vmin.u32 %v7821_v1, %v14623_v0  ;;  %v7861_v17 = vand.u32 2139095040, %v14626_v60  ;;  %v7683_v3 = vor.u32 %v7682_v58, %v7681_v59 }
 0x769   :  { %v7637_v56 = vsel %vm14606_vm11, %v14414_v57, %v7634_v54  ;;  %vm7686_vm0 = vcmp.lt.s32.totalorder %v7665_v28, 3  ;;  %vm7687_vm14 = vcmp.lt.s32.totalorder %v7665_v28, 4  ;;  %v7692_v20 = vsel %vm7684_vm13, %v7671_v46, %v7674_v51 }
 0x76a   :  { %8987 = vcosq.f32 %v7637_v56  ;;  %v7823_v23 = vclz %v8346_v14  ;;  %v7689_v62 = vsel %vm7687_vm14, %v7677_v63, 2102212464  ;;  %v7693_v15 = vsel %vm7687_vm14, %v7680_v37, 920167782 }
 0x76b   :  { %8989 = vsinq.f32 %v7637_v56  ;;  %v7696_v24 = vsel %vm7684_vm13, %v7674_v51, %v7677_v63  ;;  %vm7685_vm15 = vcmp.lt.s32.totalorder %v7665_v28, 2  ;;  %v7694_v32 = vsel %vm7686_vm0, %v7677_v63, %v7693_v15 }
 0x76c   :  { %v8347_v8 = vadd.s32 4294967294, %v7823_v23  ;;  %v7697_v41 = vsel %vm7687_vm14, %v7683_v3, 1326507024  ;;  %v7688_v26 = vsel %vm7684_vm13, %v7668_v22, %v7671_v46  ;;  %v7695_v19 = vsel %vm7685_vm15, %v7692_v20, %v7694_v32 }
 0x76d   :  { %v7698_v36 = vsel %vm7686_vm0, %v7680_v37, %v7697_v41  ;;  %v7690_v45 = vsel %vm7686_vm0, %v7674_v51, %v7689_v62  ;;  %v14660_v13 = vmul.u32.u64.low %v14641_v53, %v7695_v19  ;;  %v14661_v44 = vmul.u32.u64.high %v14641_v53, %v7695_v19, %v14660_v13 }
 0x76e   :  { %vm8348_vm1 = vcmp.lt.s32.totalorder %v8347_v8, 0  ;;  %v7699_v4 = vsel %vm7685_vm15, %v7696_v24, %v7698_v36  ;;  %v7862_v21 = vshrl.u32 %v7861_v17, 23  ;;  %vm7643_vm2 = vcmp.lt.s32.totalorder %v14621_v6, 2 }
 0x76f   :  { %v7826_v5 = vsel %vm8348_vm1, 0, %v8347_v8  ;;  %v14656_v10 = vmul.u32.u64.low %v14641_v53, %v7699_v4  ;;  %v14657_v55 = vmul.u32.u64.high %v14641_v53, %v7699_v4, %v14656_v10  ;;  %v7691_v11 = vsel %vm7685_vm15, %v7688_v26, %v7690_v45 }
 0x770   :  { %v7827_v34 = vsub.s32 32, %v7826_v5  ;;  %v7831_v42 = vsub.s32 4294967266, %v7826_v5  ;;  %v7828_v49 = vshll.u32 %v14623_v0, %v7826_v5  ;;  %vm7647_vm3 = vcmp.eq.s32.totalorder %v14621_v6, 2 }
 0x771   :  { %v8349_v7 = vadd.s32 4294967169, %v7862_v21  ;;  %vm7709_vm4 = vc.u32 %v14657_v55, %v14660_v13  ;;  %v7710_v0 = vadd.s32 1, %v14661_v44  ;;  %v7707_v28 = vmul.u32 %v14641_v53, %v7691_v11 }
 0x772   :  { %v7829_v40 = vshrl.u32 %v7811_v35, %v7827_v34  ;;  %v7832_v9 = vadd.s32 127, %v7831_v42  ;;  %v7858_v35 = vand.u32 2147483647, %v14626_v60  ;;  %vm7644_vm5 = vcmp.eq.s32.totalorder %v14621_v6, 0 }
 0x773   :  { %v7868_v27 = vadd.s32 1, %v8349_v7  ;;  %v7711_v46 = vsel %vm7709_vm4, %v7710_v0, %v14661_v44  ;;  %vm7641_vm7 = vweird.f32 %v14414_v57  ;;  %v7841_v23 = vsub.s32 4, %v14616_v12 }
 0x774   :  { %v8988_v48 = vpop.eup %8987  ;;  %v7830_v2 = vor.u32 %v7829_v40, %v7828_v49  ;;  %v7833_v1 = vshll.u32 %v7832_v9, 23  ;;  %v7712_v63 = vadd.s32 %v7711_v46, %v7707_v28  ;;  %v7865_v17 = vand.u32 8388607, %v7858_v35 }
 0x775   :  { %v8990_v38 = vpop.eup %8989  ;;  %v7648_v25 = vxor.u32 2147483648, %v8988_v48  ;;  %vm7869_vm6 = vcmp.gt.s32.totalorder %v7868_v27, 0  ;;  %vm7757_vm8 = vcmp.lt.s32.totalorder %v14457_v47, 0  ;;  %vm14686_vm10 = vcmp.le.f32.partialorder %v7755_v39, 0.7853982 }
 0x776   :  { %v7645_v50 = vxor.u32 2147483648, %v8990_v38  ;;  %v7834_v16 = vor.u32 4788187, %v7833_v1  ;;  %v7837_v14 = vcvt.s32.f32 %v7830_v2  ;;  %v7870_v59 = vsel %vm7869_vm6, %v7868_v27, 0 }
 0x777   :  { %v7649_v54 = vsel %vm7647_vm3, %v7648_v25, %v8990_v38  ;;  %v7713_v22 = vadd.s32 536870912, %v7712_v63  ;;  %v7872_v8 = vand.u32 31, %v7870_v59  ;;  %v7842_v6 = vsel %vm7757_vm8, %v7841_v23, %v14616_v12 }
 0x778   :  { %v7646_v56 = vsel %vm7644_vm5, %v8988_v48, %v7645_v50  ;;  %v7835_v51 = vand.u32 2147483647, %v7834_v16  ;;  %v7866_v32 = vor.u32 8388608, %v7865_v17  ;;  %v7844_v42 = vsel %vm14686_vm10, 0, %v7842_v6 }
 0x779   :  { %v7650_v37 = vsel %vm7643_vm2, %v7646_v56, %v7649_v54  ;;  %v14682_v62 = vshrl.u32 %v7713_v22, 30  ;;  %v7873_v20 = vsub.s32 32, %v7872_v8  ;;  %v7875_v41 = vshll.u32 %v9028_v18, %v7872_v8 }
 0x77a   :  { %v7651_v53 = vsel %vm7641_vm7, nan, %v7650_v37  ;;  %v7838_v58 = vmul.f32 %v7837_v14, %v7835_v51  ;;  %v7878_v39 = vshll.u32 %v9029_v29, %v7872_v8  ;;  %v7881_v12 = vshll.u32 %v9030_v31, %v7872_v8 }
 0x77b   :  { %8021 = vst [vmem:[#allocation2 + $0x1e0] sm:$0xff] %v7651_v53  ;;  %v7715_v24 = vshll.u32 %v14682_v62, 30  ;;  %v7876_v26 = vshrl.u32 %v9029_v29, %v7873_v20  ;;  %v7879_v19 = vshrl.u32 %v9030_v31, %v7873_v20  ;;  %v7882_v34 = vshrl.u32 %v9031_v33, %v7873_v20 }
 0x77c   :  { %v7839_v3 = vxor.u32 2147483648, %v7838_v58  ;;  %v7871_v45 = vshrl.u32 %v7870_v59, 5  ;;  %v7885_v29 = vshrl.u32 %v9032_v43, %v7873_v20  ;;  %v7884_v40 = vshll.u32 %v9031_v33, %v7872_v8 }
 0x77d   :  { %v14699_v36 = vsub.s32 %v7712_v63, %v7715_v24  ;;  %v7877_v4 = vor.u32 %v7876_v26, %v7875_v41  ;;  %v7880_v44 = vor.u32 %v7879_v19, %v7878_v39  ;;  %v7883_v49 = vor.u32 %v7882_v34, %v7881_v12 }
 0x77e   :  { %v7840_v15 = vsel %vm7757_vm8, %v7839_v3, %v7838_v58  ;;  %v7887_v9 = vshll.u32 %v9032_v43, %v7872_v8  ;;  %v7888_v31 = vshrl.u32 %v9033_v52, %v7873_v20  ;;  %v7848_v21 = vand.u32 3, %v7844_v42 }
 0x77f   :  { %v7843_v5 = vsel %vm14686_vm10, %v14457_v47, %v7840_v15  ;;  %v7718_v10 = vsub.s32 0, %v14699_v36  ;;  %v7906_v48 = vshll.u32 %v7866_v32, 8  ;;  %v7886_v2 = vor.u32 %v7885_v29, %v7884_v40 }
 0x780   :  { %8991 = vcosq.f32 %v7843_v5  ;;  %v7889_v1 = vor.u32 %v7888_v31, %v7887_v9  ;;  %vm7890_vm9 = vcmp.lt.s32.totalorder %v7871_v45, 1  ;;  %vm7892_vm11 = vcmp.lt.s32.totalorder %v7871_v45, 3 }
 0x781   :  { %8993 = vsinq.f32 %v7843_v5  ;;  %v8342_v11 = vmin.u32 %v7718_v10, %v14699_v36  ;;  %vm7893_vm12 = vcmp.lt.s32.totalorder %v7871_v45, 4  ;;  %v7898_v38 = vsel %vm7890_vm9, %v7877_v4, %v7880_v44 }
 0x782   :  { %v7902_v25 = vsel %vm7890_vm9, %v7880_v44, %v7883_v49  ;;  %v7874_v0 = vshrl.u32 %v9028_v18, %v7873_v20  ;;  %v7895_v50 = vsel %vm7893_vm12, %v7883_v49, 2102212464  ;;  %v7899_v33 = vsel %vm7893_vm12, %v7886_v2, 920167782 }
 0x783   :  { %v7720_v7 = vclz %v8342_v11  ;;  %v7903_v16 = vsel %vm7893_vm12, %v7889_v1, 1326507024  ;;  %vm7891_vm13 = vcmp.lt.s32.totalorder %v7871_v45, 2  ;;  %v7900_v52 = vsel %vm7892_vm11, %v7883_v49, %v7899_v33 }
 0x784   :  { %v7904_v28 = vsel %vm7892_vm11, %v7886_v2, %v7903_v16  ;;  %vm7853_vm0 = vcmp.eq.s32.totalorder %v7848_v21, 2  ;;  %v7894_v27 = vsel %vm7890_vm9, %v7874_v0, %v7877_v4  ;;  %v7901_v54 = vsel %vm7891_vm13, %v7898_v38, %v7900_v52 }
 0x785   :  { %v8343_v43 = vadd.s32 4294967294, %v7720_v7  ;;  %v7905_v14 = vsel %vm7891_vm13, %v7902_v25, %v7904_v28  ;;  %v7896_v56 = vsel %vm7892_vm11, %v7880_v44, %v7895_v50  ;;  %v7708_v22 = vadd.s32 %v14660_v13, %v14657_v55 }
 0x786   :  { %v14717_v18 = vmul.u32.u64.low %v7906_v48, %v7905_v14  ;;  %v14718_v51 = vmul.u32.u64.high %v7906_v48, %v7905_v14, %v14717_v18  ;;  %v14720_v59 = vmul.u32.u64.low %v7906_v48, %v7901_v54  ;;  %v14721_v53 = vmul.u32.u64.high %v7906_v48, %v7901_v54, %v14720_v59 }
 0x787   :  { %vm8344_vm14 = vcmp.lt.s32.totalorder %v8343_v43, 0  ;;  %vm7849_vm1 = vcmp.lt.s32.totalorder %v7848_v21, 2  ;;  %vm7850_vm15 = vcmp.eq.s32.totalorder %v7848_v21, 0  ;;  %v7897_v57 = vsel %vm7891_vm13, %v7894_v27, %v7896_v56 }
 0x788   :  { %v7723_v23 = vsel %vm8344_vm14, 0, %v8343_v43  ;;  %vm7847_vm2 = vweird.f32 %v14457_v47  ;;  %vm7915_vm3 = vc.u32 %v14718_v51, %v14720_v59  ;;  %v7916_v55 = vadd.s32 1, %v14721_v53 }
 0x789   :  { %v7724_v17 = vsub.s32 32, %v7723_v23  ;;  %v7728_v8 = vsub.s32 4294967266, %v7723_v23  ;;  %v7725_v20 = vshll.u32 %v14699_v36, %v7723_v23  ;;  %v7913_v26 = vmul.u32 %v7906_v48, %v7897_v57 }
 0x78a   :  { %v8992_v46 = vpop.eup %8991  ;;  %v7917_v39 = vsel %vm7915_vm3, %v7916_v55, %v14721_v53  ;;  %vm7654_vm4 = vcmp.lt.s32.totalorder %v14577_v30, 0  ;;  %v7738_v44 = vsub.s32 4, %v14682_v62  ;;  %vm7653_vm5 = vcmp.le.f32.partialorder %v7652_v61, 0.7853982 }
 0x78b   :  { %v8994_v63 = vpop.eup %8993  ;;  %v7854_v37 = vxor.u32 2147483648, %v8992_v46  ;;  %v7726_v15 = vshrl.u32 %v7708_v22, %v7724_v17  ;;  %v7729_v24 = vadd.s32 127, %v7728_v8  ;;  %v7918_v12 = vadd.s32 %v7917_v39, %v7913_v26 }
 0x78c   :  { %v7851_v58 = vxor.u32 2147483648, %v8994_v63  ;;  %v7739_v31 = vsel %vm7654_vm4, %v7738_v44, %v14682_v62  ;;  %v7914_v25 = vadd.s32 %v14720_v59, %v14718_v51  ;;  %vm7744_vm9 = vweird.f32 %v14577_v30 }
 0x78d   :  { %v7855_v3 = vsel %vm7853_vm0, %v7854_v37, %v8994_v63  ;;  %v7727_v41 = vor.u32 %v7726_v15, %v7725_v20  ;;  %v7730_v5 = vshll.u32 %v7729_v24, 23  ;;  %v7919_v42 = vadd.s32 536870912, %v7918_v12 }
 0x78e   :  { %v7852_v6 = vsel %vm7850_vm15, %v8992_v46, %v7851_v58  ;;  %v7741_v11 = vsel %vm7653_vm5, 0, %v7739_v31  ;;  %vm7860_vm11 = vcmp.lt.s32.totalorder %v14626_v60, 0  ;;  %vm7859_vm12 = vcmp.le.f32.partialorder %v7858_v35, 0.7853982 }
 0x78f   :  { %v7856_v32 = vsel %vm7849_vm1, %v7852_v6, %v7855_v3  ;;  %v7731_v19 = vor.u32 4788187, %v7730_v5  ;;  %v7734_v36 = vcvt.s32.f32 %v7727_v41  ;;  %v7920_v4 = vshrl.u32 %v7919_v42, 30 }
 0x790   :  { %v7857_v13 = vsel %vm7847_vm2, nan, %v7856_v32  ;;  %v7745_v1 = vand.u32 3, %v7741_v11  ;;  %vm7950_vm1 = vweird.f32 %v14626_v60 }
 0x791   :  { %8023 = vst [vmem:[#allocation2 + $0x1f0] sm:$0xff] %v7857_v13  ;;  %v7732_v34 = vand.u32 2147483647, %v7731_v19  ;;  %v7921_v10 = vshll.u32 %v7920_v4, 30  ;;  %v7944_v53 = vsub.s32 4, %v7920_v4 }
 0x792   :  { %vm7750_vm7 = vcmp.eq.s32.totalorder %v7745_v1, 2  ;;  %vm7747_vm8 = vcmp.eq.s32.totalorder %v7745_v1, 0  ;;  %vm7746_vm10 = vcmp.lt.s32.totalorder %v7745_v1, 2 }
 0x793   :  { %v7735_v45 = vmul.f32 %v7734_v36, %v7732_v34  ;;  %v7922_v29 = vsub.s32 %v7918_v12, %v7921_v10 }
 0x795   :  { %v7736_v47 = vxor.u32 2147483648, %v7735_v45  ;;  %v7924_v9 = vsub.s32 0, %v7922_v29 }
 0x797   :  { %v7737_v49 = vsel %vm7654_vm4, %v7736_v47, %v7735_v45  ;;  %v8350_v21 = vmin.u32 %v7924_v9, %v7922_v29 }
 0x798   :  { %v7740_v40 = vsel %vm7653_vm5, %v14577_v30, %v7737_v49  ;;  %v7945_v30 = vsel %vm7860_vm11, %v7944_v53, %v7920_v4 }
 0x799   :  { %8995 = vcosq.f32 %v7740_v40  ;;  %v7926_v48 = vclz %v8350_v21  ;;  %v7947_v22 = vsel %vm7859_vm12, 0, %v7945_v30 }
 0x79a   :  { %8997 = vsinq.f32 %v7740_v40  ;;  %v7951_v17 = vand.u32 3, %v7947_v22 }
 0x79b   :  { %v8351_v2 = vadd.s32 4294967294, %v7926_v48 }
 0x79c   :  { %vm7956_vm13 = vcmp.eq.s32.totalorder %v7951_v17, 2  ;;  %vm7953_vm0 = vcmp.eq.s32.totalorder %v7951_v17, 0  ;;  %vm7952_vm14 = vcmp.lt.s32.totalorder %v7951_v17, 2 }
 0x79d   :  { %vm8352_vm6 = vcmp.lt.s32.totalorder %v8351_v2, 0 }
 0x79e   :  { %v7929_v7 = vsel %vm8352_vm6, 0, %v8351_v2 }
 0x79f   :  { %v7930_v61 = vsub.s32 32, %v7929_v7  ;;  %v7934_v0 = vsub.s32 4294967266, %v7929_v7  ;;  %v7931_v43 = vshll.u32 %v7922_v29, %v7929_v7 }
 0x7a1   :  { %v7932_v52 = vshrl.u32 %v7914_v25, %v7930_v61  ;;  %v7935_v62 = vadd.s32 127, %v7934_v0 }
 0x7a3   :  { %v8996_v38 = vpop.eup %8995  ;;  %v7933_v54 = vor.u32 %v7932_v52, %v7931_v43  ;;  %v7936_v14 = vshll.u32 %v7935_v62, 23 }
 0x7a4   :  { %v8998_v50 = vpop.eup %8997  ;;  %v7751_v33 = vxor.u32 2147483648, %v8996_v38 }
 0x7a5   :  { %v7748_v16 = vxor.u32 2147483648, %v8998_v50  ;;  %v7937_v18 = vor.u32 4788187, %v7936_v14  ;;  %v7940_v63 = vcvt.s32.f32 %v7933_v54 }
 0x7a6   :  { %v7752_v28 = vsel %vm7750_vm7, %v7751_v33, %v8998_v50 }
 0x7a7   :  { %v7749_v27 = vsel %vm7747_vm8, %v8996_v38, %v7748_v16  ;;  %v7938_v51 = vand.u32 2147483647, %v7937_v18 }
 0x7a8   :  { %v7753_v46 = vsel %vm7746_vm10, %v7749_v27, %v7752_v28 }
 0x7a9   :  { %v7754_v56 = vsel %vm7744_vm9, nan, %v7753_v46  ;;  %v7941_v37 = vmul.f32 %v7940_v63, %v7938_v51 }
 0x7aa   :  { %8022 = vst [vmem:[#allocation2 + $0x1e8] sm:$0xff] %v7754_v56 }
 0x7ab   :  { %v7942_v23 = vxor.u32 2147483648, %v7941_v37 }
 0x7ad   :  { %v7943_v59 = vsel %vm7860_vm11, %v7942_v23, %v7941_v37 }
 0x7ae   :  { %v7946_v58 = vsel %vm7859_vm12, %v14626_v60, %v7943_v59 }
 0x7af   :  { %8999 = vcosq.f32 %v7946_v58 }
 0x7b0   :  { %9001 = vsinq.f32 %v7946_v58 }
 0x7b9   :  { %v9000_v8 = vpop.eup %8999 }
 0x7ba   :  { %v9002_v3 = vpop.eup %9001  ;;  %v7957_v57 = vxor.u32 2147483648, %v9000_v8 }
 0x7bb   :  { %v7954_v6 = vxor.u32 2147483648, %v9002_v3 }
 0x7bc   :  { %v7958_v20 = vsel %vm7956_vm13, %v7957_v57, %v9002_v3 }
 0x7bd   :  { %v7955_v35 = vsel %vm7953_vm0, %v9000_v8, %v7954_v6 }
 0x7be   :  { %v7959_v15 = vsel %vm7952_vm14, %v7955_v35, %v7958_v20 }
 0x7bf   :  { %v7960_v24 = vsel %vm7950_vm1, nan, %v7959_v15 }
 0x7c0   :  { %8024 = vst [vmem:[#allocation2 + $0x1f8] sm:$0xff] %v7960_v24 }
 0x7c1   :  { %9014 = shalt.err (!%p9011_p4)
}
 0x7c2   :  { %s9015_s23 = scalar_lea.hbm %s14760_s3, 8192 }
 0x7c3   :  { %p9016_p5 = scmp.ne.s32.totalorder %s14760_s3, %s9015_s23  ;;  %p9019_p6 = scmp.lt.u32.totalorder %s9015_s23, %s14760_s3 }
 0x7c5   :  { %p9021_p7 = pnand %p9019_p6, %p9016_p5 }
 0x7c7   :  { %9024 = shalt.err (!%p9021_p7)
}
 0x7c8   :  { %s9035_s28 = smov 1024   ;;  %s9036_s29 = smov 64  }
 0x7c9   :  { %8036 = dma.vmem_to_hbm [thread:$0]  %s8031_s19, 8192, %s14760_s3, [#allocation3], %s9035_s28, %s9035_s28, %s9036_s29  }
 0x7ca   :  { %9025 = dma.done.wait [#allocation3], 8192  }
 0x7cb   :  { %9026 = vsyncadd [#allocation3], 4294959104 }
 0x7cc   :  { %8040 = vsyncpa [#allocation3], 1 }

</bundles_post_ra>
